<compile_context>
chip_gen: v7x
topology: tpu7x:2x2x1
jax: 0.10.0
libtpu: 0.0.40
codegen_flags: <defaults>
</compile_context>

<pallas_src>
import functools

import jax
import jax.numpy as jnp
from jax.experimental import pallas as pl
from jax.experimental.pallas import tpu as pltpu


_VMEM_LIMIT = 48 * 1024 * 1024   # > v5e 16 MiB default scoped VMEM, < v7x 64 MiB physical


# --------------------------------------------------------------------------------------
# tiling helpers
# --------------------------------------------------------------------------------------
def _round_up(x, m):
    return (x + m - 1) // m * m


def _choose_tile_1x1(m, cin, cout):
    """M tile for the 1x1-conv matmul.

    Cap at 512 rows when Cin*Cout is large (merge2: 1536x768) so the double-buffered
    x-blocks + resident weights + out-blocks fit v5e's 16 MiB default scoped VMEM;
    otherwise use up to 1024 rows.  No artificial splitting for tiny M.
    """
    cap = 512 if cin * cout >= 512 * 512 else 1024
    return min(cap, _round_up(m, 8))


# --------------------------------------------------------------------------------------
# Pallas kernel: 1x1 conv == channel matmul; bias (+ optional residual) fused.
#   x tile (tm, Cin) bf16, weights (Cin, Cout) bf16 resident, bias (1, Cout) f32 resident.
# --------------------------------------------------------------------------------------
def _mm_bias_kernel(x_ref, w_ref, b_ref, o_ref):
    acc = jnp.dot(x_ref[...], w_ref[...], preferred_element_type=jnp.float32)
    o_ref[...] = (acc + b_ref[...]).astype(o_ref.dtype)


def _mm_bias_res_kernel(x_ref, w_ref, b_ref, r_ref, o_ref):
    acc = jnp.dot(x_ref[...], w_ref[...], preferred_element_type=jnp.float32)
    acc = acc + b_ref[...] + r_ref[...].astype(jnp.float32)
    o_ref[...] = acc.astype(o_ref.dtype)


def conv1x1_nhwc(x, w, b, residual=None, out_dtype=jnp.bfloat16):
    """x: (N,H,W,Cin); w: (1,1,Cin,Cout) HWIO; b: (Cout,); residual: (N,H,W,Cout)|None."""
    N, H, W, Cin = x.shape
    Cout = w.shape[-1]
    M = N * H * W
    tm = _choose_tile_1x1(M, Cin, Cout)
    Mp = _round_up(M, tm)

    xf = x.reshape(M, Cin).astype(jnp.bfloat16)
    if Mp != M:
        xf = jnp.pad(xf, ((0, Mp - M), (0, 0)))
    w2 = w.reshape(Cin, Cout).astype(jnp.bfloat16)
    b2 = b.reshape(1, Cout).astype(jnp.float32)

    in_specs = [
        pl.BlockSpec((tm, Cin), lambda i: (i, 0)),
        pl.BlockSpec((Cin, Cout), lambda i: (0, 0)),   # weights resident in VMEM
        pl.BlockSpec((1, Cout), lambda i: (0, 0)),     # bias resident in VMEM
    ]
    args = [xf, w2, b2]
    kernel = _mm_bias_kernel
    res_bytes = 0
    if residual is not None:
        rf = residual.reshape(M, Cout).astype(jnp.bfloat16)
        if Mp != M:
            rf = jnp.pad(rf, ((0, Mp - M), (0, 0)))
        in_specs.append(pl.BlockSpec((tm, Cout), lambda i: (i, 0)))
        args.append(rf)
        kernel = _mm_bias_res_kernel
        res_bytes = Mp * Cout * 2

    out_itemsize = jnp.dtype(out_dtype).itemsize
    cost = pl.CostEstimate(
        flops=2 * Mp * Cin * Cout,
        transcendentals=0,
        bytes_accessed=int(Mp * Cin * 2 + Cin * Cout * 2
                           + Mp * Cout * out_itemsize + res_bytes),
    )

    y = pl.pallas_call(
        kernel,
        out_shape=jax.ShapeDtypeStruct((Mp, Cout), out_dtype),
        grid_spec=pltpu.PrefetchScalarGridSpec(
            num_scalar_prefetch=0,
            grid=(Mp // tm,),
            in_specs=in_specs,
            out_specs=pl.BlockSpec((tm, Cout), lambda i: (i, 0)),
        ),
        compiler_params=pltpu.CompilerParams(
            dimension_semantics=("parallel",),
            vmem_limit_bytes=_VMEM_LIMIT),
        cost_estimate=cost,
    )(*args)
    return y[:M].reshape(N, H, W, Cout)


# --------------------------------------------------------------------------------------
# Pallas kernel: 3x3 "same" conv via in-kernel im2col + one big-K MXU matmul.
# The activation is zero-padded once, flattened row-major with padded width Wp8
# (rounded up to a multiple of 8 so all dy*Wp8 tap offsets are sublane-aligned) and
# DMAed into VMEM ONCE per image (block index constant across the row-tile axis).
# Per grid step: one aligned (tm+8)-row load per kernel row dy, dx=1,2 taps derived
# with static on-chip sublane shifts, packed into a (tm, 9*Cin) patch tile, then a
# single (tm,9*Cin)x(9*Cin,Cout) matmul (f32 accumulation stays inside the MXU).
# --------------------------------------------------------------------------------------
def _conv3x3_kernel(x_ref, w_ref, b_ref, o_ref, patch_ref, *, wp8, tm, cin):
    m = pl.program_id(1)
    for dy in range(3):
        start = pl.multiple_of(m * tm + dy * wp8, 8)       # wp8, tm multiples of 8
        blk = x_ref[pl.ds(start, tm + 8), :]                # aligned load, shared by 3 dx taps
        for dx in range(3):
            t = 3 * dy + dx
            # static sublane shift (XLU) instead of a separate misaligned VMEM load
            patch_ref[:, t * cin:(t + 1) * cin] = blk[dx:dx + tm, :]
    acc = jnp.dot(patch_ref[...], w_ref[...], preferred_element_type=jnp.float32)
    o_ref[...] = (acc + b_ref[...]).astype(o_ref.dtype)


def conv3x3_same_nhwc(x, w, b, out_dtype=jnp.float32, tile_rows=256):
    """x: (N,H,W,Cin); w: (3,3,Cin,Cout) HWIO; b: (Cout,). Stride 1, 'same' padding."""
    N, H, W, Cin = x.shape
    Cout = w.shape[-1]
    Wp8 = _round_up(W + 2, 8)        # padded width, multiple of 8 (left pad 1, >=1 right pad)
    G = H * Wp8                      # flat output rows computed (Wp8-W junk cols per row)
    tm = min(tile_rows, G)           # G is a multiple of 8
    Gp = _round_up(G, tm)
    deepest = Gp + 2 * Wp8 + 8       # last flat row touched by the (tm+8)-row dy=2 load
    Hp = max(H + 2, -(-deepest // Wp8))

    xp = jnp.pad(x.astype(jnp.bfloat16),
                 ((0, 0), (1, Hp - 1 - H), (1, Wp8 - 1 - W), (0, 0)))
    xp = xp.reshape(N, Hp * Wp8, Cin)            # row-major flattened padded plane
    Lfull = Hp * Wp8
    ws = w.astype(jnp.bfloat16).reshape(9 * Cin, Cout)   # row = (3*dy+dx)*Cin + ci
    b2 = b.reshape(1, Cout).astype(jnp.float32)

    out_itemsize = jnp.dtype(out_dtype).itemsize
    cost = pl.CostEstimate(
        flops=2 * 9 * N * Gp * Cin * Cout,
        transcendentals=0,
        bytes_accessed=int(N * Lfull * Cin * 2 + 9 * Cin * Cout * 2
                           + N * Gp * Cout * out_itemsize),
    )

    y = pl.pallas_call(
        functools.partial(_conv3x3_kernel, wp8=Wp8, tm=tm, cin=Cin),
        out_shape=jax.ShapeDtypeStruct((N, Gp, Cout), out_dtype),
        grid_spec=pltpu.PrefetchScalarGridSpec(
            num_scalar_prefetch=0,
            grid=(N, Gp // tm),
            in_specs=[
                # whole padded plane of image n; block index constant in m => one DMA per n
                pl.BlockSpec((None, Lfull, Cin), lambda n, m: (n, 0, 0)),
                pl.BlockSpec((9 * Cin, Cout), lambda n, m: (0, 0)),   # resident weights
                pl.BlockSpec((1, Cout), lambda n, m: (0, 0)),         # resident bias
            ],
            out_specs=pl.BlockSpec((None, tm, Cout), lambda n, m: (n, m, 0)),
            scratch_shapes=[pltpu.VMEM((tm, 9 * Cin), jnp.bfloat16)],  # im2col patch tile
        ),
        compiler_params=pltpu.CompilerParams(
            dimension_semantics=("parallel", "parallel"),
            vmem_limit_bytes=_VMEM_LIMIT),
        cost_estimate=cost,
    )(xp, ws, b2)

    # (N,Gp,C) -> (N,H,Wp8,C) is a free contiguous reshape; the junk-column strip and
    # the Gp tail slice fuse with the final NCHW transpose done by the caller.
    return y[:, :G].reshape(N, H, Wp8, Cout)[:, :, :W, :]


# --------------------------------------------------------------------------------------
# Glue: nearest-neighbor resize (matches F.interpolate default mode='nearest'),
# space-to-depth, mask downsample.
# --------------------------------------------------------------------------------------
def nearest_resize_nhwc(x, out_h, out_w):
    N, H, W, C = x.shape
    if out_h == 2 * H and out_w == 2 * W:
        # exact 2x nearest == repeat (broadcast, no gather)
        return jnp.repeat(jnp.repeat(x, 2, axis=1), 2, axis=2)
    iy = jnp.arange(out_h) * H // out_h
    ix = jnp.arange(out_w) * W // out_w
    return x[:, iy][:, :, ix]


def resize_mask_nearest(mask_bool, out_h, out_w):
    # mirrors F.interpolate(m[None].float(), size=...).to(torch.bool)[0]
    m = mask_bool.astype(jnp.float32)
    N, H, W = m.shape
    iy = jnp.arange(out_h) * H // out_h
    ix = jnp.arange(out_w) * W // out_w
    return m[:, iy][:, :, ix] != 0.0


def space_to_depth(x, r):
    N, H, W, C = x.shape
    x = x.reshape(N, H // r, r, W // r, r, C)
    return jnp.transpose(x, (0, 1, 3, 2, 4, 5)).reshape(N, H // r, W // r, r * r * C)


# --------------------------------------------------------------------------------------
# Synthetic agent-swin-t backbone stand-in (channel/stride pyramid only).
# --------------------------------------------------------------------------------------
def backbone_forward(p, x_nhwc):
    feats = []
    y = space_to_depth(x_nhwc, 4)                                       # (N, H/4, W/4, 48)
    y = conv1x1_nhwc(y, p["embed_w"], p["embed_b"], out_dtype=jnp.bfloat16)   # -> 96
    feats.append(y)
    for i in range(3):
        y = space_to_depth(y, 2)
        y = conv1x1_nhwc(y, p[f"merge{i}_w"], p[f"merge{i}_b"],
                         out_dtype=jnp.bfloat16)                        # 192 / 384 / 768
        feats.append(y)
    return feats


# --------------------------------------------------------------------------------------
# FeatsFusion FPN (C3=192, C4=384, C5=768 for agent_swin_t; hidden=out=num_channels).
# Residual (upsampled coarser level) is fused into the lateral 1x1 conv kernel.
# --------------------------------------------------------------------------------------
def fpn_forward(p, C3, C4, C5):
    P5_x = conv1x1_nhwc(C5, p["P5_1_w"], p["P5_1_b"], out_dtype=jnp.bfloat16)
    P5_up = nearest_resize_nhwc(P5_x, C4.shape[1], C4.shape[2])
    P5_out = conv3x3_same_nhwc(P5_x, p["P5_2_w"], p["P5_2_b"], out_dtype=jnp.float32)

    P4_x = conv1x1_nhwc(C4, p["P4_1_w"], p["P4_1_b"], residual=P5_up,
                        out_dtype=jnp.bfloat16)
    P4_up = nearest_resize_nhwc(P4_x, C3.shape[1], C3.shape[2])
    P4_out = conv3x3_same_nhwc(P4_x, p["P4_2_w"], p["P4_2_b"], out_dtype=jnp.float32)

    P3_x = conv1x1_nhwc(C3, p["P3_1_w"], p["P3_1_b"], residual=P4_up,
                        out_dtype=jnp.bfloat16)
    P3_out = conv3x3_same_nhwc(P3_x, p["P3_2_w"], p["P3_2_b"], out_dtype=jnp.float32)

    return [P3_out, P4_out, P5_out]


# --------------------------------------------------------------------------------------
# BackboneBase_Agent_Swin.forward  (return_interm_layers=True branch)
# --------------------------------------------------------------------------------------
def backbone_base_agent_swin_forward(params, tensors_nchw, mask):
    # layout: tensors_nchw is NCHW (PyTorch convention); mask is (N, H, W) bool.
    # cast to bf16 before the space-to-depth shuffles (kernels accumulate in f32).
    x = jnp.transpose(tensors_nchw, (0, 2, 3, 1)).astype(jnp.bfloat16)   # -> NHWC
    feats = backbone_forward(params["backbone"], x)
    fpn = fpn_forward(params["fpn"], feats[1], feats[2], feats[3])
    f4x, f8x = fpn[0], fpn[1]

    mask_4x = resize_mask_nearest(mask, f4x.shape[1], f4x.shape[2])
    mask_8x = resize_mask_nearest(mask, f8x.shape[1], f8x.shape[2])

    out = {
        "4x": (jnp.transpose(f4x, (0, 3, 1, 2)), mask_4x),   # NestedTensor(features, mask)
        "8x": (jnp.transpose(f8x, (0, 3, 1, 2)), mask_8x),
    }
    return out


# --------------------------------------------------------------------------------------
# Deterministic parameter initialization (shapes implied by the module's __init__).
# --------------------------------------------------------------------------------------
def init_params(key, num_channels=128):
    def conv_init(k, kh, kw, cin, cout):
        kw_, kb_ = jax.random.split(k)
        w = jax.random.normal(kw_, (kh, kw, cin, cout), jnp.float32) * 0.02
        b = jax.random.normal(kb_, (cout,), jnp.float32) * 0.02
        return w, b

    keys = jax.random.split(key, 10)
    backbone = {}
    backbone["embed_w"], backbone["embed_b"] = conv_init(keys[0], 1, 1, 48, 96)
    backbone["merge0_w"], backbone["merge0_b"] = conv_init(keys[1], 1, 1, 96 * 4, 192)
    backbone["merge1_w"], backbone["merge1_b"] = conv_init(keys[2], 1, 1, 192 * 4, 384)
    backbone["merge2_w"], backbone["merge2_b"] = conv_init(keys[3], 1, 1, 384 * 4, 768)

    C3, C4, C5 = 192, 384, 768  # agent_swin_t
    h = num_channels
    fpn = {}
    fpn["P5_1_w"], fpn["P5_1_b"] = conv_init(keys[4], 1, 1, C5, h)
    fpn["P5_2_w"], fpn["P5_2_b"] = conv_init(keys[5], 3, 3, h, num_channels)
    fpn["P4_1_w"], fpn["P4_1_b"] = conv_init(keys[6], 1, 1, C4, h)
    fpn["P4_2_w"], fpn["P4_2_b"] = conv_init(keys[7], 3, 3, h, num_channels)
    fpn["P3_1_w"], fpn["P3_1_b"] = conv_init(keys[8], 1, 1, C3, h)
    fpn["P3_2_w"], fpn["P3_2_b"] = conv_init(keys[9], 3, 3, h, num_channels)
    return {"backbone": backbone, "fpn": fpn}


if __name__ == "__main__":
    key = jax.random.PRNGKey(0)
    kp, kx, km = jax.random.split(key, 3)

    num_channels = 128
    params = init_params(kp, num_channels=num_channels)

    # Small example inputs: batch=2, RGB image 64x64, boolean padding mask.
    x = jax.random.normal(kx, (2, 3, 64, 64), jnp.float32)
    mask = jax.random.uniform(km, (2, 64, 64)) > 0.5

    fwd = jax.jit(backbone_base_agent_swin_forward)
    out = fwd(params, x, mask)

    jax.block_until_ready(out["4x"][0])
    jax.block_until_ready(out["4x"][1])
    jax.block_until_ready(out["8x"][0])
    jax.block_until_ready(out["8x"][1])

    # shape sanity: '4x' at feats[1] resolution (stride 8), '8x' at feats[2] (stride 16)
    assert out["4x"][0].shape == (2, num_channels, 8, 8)
    assert out["8x"][0].shape == (2, num_channels, 4, 4)
    assert out["4x"][1].shape == (2, 8, 8) and out["4x"][1].dtype == jnp.bool_
    assert out["8x"][1].shape == (2, 4, 4) and out["8x"][1].dtype == jnp.bool_

    print("KERNEL_OK")
</pallas_src>

<mosaic_0001>
module attributes {stable_mosaic.version = 11 : i64} {
  func.func @_mm_bias_kernel(%arg0: i32, %arg1: memref<512x48xbf16, #tpu.memory_space<vmem>>, %arg2: memref<48x96xbf16, #tpu.memory_space<vmem>>, %arg3: memref<1x96xf32, #tpu.memory_space<vmem>>, %arg4: memref<512x96xbf16, #tpu.memory_space<vmem>>) attributes {dimension_semantics = [#tpu.dimension_semantics<parallel>], iteration_bounds = array<i64: 1>, scalar_prefetch = 0 : i64, scratch_operands = 0 : i64, tpu.core_type = #tpu.core_type<tc>, window_params = [{transform_indices = @transform_0, window_bounds = array<i64: 512, 48>}, {pipeline_mode = #tpu.pipeline_mode<synchronous>, transform_indices = @transform_1, window_bounds = array<i64: 48, 96>}, {pipeline_mode = #tpu.pipeline_mode<synchronous>, transform_indices = @transform_2, window_bounds = array<i64: 1, 96>}, {transform_indices = @transform_3, window_bounds = array<i64: 512, 96>}]} {
    %c0 = arith.constant 0 : index
    %c0_0 = arith.constant 0 : index
    %0 = vector.load %arg1[%c0, %c0_0] : memref<512x48xbf16, #tpu.memory_space<vmem>>, vector<512x48xbf16>
    %c0_1 = arith.constant 0 : index
    %c0_2 = arith.constant 0 : index
    %1 = vector.load %arg2[%c0_1, %c0_2] : memref<48x96xbf16, #tpu.memory_space<vmem>>, vector<48x96xbf16>
    %cst = arith.constant dense<0.000000e+00> : vector<512x96xf32>
    %2 = tpu.matmul %0, %1, %cst {dimension_numbers = #tpu.dot_dimension_numbers<[1], [0], [0], [1], [0, 0, 1, 1], [], []>} : vector<512x48xbf16>, vector<48x96xbf16>, vector<512x96xf32> -> vector<512x96xf32>
    %c0_3 = arith.constant 0 : index
    %c0_4 = arith.constant 0 : index
    %3 = vector.load %arg3[%c0_3, %c0_4] : memref<1x96xf32, #tpu.memory_space<vmem>>, vector<1x96xf32>
    %4 = vector.broadcast %3 : vector<1x96xf32> to vector<512x96xf32>
    %5 = arith.addf %2, %4 : vector<512x96xf32>
    %6 = arith.truncf %5 : vector<512x96xf32> to vector<512x96xbf16>
    %c0_5 = arith.constant 0 : index
    %c0_6 = arith.constant 0 : index
    %7 = vector.load %arg4[%c0_5, %c0_6] : memref<512x96xbf16, #tpu.memory_space<vmem>>, vector<512x96xbf16>
    tpu.vector_store %arg4[%c0_5, %c0_6], %6 {strides = array<i32>} : memref<512x96xbf16, #tpu.memory_space<vmem>>, vector<512x96xbf16>,
    return
  }
  func.func @transform_0(%arg0: i32) -> (i32, i32) {
    %c0_i32 = arith.constant 0 : i32
    %c0_i32_0 = arith.constant 0 : i32
    return %arg0, %c0_i32 : i32, i32
  }
  func.func @transform_1(%arg0: i32) -> (i32, i32) {
    %c0_i32 = arith.constant 0 : i32
    %c0_i32_0 = arith.constant 0 : i32
    %c0_i32_1 = arith.constant 0 : i32
    return %c0_i32, %c0_i32_0 : i32, i32
  }
  func.func @transform_2(%arg0: i32) -> (i32, i32) {
    %c0_i32 = arith.constant 0 : i32
    %c0_i32_0 = arith.constant 0 : i32
    %c0_i32_1 = arith.constant 0 : i32
    return %c0_i32, %c0_i32_0 : i32, i32
  }
  func.func @transform_3(%arg0: i32) -> (i32, i32) {
    %c0_i32 = arith.constant 0 : i32
    %c0_i32_0 = arith.constant 0 : i32
    return %arg0, %c0_i32 : i32, i32
  }
}

module attributes {stable_mosaic.version = 11 : i64} {
  func.func @_mm_bias_kernel(%arg0: i32, %arg1: memref<128x384xbf16, #tpu.memory_space<vmem>>, %arg2: memref<384x192xbf16, #tpu.memory_space<vmem>>, %arg3: memref<1x192xf32, #tpu.memory_space<vmem>>, %arg4: memref<128x192xbf16, #tpu.memory_space<vmem>>) attributes {dimension_semantics = [#tpu.dimension_semantics<parallel>], iteration_bounds = array<i64: 1>, scalar_prefetch = 0 : i64, scratch_operands = 0 : i64, tpu.core_type = #tpu.core_type<tc>, window_params = [{transform_indices = @transform_0, window_bounds = array<i64: 128, 384>}, {pipeline_mode = #tpu.pipeline_mode<synchronous>, transform_indices = @transform_1, window_bounds = array<i64: 384, 192>}, {pipeline_mode = #tpu.pipeline_mode<synchronous>, transform_indices = @transform_2, window_bounds = array<i64: 1, 192>}, {transform_indices = @transform_3, window_bounds = array<i64: 128, 192>}]} {
    %c0 = arith.constant 0 : index
    %c0_0 = arith.constant 0 : index
    %0 = vector.load %arg1[%c0, %c0_0] : memref<128x384xbf16, #tpu.memory_space<vmem>>, vector<128x384xbf16>
    %c0_1 = arith.constant 0 : index
    %c0_2 = arith.constant 0 : index
    %1 = vector.load %arg2[%c0_1, %c0_2] : memref<384x192xbf16, #tpu.memory_space<vmem>>, vector<384x192xbf16>
    %cst = arith.constant dense<0.000000e+00> : vector<128x192xf32>
    %2 = tpu.matmul %0, %1, %cst {dimension_numbers = #tpu.dot_dimension_numbers<[1], [0], [0], [1], [0, 0, 1, 1], [], []>} : vector<128x384xbf16>, vector<384x192xbf16>, vector<128x192xf32> -> vector<128x192xf32>
    %c0_3 = arith.constant 0 : index
    %c0_4 = arith.constant 0 : index
    %3 = vector.load %arg3[%c0_3, %c0_4] : memref<1x192xf32, #tpu.memory_space<vmem>>, vector<1x192xf32>
    %4 = vector.broadcast %3 : vector<1x192xf32> to vector<128x192xf32>
    %5 = arith.addf %2, %4 : vector<128x192xf32>
    %6 = arith.truncf %5 : vector<128x192xf32> to vector<128x192xbf16>
    %c0_5 = arith.constant 0 : index
    %c0_6 = arith.constant 0 : index
    %7 = vector.load %arg4[%c0_5, %c0_6] : memref<128x192xbf16, #tpu.memory_space<vmem>>, vector<128x192xbf16>
    tpu.vector_store %arg4[%c0_5, %c0_6], %6 {strides = array<i32>} : memref<128x192xbf16, #tpu.memory_space<vmem>>, vector<128x192xbf16>,
    return
  }
  func.func @transform_0(%arg0: i32) -> (i32, i32) {
    %c0_i32 = arith.constant 0 : i32
    %c0_i32_0 = arith.constant 0 : i32
    return %arg0, %c0_i32 : i32, i32
  }
  func.func @transform_1(%arg0: i32) -> (i32, i32) {
    %c0_i32 = arith.constant 0 : i32
    %c0_i32_0 = arith.constant 0 : i32
    %c0_i32_1 = arith.constant 0 : i32
    return %c0_i32, %c0_i32_0 : i32, i32
  }
  func.func @transform_2(%arg0: i32) -> (i32, i32) {
    %c0_i32 = arith.constant 0 : i32
    %c0_i32_0 = arith.constant 0 : i32
    %c0_i32_1 = arith.constant 0 : i32
    return %c0_i32, %c0_i32_0 : i32, i32
  }
  func.func @transform_3(%arg0: i32) -> (i32, i32) {
    %c0_i32 = arith.constant 0 : i32
    %c0_i32_0 = arith.constant 0 : i32
    return %arg0, %c0_i32 : i32, i32
  }
}

module attributes {stable_mosaic.version = 11 : i64} {
  func.func @_mm_bias_kernel(%arg0: i32, %arg1: memref<32x768xbf16, #tpu.memory_space<vmem>>, %arg2: memref<768x384xbf16, #tpu.memory_space<vmem>>, %arg3: memref<1x384xf32, #tpu.memory_space<vmem>>, %arg4: memref<32x384xbf16, #tpu.memory_space<vmem>>) attributes {dimension_semantics = [#tpu.dimension_semantics<parallel>], iteration_bounds = array<i64: 1>, scalar_prefetch = 0 : i64, scratch_operands = 0 : i64, tpu.core_type = #tpu.core_type<tc>, window_params = [{transform_indices = @transform_0, window_bounds = array<i64: 32, 768>}, {pipeline_mode = #tpu.pipeline_mode<synchronous>, transform_indices = @transform_1, window_bounds = array<i64: 768, 384>}, {pipeline_mode = #tpu.pipeline_mode<synchronous>, transform_indices = @transform_2, window_bounds = array<i64: 1, 384>}, {transform_indices = @transform_3, window_bounds = array<i64: 32, 384>}]} {
    %c0 = arith.constant 0 : index
    %c0_0 = arith.constant 0 : index
    %0 = vector.load %arg1[%c0, %c0_0] : memref<32x768xbf16, #tpu.memory_space<vmem>>, vector<32x768xbf16>
    %c0_1 = arith.constant 0 : index
    %c0_2 = arith.constant 0 : index
    %1 = vector.load %arg2[%c0_1, %c0_2] : memref<768x384xbf16, #tpu.memory_space<vmem>>, vector<768x384xbf16>
    %cst = arith.constant dense<0.000000e+00> : vector<32x384xf32>
    %2 = tpu.matmul %0, %1, %cst {dimension_numbers = #tpu.dot_dimension_numbers<[1], [0], [0], [1], [0, 0, 1, 1], [], []>} : vector<32x768xbf16>, vector<768x384xbf16>, vector<32x384xf32> -> vector<32x384xf32>
    %c0_3 = arith.constant 0 : index
    %c0_4 = arith.constant 0 : index
    %3 = vector.load %arg3[%c0_3, %c0_4] : memref<1x384xf32, #tpu.memory_space<vmem>>, vector<1x384xf32>
    %4 = vector.broadcast %3 : vector<1x384xf32> to vector<32x384xf32>
    %5 = arith.addf %2, %4 : vector<32x384xf32>
    %6 = arith.truncf %5 : vector<32x384xf32> to vector<32x384xbf16>
    %c0_5 = arith.constant 0 : index
    %c0_6 = arith.constant 0 : index
    %7 = vector.load %arg4[%c0_5, %c0_6] : memref<32x384xbf16, #tpu.memory_space<vmem>>, vector<32x384xbf16>
    tpu.vector_store %arg4[%c0_5, %c0_6], %6 {strides = array<i32>} : memref<32x384xbf16, #tpu.memory_space<vmem>>, vector<32x384xbf16>,
    return
  }
  func.func @transform_0(%arg0: i32) -> (i32, i32) {
    %c0_i32 = arith.constant 0 : i32
    %c0_i32_0 = arith.constant 0 : i32
    return %arg0, %c0_i32 : i32, i32
  }
  func.func @transform_1(%arg0: i32) -> (i32, i32) {
    %c0_i32 = arith.constant 0 : i32
    %c0_i32_0 = arith.constant 0 : i32
    %c0_i32_1 = arith.constant 0 : i32
    return %c0_i32, %c0_i32_0 : i32, i32
  }
  func.func @transform_2(%arg0: i32) -> (i32, i32) {
    %c0_i32 = arith.constant 0 : i32
    %c0_i32_0 = arith.constant 0 : i32
    %c0_i32_1 = arith.constant 0 : i32
    return %c0_i32, %c0_i32_0 : i32, i32
  }
  func.func @transform_3(%arg0: i32) -> (i32, i32) {
    %c0_i32 = arith.constant 0 : i32
    %c0_i32_0 = arith.constant 0 : i32
    return %arg0, %c0_i32 : i32, i32
  }
}

module attributes {stable_mosaic.version = 11 : i64} {
  func.func @_mm_bias_kernel(%arg0: i32, %arg1: memref<8x1536xbf16, #tpu.memory_space<vmem>>, %arg2: memref<1536x768xbf16, #tpu.memory_space<vmem>>, %arg3: memref<1x768xf32, #tpu.memory_space<vmem>>, %arg4: memref<8x768xbf16, #tpu.memory_space<vmem>>) attributes {dimension_semantics = [#tpu.dimension_semantics<parallel>], iteration_bounds = array<i64: 1>, scalar_prefetch = 0 : i64, scratch_operands = 0 : i64, tpu.core_type = #tpu.core_type<tc>, window_params = [{transform_indices = @transform_0, window_bounds = array<i64: 8, 1536>}, {pipeline_mode = #tpu.pipeline_mode<synchronous>, transform_indices = @transform_1, window_bounds = array<i64: 1536, 768>}, {pipeline_mode = #tpu.pipeline_mode<synchronous>, transform_indices = @transform_2, window_bounds = array<i64: 1, 768>}, {transform_indices = @transform_3, window_bounds = array<i64: 8, 768>}]} {
    %c0 = arith.constant 0 : index
    %c0_0 = arith.constant 0 : index
    %0 = vector.load %arg1[%c0, %c0_0] : memref<8x1536xbf16, #tpu.memory_space<vmem>>, vector<8x1536xbf16>
    %c0_1 = arith.constant 0 : index
    %c0_2 = arith.constant 0 : index
    %1 = vector.load %arg2[%c0_1, %c0_2] : memref<1536x768xbf16, #tpu.memory_space<vmem>>, vector<1536x768xbf16>
    %cst = arith.constant dense<0.000000e+00> : vector<8x768xf32>
    %2 = tpu.matmul %0, %1, %cst {dimension_numbers = #tpu.dot_dimension_numbers<[1], [0], [0], [1], [0, 0, 1, 1], [], []>} : vector<8x1536xbf16>, vector<1536x768xbf16>, vector<8x768xf32> -> vector<8x768xf32>
    %c0_3 = arith.constant 0 : index
    %c0_4 = arith.constant 0 : index
    %3 = vector.load %arg3[%c0_3, %c0_4] : memref<1x768xf32, #tpu.memory_space<vmem>>, vector<1x768xf32>
    %4 = vector.broadcast %3 : vector<1x768xf32> to vector<8x768xf32>
    %5 = arith.addf %2, %4 : vector<8x768xf32>
    %6 = arith.truncf %5 : vector<8x768xf32> to vector<8x768xbf16>
    %c0_5 = arith.constant 0 : index
    %c0_6 = arith.constant 0 : index
    %7 = vector.load %arg4[%c0_5, %c0_6] : memref<8x768xbf16, #tpu.memory_space<vmem>>, vector<8x768xbf16>
    tpu.vector_store %arg4[%c0_5, %c0_6], %6 {strides = array<i32>} : memref<8x768xbf16, #tpu.memory_space<vmem>>, vector<8x768xbf16>,
    return
  }
  func.func @transform_0(%arg0: i32) -> (i32, i32) {
    %c0_i32 = arith.constant 0 : i32
    %c0_i32_0 = arith.constant 0 : i32
    return %arg0, %c0_i32 : i32, i32
  }
  func.func @transform_1(%arg0: i32) -> (i32, i32) {
    %c0_i32 = arith.constant 0 : i32
    %c0_i32_0 = arith.constant 0 : i32
    %c0_i32_1 = arith.constant 0 : i32
    return %c0_i32, %c0_i32_0 : i32, i32
  }
  func.func @transform_2(%arg0: i32) -> (i32, i32) {
    %c0_i32 = arith.constant 0 : i32
    %c0_i32_0 = arith.constant 0 : i32
    %c0_i32_1 = arith.constant 0 : i32
    return %c0_i32, %c0_i32_0 : i32, i32
  }
  func.func @transform_3(%arg0: i32) -> (i32, i32) {
    %c0_i32 = arith.constant 0 : i32
    %c0_i32_0 = arith.constant 0 : i32
    return %arg0, %c0_i32 : i32, i32
  }
}

module attributes {stable_mosaic.version = 11 : i64} {
  func.func @_mm_bias_kernel(%arg0: i32, %arg1: memref<8x768xbf16, #tpu.memory_space<vmem>>, %arg2: memref<768x128xbf16, #tpu.memory_space<vmem>>, %arg3: memref<1x128xf32, #tpu.memory_space<vmem>>, %arg4: memref<8x128xbf16, #tpu.memory_space<vmem>>) attributes {dimension_semantics = [#tpu.dimension_semantics<parallel>], iteration_bounds = array<i64: 1>, scalar_prefetch = 0 : i64, scratch_operands = 0 : i64, tpu.core_type = #tpu.core_type<tc>, window_params = [{transform_indices = @transform_0, window_bounds = array<i64: 8, 768>}, {pipeline_mode = #tpu.pipeline_mode<synchronous>, transform_indices = @transform_1, window_bounds = array<i64: 768, 128>}, {pipeline_mode = #tpu.pipeline_mode<synchronous>, transform_indices = @transform_2, window_bounds = array<i64: 1, 128>}, {transform_indices = @transform_3, window_bounds = array<i64: 8, 128>}]} {
    %c0 = arith.constant 0 : index
    %c0_0 = arith.constant 0 : index
    %0 = vector.load %arg1[%c0, %c0_0] : memref<8x768xbf16, #tpu.memory_space<vmem>>, vector<8x768xbf16>
    %c0_1 = arith.constant 0 : index
    %c0_2 = arith.constant 0 : index
    %1 = vector.load %arg2[%c0_1, %c0_2] : memref<768x128xbf16, #tpu.memory_space<vmem>>, vector<768x128xbf16>
    %cst = arith.constant dense<0.000000e+00> : vector<8x128xf32>
    %2 = tpu.matmul %0, %1, %cst {dimension_numbers = #tpu.dot_dimension_numbers<[1], [0], [0], [1], [0, 0, 1, 1], [], []>} : vector<8x768xbf16>, vector<768x128xbf16>, vector<8x128xf32> -> vector<8x128xf32>
    %c0_3 = arith.constant 0 : index
    %c0_4 = arith.constant 0 : index
    %3 = vector.load %arg3[%c0_3, %c0_4] : memref<1x128xf32, #tpu.memory_space<vmem>>, vector<1x128xf32>
    %4 = vector.broadcast %3 : vector<1x128xf32> to vector<8x128xf32>
    %5 = arith.addf %2, %4 : vector<8x128xf32>
    %6 = arith.truncf %5 : vector<8x128xf32> to vector<8x128xbf16>
    %c0_5 = arith.constant 0 : index
    %c0_6 = arith.constant 0 : index
    %7 = vector.load %arg4[%c0_5, %c0_6] : memref<8x128xbf16, #tpu.memory_space<vmem>>, vector<8x128xbf16>
    tpu.vector_store %arg4[%c0_5, %c0_6], %6 {strides = array<i32>} : memref<8x128xbf16, #tpu.memory_space<vmem>>, vector<8x128xbf16>,
    return
  }
  func.func @transform_0(%arg0: i32) -> (i32, i32) {
    %c0_i32 = arith.constant 0 : i32
    %c0_i32_0 = arith.constant 0 : i32
    return %arg0, %c0_i32 : i32, i32
  }
  func.func @transform_1(%arg0: i32) -> (i32, i32) {
    %c0_i32 = arith.constant 0 : i32
    %c0_i32_0 = arith.constant 0 : i32
    %c0_i32_1 = arith.constant 0 : i32
    return %c0_i32, %c0_i32_0 : i32, i32
  }
  func.func @transform_2(%arg0: i32) -> (i32, i32) {
    %c0_i32 = arith.constant 0 : i32
    %c0_i32_0 = arith.constant 0 : i32
    %c0_i32_1 = arith.constant 0 : i32
    return %c0_i32, %c0_i32_0 : i32, i32
  }
  func.func @transform_3(%arg0: i32) -> (i32, i32) {
    %c0_i32 = arith.constant 0 : i32
    %c0_i32_0 = arith.constant 0 : i32
    return %arg0, %c0_i32 : i32, i32
  }
}

module attributes {stable_mosaic.version = 11 : i64} {
  func.func @_mm_bias_res_kernel(%arg0: i32, %arg1: memref<32x384xbf16, #tpu.memory_space<vmem>>, %arg2: memref<384x128xbf16, #tpu.memory_space<vmem>>, %arg3: memref<1x128xf32, #tpu.memory_space<vmem>>, %arg4: memref<32x128xbf16, #tpu.memory_space<vmem>>, %arg5: memref<32x128xbf16, #tpu.memory_space<vmem>>) attributes {dimension_semantics = [#tpu.dimension_semantics<parallel>], iteration_bounds = array<i64: 1>, scalar_prefetch = 0 : i64, scratch_operands = 0 : i64, tpu.core_type = #tpu.core_type<tc>, window_params = [{transform_indices = @transform_0, window_bounds = array<i64: 32, 384>}, {pipeline_mode = #tpu.pipeline_mode<synchronous>, transform_indices = @transform_1, window_bounds = array<i64: 384, 128>}, {pipeline_mode = #tpu.pipeline_mode<synchronous>, transform_indices = @transform_2, window_bounds = array<i64: 1, 128>}, {transform_indices = @transform_3, window_bounds = array<i64: 32, 128>}, {transform_indices = @transform_4, window_bounds = array<i64: 32, 128>}]} {
    %c0 = arith.constant 0 : index
    %c0_0 = arith.constant 0 : index
    %0 = vector.load %arg1[%c0, %c0_0] : memref<32x384xbf16, #tpu.memory_space<vmem>>, vector<32x384xbf16>
    %c0_1 = arith.constant 0 : index
    %c0_2 = arith.constant 0 : index
    %1 = vector.load %arg2[%c0_1, %c0_2] : memref<384x128xbf16, #tpu.memory_space<vmem>>, vector<384x128xbf16>
    %cst = arith.constant dense<0.000000e+00> : vector<32x128xf32>
    %2 = tpu.matmul %0, %1, %cst {dimension_numbers = #tpu.dot_dimension_numbers<[1], [0], [0], [1], [0, 0, 1, 1], [], []>} : vector<32x384xbf16>, vector<384x128xbf16>, vector<32x128xf32> -> vector<32x128xf32>
    %c0_3 = arith.constant 0 : index
    %c0_4 = arith.constant 0 : index
    %3 = vector.load %arg3[%c0_3, %c0_4] : memref<1x128xf32, #tpu.memory_space<vmem>>, vector<1x128xf32>
    %4 = vector.broadcast %3 : vector<1x128xf32> to vector<32x128xf32>
    %5 = arith.addf %2, %4 : vector<32x128xf32>
    %c0_5 = arith.constant 0 : index
    %c0_6 = arith.constant 0 : index
    %6 = vector.load %arg4[%c0_5, %c0_6] : memref<32x128xbf16, #tpu.memory_space<vmem>>, vector<32x128xbf16>
    %7 = arith.extf %6 : vector<32x128xbf16> to vector<32x128xf32>
    %8 = arith.addf %5, %7 : vector<32x128xf32>
    %9 = arith.truncf %8 : vector<32x128xf32> to vector<32x128xbf16>
    %c0_7 = arith.constant 0 : index
    %c0_8 = arith.constant 0 : index
    %10 = vector.load %arg5[%c0_7, %c0_8] : memref<32x128xbf16, #tpu.memory_space<vmem>>, vector<32x128xbf16>
    tpu.vector_store %arg5[%c0_7, %c0_8], %9 {strides = array<i32>} : memref<32x128xbf16, #tpu.memory_space<vmem>>, vector<32x128xbf16>,
    return
  }
  func.func @transform_0(%arg0: i32) -> (i32, i32) {
    %c0_i32 = arith.constant 0 : i32
    %c0_i32_0 = arith.constant 0 : i32
    return %arg0, %c0_i32 : i32, i32
  }
  func.func @transform_1(%arg0: i32) -> (i32, i32) {
    %c0_i32 = arith.constant 0 : i32
    %c0_i32_0 = arith.constant 0 : i32
    %c0_i32_1 = arith.constant 0 : i32
    return %c0_i32, %c0_i32_0 : i32, i32
  }
  func.func @transform_2(%arg0: i32) -> (i32, i32) {
    %c0_i32 = arith.constant 0 : i32
    %c0_i32_0 = arith.constant 0 : i32
    %c0_i32_1 = arith.constant 0 : i32
    return %c0_i32, %c0_i32_0 : i32, i32
  }
  func.func @transform_3(%arg0: i32) -> (i32, i32) {
    %c0_i32 = arith.constant 0 : i32
    %c0_i32_0 = arith.constant 0 : i32
    return %arg0, %c0_i32 : i32, i32
  }
  func.func @transform_4(%arg0: i32) -> (i32, i32) {
    %c0_i32 = arith.constant 0 : i32
    %c0_i32_0 = arith.constant 0 : i32
    return %arg0, %c0_i32 : i32, i32
  }
}

module attributes {stable_mosaic.version = 11 : i64} {
  func.func @_mm_bias_res_kernel(%arg0: i32, %arg1: memref<128x192xbf16, #tpu.memory_space<vmem>>, %arg2: memref<192x128xbf16, #tpu.memory_space<vmem>>, %arg3: memref<1x128xf32, #tpu.memory_space<vmem>>, %arg4: memref<128x128xbf16, #tpu.memory_space<vmem>>, %arg5: memref<128x128xbf16, #tpu.memory_space<vmem>>) attributes {dimension_semantics = [#tpu.dimension_semantics<parallel>], iteration_bounds = array<i64: 1>, scalar_prefetch = 0 : i64, scratch_operands = 0 : i64, tpu.core_type = #tpu.core_type<tc>, window_params = [{transform_indices = @transform_0, window_bounds = array<i64: 128, 192>}, {pipeline_mode = #tpu.pipeline_mode<synchronous>, transform_indices = @transform_1, window_bounds = array<i64: 192, 128>}, {pipeline_mode = #tpu.pipeline_mode<synchronous>, transform_indices = @transform_2, window_bounds = array<i64: 1, 128>}, {transform_indices = @transform_3, window_bounds = array<i64: 128, 128>}, {transform_indices = @transform_4, window_bounds = array<i64: 128, 128>}]} {
    %c0 = arith.constant 0 : index
    %c0_0 = arith.constant 0 : index
    %0 = vector.load %arg1[%c0, %c0_0] : memref<128x192xbf16, #tpu.memory_space<vmem>>, vector<128x192xbf16>
    %c0_1 = arith.constant 0 : index
    %c0_2 = arith.constant 0 : index
    %1 = vector.load %arg2[%c0_1, %c0_2] : memref<192x128xbf16, #tpu.memory_space<vmem>>, vector<192x128xbf16>
    %cst = arith.constant dense<0.000000e+00> : vector<128x128xf32>
    %2 = tpu.matmul %0, %1, %cst {dimension_numbers = #tpu.dot_dimension_numbers<[1], [0], [0], [1], [0, 0, 1, 1], [], []>} : vector<128x192xbf16>, vector<192x128xbf16>, vector<128x128xf32> -> vector<128x128xf32>
    %c0_3 = arith.constant 0 : index
    %c0_4 = arith.constant 0 : index
    %3 = vector.load %arg3[%c0_3, %c0_4] : memref<1x128xf32, #tpu.memory_space<vmem>>, vector<1x128xf32>
    %4 = vector.broadcast %3 : vector<1x128xf32> to vector<128x128xf32>
    %5 = arith.addf %2, %4 : vector<128x128xf32>
    %c0_5 = arith.constant 0 : index
    %c0_6 = arith.constant 0 : index
    %6 = vector.load %arg4[%c0_5, %c0_6] : memref<128x128xbf16, #tpu.memory_space<vmem>>, vector<128x128xbf16>
    %7 = arith.extf %6 : vector<128x128xbf16> to vector<128x128xf32>
    %8 = arith.addf %5, %7 : vector<128x128xf32>
    %9 = arith.truncf %8 : vector<128x128xf32> to vector<128x128xbf16>
    %c0_7 = arith.constant 0 : index
    %c0_8 = arith.constant 0 : index
    %10 = vector.load %arg5[%c0_7, %c0_8] : memref<128x128xbf16, #tpu.memory_space<vmem>>, vector<128x128xbf16>
    tpu.vector_store %arg5[%c0_7, %c0_8], %9 {strides = array<i32>} : memref<128x128xbf16, #tpu.memory_space<vmem>>, vector<128x128xbf16>,
    return
  }
  func.func @transform_0(%arg0: i32) -> (i32, i32) {
    %c0_i32 = arith.constant 0 : i32
    %c0_i32_0 = arith.constant 0 : i32
    return %arg0, %c0_i32 : i32, i32
  }
  func.func @transform_1(%arg0: i32) -> (i32, i32) {
    %c0_i32 = arith.constant 0 : i32
    %c0_i32_0 = arith.constant 0 : i32
    %c0_i32_1 = arith.constant 0 : i32
    return %c0_i32, %c0_i32_0 : i32, i32
  }
  func.func @transform_2(%arg0: i32) -> (i32, i32) {
    %c0_i32 = arith.constant 0 : i32
    %c0_i32_0 = arith.constant 0 : i32
    %c0_i32_1 = arith.constant 0 : i32
    return %c0_i32, %c0_i32_0 : i32, i32
  }
  func.func @transform_3(%arg0: i32) -> (i32, i32) {
    %c0_i32 = arith.constant 0 : i32
    %c0_i32_0 = arith.constant 0 : i32
    return %arg0, %c0_i32 : i32, i32
  }
  func.func @transform_4(%arg0: i32) -> (i32, i32) {
    %c0_i32 = arith.constant 0 : i32
    %c0_i32_0 = arith.constant 0 : i32
    return %arg0, %c0_i32 : i32, i32
  }
}

module attributes {stable_mosaic.version = 11 : i64} {
  func.func @_conv3x3_kernel(%arg0: i32, %arg1: i32, %arg2: memref<1x176x128xbf16, #tpu.memory_space<vmem>>, %arg3: memref<1152x128xbf16, #tpu.memory_space<vmem>>, %arg4: memref<1x128xf32, #tpu.memory_space<vmem>>, %arg5: memref<1x128x128xf32, #tpu.memory_space<vmem>>, %arg6: memref<128x1152xbf16, #tpu.memory_space<vmem>>) attributes {dimension_semantics = [#tpu.dimension_semantics<parallel>, #tpu.dimension_semantics<parallel>], iteration_bounds = array<i64: 2, 1>, scalar_prefetch = 0 : i64, scratch_operands = 1 : i64, tpu.core_type = #tpu.core_type<tc>, window_params = [{transform_indices = @transform_0, window_bounds = array<i64: 1, 176, 128>}, {pipeline_mode = #tpu.pipeline_mode<synchronous>, transform_indices = @transform_1, window_bounds = array<i64: 1152, 128>}, {pipeline_mode = #tpu.pipeline_mode<synchronous>, transform_indices = @transform_2, window_bounds = array<i64: 1, 128>}, {transform_indices = @transform_3, window_bounds = array<i64: 1, 128, 128>}]} {
    %c128_i32 = arith.constant 128 : i32
    %0 = arith.muli %arg1, %c128_i32 : i32
    %c0_i32 = arith.constant 0 : i32
    %1 = arith.addi %0, %c0_i32 : i32
    %2 = tpu.assume_multiple %1, 8 : i32
    %c0 = arith.constant 0 : index
    %3 = arith.index_cast %2 : i32 to index
    %c0_0 = arith.constant 0 : index
    %4 = vector.load %arg2[%c0, %3, %c0_0] : memref<1x176x128xbf16, #tpu.memory_space<vmem>>, vector<1x136x128xbf16>
    %5 = vector.shape_cast %4 : vector<1x136x128xbf16> to vector<136x128xbf16>
    %6 = vector.extract_strided_slice %5 {offsets = [0, 0], sizes = [128, 128], strides = [1, 1]} : vector<136x128xbf16> to vector<128x128xbf16>
    %c0_1 = arith.constant 0 : index
    %c0_2 = arith.constant 0 : index
    %7 = vector.load %arg6[%c0_1, %c0_2] : memref<128x1152xbf16, #tpu.memory_space<vmem>>, vector<128x128xbf16>
    tpu.vector_store %arg6[%c0_1, %c0_2], %6 {strides = array<i32>} : memref<128x1152xbf16, #tpu.memory_space<vmem>>, vector<128x128xbf16>,
    %8 = vector.extract_strided_slice %5 {offsets = [1, 0], sizes = [128, 128], strides = [1, 1]} : vector<136x128xbf16> to vector<128x128xbf16>
    %c0_3 = arith.constant 0 : index
    %c128 = arith.constant 128 : index
    %9 = vector.load %arg6[%c0_3, %c128] : memref<128x1152xbf16, #tpu.memory_space<vmem>>, vector<128x128xbf16>
    tpu.vector_store %arg6[%c0_3, %c128], %8 {strides = array<i32>} : memref<128x1152xbf16, #tpu.memory_space<vmem>>, vector<128x128xbf16>,
    %10 = vector.extract_strided_slice %5 {offsets = [2, 0], sizes = [128, 128], strides = [1, 1]} : vector<136x128xbf16> to vector<128x128xbf16>
    %c0_4 = arith.constant 0 : index
    %c256 = arith.constant 256 : index
    %11 = vector.load %arg6[%c0_4, %c256] : memref<128x1152xbf16, #tpu.memory_space<vmem>>, vector<128x128xbf16>
    tpu.vector_store %arg6[%c0_4, %c256], %10 {strides = array<i32>} : memref<128x1152xbf16, #tpu.memory_space<vmem>>, vector<128x128xbf16>,
    %c128_i32_5 = arith.constant 128 : i32
    %12 = arith.muli %arg1, %c128_i32_5 : i32
    %c16_i32 = arith.constant 16 : i32
    %13 = arith.addi %12, %c16_i32 : i32
    %14 = tpu.assume_multiple %13, 8 : i32
    %c0_6 = arith.constant 0 : index
    %15 = arith.index_cast %14 : i32 to index
    %c0_7 = arith.constant 0 : index
    %16 = vector.load %arg2[%c0_6, %15, %c0_7] : memref<1x176x128xbf16, #tpu.memory_space<vmem>>, vector<1x136x128xbf16>
    %17 = vector.shape_cast %16 : vector<1x136x128xbf16> to vector<136x128xbf16>
    %18 = vector.extract_strided_slice %17 {offsets = [0, 0], sizes = [128, 128], strides = [1, 1]} : vector<136x128xbf16> to vector<128x128xbf16>
    %c0_8 = arith.constant 0 : index
    %c384 = arith.constant 384 : index
    %19 = vector.load %arg6[%c0_8, %c384] : memref<128x1152xbf16, #tpu.memory_space<vmem>>, vector<128x128xbf16>
    tpu.vector_store %arg6[%c0_8, %c384], %18 {strides = array<i32>} : memref<128x1152xbf16, #tpu.memory_space<vmem>>, vector<128x128xbf16>,
    %20 = vector.extract_strided_slice %17 {offsets = [1, 0], sizes = [128, 128], strides = [1, 1]} : vector<136x128xbf16> to vector<128x128xbf16>
    %c0_9 = arith.constant 0 : index
    %c512 = arith.constant 512 : index
    %21 = vector.load %arg6[%c0_9, %c512] : memref<128x1152xbf16, #tpu.memory_space<vmem>>, vector<128x128xbf16>
    tpu.vector_store %arg6[%c0_9, %c512], %20 {strides = array<i32>} : memref<128x1152xbf16, #tpu.memory_space<vmem>>, vector<128x128xbf16>,
    %22 = vector.extract_strided_slice %17 {offsets = [2, 0], sizes = [128, 128], strides = [1, 1]} : vector<136x128xbf16> to vector<128x128xbf16>
    %c0_10 = arith.constant 0 : index
    %c640 = arith.constant 640 : index
    %23 = vector.load %arg6[%c0_10, %c640] : memref<128x1152xbf16, #tpu.memory_space<vmem>>, vector<128x128xbf16>
    tpu.vector_store %arg6[%c0_10, %c640], %22 {strides = array<i32>} : memref<128x1152xbf16, #tpu.memory_space<vmem>>, vector<128x128xbf16>,
    %c128_i32_11 = arith.constant 128 : i32
    %24 = arith.muli %arg1, %c128_i32_11 : i32
    %c32_i32 = arith.constant 32 : i32
    %25 = arith.addi %24, %c32_i32 : i32
    %26 = tpu.assume_multiple %25, 8 : i32
    %c0_12 = arith.constant 0 : index
    %27 = arith.index_cast %26 : i32 to index
    %c0_13 = arith.constant 0 : index
    %28 = vector.load %arg2[%c0_12, %27, %c0_13] : memref<1x176x128xbf16, #tpu.memory_space<vmem>>, vector<1x136x128xbf16>
    %29 = vector.shape_cast %28 : vector<1x136x128xbf16> to vector<136x128xbf16>
    %30 = vector.extract_strided_slice %29 {offsets = [0, 0], sizes = [128, 128], strides = [1, 1]} : vector<136x128xbf16> to vector<128x128xbf16>
    %c0_14 = arith.constant 0 : index
    %c768 = arith.constant 768 : index
    %31 = vector.load %arg6[%c0_14, %c768] : memref<128x1152xbf16, #tpu.memory_space<vmem>>, vector<128x128xbf16>
    tpu.vector_store %arg6[%c0_14, %c768], %30 {strides = array<i32>} : memref<128x1152xbf16, #tpu.memory_space<vmem>>, vector<128x128xbf16>,
    %32 = vector.extract_strided_slice %29 {offsets = [1, 0], sizes = [128, 128], strides = [1, 1]} : vector<136x128xbf16> to vector<128x128xbf16>
    %c0_15 = arith.constant 0 : index
    %c896 = arith.constant 896 : index
    %33 = vector.load %arg6[%c0_15, %c896] : memref<128x1152xbf16, #tpu.memory_space<vmem>>, vector<128x128xbf16>
    tpu.vector_store %arg6[%c0_15, %c896], %32 {strides = array<i32>} : memref<128x1152xbf16, #tpu.memory_space<vmem>>, vector<128x128xbf16>,
    %34 = vector.extract_strided_slice %29 {offsets = [2, 0], sizes = [128, 128], strides = [1, 1]} : vector<136x128xbf16> to vector<128x128xbf16>
    %c0_16 = arith.constant 0 : index
    %c1024 = arith.constant 1024 : index
    %35 = vector.load %arg6[%c0_16, %c1024] : memref<128x1152xbf16, #tpu.memory_space<vmem>>, vector<128x128xbf16>
    tpu.vector_store %arg6[%c0_16, %c1024], %34 {strides = array<i32>} : memref<128x1152xbf16, #tpu.memory_space<vmem>>, vector<128x128xbf16>,
    %c0_17 = arith.constant 0 : index
    %c0_18 = arith.constant 0 : index
    %36 = vector.load %arg6[%c0_17, %c0_18] : memref<128x1152xbf16, #tpu.memory_space<vmem>>, vector<128x1152xbf16>
    %c0_19 = arith.constant 0 : index
    %c0_20 = arith.constant 0 : index
    %37 = vector.load %arg3[%c0_19, %c0_20] : memref<1152x128xbf16, #tpu.memory_space<vmem>>, vector<1152x128xbf16>
    %cst = arith.constant dense<0.000000e+00> : vector<128x128xf32>
    %38 = tpu.matmul %36, %37, %cst {dimension_numbers = #tpu.dot_dimension_numbers<[1], [0], [0], [1], [0, 0, 1, 1], [], []>} : vector<128x1152xbf16>, vector<1152x128xbf16>, vector<128x128xf32> -> vector<128x128xf32>
    %c0_21 = arith.constant 0 : index
    %c0_22 = arith.constant 0 : index
    %39 = vector.load %arg4[%c0_21, %c0_22] : memref<1x128xf32, #tpu.memory_space<vmem>>, vector<1x128xf32>
    %40 = vector.broadcast %39 : vector<1x128xf32> to vector<128x128xf32>
    %41 = arith.addf %38, %40 : vector<128x128xf32>
    %c0_23 = arith.constant 0 : index
    %c0_24 = arith.constant 0 : index
    %c0_25 = arith.constant 0 : index
    %42 = vector.load %arg5[%c0_23, %c0_24, %c0_25] : memref<1x128x128xf32, #tpu.memory_space<vmem>>, vector<1x128x128xf32>
    %43 = vector.shape_cast %42 : vector<1x128x128xf32> to vector<128x128xf32>
    %44 = vector.shape_cast %41 : vector<128x128xf32> to vector<1x128x128xf32>
    tpu.vector_store %arg5[%c0_23, %c0_24, %c0_25], %44 {strides = array<i32>} : memref<1x128x128xf32, #tpu.memory_space<vmem>>, vector<1x128x128xf32>,
    return
  }
  func.func @transform_0(%arg0: i32, %arg1: i32) -> (i32, i32, i32) {
    %c0_i32 = arith.constant 0 : i32
    %c0_i32_0 = arith.constant 0 : i32
    %c0_i32_1 = arith.constant 0 : i32
    return %arg0, %c0_i32, %c0_i32_0 : i32, i32, i32
  }
  func.func @transform_1(%arg0: i32, %arg1: i32) -> (i32, i32) {
    %c0_i32 = arith.constant 0 : i32
    %c0_i32_0 = arith.constant 0 : i32
    %c0_i32_1 = arith.constant 0 : i32
    return %c0_i32, %c0_i32_0 : i32, i32
  }
  func.func @transform_2(%arg0: i32, %arg1: i32) -> (i32, i32) {
    %c0_i32 = arith.constant 0 : i32
    %c0_i32_0 = arith.constant 0 : i32
    %c0_i32_1 = arith.constant 0 : i32
    return %c0_i32, %c0_i32_0 : i32, i32
  }
  func.func @transform_3(%arg0: i32, %arg1: i32) -> (i32, i32, i32) {
    %c0_i32 = arith.constant 0 : i32
    %c0_i32_0 = arith.constant 0 : i32
    return %arg0, %arg1, %c0_i32 : i32, i32, i32
  }
}

module attributes {stable_mosaic.version = 11 : i64} {
  func.func @_conv3x3_kernel(%arg0: i32, %arg1: i32, %arg2: memref<1x56x128xbf16, #tpu.memory_space<vmem>>, %arg3: memref<1152x128xbf16, #tpu.memory_space<vmem>>, %arg4: memref<1x128xf32, #tpu.memory_space<vmem>>, %arg5: memref<1x32x128xf32, #tpu.memory_space<vmem>>, %arg6: memref<32x1152xbf16, #tpu.memory_space<vmem>>) attributes {dimension_semantics = [#tpu.dimension_semantics<parallel>, #tpu.dimension_semantics<parallel>], iteration_bounds = array<i64: 2, 1>, scalar_prefetch = 0 : i64, scratch_operands = 1 : i64, tpu.core_type = #tpu.core_type<tc>, window_params = [{transform_indices = @transform_0, window_bounds = array<i64: 1, 56, 128>}, {pipeline_mode = #tpu.pipeline_mode<synchronous>, transform_indices = @transform_1, window_bounds = array<i64: 1152, 128>}, {pipeline_mode = #tpu.pipeline_mode<synchronous>, transform_indices = @transform_2, window_bounds = array<i64: 1, 128>}, {transform_indices = @transform_3, window_bounds = array<i64: 1, 32, 128>}]} {
    %c32_i32 = arith.constant 32 : i32
    %0 = arith.muli %arg1, %c32_i32 : i32
    %c0_i32 = arith.constant 0 : i32
    %1 = arith.addi %0, %c0_i32 : i32
    %2 = tpu.assume_multiple %1, 8 : i32
    %c0 = arith.constant 0 : index
    %3 = arith.index_cast %2 : i32 to index
    %c0_0 = arith.constant 0 : index
    %4 = vector.load %arg2[%c0, %3, %c0_0] : memref<1x56x128xbf16, #tpu.memory_space<vmem>>, vector<1x40x128xbf16>
    %5 = vector.shape_cast %4 : vector<1x40x128xbf16> to vector<40x128xbf16>
    %6 = vector.extract_strided_slice %5 {offsets = [0, 0], sizes = [32, 128], strides = [1, 1]} : vector<40x128xbf16> to vector<32x128xbf16>
    %c0_1 = arith.constant 0 : index
    %c0_2 = arith.constant 0 : index
    %7 = vector.load %arg6[%c0_1, %c0_2] : memref<32x1152xbf16, #tpu.memory_space<vmem>>, vector<32x128xbf16>
    tpu.vector_store %arg6[%c0_1, %c0_2], %6 {strides = array<i32>} : memref<32x1152xbf16, #tpu.memory_space<vmem>>, vector<32x128xbf16>,
    %8 = vector.extract_strided_slice %5 {offsets = [1, 0], sizes = [32, 128], strides = [1, 1]} : vector<40x128xbf16> to vector<32x128xbf16>
    %c0_3 = arith.constant 0 : index
    %c128 = arith.constant 128 : index
    %9 = vector.load %arg6[%c0_3, %c128] : memref<32x1152xbf16, #tpu.memory_space<vmem>>, vector<32x128xbf16>
    tpu.vector_store %arg6[%c0_3, %c128], %8 {strides = array<i32>} : memref<32x1152xbf16, #tpu.memory_space<vmem>>, vector<32x128xbf16>,
    %10 = vector.extract_strided_slice %5 {offsets = [2, 0], sizes = [32, 128], strides = [1, 1]} : vector<40x128xbf16> to vector<32x128xbf16>
    %c0_4 = arith.constant 0 : index
    %c256 = arith.constant 256 : index
    %11 = vector.load %arg6[%c0_4, %c256] : memref<32x1152xbf16, #tpu.memory_space<vmem>>, vector<32x128xbf16>
    tpu.vector_store %arg6[%c0_4, %c256], %10 {strides = array<i32>} : memref<32x1152xbf16, #tpu.memory_space<vmem>>, vector<32x128xbf16>,
    %c32_i32_5 = arith.constant 32 : i32
    %12 = arith.muli %arg1, %c32_i32_5 : i32
    %c8_i32 = arith.constant 8 : i32
    %13 = arith.addi %12, %c8_i32 : i32
    %14 = tpu.assume_multiple %13, 8 : i32
    %c0_6 = arith.constant 0 : index
    %15 = arith.index_cast %14 : i32 to index
    %c0_7 = arith.constant 0 : index
    %16 = vector.load %arg2[%c0_6, %15, %c0_7] : memref<1x56x128xbf16, #tpu.memory_space<vmem>>, vector<1x40x128xbf16>
    %17 = vector.shape_cast %16 : vector<1x40x128xbf16> to vector<40x128xbf16>
    %18 = vector.extract_strided_slice %17 {offsets = [0, 0], sizes = [32, 128], strides = [1, 1]} : vector<40x128xbf16> to vector<32x128xbf16>
    %c0_8 = arith.constant 0 : index
    %c384 = arith.constant 384 : index
    %19 = vector.load %arg6[%c0_8, %c384] : memref<32x1152xbf16, #tpu.memory_space<vmem>>, vector<32x128xbf16>
    tpu.vector_store %arg6[%c0_8, %c384], %18 {strides = array<i32>} : memref<32x1152xbf16, #tpu.memory_space<vmem>>, vector<32x128xbf16>,
    %20 = vector.extract_strided_slice %17 {offsets = [1, 0], sizes = [32, 128], strides = [1, 1]} : vector<40x128xbf16> to vector<32x128xbf16>
    %c0_9 = arith.constant 0 : index
    %c512 = arith.constant 512 : index
    %21 = vector.load %arg6[%c0_9, %c512] : memref<32x1152xbf16, #tpu.memory_space<vmem>>, vector<32x128xbf16>
    tpu.vector_store %arg6[%c0_9, %c512], %20 {strides = array<i32>} : memref<32x1152xbf16, #tpu.memory_space<vmem>>, vector<32x128xbf16>,
    %22 = vector.extract_strided_slice %17 {offsets = [2, 0], sizes = [32, 128], strides = [1, 1]} : vector<40x128xbf16> to vector<32x128xbf16>
    %c0_10 = arith.constant 0 : index
    %c640 = arith.constant 640 : index
    %23 = vector.load %arg6[%c0_10, %c640] : memref<32x1152xbf16, #tpu.memory_space<vmem>>, vector<32x128xbf16>
    tpu.vector_store %arg6[%c0_10, %c640], %22 {strides = array<i32>} : memref<32x1152xbf16, #tpu.memory_space<vmem>>, vector<32x128xbf16>,
    %c32_i32_11 = arith.constant 32 : i32
    %24 = arith.muli %arg1, %c32_i32_11 : i32
    %c16_i32 = arith.constant 16 : i32
    %25 = arith.addi %24, %c16_i32 : i32
    %26 = tpu.assume_multiple %25, 8 : i32
    %c0_12 = arith.constant 0 : index
    %27 = arith.index_cast %26 : i32 to index
    %c0_13 = arith.constant 0 : index
    %28 = vector.load %arg2[%c0_12, %27, %c0_13] : memref<1x56x128xbf16, #tpu.memory_space<vmem>>, vector<1x40x128xbf16>
    %29 = vector.shape_cast %28 : vector<1x40x128xbf16> to vector<40x128xbf16>
    %30 = vector.extract_strided_slice %29 {offsets = [0, 0], sizes = [32, 128], strides = [1, 1]} : vector<40x128xbf16> to vector<32x128xbf16>
    %c0_14 = arith.constant 0 : index
    %c768 = arith.constant 768 : index
    %31 = vector.load %arg6[%c0_14, %c768] : memref<32x1152xbf16, #tpu.memory_space<vmem>>, vector<32x128xbf16>
    tpu.vector_store %arg6[%c0_14, %c768], %30 {strides = array<i32>} : memref<32x1152xbf16, #tpu.memory_space<vmem>>, vector<32x128xbf16>,
    %32 = vector.extract_strided_slice %29 {offsets = [1, 0], sizes = [32, 128], strides = [1, 1]} : vector<40x128xbf16> to vector<32x128xbf16>
    %c0_15 = arith.constant 0 : index
    %c896 = arith.constant 896 : index
    %33 = vector.load %arg6[%c0_15, %c896] : memref<32x1152xbf16, #tpu.memory_space<vmem>>, vector<32x128xbf16>
    tpu.vector_store %arg6[%c0_15, %c896], %32 {strides = array<i32>} : memref<32x1152xbf16, #tpu.memory_space<vmem>>, vector<32x128xbf16>,
    %34 = vector.extract_strided_slice %29 {offsets = [2, 0], sizes = [32, 128], strides = [1, 1]} : vector<40x128xbf16> to vector<32x128xbf16>
    %c0_16 = arith.constant 0 : index
    %c1024 = arith.constant 1024 : index
    %35 = vector.load %arg6[%c0_16, %c1024] : memref<32x1152xbf16, #tpu.memory_space<vmem>>, vector<32x128xbf16>
    tpu.vector_store %arg6[%c0_16, %c1024], %34 {strides = array<i32>} : memref<32x1152xbf16, #tpu.memory_space<vmem>>, vector<32x128xbf16>,
    %c0_17 = arith.constant 0 : index
    %c0_18 = arith.constant 0 : index
    %36 = vector.load %arg6[%c0_17, %c0_18] : memref<32x1152xbf16, #tpu.memory_space<vmem>>, vector<32x1152xbf16>
    %c0_19 = arith.constant 0 : index
    %c0_20 = arith.constant 0 : index
    %37 = vector.load %arg3[%c0_19, %c0_20] : memref<1152x128xbf16, #tpu.memory_space<vmem>>, vector<1152x128xbf16>
    %cst = arith.constant dense<0.000000e+00> : vector<32x128xf32>
    %38 = tpu.matmul %36, %37, %cst {dimension_numbers = #tpu.dot_dimension_numbers<[1], [0], [0], [1], [0, 0, 1, 1], [], []>} : vector<32x1152xbf16>, vector<1152x128xbf16>, vector<32x128xf32> -> vector<32x128xf32>
    %c0_21 = arith.constant 0 : index
    %c0_22 = arith.constant 0 : index
    %39 = vector.load %arg4[%c0_21, %c0_22] : memref<1x128xf32, #tpu.memory_space<vmem>>, vector<1x128xf32>
    %40 = vector.broadcast %39 : vector<1x128xf32> to vector<32x128xf32>
    %41 = arith.addf %38, %40 : vector<32x128xf32>
    %c0_23 = arith.constant 0 : index
    %c0_24 = arith.constant 0 : index
    %c0_25 = arith.constant 0 : index
    %42 = vector.load %arg5[%c0_23, %c0_24, %c0_25] : memref<1x32x128xf32, #tpu.memory_space<vmem>>, vector<1x32x128xf32>
    %43 = vector.shape_cast %42 : vector<1x32x128xf32> to vector<32x128xf32>
    %44 = vector.shape_cast %41 : vector<32x128xf32> to vector<1x32x128xf32>
    tpu.vector_store %arg5[%c0_23, %c0_24, %c0_25], %44 {strides = array<i32>} : memref<1x32x128xf32, #tpu.memory_space<vmem>>, vector<1x32x128xf32>,
    return
  }
  func.func @transform_0(%arg0: i32, %arg1: i32) -> (i32, i32, i32) {
    %c0_i32 = arith.constant 0 : i32
    %c0_i32_0 = arith.constant 0 : i32
    %c0_i32_1 = arith.constant 0 : i32
    return %arg0, %c0_i32, %c0_i32_0 : i32, i32, i32
  }
  func.func @transform_1(%arg0: i32, %arg1: i32) -> (i32, i32) {
    %c0_i32 = arith.constant 0 : i32
    %c0_i32_0 = arith.constant 0 : i32
    %c0_i32_1 = arith.constant 0 : i32
    return %c0_i32, %c0_i32_0 : i32, i32
  }
  func.func @transform_2(%arg0: i32, %arg1: i32) -> (i32, i32) {
    %c0_i32 = arith.constant 0 : i32
    %c0_i32_0 = arith.constant 0 : i32
    %c0_i32_1 = arith.constant 0 : i32
    return %c0_i32, %c0_i32_0 : i32, i32
  }
  func.func @transform_3(%arg0: i32, %arg1: i32) -> (i32, i32, i32) {
    %c0_i32 = arith.constant 0 : i32
    %c0_i32_0 = arith.constant 0 : i32
    return %arg0, %arg1, %c0_i32 : i32, i32, i32
  }
}

</mosaic_0001>

<bundles_post_ra>
// kernel: backbone_base_agent_swin_forward.9
= control target key start
LH: loop header
LB: loop body
LE: loop exit
PB: predicated region body
PF: predicated region fallthrough
CT: control target
= control target key end

     0   :  { %vm270_vm0 = vcmask 392192   ;;  %vm912_vm1 = vcmask 781312   ;;  %s1805_s1 = inlined_call_operand.vmem [shape: bf16[48,96], index: 1, kind: input, shape index: {}]   ;;  %s1806_s0 = inlined_call_operand.vmem [shape: bf16[512,48], index: 0, kind: input, shape index: {}]   ;;  %s1807_s2 = inlined_call_operand.vmem [shape: f32[1,96], index: 2, kind: input, shape index: {}]   ;;  %s1808_s3 = inlined_call_operand.vmem [shape: bf16[512,96], index: 3, kind: output, shape index: {}]  }
   0x1   :  { %v1288_v0 = vld [vmem:[%s1805_s1] sm:$0xff]   ;;  %v1289_v1 = vld [vmem:[%s1805_s1 + $0x8] sm:$0xff]   ;;  %v1290_v2 = vld [vmem:[%s1805_s1 + $0x10] sm:$0xff]  }
   0x2   :  { %1212 = vmatprep.subr.bf16.mxu0 %v1288_v0  ;;  %1282 = vmatprep.subr.bf16.mxu1 %v1288_v0  ;;  %v1291_v3 = vld [vmem:[%s1806_s0] sm:$0xff]   ;;  %v1293_v5 = vld [vmem:[%s1806_s0 + $0x8] sm:$0xff]   ;;  %v1295_v7 = vld [vmem:[%s1806_s0 + $0x10] sm:$0xff]  }
   0x3   :  { %1213 = vmatpush3.bf16.msra.mxu0 %v1288_v0  ;;  %1285 = vmatpush3.bf16.msra.mxu1 %v1288_v0  ;;  %v1292_v4 = vld [vmem:[%s1806_s0 + $0x80] sm:$0xff]   ;;  %v1294_v6 = vld [vmem:[%s1806_s0 + $0x88] sm:$0xff]   ;;  %v1296_v8 = vld [vmem:[%s1806_s0 + $0x90] sm:$0xff]  }
   0x4   :  { %1214 = vmatprep.subr.bf16.mxu0 %v1289_v1  ;;  %1283 = vmatprep.subr.bf16.mxu1 %v1289_v1  ;;  %v1297_v9 = vld [vmem:[%s1806_s0 + $0x18] sm:$0xff]   ;;  %v1299_v11 = vld [vmem:[%s1806_s0 + $0x20] sm:$0xff]   ;;  %v1301_v13 = vld [vmem:[%s1806_s0 + $0x28] sm:$0xff]  }
   0x5   :  { %1218 = vmatprep.mubr.msk.bf16.mxu0 %vm270_vm0, %v1291_v3  ;;  %1250 = vmatprep.mubr.msk.bf16.mxu1 %vm270_vm0, %v1292_v4  ;;  %v1298_v10 = vld [vmem:[%s1806_s0 + $0x98] sm:$0xff]   ;;  %v1300_v12 = vld [vmem:[%s1806_s0 + $0xa0] sm:$0xff]   ;;  %v1302_v14 = vld [vmem:[%s1806_s0 + $0xa8] sm:$0xff]  }
   0x6   :  { %v1303_v15 = vld [vmem:[%s1806_s0 + $0x30] sm:$0xff]   ;;  %v1305_v17 = vld [vmem:[%s1806_s0 + $0x38] sm:$0xff]   ;;  %v1307_v19 = vld [vmem:[%s1806_s0 + $0x40] sm:$0xff]  }
   0x7   :  { %1215 = vmatpush3.bf16.msra.mxu0 %v1289_v1  ;;  %1286 = vmatpush3.bf16.msra.mxu1 %v1289_v1  ;;  %v1304_v16 = vld [vmem:[%s1806_s0 + $0xb0] sm:$0xff]   ;;  %v1306_v18 = vld [vmem:[%s1806_s0 + $0xb8] sm:$0xff]   ;;  %v1308_v20 = vld [vmem:[%s1806_s0 + $0xc0] sm:$0xff]  }
   0x8   :  { %1216 = vmatprep.subr.bf16.mxu0 %v1290_v2  ;;  %1284 = vmatprep.subr.bf16.mxu1 %v1290_v2  ;;  %v1309_v21 = vld [vmem:[%s1806_s0 + $0x48] sm:$0xff]   ;;  %v1311_v23 = vld [vmem:[%s1806_s0 + $0x50] sm:$0xff]   ;;  %v1313_v25 = vld [vmem:[%s1806_s0 + $0x58] sm:$0xff]  }
   0x9   :  { %v1310_v22 = vld [vmem:[%s1806_s0 + $0xc8] sm:$0xff]   ;;  %v1312_v24 = vld [vmem:[%s1806_s0 + $0xd0] sm:$0xff]   ;;  %v1314_v26 = vld [vmem:[%s1806_s0 + $0xd8] sm:$0xff]  }
   0xa   :  { %v1315_v27 = vld [vmem:[%s1806_s0 + $0x60] sm:$0xff]   ;;  %v1317_v29 = vld [vmem:[%s1806_s0 + $0x68] sm:$0xff]   ;;  %v1319_v31 = vld [vmem:[%s1806_s0 + $0x70] sm:$0xff]  }
   0xb   :  { %1217 = vmatpush3.bf16.msra.mxu0 %v1290_v2  ;;  %1287 = vmatpush3.bf16.msra.mxu1 %v1290_v2  ;;  %v1316_v28 = vld [vmem:[%s1806_s0 + $0xe0] sm:$0xff]   ;;  %v1318_v30 = vld [vmem:[%s1806_s0 + $0xe8] sm:$0xff]   ;;  %v1320_v32 = vld [vmem:[%s1806_s0 + $0xf0] sm:$0xff]  }
   0xc   :  { %v1321_v33 = vld [vmem:[%s1806_s0 + $0x78] sm:$0xff]   ;;  %v1483_v35 = vld [vmem:[%s1807_s2] ss:$0 sm:$0xff] }
   0xd   :  { %v1322_v34 = vld [vmem:[%s1806_s0 + $0xf8] sm:$0xff]  }
   0xe   :  { %1219 = vmatmul.mubr.msk.bf16.vlgmr.msra.gmra.mrb[0].mxu0 %vm270_vm0, %v1293_v5  ;;  %1251 = vmatmul.mubr.msk.bf16.vlgmr.msra.gmra.mrb[0].mxu1 %vm270_vm0, %v1294_v6 }
   0xf   :  { %1222 = vmatprep.mubr.msk.bf16.mxu0 %vm270_vm0, %v1295_v7  ;;  %1254 = vmatprep.mubr.msk.bf16.mxu1 %vm270_vm0, %v1296_v8 }
  0x16   :  { %1223 = vmatmul.mubr.msk.bf16.gmra.mrb[4].mxu0 %vm270_vm0, %v1297_v9  ;;  %1255 = vmatmul.mubr.msk.bf16.gmra.mrb[4].mxu1 %vm270_vm0, %v1298_v10 }
  0x17   :  { %1226 = vmatprep.mubr.msk.bf16.mxu0 %vm270_vm0, %v1299_v11  ;;  %1258 = vmatprep.mubr.msk.bf16.mxu1 %vm270_vm0, %v1300_v12 }
  0x1e   :  { %1227 = vmatmul.mubr.msk.bf16.gmra.mrb[8].mxu0 %vm270_vm0, %v1301_v13  ;;  %1259 = vmatmul.mubr.msk.bf16.gmra.mrb[8].mxu1 %vm270_vm0, %v1302_v14 }
  0x1f   :  { %1230 = vmatprep.mubr.msk.bf16.mxu0 %vm270_vm0, %v1303_v15  ;;  %1262 = vmatprep.mubr.msk.bf16.mxu1 %vm270_vm0, %v1304_v16 }
  0x26   :  { %1231 = vmatmul.mubr.msk.bf16.gmra.mrb[12].mxu0 %vm270_vm0, %v1305_v17  ;;  %1263 = vmatmul.mubr.msk.bf16.gmra.mrb[12].mxu1 %vm270_vm0, %v1306_v18 }
  0x27   :  { %1234 = vmatprep.mubr.msk.bf16.mxu0 %vm270_vm0, %v1307_v19  ;;  %1266 = vmatprep.mubr.msk.bf16.mxu1 %vm270_vm0, %v1308_v20 }
  0x2e   :  { %1235 = vmatmul.mubr.msk.bf16.gmra.mrb[16].mxu0 %vm270_vm0, %v1309_v21  ;;  %1267 = vmatmul.mubr.msk.bf16.gmra.mrb[16].mxu1 %vm270_vm0, %v1310_v22 }
  0x2f   :  { %1238 = vmatprep.mubr.msk.bf16.mxu0 %vm270_vm0, %v1311_v23  ;;  %1270 = vmatprep.mubr.msk.bf16.mxu1 %vm270_vm0, %v1312_v24 }
  0x36   :  { %1239 = vmatmul.mubr.msk.bf16.gmra.mrb[20].mxu0 %vm270_vm0, %v1313_v25  ;;  %1271 = vmatmul.mubr.msk.bf16.gmra.mrb[20].mxu1 %vm270_vm0, %v1314_v26 }
  0x37   :  { %1242 = vmatprep.mubr.msk.bf16.mxu0 %vm270_vm0, %v1315_v27  ;;  %1274 = vmatprep.mubr.msk.bf16.mxu1 %vm270_vm0, %v1316_v28 }
  0x3e   :  { %1243 = vmatmul.mubr.msk.bf16.gmra.mrb[24].mxu0 %vm270_vm0, %v1317_v29  ;;  %1275 = vmatmul.mubr.msk.bf16.gmra.mrb[24].mxu1 %vm270_vm0, %v1318_v30 }
  0x3f   :  { %1246 = vmatprep.mubr.msk.bf16.mxu0 %vm270_vm0, %v1319_v31  ;;  %1278 = vmatprep.mubr.msk.bf16.mxu1 %vm270_vm0, %v1320_v32 }
  0x46   :  { %1247 = vmatmul.mubr.msk.bf16.gmra.mrb[28].mxu0 %vm270_vm0, %v1321_v33  ;;  %1279 = vmatmul.mubr.msk.bf16.gmra.mrb[28].mxu1 %vm270_vm0, %v1322_v34 }
  0xe1   :  { %v1220_v36 = vpop.f32.mrb[0].mxu0  ;;  %v1252_v37 = vpop.f32.mrb[0].mxu1 }
  0xe2   :  { %v410_v38 = vadd.f32 %v1220_v36, %v1483_v35  ;;  %v538_v39 = vadd.f32 %v1252_v37, %v1483_v35  ;;  %v401_v40 = vpop.f32.mrb[1].mxu0  ;;  %v529_v41 = vpop.f32.mrb[1].mxu1 }
  0xe3   :  { %v402_v42 = vadd.f32 %v1483_v35, %v401_v40  ;;  %v530_v43 = vadd.f32 %v1483_v35, %v529_v41  ;;  %v1221_v44 = vpop.f32.mrb[2].mxu0  ;;  %v1253_v45 = vpop.f32.mrb[2].mxu1 }
  0xe4   :  { %v1115_v46 = vpack.c.bf16 %v410_v38, %v410_v38  ;;  %v1147_v47 = vpack.c.bf16 %v538_v39, %v538_v39  ;;  %v413_v48 = vadd.f32 %v1221_v44, %v1483_v35  ;;  %v541_v49 = vadd.f32 %v1253_v45, %v1483_v35  ;;  %v404_v50 = vpop.f32.mrb[3].mxu0  ;;  %v532_v51 = vpop.f32.mrb[3].mxu1 }
  0xe5   :  { %v1113_v52 = vpack.c.bf16 %v402_v42, %v402_v42  ;;  %v1145_v53 = vpack.c.bf16 %v530_v43, %v530_v43  ;;  %v405_v54 = vadd.f32 %v1483_v35, %v404_v50  ;;  %v533_v55 = vadd.f32 %v1483_v35, %v532_v51 }
  0xe6   :  { %915 = vst.msk [vmem:[%s1808_s3 + $0x8] sm:$0xf] %vm912_vm1, %v1115_v46  ;;  %947 = vst.msk [vmem:[%s1808_s3 + $0x88] sm:$0xf] %vm912_vm1, %v1147_v47  ;;  %v1116_v56 = vpack.c.bf16 %v413_v48, %v413_v48  ;;  %v1148_v57 = vpack.c.bf16 %v541_v49, %v541_v49 }
  0xe7   :  { %913 = vst.msk [vmem:[%s1808_s3] sm:$0xf] %vm912_vm1, %v1113_v52  ;;  %945 = vst.msk [vmem:[%s1808_s3 + $0x80] sm:$0xf] %vm912_vm1, %v1145_v53  ;;  %v1114_v58 = vpack.c.bf16 %v405_v54, %v405_v54  ;;  %v1146_v59 = vpack.c.bf16 %v533_v55, %v533_v55 }
  0xe8   :  { %916 = vst.msk [vmem:[%s1808_s3 + $0xc] sm:$0xf] %vm912_vm1, %v1116_v56  ;;  %948 = vst.msk [vmem:[%s1808_s3 + $0x8c] sm:$0xf] %vm912_vm1, %v1148_v57 }
  0xe9   :  { %914 = vst.msk [vmem:[%s1808_s3 + $0x4] sm:$0xf] %vm912_vm1, %v1114_v58  ;;  %946 = vst.msk [vmem:[%s1808_s3 + $0x84] sm:$0xf] %vm912_vm1, %v1146_v59  ;;  %v1224_v60 = vpop.f32.mrb[4].mxu0  ;;  %v1256_v61 = vpop.f32.mrb[4].mxu1 }
  0xea   :  { %v426_v62 = vadd.f32 %v1224_v60, %v1483_v35  ;;  %v554_v63 = vadd.f32 %v1256_v61, %v1483_v35  ;;  %v417_v0 = vpop.f32.mrb[5].mxu0  ;;  %v545_v1 = vpop.f32.mrb[5].mxu1 }
  0xeb   :  { %v418_v2 = vadd.f32 %v1483_v35, %v417_v0  ;;  %v546_v3 = vadd.f32 %v1483_v35, %v545_v1  ;;  %v1225_v4 = vpop.f32.mrb[6].mxu0  ;;  %v1257_v5 = vpop.f32.mrb[6].mxu1 }
  0xec   :  { %v1119_v6 = vpack.c.bf16 %v426_v62, %v426_v62  ;;  %v1151_v7 = vpack.c.bf16 %v554_v63, %v554_v63  ;;  %v429_v8 = vadd.f32 %v1225_v4, %v1483_v35  ;;  %v557_v9 = vadd.f32 %v1257_v5, %v1483_v35  ;;  %v420_v10 = vpop.f32.mrb[7].mxu0  ;;  %v548_v11 = vpop.f32.mrb[7].mxu1 }
  0xed   :  { %v1117_v12 = vpack.c.bf16 %v418_v2, %v418_v2  ;;  %v1149_v13 = vpack.c.bf16 %v546_v3, %v546_v3  ;;  %v421_v14 = vadd.f32 %v1483_v35, %v420_v10  ;;  %v549_v15 = vadd.f32 %v1483_v35, %v548_v11 }
  0xee   :  { %919 = vst.msk [vmem:[%s1808_s3 + $0x18] sm:$0xf] %vm912_vm1, %v1119_v6  ;;  %951 = vst.msk [vmem:[%s1808_s3 + $0x98] sm:$0xf] %vm912_vm1, %v1151_v7  ;;  %v1120_v16 = vpack.c.bf16 %v429_v8, %v429_v8  ;;  %v1152_v17 = vpack.c.bf16 %v557_v9, %v557_v9 }
  0xef   :  { %917 = vst.msk [vmem:[%s1808_s3 + $0x10] sm:$0xf] %vm912_vm1, %v1117_v12  ;;  %949 = vst.msk [vmem:[%s1808_s3 + $0x90] sm:$0xf] %vm912_vm1, %v1149_v13  ;;  %v1118_v18 = vpack.c.bf16 %v421_v14, %v421_v14  ;;  %v1150_v19 = vpack.c.bf16 %v549_v15, %v549_v15 }
  0xf0   :  { %920 = vst.msk [vmem:[%s1808_s3 + $0x1c] sm:$0xf] %vm912_vm1, %v1120_v16  ;;  %952 = vst.msk [vmem:[%s1808_s3 + $0x9c] sm:$0xf] %vm912_vm1, %v1152_v17 }
  0xf1   :  { %918 = vst.msk [vmem:[%s1808_s3 + $0x14] sm:$0xf] %vm912_vm1, %v1118_v18  ;;  %950 = vst.msk [vmem:[%s1808_s3 + $0x94] sm:$0xf] %vm912_vm1, %v1150_v19  ;;  %v1228_v20 = vpop.f32.mrb[8].mxu0  ;;  %v1260_v21 = vpop.f32.mrb[8].mxu1 }
  0xf2   :  { %v442_v22 = vadd.f32 %v1228_v20, %v1483_v35  ;;  %v570_v23 = vadd.f32 %v1260_v21, %v1483_v35  ;;  %v433_v24 = vpop.f32.mrb[9].mxu0  ;;  %v561_v25 = vpop.f32.mrb[9].mxu1 }
  0xf3   :  { %v434_v26 = vadd.f32 %v1483_v35, %v433_v24  ;;  %v562_v27 = vadd.f32 %v1483_v35, %v561_v25  ;;  %v1229_v28 = vpop.f32.mrb[10].mxu0  ;;  %v1261_v29 = vpop.f32.mrb[10].mxu1 }
  0xf4   :  { %v1123_v30 = vpack.c.bf16 %v442_v22, %v442_v22  ;;  %v1155_v31 = vpack.c.bf16 %v570_v23, %v570_v23  ;;  %v445_v32 = vadd.f32 %v1229_v28, %v1483_v35  ;;  %v573_v33 = vadd.f32 %v1261_v29, %v1483_v35  ;;  %v436_v34 = vpop.f32.mrb[11].mxu0  ;;  %v564_v36 = vpop.f32.mrb[11].mxu1 }
  0xf5   :  { %v1121_v37 = vpack.c.bf16 %v434_v26, %v434_v26  ;;  %v1153_v38 = vpack.c.bf16 %v562_v27, %v562_v27  ;;  %v437_v39 = vadd.f32 %v1483_v35, %v436_v34  ;;  %v565_v40 = vadd.f32 %v1483_v35, %v564_v36 }
  0xf6   :  { %923 = vst.msk [vmem:[%s1808_s3 + $0x28] sm:$0xf] %vm912_vm1, %v1123_v30  ;;  %955 = vst.msk [vmem:[%s1808_s3 + $0xa8] sm:$0xf] %vm912_vm1, %v1155_v31  ;;  %v1124_v41 = vpack.c.bf16 %v445_v32, %v445_v32  ;;  %v1156_v42 = vpack.c.bf16 %v573_v33, %v573_v33 }
  0xf7   :  { %921 = vst.msk [vmem:[%s1808_s3 + $0x20] sm:$0xf] %vm912_vm1, %v1121_v37  ;;  %953 = vst.msk [vmem:[%s1808_s3 + $0xa0] sm:$0xf] %vm912_vm1, %v1153_v38  ;;  %v1122_v43 = vpack.c.bf16 %v437_v39, %v437_v39  ;;  %v1154_v44 = vpack.c.bf16 %v565_v40, %v565_v40 }
  0xf8   :  { %924 = vst.msk [vmem:[%s1808_s3 + $0x2c] sm:$0xf] %vm912_vm1, %v1124_v41  ;;  %956 = vst.msk [vmem:[%s1808_s3 + $0xac] sm:$0xf] %vm912_vm1, %v1156_v42 }
  0xf9   :  { %922 = vst.msk [vmem:[%s1808_s3 + $0x24] sm:$0xf] %vm912_vm1, %v1122_v43  ;;  %954 = vst.msk [vmem:[%s1808_s3 + $0xa4] sm:$0xf] %vm912_vm1, %v1154_v44  ;;  %v1232_v45 = vpop.f32.mrb[12].mxu0  ;;  %v1264_v46 = vpop.f32.mrb[12].mxu1 }
  0xfa   :  { %v458_v47 = vadd.f32 %v1232_v45, %v1483_v35  ;;  %v586_v48 = vadd.f32 %v1264_v46, %v1483_v35  ;;  %v449_v49 = vpop.f32.mrb[13].mxu0  ;;  %v577_v50 = vpop.f32.mrb[13].mxu1 }
  0xfb   :  { %v450_v51 = vadd.f32 %v1483_v35, %v449_v49  ;;  %v578_v52 = vadd.f32 %v1483_v35, %v577_v50  ;;  %v1233_v53 = vpop.f32.mrb[14].mxu0  ;;  %v1265_v54 = vpop.f32.mrb[14].mxu1 }
  0xfc   :  { %v1127_v55 = vpack.c.bf16 %v458_v47, %v458_v47  ;;  %v1159_v56 = vpack.c.bf16 %v586_v48, %v586_v48  ;;  %v461_v57 = vadd.f32 %v1233_v53, %v1483_v35  ;;  %v589_v58 = vadd.f32 %v1265_v54, %v1483_v35  ;;  %v452_v59 = vpop.f32.mrb[15].mxu0  ;;  %v580_v60 = vpop.f32.mrb[15].mxu1 }
  0xfd   :  { %v1125_v61 = vpack.c.bf16 %v450_v51, %v450_v51  ;;  %v1157_v62 = vpack.c.bf16 %v578_v52, %v578_v52  ;;  %v453_v63 = vadd.f32 %v1483_v35, %v452_v59  ;;  %v581_v0 = vadd.f32 %v1483_v35, %v580_v60 }
  0xfe   :  { %927 = vst.msk [vmem:[%s1808_s3 + $0x38] sm:$0xf] %vm912_vm1, %v1127_v55  ;;  %959 = vst.msk [vmem:[%s1808_s3 + $0xb8] sm:$0xf] %vm912_vm1, %v1159_v56  ;;  %v1128_v1 = vpack.c.bf16 %v461_v57, %v461_v57  ;;  %v1160_v2 = vpack.c.bf16 %v589_v58, %v589_v58 }
  0xff   :  { %925 = vst.msk [vmem:[%s1808_s3 + $0x30] sm:$0xf] %vm912_vm1, %v1125_v61  ;;  %957 = vst.msk [vmem:[%s1808_s3 + $0xb0] sm:$0xf] %vm912_vm1, %v1157_v62  ;;  %v1126_v3 = vpack.c.bf16 %v453_v63, %v453_v63  ;;  %v1158_v4 = vpack.c.bf16 %v581_v0, %v581_v0 }
 0x100   :  { %928 = vst.msk [vmem:[%s1808_s3 + $0x3c] sm:$0xf] %vm912_vm1, %v1128_v1  ;;  %960 = vst.msk [vmem:[%s1808_s3 + $0xbc] sm:$0xf] %vm912_vm1, %v1160_v2 }
 0x101   :  { %926 = vst.msk [vmem:[%s1808_s3 + $0x34] sm:$0xf] %vm912_vm1, %v1126_v3  ;;  %958 = vst.msk [vmem:[%s1808_s3 + $0xb4] sm:$0xf] %vm912_vm1, %v1158_v4  ;;  %v1236_v5 = vpop.f32.mrb[16].mxu0  ;;  %v1268_v6 = vpop.f32.mrb[16].mxu1 }
 0x102   :  { %v474_v7 = vadd.f32 %v1236_v5, %v1483_v35  ;;  %v602_v8 = vadd.f32 %v1268_v6, %v1483_v35  ;;  %v465_v9 = vpop.f32.mrb[17].mxu0  ;;  %v593_v10 = vpop.f32.mrb[17].mxu1 }
 0x103   :  { %v466_v11 = vadd.f32 %v1483_v35, %v465_v9  ;;  %v594_v12 = vadd.f32 %v1483_v35, %v593_v10  ;;  %v1237_v13 = vpop.f32.mrb[18].mxu0  ;;  %v1269_v14 = vpop.f32.mrb[18].mxu1 }
 0x104   :  { %v1131_v15 = vpack.c.bf16 %v474_v7, %v474_v7  ;;  %v1163_v16 = vpack.c.bf16 %v602_v8, %v602_v8  ;;  %v477_v17 = vadd.f32 %v1237_v13, %v1483_v35  ;;  %v605_v18 = vadd.f32 %v1269_v14, %v1483_v35  ;;  %v468_v19 = vpop.f32.mrb[19].mxu0  ;;  %v596_v20 = vpop.f32.mrb[19].mxu1 }
 0x105   :  { %v1129_v21 = vpack.c.bf16 %v466_v11, %v466_v11  ;;  %v1161_v22 = vpack.c.bf16 %v594_v12, %v594_v12  ;;  %v469_v23 = vadd.f32 %v1483_v35, %v468_v19  ;;  %v597_v24 = vadd.f32 %v1483_v35, %v596_v20 }
 0x106   :  { %931 = vst.msk [vmem:[%s1808_s3 + $0x48] sm:$0xf] %vm912_vm1, %v1131_v15  ;;  %963 = vst.msk [vmem:[%s1808_s3 + $0xc8] sm:$0xf] %vm912_vm1, %v1163_v16  ;;  %v1132_v25 = vpack.c.bf16 %v477_v17, %v477_v17  ;;  %v1164_v26 = vpack.c.bf16 %v605_v18, %v605_v18 }
 0x107   :  { %929 = vst.msk [vmem:[%s1808_s3 + $0x40] sm:$0xf] %vm912_vm1, %v1129_v21  ;;  %961 = vst.msk [vmem:[%s1808_s3 + $0xc0] sm:$0xf] %vm912_vm1, %v1161_v22  ;;  %v1130_v27 = vpack.c.bf16 %v469_v23, %v469_v23  ;;  %v1162_v28 = vpack.c.bf16 %v597_v24, %v597_v24 }
 0x108   :  { %932 = vst.msk [vmem:[%s1808_s3 + $0x4c] sm:$0xf] %vm912_vm1, %v1132_v25  ;;  %964 = vst.msk [vmem:[%s1808_s3 + $0xcc] sm:$0xf] %vm912_vm1, %v1164_v26 }
 0x109   :  { %930 = vst.msk [vmem:[%s1808_s3 + $0x44] sm:$0xf] %vm912_vm1, %v1130_v27  ;;  %962 = vst.msk [vmem:[%s1808_s3 + $0xc4] sm:$0xf] %vm912_vm1, %v1162_v28  ;;  %v1240_v29 = vpop.f32.mrb[20].mxu0  ;;  %v1272_v30 = vpop.f32.mrb[20].mxu1 }
 0x10a   :  { %v490_v31 = vadd.f32 %v1240_v29, %v1483_v35  ;;  %v618_v32 = vadd.f32 %v1272_v30, %v1483_v35  ;;  %v481_v33 = vpop.f32.mrb[21].mxu0  ;;  %v609_v34 = vpop.f32.mrb[21].mxu1 }
 0x10b   :  { %v482_v36 = vadd.f32 %v1483_v35, %v481_v33  ;;  %v610_v37 = vadd.f32 %v1483_v35, %v609_v34  ;;  %v1241_v38 = vpop.f32.mrb[22].mxu0  ;;  %v1273_v39 = vpop.f32.mrb[22].mxu1 }
 0x10c   :  { %v1135_v40 = vpack.c.bf16 %v490_v31, %v490_v31  ;;  %v1167_v41 = vpack.c.bf16 %v618_v32, %v618_v32  ;;  %v493_v42 = vadd.f32 %v1241_v38, %v1483_v35  ;;  %v621_v43 = vadd.f32 %v1273_v39, %v1483_v35  ;;  %v484_v44 = vpop.f32.mrb[23].mxu0  ;;  %v612_v45 = vpop.f32.mrb[23].mxu1 }
 0x10d   :  { %v1133_v46 = vpack.c.bf16 %v482_v36, %v482_v36  ;;  %v1165_v47 = vpack.c.bf16 %v610_v37, %v610_v37  ;;  %v485_v48 = vadd.f32 %v1483_v35, %v484_v44  ;;  %v613_v49 = vadd.f32 %v1483_v35, %v612_v45 }
 0x10e   :  { %935 = vst.msk [vmem:[%s1808_s3 + $0x58] sm:$0xf] %vm912_vm1, %v1135_v40  ;;  %967 = vst.msk [vmem:[%s1808_s3 + $0xd8] sm:$0xf] %vm912_vm1, %v1167_v41  ;;  %v1136_v50 = vpack.c.bf16 %v493_v42, %v493_v42  ;;  %v1168_v51 = vpack.c.bf16 %v621_v43, %v621_v43 }
 0x10f   :  { %933 = vst.msk [vmem:[%s1808_s3 + $0x50] sm:$0xf] %vm912_vm1, %v1133_v46  ;;  %965 = vst.msk [vmem:[%s1808_s3 + $0xd0] sm:$0xf] %vm912_vm1, %v1165_v47  ;;  %v1134_v52 = vpack.c.bf16 %v485_v48, %v485_v48  ;;  %v1166_v53 = vpack.c.bf16 %v613_v49, %v613_v49 }
 0x110   :  { %936 = vst.msk [vmem:[%s1808_s3 + $0x5c] sm:$0xf] %vm912_vm1, %v1136_v50  ;;  %968 = vst.msk [vmem:[%s1808_s3 + $0xdc] sm:$0xf] %vm912_vm1, %v1168_v51 }
 0x111   :  { %934 = vst.msk [vmem:[%s1808_s3 + $0x54] sm:$0xf] %vm912_vm1, %v1134_v52  ;;  %966 = vst.msk [vmem:[%s1808_s3 + $0xd4] sm:$0xf] %vm912_vm1, %v1166_v53  ;;  %v1244_v54 = vpop.f32.mrb[24].mxu0  ;;  %v1276_v55 = vpop.f32.mrb[24].mxu1 }
 0x112   :  { %v506_v56 = vadd.f32 %v1244_v54, %v1483_v35  ;;  %v634_v57 = vadd.f32 %v1276_v55, %v1483_v35  ;;  %v497_v58 = vpop.f32.mrb[25].mxu0  ;;  %v625_v59 = vpop.f32.mrb[25].mxu1 }
 0x113   :  { %v498_v60 = vadd.f32 %v1483_v35, %v497_v58  ;;  %v626_v61 = vadd.f32 %v1483_v35, %v625_v59  ;;  %v1245_v62 = vpop.f32.mrb[26].mxu0  ;;  %v1277_v63 = vpop.f32.mrb[26].mxu1 }
 0x114   :  { %v1139_v0 = vpack.c.bf16 %v506_v56, %v506_v56  ;;  %v1171_v1 = vpack.c.bf16 %v634_v57, %v634_v57  ;;  %v509_v2 = vadd.f32 %v1245_v62, %v1483_v35  ;;  %v637_v3 = vadd.f32 %v1277_v63, %v1483_v35  ;;  %v500_v4 = vpop.f32.mrb[27].mxu0  ;;  %v628_v5 = vpop.f32.mrb[27].mxu1 }
 0x115   :  { %v1137_v6 = vpack.c.bf16 %v498_v60, %v498_v60  ;;  %v1169_v7 = vpack.c.bf16 %v626_v61, %v626_v61  ;;  %v501_v8 = vadd.f32 %v1483_v35, %v500_v4  ;;  %v629_v9 = vadd.f32 %v1483_v35, %v628_v5 }
 0x116   :  { %939 = vst.msk [vmem:[%s1808_s3 + $0x68] sm:$0xf] %vm912_vm1, %v1139_v0  ;;  %971 = vst.msk [vmem:[%s1808_s3 + $0xe8] sm:$0xf] %vm912_vm1, %v1171_v1  ;;  %v1140_v10 = vpack.c.bf16 %v509_v2, %v509_v2  ;;  %v1172_v11 = vpack.c.bf16 %v637_v3, %v637_v3 }
 0x117   :  { %937 = vst.msk [vmem:[%s1808_s3 + $0x60] sm:$0xf] %vm912_vm1, %v1137_v6  ;;  %969 = vst.msk [vmem:[%s1808_s3 + $0xe0] sm:$0xf] %vm912_vm1, %v1169_v7  ;;  %v1138_v12 = vpack.c.bf16 %v501_v8, %v501_v8  ;;  %v1170_v13 = vpack.c.bf16 %v629_v9, %v629_v9 }
 0x118   :  { %940 = vst.msk [vmem:[%s1808_s3 + $0x6c] sm:$0xf] %vm912_vm1, %v1140_v10  ;;  %972 = vst.msk [vmem:[%s1808_s3 + $0xec] sm:$0xf] %vm912_vm1, %v1172_v11 }
 0x119   :  { %938 = vst.msk [vmem:[%s1808_s3 + $0x64] sm:$0xf] %vm912_vm1, %v1138_v12  ;;  %970 = vst.msk [vmem:[%s1808_s3 + $0xe4] sm:$0xf] %vm912_vm1, %v1170_v13  ;;  %v1248_v14 = vpop.f32.mrb[28].mxu0  ;;  %v1280_v15 = vpop.f32.mrb[28].mxu1 }
 0x11a   :  { %v522_v16 = vadd.f32 %v1248_v14, %v1483_v35  ;;  %v650_v17 = vadd.f32 %v1280_v15, %v1483_v35  ;;  %v513_v18 = vpop.f32.mrb[29].mxu0  ;;  %v641_v19 = vpop.f32.mrb[29].mxu1 }
 0x11b   :  { %v514_v20 = vadd.f32 %v1483_v35, %v513_v18  ;;  %v642_v21 = vadd.f32 %v1483_v35, %v641_v19  ;;  %v1249_v22 = vpop.f32.mrb[30].mxu0  ;;  %v1281_v23 = vpop.f32.mrb[30].mxu1 }
 0x11c   :  { %v1143_v24 = vpack.c.bf16 %v522_v16, %v522_v16  ;;  %v1175_v25 = vpack.c.bf16 %v650_v17, %v650_v17  ;;  %v525_v26 = vadd.f32 %v1249_v22, %v1483_v35  ;;  %v653_v27 = vadd.f32 %v1281_v23, %v1483_v35  ;;  %v516_v28 = vpop.f32.mrb[31].mxu0  ;;  %v644_v29 = vpop.f32.mrb[31].mxu1 }
 0x11d   :  { %v1141_v30 = vpack.c.bf16 %v514_v20, %v514_v20  ;;  %v1173_v31 = vpack.c.bf16 %v642_v21, %v642_v21  ;;  %v517_v32 = vadd.f32 %v1483_v35, %v516_v28  ;;  %v645_v33 = vadd.f32 %v1483_v35, %v644_v29 }
 0x11e   :  { %943 = vst.msk [vmem:[%s1808_s3 + $0x78] sm:$0xf] %vm912_vm1, %v1143_v24  ;;  %975 = vst.msk [vmem:[%s1808_s3 + $0xf8] sm:$0xf] %vm912_vm1, %v1175_v25  ;;  %v1144_v34 = vpack.c.bf16 %v525_v26, %v525_v26  ;;  %v1176_v36 = vpack.c.bf16 %v653_v27, %v653_v27 }
 0x11f   :  { %941 = vst.msk [vmem:[%s1808_s3 + $0x70] sm:$0xf] %vm912_vm1, %v1141_v30  ;;  %973 = vst.msk [vmem:[%s1808_s3 + $0xf0] sm:$0xf] %vm912_vm1, %v1173_v31  ;;  %v1142_v35 = vpack.c.bf16 %v517_v32, %v517_v32  ;;  %v1174_v37 = vpack.c.bf16 %v645_v33, %v645_v33 }
 0x120   :  { %944 = vst.msk [vmem:[%s1808_s3 + $0x7c] sm:$0xf] %vm912_vm1, %v1144_v34  ;;  %976 = vst.msk [vmem:[%s1808_s3 + $0xfc] sm:$0xf] %vm912_vm1, %v1176_v36 }
 0x121   :  { %942 = vst.msk [vmem:[%s1808_s3 + $0x74] sm:$0xf] %vm912_vm1, %v1142_v35  ;;  %974 = vst.msk [vmem:[%s1808_s3 + $0xf4] sm:$0xf] %vm912_vm1, %v1174_v37 }

// kernel: backbone_base_agent_swin_forward.10
= control target key start
LH: loop header
LB: loop body
LE: loop exit
PB: predicated region body
PF: predicated region fallthrough
CT: control target
= control target key end

     0   :  { %v1093_v1 = vmov 0   ;;  %vm797_vm0 = vcmask 1043456   ;;  %vm798_vm1 = vcmask 523268   ;;  %s1461_s1 = inlined_call_operand.vmem [shape: bf16[384,192], index: 1, kind: input, shape index: {}]   ;;  %s1462_s0 = inlined_call_operand.vmem [shape: bf16[128,384], index: 0, kind: input, shape index: {}]   ;;  %s1463_s2 = inlined_call_operand.vmem [shape: f32[1,192], index: 2, kind: input, shape index: {}]   ;;  %s1464_s3 = inlined_call_operand.vmem [shape: bf16[128,192], index: 3, kind: output, shape index: {}]  }
   0x1   :  { %v989_v0 = vld [vmem:[%s1461_s1 + $0x4] ss:$8 sps:$4 sm:$0xff]   ;;  %620 = vmatprep.mubr.bf16.mxu0 %v1093_v1  ;;  %v991_v2 = vld [vmem:[%s1461_s1] ss:$8 sps:$4 sm:$0xff]   ;;  %v992_v3 = vld [vmem:[%s1461_s1 + $0x14] ss:$8 sps:$4 sm:$0xff]  }
   0x2   :  { %475 = vmatprep.subr.bf16.mxu1 %v989_v0  ;;  %v994_v4 = vld [vmem:[%s1461_s1 + $0x10] ss:$8 sps:$4 sm:$0xff]   ;;  %v995_v5 = vld [vmem:[%s1461_s1 + $0x24] ss:$8 sps:$4 sm:$0xff]   ;;  %v997_v6 = vld [vmem:[%s1461_s1 + $0x20] ss:$8 sps:$4 sm:$0xff]  }
   0x3   :  { %476 = vmatpush1.bf16.msra.mxu1 %v991_v2  ;;  %v998_v7 = vld [vmem:[%s1461_s1 + $0x34] ss:$8 sps:$4 sm:$0xff]   ;;  %v1000_v8 = vld [vmem:[%s1461_s1 + $0x30] ss:$8 sps:$4 sm:$0xff]   ;;  %v1013_v9 = vld [vmem:[%s1461_s1 + $0x104] ss:$8 sps:$4 sm:$0xff]  }
   0x4   :  { %477 = vmatprep.subr.bf16.mxu1 %v992_v3  ;;  %v1001_v10 = vld [vmem:[%s1461_s1 + $0x44] ss:$8 sps:$4 sm:$0xff]   ;;  %v1017_v11 = vld [vmem:[%s1461_s1 + $0x100] ss:$8 sps:$4 sm:$0xff]   ;;  %588 = vmatprep.subr.bf16.mxu0 %v1013_v9  ;;  %v1019_v12 = vld [vmem:[%s1461_s1 + $0x114] ss:$8 sps:$4 sm:$0xff]  }
   0x5   :  { %589 = vmatpush1.bf16.msra.mxu0 %v1017_v11  ;;  %v1003_v13 = vld [vmem:[%s1461_s1 + $0x40] ss:$8 sps:$4 sm:$0xff]   ;;  %v1004_v14 = vld [vmem:[%s1461_s1 + $0x54] ss:$8 sps:$4 sm:$0xff]   ;;  %v1023_v15 = vld [vmem:[%s1461_s1 + $0x110] ss:$8 sps:$4 sm:$0xff]  }
   0x6   :  { %590 = vmatprep.subr.bf16.mxu0 %v1019_v12  ;;  %v1025_v16 = vld [vmem:[%s1461_s1 + $0x124] ss:$8 sps:$4 sm:$0xff]   ;;  %v1006_v17 = vld [vmem:[%s1461_s1 + $0x50] ss:$8 sps:$4 sm:$0xff]   ;;  %v1029_v18 = vld [vmem:[%s1461_s1 + $0x120] ss:$8 sps:$4 sm:$0xff]  }
   0x7   :  { %478 = vmatpush1.bf16.msra.mxu1 %v994_v4  ;;  %v1031_v19 = vld [vmem:[%s1461_s1 + $0x134] ss:$8 sps:$4 sm:$0xff]   ;;  %v1007_v20 = vld [vmem:[%s1461_s1 + $0x64] ss:$8 sps:$4 sm:$0xff]   ;;  %v1035_v21 = vld [vmem:[%s1461_s1 + $0x130] ss:$8 sps:$4 sm:$0xff]  }
   0x8   :  { %479 = vmatprep.subr.bf16.mxu1 %v995_v5  ;;  %v1009_v22 = vld [vmem:[%s1461_s1 + $0x60] ss:$8 sps:$4 sm:$0xff]   ;;  %v1037_v23 = vld [vmem:[%s1461_s1 + $0x144] ss:$8 sps:$4 sm:$0xff]   ;;  %v1010_v24 = vld [vmem:[%s1461_s1 + $0x74] ss:$8 sps:$4 sm:$0xff]  }
   0x9   :  { %591 = vmatpush1.bf16.msra.mxu0 %v1023_v15  ;;  %v1012_v25 = vld [vmem:[%s1461_s1 + $0x70] ss:$8 sps:$4 sm:$0xff]   ;;  %v1041_v26 = vld [vmem:[%s1461_s1 + $0x140] ss:$8 sps:$4 sm:$0xff]   ;;  %v1043_v27 = vld [vmem:[%s1461_s1 + $0x154] ss:$8 sps:$4 sm:$0xff]  }
   0xa   :  { %592 = vmatprep.subr.bf16.mxu0 %v1025_v16  ;;  %v1015_v28 = vld [vmem:[%s1461_s1 + $0x84] ss:$8 sps:$4 sm:$0xff]   ;;  %v1047_v29 = vld [vmem:[%s1461_s1 + $0x150] ss:$8 sps:$4 sm:$0xff]   ;;  %v1018_v30 = vld [vmem:[%s1461_s1 + $0x80] ss:$8 sps:$4 sm:$0xff]  }
   0xb   :  { %480 = vmatpush1.bf16.msra.mxu1 %v997_v6  ;;  %v1049_v31 = vld [vmem:[%s1461_s1 + $0x164] ss:$8 sps:$4 sm:$0xff]   ;;  %v1021_v32 = vld [vmem:[%s1461_s1 + $0x94] ss:$8 sps:$4 sm:$0xff]   ;;  %v1024_v33 = vld [vmem:[%s1461_s1 + $0x90] ss:$8 sps:$4 sm:$0xff]  }
   0xc   :  { %481 = vmatprep.subr.bf16.mxu1 %v998_v7  ;;  %v1063_v34 = vld [vmem:[%s1462_s0 + $0x4] ss:$12 sps:$4 sm:$0xff]   ;;  %v1053_v35 = vld [vmem:[%s1461_s1 + $0x160] ss:$8 sps:$4 sm:$0xff]   ;;  %v1055_v36 = vld [vmem:[%s1461_s1 + $0x174] ss:$8 sps:$4 sm:$0xff]  }
   0xd   :  { %593 = vmatpush1.bf16.msra.mxu0 %v1029_v18  ;;  %v1027_v37 = vld [vmem:[%s1461_s1 + $0xa4] ss:$8 sps:$4 sm:$0xff]   ;;  %507 = vmatprep.mubr.bf16.mxu1 %v1063_v34  ;;  %v1059_v38 = vld [vmem:[%s1461_s1 + $0x170] ss:$8 sps:$4 sm:$0xff]   ;;  %v1030_v39 = vld [vmem:[%s1461_s1 + $0xa0] ss:$8 sps:$4 sm:$0xff]  }
   0xe   :  { %594 = vmatprep.subr.bf16.mxu0 %v1031_v19  ;;  %v1033_v40 = vld [vmem:[%s1461_s1 + $0xb4] ss:$8 sps:$4 sm:$0xff]   ;;  %v1036_v42 = vld [vmem:[%s1461_s1 + $0xb0] ss:$8 sps:$4 sm:$0xff]   ;;  %v1039_v43 = vld [vmem:[%s1461_s1 + $0xc4] ss:$8 sps:$4 sm:$0xff]  }
   0xf   :  { %482 = vmatpush1.bf16.msra.mxu1 %v1000_v8  ;;  %v1064_v41 = vld [vmem:[%s1462_s0 + $0x8] ss:$12 sps:$4 sm:$0xff]   ;;  %v1067_v46 = vld [vmem:[%s1462_s0 + $0x20] ss:$12 sps:$4 sm:$0xff]   ;;  %v1048_v47 = vld [vmem:[%s1461_s1 + $0xd0] ss:$8 sps:$4 sm:$0xff]  }
  0x10   :  { %483 = vmatprep.subr.bf16.mxu1 %v1001_v10  ;;  %v1042_v44 = vld [vmem:[%s1461_s1 + $0xc0] ss:$8 sps:$4 sm:$0xff]   ;;  %v1045_v45 = vld [vmem:[%s1461_s1 + $0xd4] ss:$8 sps:$4 sm:$0xff]   ;;  %v1051_v48 = vld [vmem:[%s1461_s1 + $0xe4] ss:$8 sps:$4 sm:$0xff]  }
  0x11   :  { %595 = vmatpush1.bf16.msra.mxu0 %v1035_v21  ;;  %v1054_v49 = vld [vmem:[%s1461_s1 + $0xe0] ss:$8 sps:$4 sm:$0xff]   ;;  %v1057_v50 = vld [vmem:[%s1461_s1 + $0xf4] ss:$8 sps:$4 sm:$0xff]   ;;  %v1071_v51 = vld [vmem:[%s1462_s0 + $0x38] ss:$12 sps:$4 sm:$0xff]  }
  0x12   :  { %596 = vmatprep.subr.bf16.mxu0 %v1037_v23  ;;  %v1060_v52 = vld [vmem:[%s1461_s1 + $0xf0] ss:$8 sps:$4 sm:$0xff]   ;;  %v1061_v53 = vld [vmem:[%s1462_s0] ss:$12 sps:$4 sm:$0xff]   ;;  %v1065_v54 = vld [vmem:[%s1462_s0 + $0x1c] ss:$12 sps:$4 sm:$0xff]  }
  0x13   :  { %484 = vmatpush1.bf16.msra.mxu1 %v1003_v13  ;;  %v1075_v55 = vld [vmem:[%s1462_s0 + $0x50] ss:$12 sps:$4 sm:$0xff]   ;;  %v1068_v56 = vld [vmem:[%s1462_s0 + $0x18] ss:$12 sps:$4 sm:$0xff]   ;;  %v1069_v57 = vld [vmem:[%s1462_s0 + $0x34] ss:$12 sps:$4 sm:$0xff]   ;;  %v97_v13 = vlaneseq }
  0x14   :  { %485 = vmatprep.subr.bf16.mxu1 %v1004_v14  ;;  %v1079_v58 = vld [vmem:[%s1462_s0 + $0x68] ss:$12 sps:$4 sm:$0xff]   ;;  %v1072_v59 = vld [vmem:[%s1462_s0 + $0x30] ss:$12 sps:$4 sm:$0xff]   ;;  %v1073_v60 = vld [vmem:[%s1462_s0 + $0x4c] ss:$12 sps:$4 sm:$0xff]  }
  0x15   :  { %597 = vmatpush1.bf16.msra.mxu0 %v1041_v26  ;;  %v1083_v61 = vld [vmem:[%s1462_s0 + $0x80] ss:$12 sps:$4 sm:$0xff]   ;;  %v1076_v62 = vld [vmem:[%s1462_s0 + $0x48] ss:$12 sps:$4 sm:$0xff]   ;;  %v1077_v63 = vld [vmem:[%s1462_s0 + $0x64] ss:$12 sps:$4 sm:$0xff]  }
  0x16   :  { %598 = vmatprep.subr.bf16.mxu0 %v1043_v27  ;;  %v1087_v0 = vld [vmem:[%s1462_s0 + $0x98] ss:$12 sps:$4 sm:$0xff]   ;;  %v1080_v2 = vld [vmem:[%s1462_s0 + $0x60] ss:$12 sps:$4 sm:$0xff]   ;;  %v1081_v3 = vld [vmem:[%s1462_s0 + $0x7c] ss:$12 sps:$4 sm:$0xff]  }
  0x17   :  { %486 = vmatpush1.bf16.msra.mxu1 %v1006_v17  ;;  %v1091_v4 = vld [vmem:[%s1462_s0 + $0xb0] ss:$12 sps:$4 sm:$0xff]   ;;  %v1084_v5 = vld [vmem:[%s1462_s0 + $0x78] ss:$12 sps:$4 sm:$0xff]   ;;  %v1085_v6 = vld [vmem:[%s1462_s0 + $0x94] ss:$12 sps:$4 sm:$0xff]  }
  0x18   :  { %487 = vmatprep.subr.bf16.mxu1 %v1007_v20  ;;  %v1089_v7 = vld [vmem:[%s1462_s0 + $0xac] ss:$12 sps:$4 sm:$0xff]   ;;  %v1092_v8 = vld [vmem:[%s1462_s0 + $0xa8] ss:$12 sps:$4 sm:$0xff]   ;;  %v98_v16 = vshrl.u32 %v97_v13, 7  ;;  %vm1349_vm2 = vmor %vm798_vm1, %vm797_vm0 }
  0x19   :  { %599 = vmatpush1.bf16.msra.mxu0 %v1047_v29  ;;  %v95_v20 = vld [vmem:[%s1463_s2] sm:$0x3] }
  0x1a   :  { %600 = vmatprep.subr.bf16.mxu0 %v1049_v31  ;;  %v99_v19 = vsub.s32 0, %v98_v16  ;;  %v103_v21 = vsub.s32 1, %v98_v16 }
  0x1b   :  { %488 = vmatpush1.bf16.msra.mxu1 %v1009_v22 }
  0x1c   :  { %489 = vmatprep.subr.bf16.mxu1 %v1010_v24  ;;  %v1341_v24 = vrot.slane %v95_v20, %v99_v19  ;;  %v1343_v26 = vrot.slane %v95_v20, %v103_v21 }
  0x1d   :  { %601 = vmatpush1.bf16.msra.mxu0 %v1053_v35 }
  0x1e   :  { %602 = vmatprep.subr.bf16.mxu0 %v1055_v36 }
  0x1f   :  { %490 = vmatpush1.bf16.msra.mxu1 %v1012_v25 }
  0x20   :  { %491 = vmatprep.subr.bf16.mxu1 %v1015_v28 }
  0x21   :  { %603 = vmatpush1.bf16.msra.mxu0 %v1059_v38 }
  0x23   :  { %492 = vmatpush1.bf16.msra.mxu1 %v1018_v30 }
  0x24   :  { %493 = vmatprep.subr.bf16.mxu1 %v1021_v32  ;;  %621 = vmatmul.mubr.bf16.vlgmr.msra.gmra.mrb[0].mxu0 %v1064_v41 }
  0x25   :  { %630 = vmatprep.mubr.bf16.mxu0 %v1093_v1 }
  0x27   :  { %494 = vmatpush1.bf16.msra.mxu1 %v1024_v33 }
  0x28   :  { %495 = vmatprep.subr.bf16.mxu1 %v1027_v37 }
  0x2b   :  { %496 = vmatpush1.bf16.msra.mxu1 %v1030_v39 }
  0x2c   :  { %497 = vmatprep.subr.bf16.mxu1 %v1033_v40  ;;  %631 = vmatmul.mubr.bf16.gmra.mrb[4].mxu0 %v1067_v46 }
  0x2d   :  { %640 = vmatprep.mubr.bf16.mxu0 %v1093_v1 }
  0x2f   :  { %498 = vmatpush1.bf16.msra.mxu1 %v1036_v42 }
  0x30   :  { %499 = vmatprep.subr.bf16.mxu1 %v1039_v43 }
  0x33   :  { %500 = vmatpush1.bf16.msra.mxu1 %v1042_v44 }
  0x34   :  { %501 = vmatprep.subr.bf16.mxu1 %v1045_v45  ;;  %641 = vmatmul.mubr.bf16.gmra.mrb[8].mxu0 %v1071_v51 }
  0x35   :  { %650 = vmatprep.mubr.bf16.mxu0 %v1093_v1 }
  0x37   :  { %502 = vmatpush1.bf16.msra.mxu1 %v1048_v47 }
  0x38   :  { %503 = vmatprep.subr.bf16.mxu1 %v1051_v48 }
  0x3b   :  { %504 = vmatpush1.bf16.msra.mxu1 %v1054_v49 }
  0x3c   :  { %505 = vmatprep.subr.bf16.mxu1 %v1057_v50  ;;  %651 = vmatmul.mubr.bf16.gmra.mrb[12].mxu0 %v1075_v55 }
  0x3d   :  { %660 = vmatprep.mubr.bf16.mxu0 %v1093_v1 }
  0x3f   :  { %506 = vmatpush1.bf16.msra.mxu1 %v1060_v52 }
  0x42   :  { %508 = vmatmul.mubr.bf16.vlgmr.msra.gmra.mrb[0].mxu1 %v1061_v53 }
  0x43   :  { %517 = vmatprep.mubr.bf16.mxu1 %v1065_v54 }
  0x44   :  { %661 = vmatmul.mubr.bf16.gmra.mrb[16].mxu0 %v1079_v58 }
  0x45   :  { %670 = vmatprep.mubr.bf16.mxu0 %v1093_v1 }
  0x4a   :  { %518 = vmatmul.mubr.bf16.gmra.mrb[4].mxu1 %v1068_v56 }
  0x4b   :  { %527 = vmatprep.mubr.bf16.mxu1 %v1069_v57 }
  0x4c   :  { %671 = vmatmul.mubr.bf16.gmra.mrb[20].mxu0 %v1083_v61 }
  0x4d   :  { %680 = vmatprep.mubr.bf16.mxu0 %v1093_v1 }
  0x52   :  { %528 = vmatmul.mubr.bf16.gmra.mrb[8].mxu1 %v1072_v59 }
  0x53   :  { %537 = vmatprep.mubr.bf16.mxu1 %v1073_v60 }
  0x54   :  { %681 = vmatmul.mubr.bf16.gmra.mrb[24].mxu0 %v1087_v0 }
  0x55   :  { %690 = vmatprep.mubr.bf16.mxu0 %v1093_v1  ;;  %v1088_v1 = vld [vmem:[%s1462_s0 + $0x90] ss:$12 sps:$4 sm:$0xff]  }
  0x5a   :  { %538 = vmatmul.mubr.bf16.gmra.mrb[12].mxu1 %v1076_v62 }
  0x5b   :  { %547 = vmatprep.mubr.bf16.mxu1 %v1077_v63 }
  0x5c   :  { %691 = vmatmul.mubr.bf16.gmra.mrb[28].mxu0 %v1091_v4 }
  0x62   :  { %548 = vmatmul.mubr.bf16.gmra.mrb[16].mxu1 %v1080_v2 }
  0x63   :  { %557 = vmatprep.mubr.bf16.mxu1 %v1081_v3 }
  0x6a   :  { %558 = vmatmul.mubr.bf16.gmra.mrb[20].mxu1 %v1084_v5 }
  0x6b   :  { %567 = vmatprep.mubr.bf16.mxu1 %v1085_v6 }
  0x72   :  { %568 = vmatmul.mubr.bf16.gmra.mrb[24].mxu1 %v1088_v1 }
  0x73   :  { %577 = vmatprep.mubr.bf16.mxu1 %v1089_v7 }
  0x7a   :  { %578 = vmatmul.mubr.bf16.gmra.mrb[28].mxu1 %v1092_v8 }
  0xf7   :  { %v622_v9 = vpop.f32.mrb[0].mxu0 }
  0xf8   :  { %v624_v10 = vpop.f32.mrb[1].mxu0 }
  0xf9   :  { %v626_v11 = vpop.f32.mrb[2].mxu0 }
  0xfa   :  { %v628_v12 = vpop.f32.mrb[3].mxu0 }
  0xff   :  { %v632_v14 = vpop.f32.mrb[4].mxu0 }
 0x100   :  { %v634_v15 = vpop.f32.mrb[5].mxu0 }
 0x101   :  { %v636_v17 = vpop.f32.mrb[6].mxu0 }
 0x102   :  { %v638_v18 = vpop.f32.mrb[7].mxu0 }
 0x107   :  { %v642_v22 = vpop.f32.mrb[8].mxu0 }
 0x108   :  { %v644_v23 = vpop.f32.mrb[9].mxu0 }
 0x109   :  { %v646_v25 = vpop.f32.mrb[10].mxu0 }
 0x10a   :  { %v648_v27 = vpop.f32.mrb[11].mxu0 }
 0x10f   :  { %v652_v36 = vpop.f32.mrb[12].mxu0 }
 0x110   :  { %v654_v39 = vpop.f32.mrb[13].mxu0 }
 0x111   :  { %v656_v42 = vpop.f32.mrb[14].mxu0 }
 0x112   :  { %v658_v45 = vpop.f32.mrb[15].mxu0 }
 0x115   :  { %v509_v28 = vpop.f32.mrb[0].mxu1 }
 0x116   :  { %v510_v29 = vadd.f32 %v509_v28, %v1341_v24  ;;  %v511_v30 = vpop.f32.mrb[1].mxu1 }
 0x117   :  { %v512_v31 = vadd.f32 %v511_v30, %v1343_v26  ;;  %v513_v32 = vpop.f32.mrb[2].mxu1  ;;  %v662_v55 = vpop.f32.mrb[16].mxu0 }
 0x118   :  { %v623_v33 = vadd.f32 %v622_v9, %v510_v29  ;;  %v514_v34 = vadd.f32 %v513_v32, %v1341_v24  ;;  %v515_v35 = vpop.f32.mrb[3].mxu1  ;;  %v664_v58 = vpop.f32.mrb[17].mxu0 }
 0x119   :  { %v625_v37 = vadd.f32 %v624_v10, %v512_v31  ;;  %v516_v38 = vadd.f32 %v515_v35, %v1343_v26  ;;  %v666_v60 = vpop.f32.mrb[18].mxu0 }
 0x11a   :  { %v627_v41 = vadd.f32 %v626_v11, %v514_v34  ;;  %v668_v63 = vpop.f32.mrb[19].mxu0 }
 0x11b   :  { %v908_v43 = vpack.c.bf16 %v625_v37, %v623_v33  ;;  %v629_v44 = vadd.f32 %v628_v12, %v516_v38 }
 0x11d   :  { %800 = vst.msk [vmem:[%s1464_s3] sm:$0xff] %vm1349_vm2, %v908_v43  ;;  %v909_v46 = vpack.c.bf16 %v629_v44, %v627_v41  ;;  %v519_v47 = vpop.f32.mrb[4].mxu1 }
 0x11e   :  { %v520_v48 = vadd.f32 %v519_v47, %v1341_v24  ;;  %v521_v49 = vpop.f32.mrb[5].mxu1 }
 0x11f   :  { %801 = vst.msk [vmem:[%s1464_s3 + $0x8] sm:$0xff] %vm1349_vm2, %v909_v46  ;;  %v522_v50 = vadd.f32 %v521_v49, %v1343_v26  ;;  %v523_v51 = vpop.f32.mrb[6].mxu1  ;;  %v672_v9 = vpop.f32.mrb[20].mxu0 }
 0x120   :  { %v633_v52 = vadd.f32 %v632_v14, %v520_v48  ;;  %v524_v53 = vadd.f32 %v523_v51, %v1341_v24  ;;  %v525_v54 = vpop.f32.mrb[7].mxu1  ;;  %v674_v12 = vpop.f32.mrb[21].mxu0 }
 0x121   :  { %v635_v56 = vadd.f32 %v634_v15, %v522_v50  ;;  %v526_v57 = vadd.f32 %v525_v54, %v1343_v26  ;;  %v676_v14 = vpop.f32.mrb[22].mxu0 }
 0x122   :  { %v637_v59 = vadd.f32 %v636_v17, %v524_v53  ;;  %v678_v17 = vpop.f32.mrb[23].mxu0 }
 0x123   :  { %v910_v61 = vpack.c.bf16 %v635_v56, %v633_v52  ;;  %v639_v62 = vadd.f32 %v638_v18, %v526_v57 }
 0x125   :  { %802 = vst.msk [vmem:[%s1464_s3 + $0x10] sm:$0xff] %vm1349_vm2, %v910_v61  ;;  %v911_v0 = vpack.c.bf16 %v639_v62, %v637_v59  ;;  %v529_v2 = vpop.f32.mrb[8].mxu1 }
 0x126   :  { %v530_v3 = vadd.f32 %v529_v2, %v1341_v24  ;;  %v531_v4 = vpop.f32.mrb[9].mxu1 }
 0x127   :  { %803 = vst.msk [vmem:[%s1464_s3 + $0x18] sm:$0xff] %vm1349_vm2, %v911_v0  ;;  %v532_v5 = vadd.f32 %v531_v4, %v1343_v26  ;;  %v533_v6 = vpop.f32.mrb[10].mxu1  ;;  %v682_v29 = vpop.f32.mrb[24].mxu0 }
 0x128   :  { %v643_v1 = vadd.f32 %v642_v22, %v530_v3  ;;  %v534_v7 = vadd.f32 %v533_v6, %v1341_v24  ;;  %v535_v8 = vpop.f32.mrb[11].mxu1  ;;  %v684_v32 = vpop.f32.mrb[25].mxu0 }
 0x129   :  { %v645_v10 = vadd.f32 %v644_v23, %v532_v5  ;;  %v536_v11 = vadd.f32 %v535_v8, %v1343_v26  ;;  %v686_v34 = vpop.f32.mrb[26].mxu0 }
 0x12a   :  { %v647_v13 = vadd.f32 %v646_v25, %v534_v7  ;;  %v688_v38 = vpop.f32.mrb[27].mxu0 }
 0x12b   :  { %v912_v15 = vpack.c.bf16 %v645_v10, %v643_v1  ;;  %v649_v16 = vadd.f32 %v648_v27, %v536_v11 }
 0x12d   :  { %804 = vst.msk [vmem:[%s1464_s3 + $0x20] sm:$0xff] %vm1349_vm2, %v912_v15  ;;  %v913_v18 = vpack.c.bf16 %v649_v16, %v647_v13  ;;  %v539_v19 = vpop.f32.mrb[12].mxu1 }
 0x12e   :  { %v540_v20 = vadd.f32 %v539_v19, %v1341_v24  ;;  %v541_v21 = vpop.f32.mrb[13].mxu1 }
 0x12f   :  { %805 = vst.msk [vmem:[%s1464_s3 + $0x28] sm:$0xff] %vm1349_vm2, %v913_v18  ;;  %v542_v22 = vadd.f32 %v541_v21, %v1343_v26  ;;  %v543_v23 = vpop.f32.mrb[14].mxu1  ;;  %v692_v48 = vpop.f32.mrb[28].mxu0 }
 0x130   :  { %v653_v25 = vadd.f32 %v652_v36, %v540_v20  ;;  %v544_v27 = vadd.f32 %v543_v23, %v1341_v24  ;;  %v545_v28 = vpop.f32.mrb[15].mxu1  ;;  %v694_v51 = vpop.f32.mrb[29].mxu0 }
 0x131   :  { %v655_v30 = vadd.f32 %v654_v39, %v542_v22  ;;  %v546_v31 = vadd.f32 %v545_v28, %v1343_v26  ;;  %v696_v53 = vpop.f32.mrb[30].mxu0 }
 0x132   :  { %v657_v33 = vadd.f32 %v656_v42, %v544_v27  ;;  %v698_v57 = vpop.f32.mrb[31].mxu0 }
 0x133   :  { %v914_v35 = vpack.c.bf16 %v655_v30, %v653_v25  ;;  %v659_v37 = vadd.f32 %v658_v45, %v546_v31 }
 0x135   :  { %806 = vst.msk [vmem:[%s1464_s3 + $0x30] sm:$0xff] %vm1349_vm2, %v914_v35  ;;  %v915_v36 = vpack.c.bf16 %v659_v37, %v657_v33  ;;  %v549_v41 = vpop.f32.mrb[16].mxu1 }
 0x136   :  { %v550_v43 = vadd.f32 %v549_v41, %v1341_v24  ;;  %v551_v44 = vpop.f32.mrb[17].mxu1 }
 0x137   :  { %807 = vst.msk [vmem:[%s1464_s3 + $0x38] sm:$0xff] %vm1349_vm2, %v915_v36  ;;  %v552_v39 = vadd.f32 %v551_v44, %v1343_v26  ;;  %v553_v42 = vpop.f32.mrb[18].mxu1 }
 0x138   :  { %v663_v45 = vadd.f32 %v662_v55, %v550_v43  ;;  %v554_v46 = vadd.f32 %v553_v42, %v1341_v24  ;;  %v555_v47 = vpop.f32.mrb[19].mxu1 }
 0x139   :  { %v665_v49 = vadd.f32 %v664_v58, %v552_v39  ;;  %v556_v50 = vadd.f32 %v555_v47, %v1343_v26 }
 0x13a   :  { %v667_v52 = vadd.f32 %v666_v60, %v554_v46 }
 0x13b   :  { %v916_v54 = vpack.c.bf16 %v665_v49, %v663_v45  ;;  %v669_v56 = vadd.f32 %v668_v63, %v556_v50 }
 0x13d   :  { %808 = vst.msk [vmem:[%s1464_s3 + $0x40] sm:$0xff] %vm1349_vm2, %v916_v54  ;;  %v917_v55 = vpack.c.bf16 %v669_v56, %v667_v52  ;;  %v559_v59 = vpop.f32.mrb[20].mxu1 }
 0x13e   :  { %v560_v61 = vadd.f32 %v559_v59, %v1341_v24  ;;  %v561_v62 = vpop.f32.mrb[21].mxu1 }
 0x13f   :  { %809 = vst.msk [vmem:[%s1464_s3 + $0x48] sm:$0xff] %vm1349_vm2, %v917_v55  ;;  %v562_v58 = vadd.f32 %v561_v62, %v1343_v26  ;;  %v563_v60 = vpop.f32.mrb[22].mxu1 }
 0x140   :  { %v673_v63 = vadd.f32 %v672_v9, %v560_v61  ;;  %v564_v0 = vadd.f32 %v563_v60, %v1341_v24  ;;  %v565_v2 = vpop.f32.mrb[23].mxu1 }
 0x141   :  { %v675_v3 = vadd.f32 %v674_v12, %v562_v58  ;;  %v566_v4 = vadd.f32 %v565_v2, %v1343_v26 }
 0x142   :  { %v677_v5 = vadd.f32 %v676_v14, %v564_v0 }
 0x143   :  { %v918_v6 = vpack.c.bf16 %v675_v3, %v673_v63  ;;  %v679_v1 = vadd.f32 %v678_v17, %v566_v4 }
 0x145   :  { %810 = vst.msk [vmem:[%s1464_s3 + $0x50] sm:$0xff] %vm1349_vm2, %v918_v6  ;;  %v919_v7 = vpack.c.bf16 %v679_v1, %v677_v5  ;;  %v569_v8 = vpop.f32.mrb[24].mxu1 }
 0x146   :  { %v570_v10 = vadd.f32 %v569_v8, %v1341_v24  ;;  %v571_v9 = vpop.f32.mrb[25].mxu1 }
 0x147   :  { %811 = vst.msk [vmem:[%s1464_s3 + $0x58] sm:$0xff] %vm1349_vm2, %v919_v7  ;;  %v572_v11 = vadd.f32 %v571_v9, %v1343_v26  ;;  %v573_v12 = vpop.f32.mrb[26].mxu1 }
 0x148   :  { %v683_v13 = vadd.f32 %v682_v29, %v570_v10  ;;  %v574_v14 = vadd.f32 %v573_v12, %v1341_v24  ;;  %v575_v15 = vpop.f32.mrb[27].mxu1 }
 0x149   :  { %v685_v16 = vadd.f32 %v684_v32, %v572_v11  ;;  %v576_v17 = vadd.f32 %v575_v15, %v1343_v26 }
 0x14a   :  { %v687_v18 = vadd.f32 %v686_v34, %v574_v14 }
 0x14b   :  { %v920_v19 = vpack.c.bf16 %v685_v16, %v683_v13  ;;  %v689_v20 = vadd.f32 %v688_v38, %v576_v17 }
 0x14d   :  { %812 = vst.msk [vmem:[%s1464_s3 + $0x60] sm:$0xff] %vm1349_vm2, %v920_v19  ;;  %v921_v21 = vpack.c.bf16 %v689_v20, %v687_v18  ;;  %v579_v22 = vpop.f32.mrb[28].mxu1 }
 0x14e   :  { %v580_v23 = vadd.f32 %v579_v22, %v1341_v24  ;;  %v581_v25 = vpop.f32.mrb[29].mxu1 }
 0x14f   :  { %813 = vst.msk [vmem:[%s1464_s3 + $0x68] sm:$0xff] %vm1349_vm2, %v921_v21  ;;  %v582_v27 = vadd.f32 %v581_v25, %v1343_v26  ;;  %v583_v28 = vpop.f32.mrb[30].mxu1 }
 0x150   :  { %v693_v29 = vadd.f32 %v692_v48, %v580_v23  ;;  %v584_v30 = vadd.f32 %v583_v28, %v1341_v24  ;;  %v585_v31 = vpop.f32.mrb[31].mxu1 }
 0x151   :  { %v695_v32 = vadd.f32 %v694_v51, %v582_v27  ;;  %v586_v33 = vadd.f32 %v585_v31, %v1343_v26 }
 0x152   :  { %v697_v34 = vadd.f32 %v696_v53, %v584_v30 }
 0x153   :  { %v922_v35 = vpack.c.bf16 %v695_v32, %v693_v29  ;;  %v699_v37 = vadd.f32 %v698_v57, %v586_v33 }
 0x155   :  { %814 = vst.msk [vmem:[%s1464_s3 + $0x70] sm:$0xff] %vm1349_vm2, %v922_v35  ;;  %v923_v38 = vpack.c.bf16 %v699_v37, %v697_v34 }
 0x157   :  { %815 = vst.msk [vmem:[%s1464_s3 + $0x78] sm:$0xff] %vm1349_vm2, %v923_v38 }

// kernel: backbone_base_agent_swin_forward.11
= control target key start
LH: loop header
LB: loop body
LE: loop exit
PB: predicated region body
PF: predicated region fallthrough
CT: control target
= control target key end

     0   :  { %s2479_s1 = inlined_call_operand.vmem [shape: bf16[768,384], index: 1, kind: input, shape index: {}]   ;;  %s2480_s0 = inlined_call_operand.vmem [shape: bf16[32,768], index: 0, kind: input, shape index: {}]   ;;  %s2481_s2 = inlined_call_operand.vmem [shape: f32[1,384], index: 2, kind: input, shape index: {}]   ;;  %s2482_s3 = inlined_call_operand.vmem [shape: bf16[32,384], index: 3, kind: output, shape index: {}]  }
   0x1   :  { %v1718_v0 = vld [vmem:[%s2479_s1 + $0x4] ss:$12 sps:$4 sm:$0xff]   ;;  %v1722_v2 = vld [vmem:[%s2479_s1] ss:$12 sps:$4 sm:$0xff]   ;;  %v1724_v4 = vld [vmem:[%s2479_s1 + $0x1c] ss:$12 sps:$4 sm:$0xff]  }
   0x2   :  { %v1720_v1 = vld [vmem:[%s2479_s1 + $0x184] ss:$12 sps:$4 sm:$0xff]   ;;  %1064 = vmatprep.subr.bf16.mxu1 %v1718_v0  ;;  %v1723_v3 = vld [vmem:[%s2479_s1 + $0x180] ss:$12 sps:$4 sm:$0xff]   ;;  %v1726_v5 = vld [vmem:[%s2479_s1 + $0x19c] ss:$12 sps:$4 sm:$0xff]  }
   0x3   :  { %1117 = vmatprep.subr.bf16.mxu0 %v1720_v1  ;;  %1065 = vmatpush1.bf16.msra.mxu1 %v1722_v2  ;;  %v1728_v6 = vld [vmem:[%s2479_s1 + $0x18] ss:$12 sps:$4 sm:$0xff]   ;;  %v1730_v8 = vld [vmem:[%s2479_s1 + $0x34] ss:$12 sps:$4 sm:$0xff]   ;;  %v1734_v10 = vld [vmem:[%s2479_s1 + $0x30] ss:$12 sps:$4 sm:$0xff]  }
   0x4   :  { %1118 = vmatpush1.bf16.msra.mxu0 %v1723_v3  ;;  %1066 = vmatprep.subr.bf16.mxu1 %v1724_v4  ;;  %v1729_v7 = vld [vmem:[%s2479_s1 + $0x198] ss:$12 sps:$4 sm:$0xff]   ;;  %v1732_v9 = vld [vmem:[%s2479_s1 + $0x1b4] ss:$12 sps:$4 sm:$0xff]   ;;  %v1735_v11 = vld [vmem:[%s2479_s1 + $0x1b0] ss:$12 sps:$4 sm:$0xff]  }
   0x5   :  { %1119 = vmatprep.subr.bf16.mxu0 %v1726_v5  ;;  %v1736_v12 = vld [vmem:[%s2479_s1 + $0x4c] ss:$12 sps:$4 sm:$0xff]   ;;  %v1740_v14 = vld [vmem:[%s2479_s1 + $0x48] ss:$12 sps:$4 sm:$0xff]   ;;  %v1742_v16 = vld [vmem:[%s2479_s1 + $0x64] ss:$12 sps:$4 sm:$0xff]  }
   0x6   :  { %v1738_v13 = vld [vmem:[%s2479_s1 + $0x1cc] ss:$12 sps:$4 sm:$0xff]   ;;  %v1741_v15 = vld [vmem:[%s2479_s1 + $0x1c8] ss:$12 sps:$4 sm:$0xff]   ;;  %v1744_v17 = vld [vmem:[%s2479_s1 + $0x1e4] ss:$12 sps:$4 sm:$0xff]  }
   0x7   :  { %1067 = vmatpush1.bf16.msra.mxu1 %v1728_v6  ;;  %v1746_v18 = vld [vmem:[%s2479_s1 + $0x60] ss:$12 sps:$4 sm:$0xff]   ;;  %v1748_v20 = vld [vmem:[%s2479_s1 + $0x7c] ss:$12 sps:$4 sm:$0xff]   ;;  %v1752_v22 = vld [vmem:[%s2479_s1 + $0x78] ss:$12 sps:$4 sm:$0xff]  }
   0x8   :  { %1120 = vmatpush1.bf16.msra.mxu0 %v1729_v7  ;;  %1068 = vmatprep.subr.bf16.mxu1 %v1730_v8  ;;  %v1747_v19 = vld [vmem:[%s2479_s1 + $0x1e0] ss:$12 sps:$4 sm:$0xff]   ;;  %v1750_v21 = vld [vmem:[%s2479_s1 + $0x1fc] ss:$12 sps:$4 sm:$0xff]   ;;  %v1753_v23 = vld [vmem:[%s2479_s1 + $0x1f8] ss:$12 sps:$4 sm:$0xff]  }
   0x9   :  { %1121 = vmatprep.subr.bf16.mxu0 %v1732_v9  ;;  %v1754_v24 = vld [vmem:[%s2479_s1 + $0x94] ss:$12 sps:$4 sm:$0xff]   ;;  %v1758_v26 = vld [vmem:[%s2479_s1 + $0x90] ss:$12 sps:$4 sm:$0xff]   ;;  %v1760_v28 = vld [vmem:[%s2479_s1 + $0xac] ss:$12 sps:$4 sm:$0xff]  }
   0xa   :  { %v1756_v25 = vld [vmem:[%s2479_s1 + $0x214] ss:$12 sps:$4 sm:$0xff]   ;;  %v1759_v27 = vld [vmem:[%s2479_s1 + $0x210] ss:$12 sps:$4 sm:$0xff]   ;;  %v1762_v29 = vld [vmem:[%s2479_s1 + $0x22c] ss:$12 sps:$4 sm:$0xff]  }
   0xb   :  { %1069 = vmatpush1.bf16.msra.mxu1 %v1734_v10  ;;  %v1764_v30 = vld [vmem:[%s2479_s1 + $0xa8] ss:$12 sps:$4 sm:$0xff]   ;;  %v1766_v32 = vld [vmem:[%s2479_s1 + $0xc4] ss:$12 sps:$4 sm:$0xff]   ;;  %v1770_v34 = vld [vmem:[%s2479_s1 + $0xc0] ss:$12 sps:$4 sm:$0xff]  }
   0xc   :  { %1122 = vmatpush1.bf16.msra.mxu0 %v1735_v11  ;;  %1070 = vmatprep.subr.bf16.mxu1 %v1736_v12  ;;  %v1765_v31 = vld [vmem:[%s2479_s1 + $0x228] ss:$12 sps:$4 sm:$0xff]   ;;  %v1768_v33 = vld [vmem:[%s2479_s1 + $0x244] ss:$12 sps:$4 sm:$0xff]   ;;  %v1771_v35 = vld [vmem:[%s2479_s1 + $0x240] ss:$12 sps:$4 sm:$0xff]  }
   0xd   :  { %1123 = vmatprep.subr.bf16.mxu0 %v1738_v13  ;;  %v1772_v36 = vld [vmem:[%s2479_s1 + $0xdc] ss:$12 sps:$4 sm:$0xff]   ;;  %v1776_v38 = vld [vmem:[%s2479_s1 + $0xd8] ss:$12 sps:$4 sm:$0xff]   ;;  %v1778_v40 = vld [vmem:[%s2479_s1 + $0xf4] ss:$12 sps:$4 sm:$0xff]  }
   0xe   :  { %v1774_v37 = vld [vmem:[%s2479_s1 + $0x25c] ss:$12 sps:$4 sm:$0xff]   ;;  %v1777_v39 = vld [vmem:[%s2479_s1 + $0x258] ss:$12 sps:$4 sm:$0xff]   ;;  %v1780_v41 = vld [vmem:[%s2479_s1 + $0x274] ss:$12 sps:$4 sm:$0xff]  }
   0xf   :  { %1071 = vmatpush1.bf16.msra.mxu1 %v1740_v14  ;;  %v1782_v42 = vld [vmem:[%s2479_s1 + $0xf0] ss:$12 sps:$4 sm:$0xff]   ;;  %v1784_v44 = vld [vmem:[%s2479_s1 + $0x10c] ss:$12 sps:$4 sm:$0xff]   ;;  %v1788_v46 = vld [vmem:[%s2479_s1 + $0x108] ss:$12 sps:$4 sm:$0xff]  }
  0x10   :  { %1124 = vmatpush1.bf16.msra.mxu0 %v1741_v15  ;;  %1072 = vmatprep.subr.bf16.mxu1 %v1742_v16  ;;  %v1783_v43 = vld [vmem:[%s2479_s1 + $0x270] ss:$12 sps:$4 sm:$0xff]   ;;  %v1786_v45 = vld [vmem:[%s2479_s1 + $0x28c] ss:$12 sps:$4 sm:$0xff]   ;;  %v1789_v47 = vld [vmem:[%s2479_s1 + $0x288] ss:$12 sps:$4 sm:$0xff]  }
  0x11   :  { %1125 = vmatprep.subr.bf16.mxu0 %v1744_v17  ;;  %v1790_v48 = vld [vmem:[%s2479_s1 + $0x124] ss:$12 sps:$4 sm:$0xff]   ;;  %v1794_v52 = vld [vmem:[%s2479_s1 + $0x120] ss:$12 sps:$4 sm:$0xff]   ;;  %v1796_v54 = vld [vmem:[%s2479_s1 + $0x13c] ss:$12 sps:$4 sm:$0xff]  }
  0x12   :  { %v2098_v49 = vld [vmem:[%s2480_s0 + $0x4] ss:$24 sps:$4 sm:$0xff]   ;;  %v1795_v53 = vld [vmem:[%s2479_s1 + $0x2a0] ss:$12 sps:$4 sm:$0xff]   ;;  %v1812_v0 = vld [vmem:[%s2479_s1 + $0x168] ss:$12 sps:$4 sm:$0xff]  }
  0x13   :  { %1073 = vmatpush1.bf16.msra.mxu1 %v1746_v18  ;;  %v1792_v50 = vld [vmem:[%s2479_s1 + $0x2a4] ss:$12 sps:$4 sm:$0xff]   ;;  %1096 = vmatprep.mubr.bf16.mxu1 %v2098_v49  ;;  %v1798_v55 = vld [vmem:[%s2479_s1 + $0x2bc] ss:$12 sps:$4 sm:$0xff]   ;;  %v1802_v58 = vld [vmem:[%s2479_s1 + $0x154] ss:$12 sps:$4 sm:$0xff]  }
  0x14   :  { %1126 = vmatpush1.bf16.msra.mxu0 %v1747_v19  ;;  %1074 = vmatprep.subr.bf16.mxu1 %v1748_v20  ;;  %v2106_v51 = vld [vmem:[%s2480_s0 + $0xc] ss:$24 sps:$4 sm:$0xff]   ;;  %v1804_v59 = vld [vmem:[%s2479_s1 + $0x2d4] ss:$12 sps:$4 sm:$0xff]   ;;  %v1806_v60 = vld [vmem:[%s2479_s1 + $0x150] ss:$12 sps:$4 sm:$0xff]  }
  0x15   :  { %1127 = vmatprep.subr.bf16.mxu0 %v1750_v21  ;;  %1149 = vmatprep.mubr.bf16.mxu0 %v2106_v51  ;;  %v1800_v56 = vld [vmem:[%s2479_s1 + $0x138] ss:$12 sps:$4 sm:$0xff]   ;;  %v1807_v61 = vld [vmem:[%s2479_s1 + $0x2d0] ss:$12 sps:$4 sm:$0xff]   ;;  %v1813_v1 = vld [vmem:[%s2479_s1 + $0x2e8] ss:$12 sps:$4 sm:$0xff]  }
  0x16   :  { %v1801_v57 = vld [vmem:[%s2479_s1 + $0x2b8] ss:$12 sps:$4 sm:$0xff]   ;;  %v2163_v4 = vld [vmem:[%s2480_s0 + $0x8] ss:$24 sps:$4 sm:$0xff]   ;;  %v2183_v10 = vld [vmem:[%s2480_s0 + $0x34] ss:$24 sps:$4 sm:$0xff]  }
  0x17   :  { %1075 = vmatpush1.bf16.msra.mxu1 %v1752_v22  ;;  %v1808_v62 = vld [vmem:[%s2479_s1 + $0x16c] ss:$12 sps:$4 sm:$0xff]   ;;  %v1822_v2 = vld [vmem:[%s2479_s1 + $0x304] ss:$12 sps:$4 sm:$0xff]   ;;  %v1823_v5 = vld [vmem:[%s2479_s1 + $0xc8] ss:$12 sps:$4 sm:$0xff]  }
  0x18   :  { %1128 = vmatpush1.bf16.msra.mxu0 %v1753_v23  ;;  %1076 = vmatprep.subr.bf16.mxu1 %v1754_v24  ;;  %v1810_v63 = vld [vmem:[%s2479_s1 + $0x2ec] ss:$12 sps:$4 sm:$0xff]   ;;  %v1824_v7 = vld [vmem:[%s2479_s1 + $0x8] ss:$12 sps:$4 sm:$0xff]   ;;  %v1830_v15 = vld [vmem:[%s2479_s1 + $0x330] ss:$12 sps:$4 sm:$0xff]  }
  0x19   :  { %1129 = vmatprep.subr.bf16.mxu0 %v1756_v25  ;;  %v2158_v3 = vld [vmem:[%s2480_s0] ss:$24 sps:$4 sm:$0xff]   ;;  %v1827_v8 = vld [vmem:[%s2479_s1 + $0x31c] ss:$12 sps:$4 sm:$0xff]   ;;  %v1842_v22 = vld [vmem:[%s2479_s1 + $0x364] ss:$12 sps:$4 sm:$0xff]  }
  0x1a   :  { %v1820_v6 = vld [vmem:[%s2479_s1 + $0x300] ss:$12 sps:$4 sm:$0xff]   ;;  %v1825_v11 = vld [vmem:[%s2479_s1 + $0x318] ss:$12 sps:$4 sm:$0xff]   ;;  %v2209_v17 = vld [vmem:[%s2480_s0 + $0x30] ss:$24 sps:$4 sm:$0xff]  }
  0x1b   :  { %1077 = vmatpush1.bf16.msra.mxu1 %v1758_v26  ;;  %v1828_v9 = vld [vmem:[%s2479_s1 + $0xe0] ss:$12 sps:$4 sm:$0xff]   ;;  %v1833_v14 = vld [vmem:[%s2479_s1 + $0xf8] ss:$12 sps:$4 sm:$0xff]   ;;  %v1838_v19 = vld [vmem:[%s2479_s1 + $0x110] ss:$12 sps:$4 sm:$0xff]  }
  0x1c   :  { %1130 = vmatpush1.bf16.msra.mxu0 %v1759_v27  ;;  %1078 = vmatprep.subr.bf16.mxu1 %v1760_v28  ;;  %v1829_v12 = vld [vmem:[%s2479_s1 + $0x20] ss:$12 sps:$4 sm:$0xff]   ;;  %v1834_v16 = vld [vmem:[%s2479_s1 + $0x38] ss:$12 sps:$4 sm:$0xff]   ;;  %v1835_v20 = vld [vmem:[%s2479_s1 + $0x348] ss:$12 sps:$4 sm:$0xff]  }
  0x1d   :  { %1131 = vmatprep.subr.bf16.mxu0 %v1762_v29  ;;  %v1832_v13 = vld [vmem:[%s2479_s1 + $0x334] ss:$12 sps:$4 sm:$0xff]   ;;  %v1837_v18 = vld [vmem:[%s2479_s1 + $0x34c] ss:$12 sps:$4 sm:$0xff]   ;;  %v1839_v21 = vld [vmem:[%s2479_s1 + $0x50] ss:$12 sps:$4 sm:$0xff]  }
  0x1e   :  { %v1843_v23 = vld [vmem:[%s2479_s1 + $0x128] ss:$12 sps:$4 sm:$0xff]   ;;  %v1840_v24 = vld [vmem:[%s2479_s1 + $0x360] ss:$12 sps:$4 sm:$0xff]   ;;  %v1845_v28 = vld [vmem:[%s2479_s1 + $0x378] ss:$12 sps:$4 sm:$0xff]  }
  0x1f   :  { %1079 = vmatpush1.bf16.msra.mxu1 %v1764_v30  ;;  %v1844_v25 = vld [vmem:[%s2479_s1 + $0x68] ss:$12 sps:$4 sm:$0xff]   ;;  %v1848_v27 = vld [vmem:[%s2479_s1 + $0x140] ss:$12 sps:$4 sm:$0xff]  }
  0x20   :  { %1132 = vmatpush1.bf16.msra.mxu0 %v1765_v31  ;;  %1080 = vmatprep.subr.bf16.mxu1 %v1766_v32  ;;  %v1847_v26 = vld [vmem:[%s2479_s1 + $0x37c] ss:$12 sps:$4 sm:$0xff]   ;;  %v1851_v29 = vld [vmem:[%s2479_s1 + $0x80] ss:$12 sps:$4 sm:$0xff]   ;;  %v1856_v31 = vld [vmem:[%s2479_s1 + $0x158] ss:$12 sps:$4 sm:$0xff]  }
  0x21   :  { %1133 = vmatprep.subr.bf16.mxu0 %v1768_v33  ;;  %v1855_v30 = vld [vmem:[%s2479_s1 + $0x394] ss:$12 sps:$4 sm:$0xff]   ;;  %v1853_v32 = vld [vmem:[%s2479_s1 + $0x390] ss:$12 sps:$4 sm:$0xff]   ;;  %v1857_v33 = vld [vmem:[%s2479_s1 + $0x98] ss:$12 sps:$4 sm:$0xff]  }
  0x23   :  { %1081 = vmatpush1.bf16.msra.mxu1 %v1770_v34  ;;  %v1860_v34 = vld [vmem:[%s2479_s1 + $0x3ac] ss:$12 sps:$4 sm:$0xff]  }
  0x24   :  { %1134 = vmatpush1.bf16.msra.mxu0 %v1771_v35  ;;  %1082 = vmatprep.subr.bf16.mxu1 %v1772_v36  ;;  %v1861_v35 = vld [vmem:[%s2479_s1 + $0x170] ss:$12 sps:$4 sm:$0xff]   ;;  %v1858_v36 = vld [vmem:[%s2479_s1 + $0x3a8] ss:$12 sps:$4 sm:$0xff]  }
  0x25   :  { %1135 = vmatprep.subr.bf16.mxu0 %v1774_v37  ;;  %v1862_v37 = vld [vmem:[%s2479_s1 + $0xb0] ss:$12 sps:$4 sm:$0xff]  }
  0x27   :  { %1083 = vmatpush1.bf16.msra.mxu1 %v1776_v38  ;;  %v1865_v38 = vld [vmem:[%s2479_s1 + $0x3c4] ss:$12 sps:$4 sm:$0xff]  }
  0x28   :  { %1136 = vmatpush1.bf16.msra.mxu0 %v1777_v39  ;;  %1084 = vmatprep.subr.bf16.mxu1 %v1778_v40  ;;  %v1866_v39 = vld [vmem:[%s2479_s1 + $0x248] ss:$12 sps:$4 sm:$0xff]   ;;  %v1863_v40 = vld [vmem:[%s2479_s1 + $0x3c0] ss:$12 sps:$4 sm:$0xff]  }
  0x29   :  { %1137 = vmatprep.subr.bf16.mxu0 %v1780_v41  ;;  %v2285_v41 = vld [vmem:[%s2480_s0 + $0x3c] ss:$24 sps:$4 sm:$0xff]  }
  0x2b   :  { %1085 = vmatpush1.bf16.msra.mxu1 %v1782_v42  ;;  %v1867_v42 = vld [vmem:[%s2479_s1 + $0x188] ss:$12 sps:$4 sm:$0xff]  }
  0x2c   :  { %1138 = vmatpush1.bf16.msra.mxu0 %v1783_v43  ;;  %1086 = vmatprep.subr.bf16.mxu1 %v1784_v44  ;;  %v2293_v43 = vld [vmem:[%s2480_s0 + $0x38] ss:$24 sps:$4 sm:$0xff]   ;;  %v1870_v44 = vld [vmem:[%s2479_s1 + $0x3dc] ss:$12 sps:$4 sm:$0xff]  }
  0x2d   :  { %1139 = vmatprep.subr.bf16.mxu0 %v1786_v45  ;;  %v1871_v45 = vld [vmem:[%s2479_s1 + $0x260] ss:$12 sps:$4 sm:$0xff]  }
  0x2f   :  { %1087 = vmatpush1.bf16.msra.mxu1 %v1788_v46  ;;  %v1868_v46 = vld [vmem:[%s2479_s1 + $0x3d8] ss:$12 sps:$4 sm:$0xff]  }
  0x30   :  { %1140 = vmatpush1.bf16.msra.mxu0 %v1789_v47  ;;  %1088 = vmatprep.subr.bf16.mxu1 %v1790_v48  ;;  %v1872_v47 = vld [vmem:[%s2479_s1 + $0x1a0] ss:$12 sps:$4 sm:$0xff]  }
  0x31   :  { %1141 = vmatprep.subr.bf16.mxu0 %v1792_v50  ;;  %v1875_v48 = vld [vmem:[%s2479_s1 + $0x3f4] ss:$12 sps:$4 sm:$0xff]   ;;  %v1873_v50 = vld [vmem:[%s2479_s1 + $0x3f0] ss:$12 sps:$4 sm:$0xff]  }
  0x33   :  { %1089 = vmatpush1.bf16.msra.mxu1 %v1794_v52  ;;  %v2323_v52 = vld [vmem:[%s2480_s0 + $0x14] ss:$24 sps:$4 sm:$0xff]  }
  0x34   :  { %1142 = vmatpush1.bf16.msra.mxu0 %v1795_v53  ;;  %1090 = vmatprep.subr.bf16.mxu1 %v1796_v54  ;;  %v1877_v53 = vld [vmem:[%s2479_s1 + $0x1b8] ss:$12 sps:$4 sm:$0xff]  }
  0x35   :  { %1143 = vmatprep.subr.bf16.mxu0 %v1798_v55  ;;  %v1880_v54 = vld [vmem:[%s2479_s1 + $0x40c] ss:$12 sps:$4 sm:$0xff]   ;;  %v1881_v55 = vld [vmem:[%s2479_s1 + $0x290] ss:$12 sps:$4 sm:$0xff]  }
  0x37   :  { %1091 = vmatpush1.bf16.msra.mxu1 %v1800_v56  ;;  %v1878_v56 = vld [vmem:[%s2479_s1 + $0x408] ss:$12 sps:$4 sm:$0xff]  }
  0x38   :  { %1144 = vmatpush1.bf16.msra.mxu0 %v1801_v57  ;;  %1092 = vmatprep.subr.bf16.mxu1 %v1802_v58  ;;  %v1882_v57 = vld [vmem:[%s2479_s1 + $0x1d0] ss:$12 sps:$4 sm:$0xff]  }
  0x39   :  { %1145 = vmatprep.subr.bf16.mxu0 %v1804_v59  ;;  %v1885_v58 = vld [vmem:[%s2479_s1 + $0x424] ss:$12 sps:$4 sm:$0xff]   ;;  %v1886_v59 = vld [vmem:[%s2479_s1 + $0x2a8] ss:$12 sps:$4 sm:$0xff]  }
  0x3b   :  { %1093 = vmatpush1.bf16.msra.mxu1 %v1806_v60  ;;  %v1883_v60 = vld [vmem:[%s2479_s1 + $0x420] ss:$12 sps:$4 sm:$0xff]  }
  0x3c   :  { %1146 = vmatpush1.bf16.msra.mxu0 %v1807_v61  ;;  %1094 = vmatprep.subr.bf16.mxu1 %v1808_v62  ;;  %v1887_v61 = vld [vmem:[%s2479_s1 + $0x1e8] ss:$12 sps:$4 sm:$0xff]  }
  0x3d   :  { %1147 = vmatprep.subr.bf16.mxu0 %v1810_v63  ;;  %v1890_v62 = vld [vmem:[%s2479_s1 + $0x43c] ss:$12 sps:$4 sm:$0xff]   ;;  %v1891_v63 = vld [vmem:[%s2479_s1 + $0x2c0] ss:$12 sps:$4 sm:$0xff]  }
  0x3f   :  { %1095 = vmatpush1.bf16.msra.mxu1 %v1812_v0  ;;  %v1892_v0 = vld [vmem:[%s2479_s1 + $0x200] ss:$12 sps:$4 sm:$0xff]  }
  0x40   :  { %1148 = vmatpush1.bf16.msra.mxu0 %v1813_v1  ;;  %1594 = vmatprep.subr.bf16.mxu1 %v1823_v5  ;;  %v1898_v1 = vld [vmem:[%s2479_s1 + $0x454] ss:$12 sps:$4 sm:$0xff]   ;;  %v1900_v5 = vld [vmem:[%s2479_s1 + $0x218] ss:$12 sps:$4 sm:$0xff]  }
  0x41   :  { %1170 = vmatprep.subr.bf16.mxu0 %v1822_v2  ;;  %v1899_v2 = vld [vmem:[%s2479_s1 + $0x2d8] ss:$12 sps:$4 sm:$0xff]  }
  0x42   :  { %1097 = vmatmul.mubr.bf16.vlgmr.msra.gmra.mrb[0].mxu1 %v2158_v3 }
  0x43   :  { %1150 = vmatmul.mubr.bf16.vlgmr.msra.gmra.mrb[0].mxu0 %v2163_v4  ;;  %1595 = vmatpush3.bf16.msra.mxu1 %v1824_v7  ;;  %v1904_v7 = vld [vmem:[%s2479_s1 + $0x2f0] ss:$12 sps:$4 sm:$0xff]  }
  0x44   :  { %1171 = vmatpush1.bf16.msra.mxu0 %v1820_v6  ;;  %1596 = vmatprep.subr.bf16.mxu1 %v1828_v9  ;;  %v1903_v6 = vld [vmem:[%s2479_s1 + $0x46c] ss:$12 sps:$4 sm:$0xff]   ;;  %v1905_v9 = vld [vmem:[%s2479_s1 + $0x230] ss:$12 sps:$4 sm:$0xff]  }
  0x45   :  { %1172 = vmatprep.subr.bf16.mxu0 %v1827_v8  ;;  %1106 = vmatprep.mubr.bf16.mxu1 %v2183_v10  ;;  %v1901_v8 = vld [vmem:[%s2479_s1 + $0x468] ss:$12 sps:$4 sm:$0xff]  }
  0x46   :  { %1159 = vmatprep.mubr.bf16.mxu0 %v2285_v41 }
  0x47   :  { %1597 = vmatpush3.bf16.msra.mxu1 %v1829_v12  ;;  %v1910_v12 = vld [vmem:[%s2479_s1 + $0x308] ss:$12 sps:$4 sm:$0xff]  }
  0x48   :  { %1173 = vmatpush1.bf16.msra.mxu0 %v1825_v11  ;;  %1598 = vmatprep.subr.bf16.mxu1 %v1833_v14  ;;  %v1906_v11 = vld [vmem:[%s2480_s0 + $0x10] ss:$24 sps:$4 sm:$0xff]   ;;  %v1913_v14 = vld [vmem:[%s2480_s0 + $0x44] ss:$24 sps:$4 sm:$0xff]  }
  0x49   :  { %1174 = vmatprep.subr.bf16.mxu0 %v1832_v13  ;;  %v1911_v13 = vld [vmem:[%s2479_s1 + $0x3e0] ss:$12 sps:$4 sm:$0xff]  }
  0x4a   :  { %1107 = vmatmul.mubr.bf16.gmra.mrb[4].mxu1 %v2209_v17 }
  0x4b   :  { %1599 = vmatpush3.bf16.msra.mxu1 %v1834_v16  ;;  %1255 = vmatprep.mubr.bf16.mxu1 %v2098_v49  ;;  %v1876_v49 = vld [vmem:[%s2479_s1 + $0x278] ss:$12 sps:$4 sm:$0xff]  }
  0x4c   :  { %1175 = vmatpush1.bf16.msra.mxu0 %v1830_v15  ;;  %1600 = vmatprep.subr.bf16.mxu1 %v1838_v19  ;;  %v1912_v15 = vld [vmem:[%s2479_s1 + $0x320] ss:$12 sps:$4 sm:$0xff]   ;;  %v1916_v16 = vld [vmem:[%s2479_s1 + $0x3f8] ss:$12 sps:$4 sm:$0xff]   ;;  %v1919_v19 = vld [vmem:[%s2479_s1 + $0x350] ss:$12 sps:$4 sm:$0xff]  }
  0x4d   :  { %1176 = vmatprep.subr.bf16.mxu0 %v1837_v18  ;;  %1160 = vmatmul.mubr.bf16.gmra.mrb[4].mxu0 %v2293_v43  ;;  %v1918_v18 = vld [vmem:[%s2479_s1 + $0x410] ss:$12 sps:$4 sm:$0xff]  }
  0x4e   :  { %1202 = vmatprep.mubr.bf16.mxu0 %v2323_v52 }
  0x4f   :  { %1601 = vmatpush3.bf16.msra.mxu1 %v1839_v21  ;;  %v1921_v21 = vld [vmem:[%s2479_s1 + $0x368] ss:$12 sps:$4 sm:$0xff]  }
  0x50   :  { %1177 = vmatpush1.bf16.msra.mxu0 %v1835_v20  ;;  %1602 = vmatprep.subr.bf16.mxu1 %v1843_v23  ;;  %v1920_v20 = vld [vmem:[%s2479_s1 + $0x428] ss:$12 sps:$4 sm:$0xff]   ;;  %v1923_v23 = vld [vmem:[%s2479_s1 + $0x380] ss:$12 sps:$4 sm:$0xff]  }
  0x51   :  { %1178 = vmatprep.subr.bf16.mxu0 %v1842_v22  ;;  %v1922_v22 = vld [vmem:[%s2479_s1 + $0x440] ss:$12 sps:$4 sm:$0xff]  }
  0x53   :  { %1603 = vmatpush3.bf16.msra.mxu1 %v1844_v25  ;;  %v1925_v25 = vld [vmem:[%s2479_s1 + $0x398] ss:$12 sps:$4 sm:$0xff]  }
  0x54   :  { %1179 = vmatpush1.bf16.msra.mxu0 %v1840_v24  ;;  %1604 = vmatprep.subr.bf16.mxu1 %v1848_v27  ;;  %v1924_v24 = vld [vmem:[%s2479_s1 + $0x458] ss:$12 sps:$4 sm:$0xff]   ;;  %v1927_v27 = vld [vmem:[%s2479_s1 + $0x3b0] ss:$12 sps:$4 sm:$0xff]  }
  0x55   :  { %1180 = vmatprep.subr.bf16.mxu0 %v1847_v26  ;;  %v1926_v26 = vld [vmem:[%s2479_s1 + $0x470] ss:$12 sps:$4 sm:$0xff]  }
  0x57   :  { %1605 = vmatpush3.bf16.msra.mxu1 %v1851_v29 }
  0x58   :  { %1181 = vmatpush1.bf16.msra.mxu0 %v1845_v28  ;;  %1606 = vmatprep.subr.bf16.mxu1 %v1856_v31 }
  0x59   :  { %1182 = vmatprep.subr.bf16.mxu0 %v1855_v30 }
  0x5b   :  { %1607 = vmatpush3.bf16.msra.mxu1 %v1857_v33 }
  0x5c   :  { %1183 = vmatpush1.bf16.msra.mxu0 %v1853_v32  ;;  %1608 = vmatprep.subr.bf16.mxu1 %v1861_v35 }
  0x5d   :  { %1184 = vmatprep.subr.bf16.mxu0 %v1860_v34 }
  0x5f   :  { %1609 = vmatpush3.bf16.msra.mxu1 %v1862_v37 }
  0x60   :  { %1185 = vmatpush1.bf16.msra.mxu0 %v1858_v36  ;;  %1622 = vmatprep.subr.bf16.mxu1 %v1866_v39 }
  0x61   :  { %1186 = vmatprep.subr.bf16.mxu0 %v1865_v38 }
  0x62   :  { %1256 = vmatmul.mubr.bf16.vlgmr.msra.gmra.mrb[8].mxu1 %v2158_v3  ;;  %v1896_v3 = vld [vmem:[%s2479_s1 + $0x450] ss:$12 sps:$4 sm:$0xff]  }
  0x63   :  { %1623 = vmatpush3.bf16.msra.mxu1 %v1867_v42  ;;  %1263 = vmatprep.mubr.bf16.mxu1 %v2183_v10  ;;  %v1909_v10 = vld [vmem:[%s2479_s1 + $0x3c8] ss:$12 sps:$4 sm:$0xff]  }
  0x64   :  { %1187 = vmatpush1.bf16.msra.mxu0 %v1863_v40  ;;  %1624 = vmatprep.subr.bf16.mxu1 %v1871_v45 }
  0x65   :  { %1188 = vmatprep.subr.bf16.mxu0 %v1870_v44 }
  0x67   :  { %1625 = vmatpush3.bf16.msra.mxu1 %v1872_v47 }
  0x68   :  { %1189 = vmatpush1.bf16.msra.mxu0 %v1868_v46  ;;  %1626 = vmatprep.subr.bf16.mxu1 %v1876_v49 }
  0x69   :  { %1190 = vmatprep.subr.bf16.mxu0 %v1875_v48  ;;  %v221_v48 = vlaneseq }
  0x6a   :  { %1264 = vmatmul.mubr.bf16.gmra.mrb[12].mxu1 %v2209_v17  ;;  %v1915_v17 = vld [vmem:[%s2480_s0 + $0x40] ss:$24 sps:$4 sm:$0xff]  }
  0x6b   :  { %1627 = vmatpush3.bf16.msra.mxu1 %v1877_v53  ;;  %1304 = vmatprep.mubr.bf16.mxu1 %v2106_v51  ;;  %v1888_v51 = vld [vmem:[%s2479_s1 + $0x438] ss:$12 sps:$4 sm:$0xff]   ;;  %v222_v49 = vshrl.u32 %v221_v48, 7 }
  0x6c   :  { %1191 = vmatpush1.bf16.msra.mxu0 %v1873_v50  ;;  %1628 = vmatprep.subr.bf16.mxu1 %v1881_v55 }
  0x6d   :  { %1192 = vmatprep.subr.bf16.mxu0 %v1880_v54  ;;  %v223_v50 = vsub.s32 0, %v222_v49  ;;  %v227_v53 = vsub.s32 1, %v222_v49  ;;  %v231_v54 = vsub.s32 2, %v222_v49 }
  0x6f   :  { %1629 = vmatpush3.bf16.msra.mxu1 %v1882_v57 }
  0x70   :  { %1193 = vmatpush1.bf16.msra.mxu0 %v1878_v56  ;;  %1630 = vmatprep.subr.bf16.mxu1 %v1886_v59 }
  0x71   :  { %1194 = vmatprep.subr.bf16.mxu0 %v1885_v58 }
  0x73   :  { %1631 = vmatpush3.bf16.msra.mxu1 %v1887_v61 }
  0x74   :  { %1195 = vmatpush1.bf16.msra.mxu0 %v1883_v60  ;;  %1632 = vmatprep.subr.bf16.mxu1 %v1891_v63 }
  0x75   :  { %1196 = vmatprep.subr.bf16.mxu0 %v1890_v62 }
  0x77   :  { %1633 = vmatpush3.bf16.msra.mxu1 %v1892_v0 }
  0x78   :  { %1197 = vmatpush1.bf16.msra.mxu0 %v1888_v51  ;;  %1634 = vmatprep.subr.bf16.mxu1 %v1899_v2 }
  0x79   :  { %1198 = vmatprep.subr.bf16.mxu0 %v1898_v1 }
  0x7b   :  { %1635 = vmatpush3.bf16.msra.mxu1 %v1900_v5 }
  0x7c   :  { %1199 = vmatpush1.bf16.msra.mxu0 %v1896_v3  ;;  %1636 = vmatprep.subr.bf16.mxu1 %v1904_v7 }
  0x7d   :  { %1200 = vmatprep.subr.bf16.mxu0 %v1903_v6 }
  0x7f   :  { %1637 = vmatpush3.bf16.msra.mxu1 %v1905_v9 }
  0x80   :  { %1201 = vmatpush1.bf16.msra.mxu0 %v1901_v8  ;;  %1678 = vmatprep.subr.bf16.mxu1 %v1909_v10 }
  0x81   :  { %1650 = vmatprep.subr.bf16.mxu0 %v1909_v10 }
  0x82   :  { %1305 = vmatmul.mubr.bf16.vlgmr.msra.gmra.mrb[16].mxu1 %v2163_v4  ;;  %v1917_v4 = vld [vmem:[%s2479_s1 + $0x338] ss:$12 sps:$4 sm:$0xff]  }
  0x83   :  { %1203 = vmatmul.mubr.bf16.vlgmr.msra.gmra.mrb[0].mxu0 %v1906_v11  ;;  %1686 = vmatpush3.bf16.msra.mxu1 %v1910_v12 }
  0x84   :  { %1651 = vmatpush3.bf16.msra.mxu0 %v1910_v12  ;;  %1679 = vmatprep.subr.bf16.mxu1 %v1911_v13 }
  0x85   :  { %1652 = vmatprep.subr.bf16.mxu0 %v1911_v13  ;;  %1212 = vmatprep.mubr.bf16.mxu0 %v1913_v14 }
  0x86   :  { %1312 = vmatprep.mubr.bf16.mxu1 %v2285_v41 }
  0x87   :  { %1687 = vmatpush3.bf16.msra.mxu1 %v1912_v15 }
  0x88   :  { %1653 = vmatpush3.bf16.msra.mxu0 %v1912_v15  ;;  %1680 = vmatprep.subr.bf16.mxu1 %v1916_v16 }
  0x89   :  { %1654 = vmatprep.subr.bf16.mxu0 %v1916_v16 }
  0x8a   :  { %1313 = vmatmul.mubr.bf16.gmra.mrb[20].mxu1 %v2293_v43 }
  0x8b   :  { %1213 = vmatmul.mubr.bf16.gmra.mrb[4].mxu0 %v1915_v17  ;;  %1688 = vmatpush3.bf16.msra.mxu1 %v1917_v4 }
  0x8c   :  { %1655 = vmatpush3.bf16.msra.mxu0 %v1917_v4  ;;  %1681 = vmatprep.subr.bf16.mxu1 %v1918_v18 }
  0x8d   :  { %1656 = vmatprep.subr.bf16.mxu0 %v1918_v18  ;;  %1353 = vmatprep.mubr.bf16.mxu0 %v2323_v52  ;;  %v219_v52 = vld [vmem:[%s2481_s2] sm:$0x7] }
  0x8e   :  { %1361 = vmatprep.mubr.bf16.mxu1 %v1913_v14  ;;  %v224_v55 = vrot.slane %v219_v52, %v223_v50  ;;  %v228_v56 = vrot.slane %v219_v52, %v227_v53  ;;  %v232_v57 = vrot.slane %v219_v52, %v231_v54 }
  0x8f   :  { %1689 = vmatpush3.bf16.msra.mxu1 %v1919_v19 }
  0x90   :  { %1657 = vmatpush3.bf16.msra.mxu0 %v1919_v19  ;;  %1682 = vmatprep.subr.bf16.mxu1 %v1920_v20 }
  0x91   :  { %1658 = vmatprep.subr.bf16.mxu0 %v1920_v20 }
  0x93   :  { %1690 = vmatpush3.bf16.msra.mxu1 %v1921_v21 }
  0x94   :  { %1659 = vmatpush3.bf16.msra.mxu0 %v1921_v21  ;;  %1683 = vmatprep.subr.bf16.mxu1 %v1922_v22 }
  0x95   :  { %1660 = vmatprep.subr.bf16.mxu0 %v1922_v22 }
  0x97   :  { %1691 = vmatpush3.bf16.msra.mxu1 %v1923_v23 }
  0x98   :  { %1661 = vmatpush3.bf16.msra.mxu0 %v1923_v23  ;;  %1684 = vmatprep.subr.bf16.mxu1 %v1924_v24 }
  0x99   :  { %1662 = vmatprep.subr.bf16.mxu0 %v1924_v24 }
  0x9b   :  { %1692 = vmatpush3.bf16.msra.mxu1 %v1925_v25 }
  0x9c   :  { %1663 = vmatpush3.bf16.msra.mxu0 %v1925_v25  ;;  %1685 = vmatprep.subr.bf16.mxu1 %v1926_v26 }
  0x9d   :  { %1664 = vmatprep.subr.bf16.mxu0 %v1926_v26 }
  0x9f   :  { %1693 = vmatpush3.bf16.msra.mxu1 %v1927_v27 }
  0xa0   :  { %1665 = vmatpush3.bf16.msra.mxu0 %v1927_v27 }
  0xa2   :  { %1362 = vmatmul.mubr.bf16.vlgmr.msra.gmra.mrb[24].mxu1 %v1915_v17 }
  0xa3   :  { %1354 = vmatmul.mubr.bf16.vlgmr.msra.gmra.mrb[8].mxu0 %v1906_v11 }
 0x115   :  { %v1098_v28 = vpop.f32.mrb[0].mxu1 }
 0x116   :  { %v1100_v29 = vpop.f32.mrb[1].mxu1  ;;  %v1099_v58 = vadd.f32 %v1098_v28, %v224_v55 }
 0x117   :  { %v1102_v30 = vpop.f32.mrb[2].mxu1  ;;  %v1101_v59 = vadd.f32 %v1100_v29, %v228_v56 }
 0x118   :  { %v1104_v31 = vpop.f32.mrb[3].mxu1  ;;  %v1103_v62 = vadd.f32 %v1102_v30, %v224_v55 }
 0x119   :  { %v1105_v1 = vadd.f32 %v1104_v31, %v228_v56 }
 0x11d   :  { %v1108_v32 = vpop.f32.mrb[4].mxu1 }
 0x11e   :  { %v1110_v33 = vpop.f32.mrb[5].mxu1  ;;  %v1109_v4 = vadd.f32 %v1108_v32, %v224_v55 }
 0x11f   :  { %v1112_v34 = vpop.f32.mrb[6].mxu1  ;;  %v1111_v18 = vadd.f32 %v1110_v33, %v228_v56 }
 0x120   :  { %v1114_v35 = vpop.f32.mrb[7].mxu1  ;;  %v1113_v21 = vadd.f32 %v1112_v34, %v224_v55 }
 0x121   :  { %v1115_v25 = vadd.f32 %v1114_v35, %v228_v56 }
 0x135   :  { %v1610_v36 = vpop.f32.mrb[8].mxu1 }
 0x136   :  { %v1611_v37 = vpop.f32.mrb[9].mxu1 }
 0x137   :  { %v1612_v38 = vadd.f32 %v1611_v37, %v1610_v36  ;;  %v1613_v39 = vpop.f32.mrb[10].mxu1 }
 0x138   :  { %v1614_v40 = vpop.f32.mrb[11].mxu1 }
 0x139   :  { %v1615_v41 = vadd.f32 %v1614_v40, %v1613_v39  ;;  %v1258_v2 = vadd.f32 %v1612_v38, %v232_v57 }
 0x13b   :  { %v1261_v8 = vadd.f32 %v1615_v41, %v232_v57 }
 0x13d   :  { %v1616_v42 = vpop.f32.mrb[12].mxu1 }
 0x13e   :  { %v1617_v43 = vpop.f32.mrb[13].mxu1 }
 0x13f   :  { %v1618_v44 = vadd.f32 %v1617_v43, %v1616_v42  ;;  %v1619_v45 = vpop.f32.mrb[14].mxu1 }
 0x140   :  { %v1620_v46 = vpop.f32.mrb[15].mxu1 }
 0x141   :  { %v1621_v47 = vadd.f32 %v1620_v46, %v1619_v45  ;;  %v1266_v26 = vadd.f32 %v1618_v44, %v232_v57 }
 0x143   :  { %v1269_v31 = vadd.f32 %v1621_v47, %v232_v57 }
 0x155   :  { %v1638_v61 = vpop.f32.mrb[16].mxu1 }
 0x156   :  { %v1204_v60 = vpop.f32.mrb[0].mxu0  ;;  %v1639_v0 = vpop.f32.mrb[17].mxu1 }
 0x157   :  { %v1695_v63 = vadd.f32 %v1204_v60, %v1099_v58  ;;  %v1206_v51 = vpop.f32.mrb[1].mxu0  ;;  %v1640_v5 = vadd.f32 %v1639_v0, %v1638_v61  ;;  %v1641_v7 = vpop.f32.mrb[18].mxu1 }
 0x158   :  { %v1697_v3 = vadd.f32 %v1206_v51, %v1101_v59  ;;  %v1208_v6 = vpop.f32.mrb[2].mxu0  ;;  %v1642_v11 = vpop.f32.mrb[19].mxu1 }
 0x159   :  { %v1699_v9 = vadd.f32 %v1208_v6, %v1103_v62  ;;  %v1210_v10 = vpop.f32.mrb[3].mxu0  ;;  %v1307_v13 = vadd.f32 %v1640_v5, %v1258_v2  ;;  %v1643_v15 = vadd.f32 %v1642_v11, %v1641_v7 }
 0x15a   :  { %v1586_v12 = vpack.c.bf16 %v1697_v3, %v1695_v63  ;;  %v1701_v14 = vadd.f32 %v1210_v10, %v1105_v1 }
 0x15b   :  { %v1310_v17 = vadd.f32 %v1643_v15, %v1261_v8 }
 0x15c   :  { %1410 = vst [vmem:[%s2482_s3] sm:$0xff] %v1586_v12  ;;  %v1588_v16 = vpack.c.bf16 %v1701_v14, %v1699_v9 }
 0x15d   :  { %v1644_v20 = vpop.f32.mrb[20].mxu1 }
 0x15e   :  { %1412 = vst [vmem:[%s2482_s3 + $0xc] sm:$0xff] %v1588_v16  ;;  %v1214_v19 = vpop.f32.mrb[4].mxu0  ;;  %v1645_v24 = vpop.f32.mrb[21].mxu1 }
 0x15f   :  { %v1703_v22 = vadd.f32 %v1214_v19, %v1109_v4  ;;  %v1216_v23 = vpop.f32.mrb[5].mxu0  ;;  %v1646_v28 = vadd.f32 %v1645_v24, %v1644_v20  ;;  %v1647_v30 = vpop.f32.mrb[22].mxu1 }
 0x160   :  { %v1705_v27 = vadd.f32 %v1216_v23, %v1111_v18  ;;  %v1218_v29 = vpop.f32.mrb[6].mxu0  ;;  %v1648_v33 = vpop.f32.mrb[23].mxu1 }
 0x161   :  { %v1707_v36 = vadd.f32 %v1218_v29, %v1113_v21  ;;  %v1220_v32 = vpop.f32.mrb[7].mxu0  ;;  %v1315_v38 = vadd.f32 %v1646_v28, %v1266_v26  ;;  %v1649_v40 = vadd.f32 %v1648_v33, %v1647_v30 }
 0x162   :  { %v1590_v37 = vpack.c.bf16 %v1705_v27, %v1703_v22  ;;  %v1709_v39 = vadd.f32 %v1220_v32, %v1115_v25 }
 0x163   :  { %v1318_v41 = vadd.f32 %v1649_v40, %v1269_v31 }
 0x164   :  { %1414 = vst [vmem:[%s2482_s3 + $0x18] sm:$0xff] %v1590_v37  ;;  %v1592_v34 = vpack.c.bf16 %v1709_v39, %v1707_v36 }
 0x166   :  { %1416 = vst [vmem:[%s2482_s3 + $0x24] sm:$0xff] %v1592_v34 }
 0x175   :  { %v1672_v42 = vpop.f32.mrb[24].mxu1 }
 0x176   :  { %v1666_v35 = vpop.f32.mrb[8].mxu0  ;;  %v1673_v44 = vpop.f32.mrb[25].mxu1 }
 0x177   :  { %v1667_v43 = vpop.f32.mrb[9].mxu0  ;;  %v1674_v46 = vadd.f32 %v1673_v44, %v1672_v42  ;;  %v1675_v48 = vpop.f32.mrb[26].mxu1 }
 0x178   :  { %v1668_v45 = vadd.f32 %v1667_v43, %v1666_v35  ;;  %v1669_v47 = vpop.f32.mrb[10].mxu0  ;;  %v1676_v50 = vpop.f32.mrb[27].mxu1 }
 0x179   :  { %v1670_v49 = vpop.f32.mrb[11].mxu0  ;;  %v1364_v53 = vadd.f32 %v1674_v46, %v1315_v38  ;;  %v1677_v55 = vadd.f32 %v1676_v50, %v1675_v48 }
 0x17a   :  { %v1356_v52 = vadd.f32 %v1668_v45, %v1307_v13  ;;  %v1671_v54 = vadd.f32 %v1670_v49, %v1669_v47 }
 0x17b   :  { %v1591_v57 = vpack.c.bf16 %v1364_v53, %v1364_v53  ;;  %v1367_v59 = vadd.f32 %v1677_v55, %v1318_v41 }
 0x17c   :  { %v1587_v56 = vpack.c.bf16 %v1356_v52, %v1356_v52  ;;  %v1359_v58 = vadd.f32 %v1671_v54, %v1310_v17 }
 0x17d   :  { %1415 = vst [vmem:[%s2482_s3 + $0x20] sm:$0xf] %v1591_v57  ;;  %v1593_v61 = vpack.c.bf16 %v1367_v59, %v1367_v59 }
 0x17e   :  { %1411 = vst [vmem:[%s2482_s3 + $0x8] sm:$0xf] %v1587_v56  ;;  %v1589_v60 = vpack.c.bf16 %v1359_v58, %v1359_v58 }
 0x17f   :  { %1417 = vst [vmem:[%s2482_s3 + $0x2c] sm:$0xf] %v1593_v61 }
 0x180   :  { %1413 = vst [vmem:[%s2482_s3 + $0x14] sm:$0xf] %v1589_v60 }

// kernel: backbone_base_agent_swin_forward.13
= control target key start
LH: loop header
LB: loop body
LE: loop exit
PB: predicated region body
PF: predicated region fallthrough
CT: control target
= control target key end

     0   :  { %s910_s1 = inlined_call_operand.vmem [shape: bf16[768,128], index: 1, kind: input, shape index: {}]   ;;  %s911_s0 = inlined_call_operand.vmem [shape: bf16[8,768], index: 0, kind: input, shape index: {}]   ;;  %s912_s2 = inlined_call_operand.vmem [shape: f32[1,128], index: 2, kind: input, shape index: {}]   ;;  %s913_s3 = inlined_call_operand.vmem [shape: bf16[8,128], index: 3, kind: output, shape index: {}]  }
   0x1   :  { %v677_v0 = vld [vmem:[%s910_s1 + $0x40] sm:$0xff]   ;;  %v681_v4 = vld [vmem:[%s910_s1 + $0x48] sm:$0xff]   ;;  %v685_v8 = vld [vmem:[%s910_s1 + $0x50] sm:$0xff]  }
   0x2   :  { %v678_v1 = vld [vmem:[%s910_s1] sm:$0xff]   ;;  %611 = vmatprep.subr.bf16.mxu0 %v677_v0  ;;  %v682_v5 = vld [vmem:[%s910_s1 + $0x8] sm:$0xff]   ;;  %v686_v9 = vld [vmem:[%s910_s1 + $0x10] sm:$0xff]  }
   0x3   :  { %v679_v2 = vld [vmem:[%s910_s1 + $0xc0] sm:$0xff]   ;;  %612 = vmatpush3.bf16.msra.mxu0 %v678_v1  ;;  %v683_v6 = vld [vmem:[%s910_s1 + $0xc8] sm:$0xff]   ;;  %v687_v10 = vld [vmem:[%s910_s1 + $0xd0] sm:$0xff]  }
   0x4   :  { %v680_v3 = vld [vmem:[%s910_s1 + $0x80] sm:$0xff]   ;;  %633 = vmatprep.subr.bf16.mxu1 %v679_v2  ;;  %613 = vmatprep.subr.bf16.mxu0 %v681_v4  ;;  %v684_v7 = vld [vmem:[%s910_s1 + $0x88] sm:$0xff]   ;;  %v688_v11 = vld [vmem:[%s910_s1 + $0x90] sm:$0xff]  }
   0x5   :  { %634 = vmatpush3.bf16.msra.mxu1 %v680_v3  ;;  %v689_v12 = vld [vmem:[%s910_s1 + $0x58] sm:$0xff]   ;;  %v693_v16 = vld [vmem:[%s910_s1 + $0x60] sm:$0xff]   ;;  %v697_v20 = vld [vmem:[%s910_s1 + $0x68] sm:$0xff]  }
   0x6   :  { %635 = vmatprep.subr.bf16.mxu1 %v683_v6  ;;  %v690_v13 = vld [vmem:[%s910_s1 + $0x18] sm:$0xff]   ;;  %v694_v17 = vld [vmem:[%s910_s1 + $0x20] sm:$0xff]   ;;  %v698_v21 = vld [vmem:[%s910_s1 + $0x28] sm:$0xff]  }
   0x7   :  { %614 = vmatpush3.bf16.msra.mxu0 %v682_v5  ;;  %v691_v14 = vld [vmem:[%s910_s1 + $0xd8] sm:$0xff]   ;;  %v695_v18 = vld [vmem:[%s910_s1 + $0xe0] sm:$0xff]   ;;  %v699_v22 = vld [vmem:[%s910_s1 + $0xe8] sm:$0xff]  }
   0x8   :  { %615 = vmatprep.subr.bf16.mxu0 %v685_v8  ;;  %v692_v15 = vld [vmem:[%s910_s1 + $0x98] sm:$0xff]   ;;  %v696_v19 = vld [vmem:[%s910_s1 + $0xa0] sm:$0xff]   ;;  %v700_v23 = vld [vmem:[%s910_s1 + $0xa8] sm:$0xff]  }
   0x9   :  { %636 = vmatpush3.bf16.msra.mxu1 %v684_v7  ;;  %v701_v24 = vld [vmem:[%s910_s1 + $0x70] sm:$0xff]   ;;  %v705_v28 = vld [vmem:[%s910_s1 + $0x78] sm:$0xff]   ;;  %v15_v31 = vld [vmem:[%s911_s0] sm:$0xff] }
   0xa   :  { %637 = vmatprep.subr.bf16.mxu1 %v687_v10  ;;  %v702_v25 = vld [vmem:[%s910_s1 + $0x30] sm:$0xff]   ;;  %v706_v29 = vld [vmem:[%s910_s1 + $0x38] sm:$0xff]   ;;  %v557_v32 = vcombine.low %v15_v31, %v15_v31  ;;  %v558_v33 = vcombine.high %v15_v31, %v15_v31  ;;  %v711_v35 = vld [vmem:[%s910_s1 + $0x140] sm:$0xff]  }
   0xb   :  { %616 = vmatpush3.bf16.msra.mxu0 %v686_v9  ;;  %v703_v26 = vld [vmem:[%s910_s1 + $0xf0] sm:$0xff]   ;;  %v707_v30 = vld [vmem:[%s910_s1 + $0xf8] sm:$0xff]   ;;  %v16_v36 = vld [vmem:[%s911_s0 + $0x8] sm:$0xff] }
   0xc   :  { %617 = vmatprep.subr.bf16.mxu0 %v689_v12  ;;  %v704_v27 = vld [vmem:[%s910_s1 + $0xb0] sm:$0xff]   ;;  %v710_v34 = vld [vmem:[%s910_s1 + $0xb8] sm:$0xff]   ;;  %462 = vmatprep.mubr.bf16.mxu0 %v558_v33  ;;  %v559_v37 = vcombine.low %v16_v36, %v16_v36  ;;  %v560_v38 = vcombine.high %v16_v36, %v16_v36  ;;  %v714_v39 = vld [vmem:[%s910_s1 + $0x100] sm:$0xff]  }
   0xd   :  { %638 = vmatpush3.bf16.msra.mxu1 %v688_v11  ;;  %v715_v40 = vld [vmem:[%s910_s1 + $0x148] sm:$0xff]   ;;  %v717_v42 = vld [vmem:[%s910_s1 + $0x150] sm:$0xff]   ;;  %v719_v44 = vld [vmem:[%s910_s1 + $0x158] sm:$0xff]  }
   0xe   :  { %639 = vmatprep.subr.bf16.mxu1 %v691_v14  ;;  %502 = vmatprep.mubr.bf16.mxu1 %v560_v38  ;;  %v716_v41 = vld [vmem:[%s910_s1 + $0x108] sm:$0xff]   ;;  %v718_v43 = vld [vmem:[%s910_s1 + $0x110] sm:$0xff]   ;;  %v720_v45 = vld [vmem:[%s910_s1 + $0x118] sm:$0xff]  }
   0xf   :  { %618 = vmatpush3.bf16.msra.mxu0 %v690_v13  ;;  %v721_v46 = vld [vmem:[%s910_s1 + $0x160] sm:$0xff]   ;;  %v17_v48 = vld [vmem:[%s911_s0 + $0x10] sm:$0xff]  ;;  %v723_v49 = vld [vmem:[%s910_s1 + $0x168] sm:$0xff]  }
  0x10   :  { %619 = vmatprep.subr.bf16.mxu0 %v693_v16  ;;  %v722_v47 = vld [vmem:[%s910_s1 + $0x120] sm:$0xff]   ;;  %v562_v50 = vcombine.high %v17_v48, %v17_v48  ;;  %v724_v51 = vld [vmem:[%s910_s1 + $0x128] sm:$0xff]   ;;  %v725_v52 = vld [vmem:[%s910_s1 + $0x170] sm:$0xff]   ;;  %v561_v56 = vcombine.low %v17_v48, %v17_v48 }
  0x11   :  { %640 = vmatpush3.bf16.msra.mxu1 %v692_v15  ;;  %v726_v53 = vld [vmem:[%s910_s1 + $0x130] sm:$0xff]   ;;  %v727_v54 = vld [vmem:[%s910_s1 + $0x178] sm:$0xff]   ;;  %v556_v58 = vld [vmem:[%s912_s2] ss:$0 sm:$0xff] }
  0x12   :  { %641 = vmatprep.subr.bf16.mxu1 %v695_v18  ;;  %v728_v55 = vld [vmem:[%s910_s1 + $0x138] sm:$0xff]  }
  0x13   :  { %620 = vmatpush3.bf16.msra.mxu0 %v694_v17 }
  0x14   :  { %621 = vmatprep.subr.bf16.mxu0 %v697_v20 }
  0x15   :  { %642 = vmatpush3.bf16.msra.mxu1 %v696_v19 }
  0x16   :  { %643 = vmatprep.subr.bf16.mxu1 %v699_v22 }
  0x17   :  { %622 = vmatpush3.bf16.msra.mxu0 %v698_v21 }
  0x18   :  { %623 = vmatprep.subr.bf16.mxu0 %v701_v24 }
  0x19   :  { %644 = vmatpush3.bf16.msra.mxu1 %v700_v23 }
  0x1a   :  { %645 = vmatprep.subr.bf16.mxu1 %v703_v26 }
  0x1b   :  { %624 = vmatpush3.bf16.msra.mxu0 %v702_v25 }
  0x1c   :  { %625 = vmatprep.subr.bf16.mxu0 %v705_v28 }
  0x1d   :  { %646 = vmatpush3.bf16.msra.mxu1 %v704_v27 }
  0x1e   :  { %647 = vmatprep.subr.bf16.mxu1 %v707_v30 }
  0x1f   :  { %626 = vmatpush3.bf16.msra.mxu0 %v706_v29 }
  0x20   :  { %655 = vmatprep.subr.bf16.mxu0 %v711_v35 }
  0x21   :  { %648 = vmatpush3.bf16.msra.mxu1 %v710_v34 }
  0x22   :  { %463 = vmatmul.mubr.bf16.vlgmr.msra.gmra.mrb[0].mxu0 %v557_v32 }
  0x23   :  { %656 = vmatpush3.bf16.msra.mxu0 %v714_v39  ;;  %542 = vmatprep.mubr.bf16.mxu0 %v562_v50 }
  0x24   :  { %503 = vmatmul.mubr.bf16.vlgmr.msra.gmra.mrb[0].mxu1 %v559_v37  ;;  %657 = vmatprep.subr.bf16.mxu0 %v715_v40 }
  0x27   :  { %658 = vmatpush3.bf16.msra.mxu0 %v716_v41 }
  0x28   :  { %659 = vmatprep.subr.bf16.mxu0 %v717_v42 }
  0x2b   :  { %660 = vmatpush3.bf16.msra.mxu0 %v718_v43 }
  0x2c   :  { %661 = vmatprep.subr.bf16.mxu0 %v719_v44 }
  0x2f   :  { %662 = vmatpush3.bf16.msra.mxu0 %v720_v45 }
  0x30   :  { %663 = vmatprep.subr.bf16.mxu0 %v721_v46 }
  0x33   :  { %664 = vmatpush3.bf16.msra.mxu0 %v722_v47 }
  0x34   :  { %665 = vmatprep.subr.bf16.mxu0 %v723_v49 }
  0x37   :  { %666 = vmatpush3.bf16.msra.mxu0 %v724_v51 }
  0x38   :  { %667 = vmatprep.subr.bf16.mxu0 %v725_v52 }
  0x3b   :  { %668 = vmatpush3.bf16.msra.mxu0 %v726_v53 }
  0x3c   :  { %669 = vmatprep.subr.bf16.mxu0 %v727_v54 }
  0x3f   :  { %670 = vmatpush3.bf16.msra.mxu0 %v728_v55 }
  0x42   :  { %543 = vmatmul.mubr.bf16.vlgmr.msra.gmra.mrb[4].mxu0 %v561_v56 }
  0xf5   :  { %v627_v57 = vpop.f32.mrb[0].mxu0 }
  0xf6   :  { %v628_v59 = vpop.f32.mrb[1].mxu0 }
  0xf7   :  { %v629_v60 = vadd.f32 %v628_v59, %v627_v57  ;;  %v630_v61 = vpop.f32.mrb[2].mxu0  ;;  %v649_v62 = vpop.f32.mrb[0].mxu1 }
  0xf8   :  { %v631_v63 = vpop.f32.mrb[3].mxu0  ;;  %v650_v0 = vpop.f32.mrb[1].mxu1 }
  0xf9   :  { %v465_v1 = vadd.f32 %v629_v60, %v556_v58  ;;  %v651_v2 = vadd.f32 %v650_v0, %v649_v62  ;;  %v652_v3 = vpop.f32.mrb[2].mxu1 }
  0xfa   :  { %v653_v4 = vpop.f32.mrb[3].mxu1 }
  0xfb   :  { %v505_v5 = vadd.f32 %v651_v2, %v465_v1 }
 0x115   :  { %v671_v6 = vpop.f32.mrb[4].mxu0 }
 0x116   :  { %v672_v7 = vpop.f32.mrb[5].mxu0 }
 0x117   :  { %v673_v8 = vadd.f32 %v672_v7, %v671_v6  ;;  %v674_v9 = vpop.f32.mrb[6].mxu0 }
 0x118   :  { %v675_v10 = vpop.f32.mrb[7].mxu0 }
 0x119   :  { %v545_v11 = vadd.f32 %v673_v8, %v505_v5 }
 0x11b   :  { %v550_v12 = vpack.c.bf16 %v545_v11, %v545_v11 }
 0x11d   :  { %551 = vst [vmem:[%s913_s3] sm:$0xf] %v550_v12 }

// kernel: backbone_base_agent_swin_forward.14
= control target key start
LH: loop header
LB: loop body
LE: loop exit
PB: predicated region body
PF: predicated region fallthrough
CT: control target
= control target key end

     0   :  { %s670_s1 = inlined_call_operand.vmem [shape: bf16[384,128], index: 1, kind: input, shape index: {}]   ;;  %s671_s0 = inlined_call_operand.vmem [shape: bf16[32,384], index: 0, kind: input, shape index: {}]   ;;  %s672_s2 = inlined_call_operand.vmem [shape: f32[1,128], index: 2, kind: input, shape index: {}]   ;;  %s673_s3 = inlined_call_operand.vmem [shape: bf16[32,128], index: 3, kind: input, shape index: {}]   ;;  %s674_s4 = inlined_call_operand.vmem [shape: bf16[32,128], index: 4, kind: output, shape index: {}]  }
   0x1   :  { %v508_v0 = vld [vmem:[%s670_s1 + $0x40] sm:$0xff]   ;;  %v510_v2 = vld [vmem:[%s670_s1 + $0x48] sm:$0xff]   ;;  %v513_v5 = vld [vmem:[%s670_s1 + $0x50] sm:$0xff]  }
   0x2   :  { %v509_v1 = vld [vmem:[%s670_s1] sm:$0xff]   ;;  %450 = vmatprep.subr.bf16.mxu0 %v508_v0  ;;  %v512_v4 = vld [vmem:[%s670_s1 + $0x8] sm:$0xff]   ;;  %v515_v7 = vld [vmem:[%s670_s1 + $0x10] sm:$0xff]  }
   0x3   :  { %451 = vmatpush3.bf16.msra.mxu0 %v509_v1  ;;  %v511_v3 = vld [vmem:[%s670_s1 + $0x80] sm:$0xff]   ;;  %v514_v6 = vld [vmem:[%s670_s1 + $0x88] sm:$0xff]   ;;  %v516_v8 = vld [vmem:[%s670_s1 + $0x58] sm:$0xff]  }
   0x4   :  { %452 = vmatprep.subr.bf16.mxu0 %v510_v2  ;;  %488 = vmatprep.subr.bf16.mxu1 %v511_v3  ;;  %v517_v9 = vld [vmem:[%s670_s1 + $0x90] sm:$0xff]   ;;  %v518_v10 = vld [vmem:[%s670_s1 + $0x18] sm:$0xff]   ;;  %v519_v11 = vld [vmem:[%s670_s1 + $0x60] sm:$0xff]  }
   0x5   :  { %489 = vmatpush3.bf16.msra.mxu1 %v511_v3  ;;  %v520_v12 = vld [vmem:[%s670_s1 + $0x98] sm:$0xff]   ;;  %v521_v13 = vld [vmem:[%s670_s1 + $0x20] sm:$0xff]   ;;  %v522_v15 = vld [vmem:[%s670_s1 + $0x68] sm:$0xff]  }
   0x6   :  { %490 = vmatprep.subr.bf16.mxu1 %v514_v6  ;;  %v523_v14 = vld [vmem:[%s670_s1 + $0xa0] sm:$0xff]   ;;  %v524_v16 = vld [vmem:[%s670_s1 + $0x28] sm:$0xff]   ;;  %v525_v18 = vld [vmem:[%s670_s1 + $0x70] sm:$0xff]  }
   0x7   :  { %453 = vmatpush3.bf16.msra.mxu0 %v512_v4  ;;  %v526_v17 = vld [vmem:[%s670_s1 + $0xa8] sm:$0xff]   ;;  %v527_v19 = vld [vmem:[%s670_s1 + $0x30] sm:$0xff]   ;;  %v528_v20 = vld [vmem:[%s670_s1 + $0x78] sm:$0xff]  }
   0x8   :  { %454 = vmatprep.subr.bf16.mxu0 %v513_v5  ;;  %v529_v21 = vld [vmem:[%s670_s1 + $0xb0] sm:$0xff]   ;;  %v530_v23 = vld [vmem:[%s670_s1 + $0x38] sm:$0xff]   ;;  %v531_v26 = vld [vmem:[%s671_s0] ss:$12 sps:$4 sm:$0xff]  }
   0x9   :  { %491 = vmatpush3.bf16.msra.mxu1 %v514_v6  ;;  %v533_v22 = vld [vmem:[%s671_s0 + $0x4] ss:$12 sps:$4 sm:$0xff]   ;;  %v535_v24 = vld [vmem:[%s671_s0 + $0x8] ss:$12 sps:$4 sm:$0xff]   ;;  %v534_v25 = vld [vmem:[%s670_s1 + $0xb8] sm:$0xff]  }
   0xa   :  { %492 = vmatprep.subr.bf16.mxu1 %v517_v9  ;;  %289 = vmatprep.mubr.bf16.mxu0 %v533_v22  ;;  %v537_v27 = vld [vmem:[%s671_s0 + $0x1c] ss:$12 sps:$4 sm:$0xff]   ;;  %v536_v28 = vld [vmem:[%s671_s0 + $0x20] ss:$12 sps:$4 sm:$0xff]   ;;  %v539_v29 = vld [vmem:[%s671_s0 + $0x18] ss:$12 sps:$4 sm:$0xff]  }
   0xb   :  { %455 = vmatpush3.bf16.msra.mxu0 %v515_v7  ;;  %504 = vmatprep.mubr.bf16.mxu1 %v535_v24  ;;  %v391_v32 = vld [vmem:[%s672_s2] ss:$0 sm:$0xff]  ;;  %v448_v54 = vld [vmem:[%s673_s3 + $0x8] sm:$0xff]  }
   0xc   :  { %456 = vmatprep.subr.bf16.mxu0 %v516_v8  ;;  %v431_v37 = vld [vmem:[%s673_s3] sm:$0xff]   ;;  %v436_v60 = vunpack.c.l.bf16 %v448_v54  ;;  %v437_v62 = vunpack.c.h.bf16 %v448_v54 }
   0xd   :  { %493 = vmatpush3.bf16.msra.mxu1 %v517_v9  ;;  %v432_v43 = vunpack.c.l.bf16 %v431_v37  ;;  %v433_v46 = vunpack.c.h.bf16 %v431_v37 }
   0xe   :  { %494 = vmatprep.subr.bf16.mxu1 %v520_v12 }
   0xf   :  { %457 = vmatpush3.bf16.msra.mxu0 %v518_v10 }
  0x10   :  { %458 = vmatprep.subr.bf16.mxu0 %v519_v11 }
  0x11   :  { %495 = vmatpush3.bf16.msra.mxu1 %v520_v12 }
  0x12   :  { %496 = vmatprep.subr.bf16.mxu1 %v523_v14 }
  0x13   :  { %459 = vmatpush3.bf16.msra.mxu0 %v521_v13 }
  0x14   :  { %460 = vmatprep.subr.bf16.mxu0 %v522_v15 }
  0x15   :  { %497 = vmatpush3.bf16.msra.mxu1 %v523_v14 }
  0x16   :  { %498 = vmatprep.subr.bf16.mxu1 %v526_v17 }
  0x17   :  { %461 = vmatpush3.bf16.msra.mxu0 %v524_v16 }
  0x18   :  { %462 = vmatprep.subr.bf16.mxu0 %v525_v18 }
  0x19   :  { %499 = vmatpush3.bf16.msra.mxu1 %v526_v17 }
  0x1a   :  { %500 = vmatprep.subr.bf16.mxu1 %v529_v21 }
  0x1b   :  { %463 = vmatpush3.bf16.msra.mxu0 %v527_v19 }
  0x1c   :  { %464 = vmatprep.subr.bf16.mxu0 %v528_v20 }
  0x1d   :  { %501 = vmatpush3.bf16.msra.mxu1 %v529_v21 }
  0x1e   :  { %502 = vmatprep.subr.bf16.mxu1 %v534_v25 }
  0x1f   :  { %465 = vmatpush3.bf16.msra.mxu0 %v530_v23 }
  0x21   :  { %503 = vmatpush3.bf16.msra.mxu1 %v534_v25 }
  0x22   :  { %290 = vmatmul.mubr.bf16.vlgmr.msra.gmra.mrb[0].mxu0 %v531_v26 }
  0x23   :  { %297 = vmatprep.mubr.bf16.mxu0 %v537_v27 }
  0x24   :  { %505 = vmatmul.mubr.bf16.vlgmr.msra.gmra.mrb[0].mxu1 %v536_v28 }
  0x2a   :  { %298 = vmatmul.mubr.bf16.gmra.mrb[4].mxu0 %v539_v29 }
  0xf5   :  { %v466_v30 = vpop.f32.mrb[0].mxu0 }
  0xf6   :  { %v467_v31 = vpop.f32.mrb[1].mxu0 }
  0xf7   :  { %v468_v33 = vadd.f32 %v467_v31, %v466_v30  ;;  %v469_v34 = vpop.f32.mrb[2].mxu0  ;;  %v506_v36 = vpop.f32.mrb[0].mxu1 }
  0xf8   :  { %v470_v35 = vpop.f32.mrb[3].mxu0  ;;  %v340_v40 = vpop.f32.mrb[1].mxu1 }
  0xf9   :  { %v471_v38 = vadd.f32 %v470_v35, %v469_v34  ;;  %v292_v39 = vadd.f32 %v468_v33, %v391_v32  ;;  %v507_v41 = vpop.f32.mrb[2].mxu1 }
  0xfa   :  { %v343_v45 = vpop.f32.mrb[3].mxu1 }
  0xfb   :  { %v341_v42 = vadd.f32 %v340_v40, %v292_v39  ;;  %v295_v44 = vadd.f32 %v471_v38, %v391_v32 }
  0xfd   :  { %v344_v47 = vadd.f32 %v343_v45, %v295_v44  ;;  %v472_v48 = vpop.f32.mrb[4].mxu0  ;;  %v363_v50 = vadd.f32 %v432_v43, %v341_v42 }
  0xfe   :  { %v473_v49 = vpop.f32.mrb[5].mxu0 }
  0xff   :  { %v364_v51 = vadd.f32 %v433_v46, %v344_v47  ;;  %v474_v52 = vadd.f32 %v473_v49, %v472_v48  ;;  %v475_v53 = vpop.f32.mrb[6].mxu0 }
 0x100   :  { %v476_v55 = vpop.f32.mrb[7].mxu0 }
 0x101   :  { %v441_v56 = vpack.c.bf16 %v364_v51, %v363_v50  ;;  %v300_v57 = vadd.f32 %v474_v52, %v391_v32  ;;  %v477_v58 = vadd.f32 %v476_v55, %v475_v53 }
 0x103   :  { %442 = vst [vmem:[%s674_s4] sm:$0xff] %v441_v56   ;;  %v349_v59 = vadd.f32 %v506_v36, %v300_v57  ;;  %v303_v61 = vadd.f32 %v477_v58, %v391_v32 }
 0x105   :  { %v352_v63 = vadd.f32 %v507_v41, %v303_v61  ;;  %v365_v0 = vadd.f32 %v436_v60, %v349_v59 }
 0x107   :  { %v366_v1 = vadd.f32 %v437_v62, %v352_v63 }
 0x109   :  { %v446_v2 = vpack.c.bf16 %v366_v1, %v365_v0 }
 0x10b   :  { %449 = vst [vmem:[%s674_s4 + $0x8] sm:$0xff] %v446_v2  }

// kernel: backbone_base_agent_swin_forward.12
= control target key start
LH: loop header
LB: loop body
LE: loop exit
PB: predicated region body
PF: predicated region fallthrough
CT: control target
= control target key end

     0   :  { %s7731_s1 = inlined_call_operand.vmem [shape: bf16[1536,768], index: 1, kind: input, shape index: {}]   ;;  %s7732_s0 = inlined_call_operand.vmem [shape: bf16[8,1536], index: 0, kind: input, shape index: {}]   ;;  %s7733_s2 = inlined_call_operand.vmem [shape: f32[1,768], index: 2, kind: input, shape index: {}]   ;;  %s7734_s3 = inlined_call_operand.vmem [shape: bf16[8,768], index: 3, kind: output, shape index: {}]  }
   0x1   :  { %v4977_v0 = vld [vmem:[%s7731_s1 + $0x4] ss:$24 sps:$4 sm:$0xff]   ;;  %v4981_v2 = vld [vmem:[%s7731_s1] ss:$24 sps:$4 sm:$0xff]   ;;  %v4983_v4 = vld [vmem:[%s7731_s1 + $0x34] ss:$24 sps:$4 sm:$0xff]  }
   0x2   :  { %v4979_v1 = vld [vmem:[%s7731_s1 + $0x904] ss:$24 sps:$4 sm:$0xff]   ;;  %3550 = vmatprep.subr.bf16.mxu1 %v4977_v0  ;;  %v4982_v3 = vld [vmem:[%s7731_s1 + $0x900] ss:$24 sps:$4 sm:$0xff]   ;;  %v4985_v5 = vld [vmem:[%s7731_s1 + $0x934] ss:$24 sps:$4 sm:$0xff]  }
   0x3   :  { %3673 = vmatprep.subr.bf16.mxu0 %v4979_v1  ;;  %3551 = vmatpush1.bf16.msra.mxu1 %v4981_v2  ;;  %v4987_v6 = vld [vmem:[%s7731_s1 + $0x30] ss:$24 sps:$4 sm:$0xff]   ;;  %v4989_v8 = vld [vmem:[%s7731_s1 + $0x64] ss:$24 sps:$4 sm:$0xff]   ;;  %v4993_v10 = vld [vmem:[%s7731_s1 + $0x60] ss:$24 sps:$4 sm:$0xff]  }
   0x4   :  { %3674 = vmatpush1.bf16.msra.mxu0 %v4982_v3  ;;  %3552 = vmatprep.subr.bf16.mxu1 %v4983_v4  ;;  %v4988_v7 = vld [vmem:[%s7731_s1 + $0x930] ss:$24 sps:$4 sm:$0xff]   ;;  %v4991_v9 = vld [vmem:[%s7731_s1 + $0x964] ss:$24 sps:$4 sm:$0xff]   ;;  %v4994_v11 = vld [vmem:[%s7731_s1 + $0x960] ss:$24 sps:$4 sm:$0xff]  }
   0x5   :  { %3675 = vmatprep.subr.bf16.mxu0 %v4985_v5  ;;  %v4995_v12 = vld [vmem:[%s7731_s1 + $0x94] ss:$24 sps:$4 sm:$0xff]   ;;  %v4999_v14 = vld [vmem:[%s7731_s1 + $0x90] ss:$24 sps:$4 sm:$0xff]   ;;  %v5001_v16 = vld [vmem:[%s7731_s1 + $0xc4] ss:$24 sps:$4 sm:$0xff]  }
   0x6   :  { %v4997_v13 = vld [vmem:[%s7731_s1 + $0x994] ss:$24 sps:$4 sm:$0xff]   ;;  %v5000_v15 = vld [vmem:[%s7731_s1 + $0x990] ss:$24 sps:$4 sm:$0xff]   ;;  %v5003_v17 = vld [vmem:[%s7731_s1 + $0x9c4] ss:$24 sps:$4 sm:$0xff]  }
   0x7   :  { %3553 = vmatpush1.bf16.msra.mxu1 %v4987_v6  ;;  %v5005_v18 = vld [vmem:[%s7731_s1 + $0xc0] ss:$24 sps:$4 sm:$0xff]   ;;  %v5007_v20 = vld [vmem:[%s7731_s1 + $0xf4] ss:$24 sps:$4 sm:$0xff]   ;;  %v5011_v22 = vld [vmem:[%s7731_s1 + $0xf0] ss:$24 sps:$4 sm:$0xff]  }
   0x8   :  { %3676 = vmatpush1.bf16.msra.mxu0 %v4988_v7  ;;  %3554 = vmatprep.subr.bf16.mxu1 %v4989_v8  ;;  %v5006_v19 = vld [vmem:[%s7731_s1 + $0x9c0] ss:$24 sps:$4 sm:$0xff]   ;;  %v5009_v21 = vld [vmem:[%s7731_s1 + $0x9f4] ss:$24 sps:$4 sm:$0xff]   ;;  %v5012_v23 = vld [vmem:[%s7731_s1 + $0x9f0] ss:$24 sps:$4 sm:$0xff]  }
   0x9   :  { %3677 = vmatprep.subr.bf16.mxu0 %v4991_v9  ;;  %v5013_v24 = vld [vmem:[%s7731_s1 + $0x124] ss:$24 sps:$4 sm:$0xff]   ;;  %v5017_v26 = vld [vmem:[%s7731_s1 + $0x120] ss:$24 sps:$4 sm:$0xff]   ;;  %v5019_v28 = vld [vmem:[%s7731_s1 + $0x154] ss:$24 sps:$4 sm:$0xff]  }
   0xa   :  { %v5015_v25 = vld [vmem:[%s7731_s1 + $0xa24] ss:$24 sps:$4 sm:$0xff]   ;;  %v5018_v27 = vld [vmem:[%s7731_s1 + $0xa20] ss:$24 sps:$4 sm:$0xff]   ;;  %v5021_v29 = vld [vmem:[%s7731_s1 + $0xa54] ss:$24 sps:$4 sm:$0xff]  }
   0xb   :  { %3555 = vmatpush1.bf16.msra.mxu1 %v4993_v10  ;;  %v5023_v30 = vld [vmem:[%s7731_s1 + $0x150] ss:$24 sps:$4 sm:$0xff]   ;;  %v5025_v32 = vld [vmem:[%s7731_s1 + $0x184] ss:$24 sps:$4 sm:$0xff]   ;;  %v5029_v34 = vld [vmem:[%s7731_s1 + $0x180] ss:$24 sps:$4 sm:$0xff]  }
   0xc   :  { %3678 = vmatpush1.bf16.msra.mxu0 %v4994_v11  ;;  %3556 = vmatprep.subr.bf16.mxu1 %v4995_v12  ;;  %v5024_v31 = vld [vmem:[%s7731_s1 + $0xa50] ss:$24 sps:$4 sm:$0xff]   ;;  %v5027_v33 = vld [vmem:[%s7731_s1 + $0xa84] ss:$24 sps:$4 sm:$0xff]   ;;  %v5030_v35 = vld [vmem:[%s7731_s1 + $0xa80] ss:$24 sps:$4 sm:$0xff]  }
   0xd   :  { %3679 = vmatprep.subr.bf16.mxu0 %v4997_v13  ;;  %v5031_v36 = vld [vmem:[%s7731_s1 + $0x1b4] ss:$24 sps:$4 sm:$0xff]   ;;  %v5035_v38 = vld [vmem:[%s7731_s1 + $0x1b0] ss:$24 sps:$4 sm:$0xff]   ;;  %v5037_v40 = vld [vmem:[%s7731_s1 + $0x1e4] ss:$24 sps:$4 sm:$0xff]  }
   0xe   :  { %v5033_v37 = vld [vmem:[%s7731_s1 + $0xab4] ss:$24 sps:$4 sm:$0xff]   ;;  %v5036_v39 = vld [vmem:[%s7731_s1 + $0xab0] ss:$24 sps:$4 sm:$0xff]   ;;  %v5039_v41 = vld [vmem:[%s7731_s1 + $0xae4] ss:$24 sps:$4 sm:$0xff]  }
   0xf   :  { %3557 = vmatpush1.bf16.msra.mxu1 %v4999_v14  ;;  %v5041_v42 = vld [vmem:[%s7731_s1 + $0x1e0] ss:$24 sps:$4 sm:$0xff]   ;;  %v5043_v44 = vld [vmem:[%s7731_s1 + $0x214] ss:$24 sps:$4 sm:$0xff]   ;;  %v5047_v47 = vld [vmem:[%s7731_s1 + $0x210] ss:$24 sps:$4 sm:$0xff]  }
  0x10   :  { %3680 = vmatpush1.bf16.msra.mxu0 %v5000_v15  ;;  %3558 = vmatprep.subr.bf16.mxu1 %v5001_v16  ;;  %v5042_v43 = vld [vmem:[%s7731_s1 + $0xae0] ss:$24 sps:$4 sm:$0xff]   ;;  %v5045_v45 = vld [vmem:[%s7731_s1 + $0xb14] ss:$24 sps:$4 sm:$0xff]   ;;  %v5048_v49 = vld [vmem:[%s7731_s1 + $0xb10] ss:$24 sps:$4 sm:$0xff]  }
  0x11   :  { %3681 = vmatprep.subr.bf16.mxu0 %v5003_v17  ;;  %v14_v46 = vld [vmem:[%s7732_s0] sm:$0xff]  ;;  %v17_v50 = vld [vmem:[%s7732_s0 + $0x18] sm:$0xff]  ;;  %v5055_v56 = vld [vmem:[%s7731_s1 + $0x274] ss:$24 sps:$4 sm:$0xff]  }
  0x12   :  { %v6017_v48 = vcombine.high %v14_v46, %v14_v46  ;;  %v5049_v51 = vld [vmem:[%s7731_s1 + $0x244] ss:$24 sps:$4 sm:$0xff]   ;;  %v6031_v53 = vcombine.high %v17_v50, %v17_v50  ;;  %v5053_v54 = vld [vmem:[%s7731_s1 + $0x240] ss:$24 sps:$4 sm:$0xff]   ;;  %v5057_v57 = vld [vmem:[%s7731_s1 + $0xb74] ss:$24 sps:$4 sm:$0xff]   ;;  %v6083_v6 = vcombine.low %v14_v46, %v14_v46  ;;  %v6085_v7 = vcombine.low %v17_v50, %v17_v50 }
  0x13   :  { %3559 = vmatpush1.bf16.msra.mxu1 %v5005_v18  ;;  %v5051_v52 = vld [vmem:[%s7731_s1 + $0xb44] ss:$24 sps:$4 sm:$0xff]   ;;  %v5054_v55 = vld [vmem:[%s7731_s1 + $0xb40] ss:$24 sps:$4 sm:$0xff]   ;;  %v5059_v58 = vld [vmem:[%s7731_s1 + $0x270] ss:$24 sps:$4 sm:$0xff]  }
  0x14   :  { %3682 = vmatpush1.bf16.msra.mxu0 %v5006_v19  ;;  %3560 = vmatprep.subr.bf16.mxu1 %v5007_v20  ;;  %v5060_v59 = vld [vmem:[%s7731_s1 + $0xb70] ss:$24 sps:$4 sm:$0xff]   ;;  %v5061_v60 = vld [vmem:[%s7731_s1 + $0x2a4] ss:$24 sps:$4 sm:$0xff]   ;;  %v5065_v62 = vld [vmem:[%s7731_s1 + $0x2a0] ss:$24 sps:$4 sm:$0xff]  }
  0x15   :  { %3683 = vmatprep.subr.bf16.mxu0 %v5009_v21  ;;  %3582 = vmatprep.mubr.bf16.mxu1 %v6017_v48  ;;  %v5063_v61 = vld [vmem:[%s7731_s1 + $0xba4] ss:$24 sps:$4 sm:$0xff]   ;;  %v5066_v63 = vld [vmem:[%s7731_s1 + $0xba0] ss:$24 sps:$4 sm:$0xff]   ;;  %v5067_v0 = vld [vmem:[%s7731_s1 + $0x2d4] ss:$24 sps:$4 sm:$0xff]  }
  0x16   :  { %3705 = vmatprep.mubr.bf16.mxu0 %v6031_v53  ;;  %v5069_v1 = vld [vmem:[%s7731_s1 + $0xbd4] ss:$24 sps:$4 sm:$0xff]   ;;  %v5071_v2 = vld [vmem:[%s7731_s1 + $0x2d0] ss:$24 sps:$4 sm:$0xff]   ;;  %v5076_v4 = vld [vmem:[%s7731_s1 + $0x304] ss:$24 sps:$4 sm:$0xff]  }
  0x17   :  { %3561 = vmatpush1.bf16.msra.mxu1 %v5011_v22  ;;  %v5072_v3 = vld [vmem:[%s7731_s1 + $0xbd0] ss:$24 sps:$4 sm:$0xff]   ;;  %v5080_v5 = vld [vmem:[%s7731_s1 + $0xc04] ss:$24 sps:$4 sm:$0xff]   ;;  %v5074_v8 = vld [vmem:[%s7731_s1 + $0x300] ss:$24 sps:$4 sm:$0xff]  }
  0x18   :  { %3684 = vmatpush1.bf16.msra.mxu0 %v5012_v23  ;;  %3562 = vmatprep.subr.bf16.mxu1 %v5013_v24  ;;  %v5078_v9 = vld [vmem:[%s7731_s1 + $0xc00] ss:$24 sps:$4 sm:$0xff]   ;;  %v5085_v10 = vld [vmem:[%s7731_s1 + $0x334] ss:$24 sps:$4 sm:$0xff]   ;;  %v5083_v12 = vld [vmem:[%s7731_s1 + $0x330] ss:$24 sps:$4 sm:$0xff]  }
  0x19   :  { %3685 = vmatprep.subr.bf16.mxu0 %v5015_v25  ;;  %v5088_v11 = vld [vmem:[%s7731_s1 + $0xc34] ss:$24 sps:$4 sm:$0xff]   ;;  %v5086_v13 = vld [vmem:[%s7731_s1 + $0xc30] ss:$24 sps:$4 sm:$0xff]   ;;  %v5091_v14 = vld [vmem:[%s7731_s1 + $0x364] ss:$24 sps:$4 sm:$0xff]  }
  0x1a   :  { %v5094_v15 = vld [vmem:[%s7731_s1 + $0xc64] ss:$24 sps:$4 sm:$0xff]   ;;  %v5089_v16 = vld [vmem:[%s7731_s1 + $0x360] ss:$24 sps:$4 sm:$0xff]   ;;  %v5097_v18 = vld [vmem:[%s7731_s1 + $0x394] ss:$24 sps:$4 sm:$0xff]  }
  0x1b   :  { %3563 = vmatpush1.bf16.msra.mxu1 %v5017_v26  ;;  %v5092_v17 = vld [vmem:[%s7731_s1 + $0xc60] ss:$24 sps:$4 sm:$0xff]   ;;  %v5100_v19 = vld [vmem:[%s7731_s1 + $0xc94] ss:$24 sps:$4 sm:$0xff]   ;;  %v5095_v20 = vld [vmem:[%s7731_s1 + $0x390] ss:$24 sps:$4 sm:$0xff]  }
  0x1c   :  { %3686 = vmatpush1.bf16.msra.mxu0 %v5018_v27  ;;  %3564 = vmatprep.subr.bf16.mxu1 %v5019_v28  ;;  %v5098_v21 = vld [vmem:[%s7731_s1 + $0xc90] ss:$24 sps:$4 sm:$0xff]   ;;  %v5103_v22 = vld [vmem:[%s7731_s1 + $0x3c4] ss:$24 sps:$4 sm:$0xff]   ;;  %v5101_v24 = vld [vmem:[%s7731_s1 + $0x3c0] ss:$24 sps:$4 sm:$0xff]  }
  0x1d   :  { %3687 = vmatprep.subr.bf16.mxu0 %v5021_v29  ;;  %v5106_v23 = vld [vmem:[%s7731_s1 + $0xcc4] ss:$24 sps:$4 sm:$0xff]   ;;  %v5104_v25 = vld [vmem:[%s7731_s1 + $0xcc0] ss:$24 sps:$4 sm:$0xff]   ;;  %v5109_v26 = vld [vmem:[%s7731_s1 + $0x3f4] ss:$24 sps:$4 sm:$0xff]  }
  0x1e   :  { %v5112_v27 = vld [vmem:[%s7731_s1 + $0xcf4] ss:$24 sps:$4 sm:$0xff]   ;;  %v5107_v28 = vld [vmem:[%s7731_s1 + $0x3f0] ss:$24 sps:$4 sm:$0xff]  }
  0x1f   :  { %3565 = vmatpush1.bf16.msra.mxu1 %v5023_v30  ;;  %v5110_v29 = vld [vmem:[%s7731_s1 + $0xcf0] ss:$24 sps:$4 sm:$0xff]   ;;  %v5115_v30 = vld [vmem:[%s7731_s1 + $0x424] ss:$24 sps:$4 sm:$0xff]   ;;  %v5133_v46 = vld [vmem:[%s7731_s1 + $0x4b4] ss:$24 sps:$4 sm:$0xff]  }
  0x20   :  { %3688 = vmatpush1.bf16.msra.mxu0 %v5024_v31  ;;  %3566 = vmatprep.subr.bf16.mxu1 %v5025_v32  ;;  %v5118_v31 = vld [vmem:[%s7731_s1 + $0xd24] ss:$24 sps:$4 sm:$0xff]   ;;  %v6164_v32 = vld [vmem:[%s7732_s0 + $0x8] sm:$0xff] }
  0x21   :  { %3689 = vmatprep.subr.bf16.mxu0 %v5027_v33  ;;  %v5113_v33 = vld [vmem:[%s7731_s1 + $0x420] ss:$24 sps:$4 sm:$0xff]   ;;  %v5134_v50 = vld [vmem:[%s7731_s1 + $0xdb0] ss:$24 sps:$4 sm:$0xff]  }
  0x23   :  { %3567 = vmatpush1.bf16.msra.mxu1 %v5029_v34  ;;  %v5116_v34 = vld [vmem:[%s7731_s1 + $0xd20] ss:$24 sps:$4 sm:$0xff]  }
  0x24   :  { %3690 = vmatpush1.bf16.msra.mxu0 %v5030_v35  ;;  %3568 = vmatprep.subr.bf16.mxu1 %v5031_v36  ;;  %v6174_v35 = vcombine.high %v6164_v32, %v6164_v32  ;;  %v6179_v36 = vld [vmem:[%s7732_s0 + $0x20] sm:$0xff] }
  0x25   :  { %3691 = vmatprep.subr.bf16.mxu0 %v5033_v37  ;;  %v5121_v37 = vld [vmem:[%s7731_s1 + $0x454] ss:$24 sps:$4 sm:$0xff]  }
  0x27   :  { %3569 = vmatpush1.bf16.msra.mxu1 %v5035_v38  ;;  %v6186_v38 = vcombine.high %v6179_v36, %v6179_v36 }
  0x28   :  { %3692 = vmatpush1.bf16.msra.mxu0 %v5036_v39  ;;  %3570 = vmatprep.subr.bf16.mxu1 %v5037_v40  ;;  %v5124_v39 = vld [vmem:[%s7731_s1 + $0xd54] ss:$24 sps:$4 sm:$0xff]   ;;  %v5119_v40 = vld [vmem:[%s7731_s1 + $0x450] ss:$24 sps:$4 sm:$0xff]  }
  0x29   :  { %3693 = vmatprep.subr.bf16.mxu0 %v5039_v41  ;;  %v5122_v41 = vld [vmem:[%s7731_s1 + $0xd50] ss:$24 sps:$4 sm:$0xff]  }
  0x2b   :  { %3571 = vmatpush1.bf16.msra.mxu1 %v5041_v42  ;;  %v5127_v42 = vld [vmem:[%s7731_s1 + $0x484] ss:$24 sps:$4 sm:$0xff]  }
  0x2c   :  { %3694 = vmatpush1.bf16.msra.mxu0 %v5042_v43  ;;  %3572 = vmatprep.subr.bf16.mxu1 %v5043_v44  ;;  %v5130_v43 = vld [vmem:[%s7731_s1 + $0xd84] ss:$24 sps:$4 sm:$0xff]   ;;  %v5125_v44 = vld [vmem:[%s7731_s1 + $0x480] ss:$24 sps:$4 sm:$0xff]  }
  0x2d   :  { %3695 = vmatprep.subr.bf16.mxu0 %v5045_v45  ;;  %v5128_v45 = vld [vmem:[%s7731_s1 + $0xd80] ss:$24 sps:$4 sm:$0xff]  }
  0x2f   :  { %3573 = vmatpush1.bf16.msra.mxu1 %v5047_v47  ;;  %v5136_v47 = vld [vmem:[%s7731_s1 + $0xdb4] ss:$24 sps:$4 sm:$0xff]  }
  0x30   :  { %3696 = vmatpush1.bf16.msra.mxu0 %v5048_v49  ;;  %3574 = vmatprep.subr.bf16.mxu1 %v5049_v51  ;;  %v5131_v49 = vld [vmem:[%s7731_s1 + $0x4b0] ss:$24 sps:$4 sm:$0xff]   ;;  %v5139_v51 = vld [vmem:[%s7731_s1 + $0x4e4] ss:$24 sps:$4 sm:$0xff]  }
  0x31   :  { %3697 = vmatprep.subr.bf16.mxu0 %v5051_v52  ;;  %v5142_v52 = vld [vmem:[%s7731_s1 + $0xde4] ss:$24 sps:$4 sm:$0xff]  }
  0x33   :  { %3575 = vmatpush1.bf16.msra.mxu1 %v5053_v54  ;;  %v5137_v54 = vld [vmem:[%s7731_s1 + $0x4e0] ss:$24 sps:$4 sm:$0xff]  }
  0x34   :  { %3698 = vmatpush1.bf16.msra.mxu0 %v5054_v55  ;;  %3576 = vmatprep.subr.bf16.mxu1 %v5055_v56  ;;  %v5140_v55 = vld [vmem:[%s7731_s1 + $0xde0] ss:$24 sps:$4 sm:$0xff]   ;;  %v5145_v56 = vld [vmem:[%s7731_s1 + $0x514] ss:$24 sps:$4 sm:$0xff]  }
  0x35   :  { %3699 = vmatprep.subr.bf16.mxu0 %v5057_v57  ;;  %v5148_v57 = vld [vmem:[%s7731_s1 + $0xe14] ss:$24 sps:$4 sm:$0xff]  }
  0x37   :  { %3577 = vmatpush1.bf16.msra.mxu1 %v5059_v58  ;;  %v5143_v58 = vld [vmem:[%s7731_s1 + $0x510] ss:$24 sps:$4 sm:$0xff]  }
  0x38   :  { %3700 = vmatpush1.bf16.msra.mxu0 %v5060_v59  ;;  %3578 = vmatprep.subr.bf16.mxu1 %v5061_v60  ;;  %v5146_v59 = vld [vmem:[%s7731_s1 + $0xe10] ss:$24 sps:$4 sm:$0xff]   ;;  %v5151_v60 = vld [vmem:[%s7731_s1 + $0x544] ss:$24 sps:$4 sm:$0xff]  }
  0x39   :  { %3701 = vmatprep.subr.bf16.mxu0 %v5063_v61  ;;  %v5154_v61 = vld [vmem:[%s7731_s1 + $0xe44] ss:$24 sps:$4 sm:$0xff]  }
  0x3b   :  { %3579 = vmatpush1.bf16.msra.mxu1 %v5065_v62  ;;  %v5149_v62 = vld [vmem:[%s7731_s1 + $0x540] ss:$24 sps:$4 sm:$0xff]  }
  0x3c   :  { %3702 = vmatpush1.bf16.msra.mxu0 %v5066_v63  ;;  %3580 = vmatprep.subr.bf16.mxu1 %v5067_v0  ;;  %v5152_v63 = vld [vmem:[%s7731_s1 + $0xe40] ss:$24 sps:$4 sm:$0xff]   ;;  %v5157_v0 = vld [vmem:[%s7731_s1 + $0x574] ss:$24 sps:$4 sm:$0xff]  }
  0x3d   :  { %3703 = vmatprep.subr.bf16.mxu0 %v5069_v1  ;;  %v5160_v1 = vld [vmem:[%s7731_s1 + $0xe74] ss:$24 sps:$4 sm:$0xff]  }
  0x3f   :  { %3581 = vmatpush1.bf16.msra.mxu1 %v5071_v2  ;;  %v5155_v2 = vld [vmem:[%s7731_s1 + $0x570] ss:$24 sps:$4 sm:$0xff]  }
  0x40   :  { %3704 = vmatpush1.bf16.msra.mxu0 %v5072_v3  ;;  %3591 = vmatprep.subr.bf16.mxu1 %v5076_v4  ;;  %v5158_v3 = vld [vmem:[%s7731_s1 + $0xe70] ss:$24 sps:$4 sm:$0xff]   ;;  %v5163_v4 = vld [vmem:[%s7731_s1 + $0x5a4] ss:$24 sps:$4 sm:$0xff]  }
  0x41   :  { %3714 = vmatprep.subr.bf16.mxu0 %v5080_v5  ;;  %v5166_v5 = vld [vmem:[%s7731_s1 + $0xea4] ss:$24 sps:$4 sm:$0xff]  }
  0x42   :  { %3583 = vmatmul.mubr.bf16.vlgmr.msra.gmra.mrb[0].mxu1 %v6083_v6 }
  0x43   :  { %3706 = vmatmul.mubr.bf16.vlgmr.msra.gmra.mrb[0].mxu0 %v6085_v7  ;;  %3592 = vmatpush1.bf16.msra.mxu1 %v5074_v8  ;;  %v5161_v8 = vld [vmem:[%s7731_s1 + $0x5a0] ss:$24 sps:$4 sm:$0xff]  }
  0x44   :  { %3715 = vmatpush1.bf16.msra.mxu0 %v5078_v9  ;;  %3593 = vmatprep.subr.bf16.mxu1 %v5085_v10  ;;  %v5164_v9 = vld [vmem:[%s7731_s1 + $0xea0] ss:$24 sps:$4 sm:$0xff]   ;;  %v5169_v10 = vld [vmem:[%s7731_s1 + $0x5d4] ss:$24 sps:$4 sm:$0xff]  }
  0x45   :  { %3716 = vmatprep.subr.bf16.mxu0 %v5088_v11  ;;  %3623 = vmatprep.mubr.bf16.mxu1 %v6174_v35  ;;  %v5172_v11 = vld [vmem:[%s7731_s1 + $0xed4] ss:$24 sps:$4 sm:$0xff]  }
  0x46   :  { %3746 = vmatprep.mubr.bf16.mxu0 %v6186_v38 }
  0x47   :  { %3594 = vmatpush1.bf16.msra.mxu1 %v5083_v12  ;;  %v5167_v12 = vld [vmem:[%s7731_s1 + $0x5d0] ss:$24 sps:$4 sm:$0xff]  }
  0x48   :  { %3717 = vmatpush1.bf16.msra.mxu0 %v5086_v13  ;;  %3595 = vmatprep.subr.bf16.mxu1 %v5091_v14  ;;  %v5170_v13 = vld [vmem:[%s7731_s1 + $0xed0] ss:$24 sps:$4 sm:$0xff]   ;;  %v5177_v14 = vld [vmem:[%s7731_s1 + $0x604] ss:$24 sps:$4 sm:$0xff]  }
  0x49   :  { %3718 = vmatprep.subr.bf16.mxu0 %v5094_v15  ;;  %v5182_v15 = vld [vmem:[%s7731_s1 + $0xf04] ss:$24 sps:$4 sm:$0xff]  }
  0x4b   :  { %3596 = vmatpush1.bf16.msra.mxu1 %v5089_v16  ;;  %v6303_v16 = vcombine.low %v6164_v32, %v6164_v32  ;;  %v5197_v32 = vld [vmem:[%s7731_s1 + $0x694] ss:$24 sps:$4 sm:$0xff]  }
  0x4c   :  { %3719 = vmatpush1.bf16.msra.mxu0 %v5092_v17  ;;  %3597 = vmatprep.subr.bf16.mxu1 %v5097_v18  ;;  %v5175_v17 = vld [vmem:[%s7731_s1 + $0x600] ss:$24 sps:$4 sm:$0xff]   ;;  %v6310_v18 = vcombine.low %v6179_v36, %v6179_v36  ;;  %v5198_v36 = vld [vmem:[%s7731_s1 + $0xf90] ss:$24 sps:$4 sm:$0xff]  }
  0x4d   :  { %3720 = vmatprep.subr.bf16.mxu0 %v5100_v19  ;;  %v5180_v19 = vld [vmem:[%s7731_s1 + $0xf00] ss:$24 sps:$4 sm:$0xff]  }
  0x4f   :  { %3598 = vmatpush1.bf16.msra.mxu1 %v5095_v20  ;;  %v5185_v20 = vld [vmem:[%s7731_s1 + $0x634] ss:$24 sps:$4 sm:$0xff]  }
  0x50   :  { %3721 = vmatpush1.bf16.msra.mxu0 %v5098_v21  ;;  %3599 = vmatprep.subr.bf16.mxu1 %v5103_v22  ;;  %v5188_v21 = vld [vmem:[%s7731_s1 + $0xf34] ss:$24 sps:$4 sm:$0xff]  }
  0x51   :  { %3722 = vmatprep.subr.bf16.mxu0 %v5106_v23  ;;  %v6324_v22 = vld [vmem:[%s7732_s0 + $0x10] sm:$0xff]  ;;  %v6329_v23 = vld [vmem:[%s7732_s0 + $0x28] sm:$0xff] }
  0x53   :  { %3600 = vmatpush1.bf16.msra.mxu1 %v5101_v24  ;;  %v6333_v24 = vcombine.high %v6324_v22, %v6324_v22 }
  0x54   :  { %3723 = vmatpush1.bf16.msra.mxu0 %v5104_v25  ;;  %3601 = vmatprep.subr.bf16.mxu1 %v5109_v26  ;;  %v6337_v25 = vcombine.high %v6329_v23, %v6329_v23  ;;  %v5183_v26 = vld [vmem:[%s7731_s1 + $0x630] ss:$24 sps:$4 sm:$0xff]  }
  0x55   :  { %3724 = vmatprep.subr.bf16.mxu0 %v5112_v27  ;;  %v5186_v27 = vld [vmem:[%s7731_s1 + $0xf30] ss:$24 sps:$4 sm:$0xff]  }
  0x57   :  { %3602 = vmatpush1.bf16.msra.mxu1 %v5107_v28  ;;  %v5191_v28 = vld [vmem:[%s7731_s1 + $0x664] ss:$24 sps:$4 sm:$0xff]  }
  0x58   :  { %3725 = vmatpush1.bf16.msra.mxu0 %v5110_v29  ;;  %3603 = vmatprep.subr.bf16.mxu1 %v5115_v30  ;;  %v5194_v29 = vld [vmem:[%s7731_s1 + $0xf64] ss:$24 sps:$4 sm:$0xff]   ;;  %v5189_v30 = vld [vmem:[%s7731_s1 + $0x660] ss:$24 sps:$4 sm:$0xff]  }
  0x59   :  { %3726 = vmatprep.subr.bf16.mxu0 %v5118_v31  ;;  %v5192_v31 = vld [vmem:[%s7731_s1 + $0xf60] ss:$24 sps:$4 sm:$0xff]  }
  0x5b   :  { %3604 = vmatpush1.bf16.msra.mxu1 %v5113_v33  ;;  %v5200_v33 = vld [vmem:[%s7731_s1 + $0xf94] ss:$24 sps:$4 sm:$0xff]  }
  0x5c   :  { %3727 = vmatpush1.bf16.msra.mxu0 %v5116_v34  ;;  %3605 = vmatprep.subr.bf16.mxu1 %v5121_v37  ;;  %v5195_v34 = vld [vmem:[%s7731_s1 + $0x690] ss:$24 sps:$4 sm:$0xff]   ;;  %v5203_v37 = vld [vmem:[%s7731_s1 + $0x6c4] ss:$24 sps:$4 sm:$0xff]  }
  0x5d   :  { %3728 = vmatprep.subr.bf16.mxu0 %v5124_v39  ;;  %v5206_v39 = vld [vmem:[%s7731_s1 + $0xfc4] ss:$24 sps:$4 sm:$0xff]  }
  0x5f   :  { %3606 = vmatpush1.bf16.msra.mxu1 %v5119_v40  ;;  %v5201_v40 = vld [vmem:[%s7731_s1 + $0x6c0] ss:$24 sps:$4 sm:$0xff]  }
  0x60   :  { %3729 = vmatpush1.bf16.msra.mxu0 %v5122_v41  ;;  %3607 = vmatprep.subr.bf16.mxu1 %v5127_v42  ;;  %v5204_v41 = vld [vmem:[%s7731_s1 + $0xfc0] ss:$24 sps:$4 sm:$0xff]   ;;  %v5209_v42 = vld [vmem:[%s7731_s1 + $0x6f4] ss:$24 sps:$4 sm:$0xff]  }
  0x61   :  { %3730 = vmatprep.subr.bf16.mxu0 %v5130_v43  ;;  %v5212_v43 = vld [vmem:[%s7731_s1 + $0xff4] ss:$24 sps:$4 sm:$0xff]  }
  0x63   :  { %3608 = vmatpush1.bf16.msra.mxu1 %v5125_v44  ;;  %v5207_v44 = vld [vmem:[%s7731_s1 + $0x6f0] ss:$24 sps:$4 sm:$0xff]  }
  0x64   :  { %3731 = vmatpush1.bf16.msra.mxu0 %v5128_v45  ;;  %3609 = vmatprep.subr.bf16.mxu1 %v5133_v46  ;;  %v5210_v45 = vld [vmem:[%s7731_s1 + $0xff0] ss:$24 sps:$4 sm:$0xff]   ;;  %v5215_v46 = vld [vmem:[%s7731_s1 + $0x724] ss:$24 sps:$4 sm:$0xff]  }
  0x65   :  { %3732 = vmatprep.subr.bf16.mxu0 %v5136_v47  ;;  %v5218_v47 = vld [vmem:[%s7731_s1 + $0x1024] ss:$24 sps:$4 sm:$0xff]  }
  0x67   :  { %3610 = vmatpush1.bf16.msra.mxu1 %v5131_v49  ;;  %v5213_v49 = vld [vmem:[%s7731_s1 + $0x720] ss:$24 sps:$4 sm:$0xff]  }
  0x68   :  { %3733 = vmatpush1.bf16.msra.mxu0 %v5134_v50  ;;  %3611 = vmatprep.subr.bf16.mxu1 %v5139_v51  ;;  %v5216_v50 = vld [vmem:[%s7731_s1 + $0x1020] ss:$24 sps:$4 sm:$0xff]   ;;  %v5221_v51 = vld [vmem:[%s7731_s1 + $0x754] ss:$24 sps:$4 sm:$0xff]  }
  0x69   :  { %3734 = vmatprep.subr.bf16.mxu0 %v5142_v52  ;;  %v5224_v52 = vld [vmem:[%s7731_s1 + $0x1054] ss:$24 sps:$4 sm:$0xff]  }
  0x6b   :  { %3612 = vmatpush1.bf16.msra.mxu1 %v5137_v54  ;;  %v5219_v54 = vld [vmem:[%s7731_s1 + $0x750] ss:$24 sps:$4 sm:$0xff]  }
  0x6c   :  { %3735 = vmatpush1.bf16.msra.mxu0 %v5140_v55  ;;  %3613 = vmatprep.subr.bf16.mxu1 %v5145_v56  ;;  %v5222_v55 = vld [vmem:[%s7731_s1 + $0x1050] ss:$24 sps:$4 sm:$0xff]   ;;  %v5227_v56 = vld [vmem:[%s7731_s1 + $0x784] ss:$24 sps:$4 sm:$0xff]  }
  0x6d   :  { %3736 = vmatprep.subr.bf16.mxu0 %v5148_v57  ;;  %v5230_v57 = vld [vmem:[%s7731_s1 + $0x1084] ss:$24 sps:$4 sm:$0xff]  }
  0x6f   :  { %3614 = vmatpush1.bf16.msra.mxu1 %v5143_v58  ;;  %v5225_v58 = vld [vmem:[%s7731_s1 + $0x780] ss:$24 sps:$4 sm:$0xff]  }
  0x70   :  { %3737 = vmatpush1.bf16.msra.mxu0 %v5146_v59  ;;  %3615 = vmatprep.subr.bf16.mxu1 %v5151_v60  ;;  %v5228_v59 = vld [vmem:[%s7731_s1 + $0x1080] ss:$24 sps:$4 sm:$0xff]   ;;  %v5233_v60 = vld [vmem:[%s7731_s1 + $0x7b4] ss:$24 sps:$4 sm:$0xff]  }
  0x71   :  { %3738 = vmatprep.subr.bf16.mxu0 %v5154_v61  ;;  %v5236_v61 = vld [vmem:[%s7731_s1 + $0x10b4] ss:$24 sps:$4 sm:$0xff]  }
  0x73   :  { %3616 = vmatpush1.bf16.msra.mxu1 %v5149_v62  ;;  %v5231_v62 = vld [vmem:[%s7731_s1 + $0x7b0] ss:$24 sps:$4 sm:$0xff]  }
  0x74   :  { %3739 = vmatpush1.bf16.msra.mxu0 %v5152_v63  ;;  %3617 = vmatprep.subr.bf16.mxu1 %v5157_v0  ;;  %v5234_v63 = vld [vmem:[%s7731_s1 + $0x10b0] ss:$24 sps:$4 sm:$0xff]   ;;  %v5239_v0 = vld [vmem:[%s7731_s1 + $0x7e4] ss:$24 sps:$4 sm:$0xff]  }
  0x75   :  { %3740 = vmatprep.subr.bf16.mxu0 %v5160_v1  ;;  %v5242_v1 = vld [vmem:[%s7731_s1 + $0x10e4] ss:$24 sps:$4 sm:$0xff]  }
  0x77   :  { %3618 = vmatpush1.bf16.msra.mxu1 %v5155_v2  ;;  %v5237_v2 = vld [vmem:[%s7731_s1 + $0x7e0] ss:$24 sps:$4 sm:$0xff]  }
  0x78   :  { %3741 = vmatpush1.bf16.msra.mxu0 %v5158_v3  ;;  %3619 = vmatprep.subr.bf16.mxu1 %v5163_v4  ;;  %v5240_v3 = vld [vmem:[%s7731_s1 + $0x10e0] ss:$24 sps:$4 sm:$0xff]   ;;  %v5245_v4 = vld [vmem:[%s7731_s1 + $0x814] ss:$24 sps:$4 sm:$0xff]  }
  0x79   :  { %3742 = vmatprep.subr.bf16.mxu0 %v5166_v5  ;;  %v5248_v5 = vld [vmem:[%s7731_s1 + $0x1114] ss:$24 sps:$4 sm:$0xff]  }
  0x7b   :  { %3620 = vmatpush1.bf16.msra.mxu1 %v5161_v8  ;;  %v5243_v8 = vld [vmem:[%s7731_s1 + $0x810] ss:$24 sps:$4 sm:$0xff]  }
  0x7c   :  { %3743 = vmatpush1.bf16.msra.mxu0 %v5164_v9  ;;  %3621 = vmatprep.subr.bf16.mxu1 %v5169_v10  ;;  %v5246_v9 = vld [vmem:[%s7731_s1 + $0x1110] ss:$24 sps:$4 sm:$0xff]   ;;  %v5251_v10 = vld [vmem:[%s7731_s1 + $0x844] ss:$24 sps:$4 sm:$0xff]  }
  0x7d   :  { %3744 = vmatprep.subr.bf16.mxu0 %v5172_v11  ;;  %v5254_v11 = vld [vmem:[%s7731_s1 + $0x1144] ss:$24 sps:$4 sm:$0xff]  }
  0x7f   :  { %3622 = vmatpush1.bf16.msra.mxu1 %v5167_v12  ;;  %v5249_v12 = vld [vmem:[%s7731_s1 + $0x840] ss:$24 sps:$4 sm:$0xff]  }
  0x80   :  { %3745 = vmatpush1.bf16.msra.mxu0 %v5170_v13  ;;  %3632 = vmatprep.subr.bf16.mxu1 %v5177_v14  ;;  %v5252_v13 = vld [vmem:[%s7731_s1 + $0x1140] ss:$24 sps:$4 sm:$0xff]   ;;  %v5257_v14 = vld [vmem:[%s7731_s1 + $0x874] ss:$24 sps:$4 sm:$0xff]  }
  0x81   :  { %3755 = vmatprep.subr.bf16.mxu0 %v5182_v15  ;;  %v5260_v15 = vld [vmem:[%s7731_s1 + $0x1174] ss:$24 sps:$4 sm:$0xff]  }
  0x82   :  { %3624 = vmatmul.mubr.bf16.vlgmr.msra.gmra.mrb[0].mxu1 %v6303_v16 }
  0x83   :  { %3747 = vmatmul.mubr.bf16.vlgmr.msra.gmra.mrb[0].mxu0 %v6310_v18  ;;  %3633 = vmatpush1.bf16.msra.mxu1 %v5175_v17  ;;  %v5255_v17 = vld [vmem:[%s7731_s1 + $0x870] ss:$24 sps:$4 sm:$0xff]  }
  0x84   :  { %3756 = vmatpush1.bf16.msra.mxu0 %v5180_v19  ;;  %3634 = vmatprep.subr.bf16.mxu1 %v5185_v20  ;;  %v5258_v19 = vld [vmem:[%s7731_s1 + $0x1170] ss:$24 sps:$4 sm:$0xff]   ;;  %v5263_v20 = vld [vmem:[%s7731_s1 + $0x8a4] ss:$24 sps:$4 sm:$0xff]  }
  0x85   :  { %3757 = vmatprep.subr.bf16.mxu0 %v5188_v21  ;;  %3664 = vmatprep.mubr.bf16.mxu1 %v6333_v24  ;;  %v5266_v21 = vld [vmem:[%s7731_s1 + $0x11a4] ss:$24 sps:$4 sm:$0xff]  }
  0x86   :  { %3787 = vmatprep.mubr.bf16.mxu0 %v6337_v25 }
  0x87   :  { %3635 = vmatpush1.bf16.msra.mxu1 %v5183_v26  ;;  %v5261_v26 = vld [vmem:[%s7731_s1 + $0x8a0] ss:$24 sps:$4 sm:$0xff]  }
  0x88   :  { %3758 = vmatpush1.bf16.msra.mxu0 %v5186_v27  ;;  %3636 = vmatprep.subr.bf16.mxu1 %v5191_v28  ;;  %v5264_v27 = vld [vmem:[%s7731_s1 + $0x11a0] ss:$24 sps:$4 sm:$0xff]   ;;  %v5269_v28 = vld [vmem:[%s7731_s1 + $0x8d4] ss:$24 sps:$4 sm:$0xff]  }
  0x89   :  { %3759 = vmatprep.subr.bf16.mxu0 %v5194_v29  ;;  %v5272_v29 = vld [vmem:[%s7731_s1 + $0x11d4] ss:$24 sps:$4 sm:$0xff]  }
  0x8b   :  { %3637 = vmatpush1.bf16.msra.mxu1 %v5189_v30  ;;  %v5267_v30 = vld [vmem:[%s7731_s1 + $0x8d0] ss:$24 sps:$4 sm:$0xff]  }
  0x8c   :  { %3760 = vmatpush1.bf16.msra.mxu0 %v5192_v31  ;;  %3638 = vmatprep.subr.bf16.mxu1 %v5197_v32  ;;  %v5270_v31 = vld [vmem:[%s7731_s1 + $0x11d0] ss:$24 sps:$4 sm:$0xff]   ;;  %v5279_v32 = vld [vmem:[%s7731_s1 + $0xc] ss:$24 sps:$4 sm:$0xff]  }
  0x8d   :  { %3761 = vmatprep.subr.bf16.mxu0 %v5200_v33  ;;  %v5282_v33 = vld [vmem:[%s7731_s1 + $0x14] ss:$24 sps:$4 sm:$0xff]  }
  0x8f   :  { %3639 = vmatpush1.bf16.msra.mxu1 %v5195_v34  ;;  %v6525_v34 = vcombine.low %v6324_v22, %v6324_v22  ;;  %v5285_v22 = vld [vmem:[%s7731_s1 + $0x3c] ss:$24 sps:$4 sm:$0xff]  }
  0x90   :  { %3762 = vmatpush1.bf16.msra.mxu0 %v5198_v36  ;;  %3640 = vmatprep.subr.bf16.mxu1 %v5203_v37  ;;  %v6529_v36 = vcombine.low %v6329_v23, %v6329_v23  ;;  %v5277_v37 = vld [vmem:[%s7731_s1 + $0x8] ss:$24 sps:$4 sm:$0xff]   ;;  %v5288_v23 = vld [vmem:[%s7731_s1 + $0x44] ss:$24 sps:$4 sm:$0xff]  }
  0x91   :  { %3763 = vmatprep.subr.bf16.mxu0 %v5206_v39  ;;  %v5280_v39 = vld [vmem:[%s7731_s1 + $0x10] ss:$24 sps:$4 sm:$0xff]  }
  0x93   :  { %3641 = vmatpush1.bf16.msra.mxu1 %v5201_v40  ;;  %v5283_v40 = vld [vmem:[%s7731_s1 + $0x38] ss:$24 sps:$4 sm:$0xff]  }
  0x94   :  { %3764 = vmatpush1.bf16.msra.mxu0 %v5204_v41  ;;  %3642 = vmatprep.subr.bf16.mxu1 %v5209_v42  ;;  %v5286_v41 = vld [vmem:[%s7731_s1 + $0x40] ss:$24 sps:$4 sm:$0xff]   ;;  %v5291_v42 = vld [vmem:[%s7731_s1 + $0x6c] ss:$24 sps:$4 sm:$0xff]  }
  0x95   :  { %3765 = vmatprep.subr.bf16.mxu0 %v5212_v43  ;;  %v5294_v43 = vld [vmem:[%s7731_s1 + $0x74] ss:$24 sps:$4 sm:$0xff]  }
  0x97   :  { %3643 = vmatpush1.bf16.msra.mxu1 %v5207_v44  ;;  %v5289_v44 = vld [vmem:[%s7731_s1 + $0x68] ss:$24 sps:$4 sm:$0xff]  }
  0x98   :  { %3766 = vmatpush1.bf16.msra.mxu0 %v5210_v45  ;;  %3644 = vmatprep.subr.bf16.mxu1 %v5215_v46  ;;  %v5292_v45 = vld [vmem:[%s7731_s1 + $0x70] ss:$24 sps:$4 sm:$0xff]   ;;  %v5297_v46 = vld [vmem:[%s7731_s1 + $0x9c] ss:$24 sps:$4 sm:$0xff]  }
  0x99   :  { %3767 = vmatprep.subr.bf16.mxu0 %v5218_v47  ;;  %v5295_v47 = vld [vmem:[%s7731_s1 + $0x98] ss:$24 sps:$4 sm:$0xff]  }
  0x9b   :  { %3645 = vmatpush1.bf16.msra.mxu1 %v5213_v49  ;;  %v5298_v49 = vld [vmem:[%s7731_s1 + $0xa0] ss:$24 sps:$4 sm:$0xff]  }
  0x9c   :  { %3768 = vmatpush1.bf16.msra.mxu0 %v5216_v50  ;;  %3646 = vmatprep.subr.bf16.mxu1 %v5221_v51  ;;  %v5303_v50 = vld [vmem:[%s7731_s1 + $0xcc] ss:$24 sps:$4 sm:$0xff]  }
  0x9d   :  { %3769 = vmatprep.subr.bf16.mxu0 %v5224_v52  ;;  %v5306_v51 = vld [vmem:[%s7731_s1 + $0xd4] ss:$24 sps:$4 sm:$0xff]   ;;  %v5301_v52 = vld [vmem:[%s7731_s1 + $0xc8] ss:$24 sps:$4 sm:$0xff]  }
  0x9f   :  { %3647 = vmatpush1.bf16.msra.mxu1 %v5219_v54  ;;  %v5304_v54 = vld [vmem:[%s7731_s1 + $0xd0] ss:$24 sps:$4 sm:$0xff]  }
  0xa0   :  { %3770 = vmatpush1.bf16.msra.mxu0 %v5222_v55  ;;  %3648 = vmatprep.subr.bf16.mxu1 %v5227_v56  ;;  %v5309_v55 = vld [vmem:[%s7731_s1 + $0xfc] ss:$24 sps:$4 sm:$0xff]  }
  0xa1   :  { %3771 = vmatprep.subr.bf16.mxu0 %v5230_v57  ;;  %v5312_v56 = vld [vmem:[%s7731_s1 + $0x104] ss:$24 sps:$4 sm:$0xff]   ;;  %v5307_v57 = vld [vmem:[%s7731_s1 + $0xf8] ss:$24 sps:$4 sm:$0xff]  }
  0xa3   :  { %3649 = vmatpush1.bf16.msra.mxu1 %v5225_v58  ;;  %v5310_v58 = vld [vmem:[%s7731_s1 + $0x100] ss:$24 sps:$4 sm:$0xff]  }
  0xa4   :  { %3772 = vmatpush1.bf16.msra.mxu0 %v5228_v59  ;;  %3650 = vmatprep.subr.bf16.mxu1 %v5233_v60  ;;  %v5315_v59 = vld [vmem:[%s7731_s1 + $0x12c] ss:$24 sps:$4 sm:$0xff]  }
  0xa5   :  { %3773 = vmatprep.subr.bf16.mxu0 %v5236_v61  ;;  %v5318_v60 = vld [vmem:[%s7731_s1 + $0x134] ss:$24 sps:$4 sm:$0xff]   ;;  %v5313_v61 = vld [vmem:[%s7731_s1 + $0x128] ss:$24 sps:$4 sm:$0xff]  }
  0xa7   :  { %3651 = vmatpush1.bf16.msra.mxu1 %v5231_v62  ;;  %v5316_v62 = vld [vmem:[%s7731_s1 + $0x130] ss:$24 sps:$4 sm:$0xff]  }
  0xa8   :  { %3774 = vmatpush1.bf16.msra.mxu0 %v5234_v63  ;;  %3652 = vmatprep.subr.bf16.mxu1 %v5239_v0  ;;  %v5321_v63 = vld [vmem:[%s7731_s1 + $0x15c] ss:$24 sps:$4 sm:$0xff]  }
  0xa9   :  { %3775 = vmatprep.subr.bf16.mxu0 %v5242_v1  ;;  %v5324_v0 = vld [vmem:[%s7731_s1 + $0x164] ss:$24 sps:$4 sm:$0xff]   ;;  %v5319_v1 = vld [vmem:[%s7731_s1 + $0x158] ss:$24 sps:$4 sm:$0xff]  }
  0xab   :  { %3653 = vmatpush1.bf16.msra.mxu1 %v5237_v2  ;;  %v5322_v2 = vld [vmem:[%s7731_s1 + $0x160] ss:$24 sps:$4 sm:$0xff]  }
  0xac   :  { %3776 = vmatpush1.bf16.msra.mxu0 %v5240_v3  ;;  %3654 = vmatprep.subr.bf16.mxu1 %v5245_v4  ;;  %v5327_v3 = vld [vmem:[%s7731_s1 + $0x18c] ss:$24 sps:$4 sm:$0xff]  }
  0xad   :  { %3777 = vmatprep.subr.bf16.mxu0 %v5248_v5  ;;  %v5330_v4 = vld [vmem:[%s7731_s1 + $0x194] ss:$24 sps:$4 sm:$0xff]   ;;  %v5325_v5 = vld [vmem:[%s7731_s1 + $0x188] ss:$24 sps:$4 sm:$0xff]  }
  0xaf   :  { %3655 = vmatpush1.bf16.msra.mxu1 %v5243_v8  ;;  %v5328_v8 = vld [vmem:[%s7731_s1 + $0x190] ss:$24 sps:$4 sm:$0xff]  }
  0xb0   :  { %3778 = vmatpush1.bf16.msra.mxu0 %v5246_v9  ;;  %3656 = vmatprep.subr.bf16.mxu1 %v5251_v10  ;;  %v5333_v9 = vld [vmem:[%s7731_s1 + $0x1bc] ss:$24 sps:$4 sm:$0xff]  }
  0xb1   :  { %3779 = vmatprep.subr.bf16.mxu0 %v5254_v11  ;;  %v5336_v10 = vld [vmem:[%s7731_s1 + $0x1c4] ss:$24 sps:$4 sm:$0xff]   ;;  %v5331_v11 = vld [vmem:[%s7731_s1 + $0x1b8] ss:$24 sps:$4 sm:$0xff]  }
  0xb3   :  { %3657 = vmatpush1.bf16.msra.mxu1 %v5249_v12  ;;  %v5334_v12 = vld [vmem:[%s7731_s1 + $0x1c0] ss:$24 sps:$4 sm:$0xff]  }
  0xb4   :  { %3780 = vmatpush1.bf16.msra.mxu0 %v5252_v13  ;;  %3658 = vmatprep.subr.bf16.mxu1 %v5257_v14  ;;  %v5339_v13 = vld [vmem:[%s7731_s1 + $0x1ec] ss:$24 sps:$4 sm:$0xff]  }
  0xb5   :  { %3781 = vmatprep.subr.bf16.mxu0 %v5260_v15  ;;  %v5342_v14 = vld [vmem:[%s7731_s1 + $0x1f4] ss:$24 sps:$4 sm:$0xff]   ;;  %v5337_v15 = vld [vmem:[%s7731_s1 + $0x1e8] ss:$24 sps:$4 sm:$0xff]  }
  0xb7   :  { %3659 = vmatpush1.bf16.msra.mxu1 %v5255_v17  ;;  %v5340_v17 = vld [vmem:[%s7731_s1 + $0x1f0] ss:$24 sps:$4 sm:$0xff]  }
  0xb8   :  { %3782 = vmatpush1.bf16.msra.mxu0 %v5258_v19  ;;  %3660 = vmatprep.subr.bf16.mxu1 %v5263_v20  ;;  %v5345_v19 = vld [vmem:[%s7731_s1 + $0x21c] ss:$24 sps:$4 sm:$0xff]  }
  0xb9   :  { %3783 = vmatprep.subr.bf16.mxu0 %v5266_v21  ;;  %v5348_v20 = vld [vmem:[%s7731_s1 + $0x224] ss:$24 sps:$4 sm:$0xff]   ;;  %v5343_v21 = vld [vmem:[%s7731_s1 + $0x218] ss:$24 sps:$4 sm:$0xff]  }
  0xbb   :  { %3661 = vmatpush1.bf16.msra.mxu1 %v5261_v26  ;;  %v5346_v26 = vld [vmem:[%s7731_s1 + $0x220] ss:$24 sps:$4 sm:$0xff]  }
  0xbc   :  { %3784 = vmatpush1.bf16.msra.mxu0 %v5264_v27  ;;  %3662 = vmatprep.subr.bf16.mxu1 %v5269_v28  ;;  %v5351_v27 = vld [vmem:[%s7731_s1 + $0x24c] ss:$24 sps:$4 sm:$0xff]  }
  0xbd   :  { %3785 = vmatprep.subr.bf16.mxu0 %v5272_v29  ;;  %v5354_v28 = vld [vmem:[%s7731_s1 + $0x254] ss:$24 sps:$4 sm:$0xff]   ;;  %v5349_v29 = vld [vmem:[%s7731_s1 + $0x248] ss:$24 sps:$4 sm:$0xff]  }
  0xbf   :  { %3663 = vmatpush1.bf16.msra.mxu1 %v5267_v30  ;;  %v5352_v30 = vld [vmem:[%s7731_s1 + $0x250] ss:$24 sps:$4 sm:$0xff]  }
  0xc0   :  { %3786 = vmatpush1.bf16.msra.mxu0 %v5270_v31  ;;  %3796 = vmatprep.subr.bf16.mxu1 %v5279_v32  ;;  %v5357_v31 = vld [vmem:[%s7731_s1 + $0x27c] ss:$24 sps:$4 sm:$0xff]  }
  0xc1   :  { %4042 = vmatprep.subr.bf16.mxu0 %v5282_v33  ;;  %v5360_v32 = vld [vmem:[%s7731_s1 + $0x284] ss:$24 sps:$4 sm:$0xff]   ;;  %v5355_v33 = vld [vmem:[%s7731_s1 + $0x278] ss:$24 sps:$4 sm:$0xff]  }
  0xc2   :  { %3665 = vmatmul.mubr.bf16.vlgmr.msra.gmra.mrb[0].mxu1 %v6525_v34 }
  0xc3   :  { %3788 = vmatmul.mubr.bf16.vlgmr.msra.gmra.mrb[0].mxu0 %v6529_v36  ;;  %3797 = vmatpush1.bf16.msra.mxu1 %v5277_v37  ;;  %v5358_v37 = vld [vmem:[%s7731_s1 + $0x280] ss:$24 sps:$4 sm:$0xff]  }
  0xc4   :  { %4043 = vmatpush1.bf16.msra.mxu0 %v5280_v39  ;;  %3798 = vmatprep.subr.bf16.mxu1 %v5285_v22  ;;  %v5363_v39 = vld [vmem:[%s7731_s1 + $0x2ac] ss:$24 sps:$4 sm:$0xff]  }
  0xc5   :  { %4044 = vmatprep.subr.bf16.mxu0 %v5288_v23  ;;  %3828 = vmatprep.mubr.bf16.mxu1 %v6017_v48  ;;  %v5366_v22 = vld [vmem:[%s7731_s1 + $0x2b4] ss:$24 sps:$4 sm:$0xff]   ;;  %v5361_v23 = vld [vmem:[%s7731_s1 + $0x2a8] ss:$24 sps:$4 sm:$0xff]  }
  0xc6   :  { %4074 = vmatprep.mubr.bf16.mxu0 %v6017_v48  ;;  %v5300_v48 = vld [vmem:[%s7731_s1 + $0xa4] ss:$24 sps:$4 sm:$0xff]  }
  0xc7   :  { %3799 = vmatpush1.bf16.msra.mxu1 %v5283_v40  ;;  %v5364_v40 = vld [vmem:[%s7731_s1 + $0x2b0] ss:$24 sps:$4 sm:$0xff]  }
  0xc8   :  { %4045 = vmatpush1.bf16.msra.mxu0 %v5286_v41  ;;  %3800 = vmatprep.subr.bf16.mxu1 %v5291_v42  ;;  %v5369_v41 = vld [vmem:[%s7731_s1 + $0x2dc] ss:$24 sps:$4 sm:$0xff]  }
  0xc9   :  { %4046 = vmatprep.subr.bf16.mxu0 %v5294_v43  ;;  %v5372_v42 = vld [vmem:[%s7731_s1 + $0x2e4] ss:$24 sps:$4 sm:$0xff]   ;;  %v5367_v43 = vld [vmem:[%s7731_s1 + $0x2d8] ss:$24 sps:$4 sm:$0xff]  }
  0xcb   :  { %3801 = vmatpush1.bf16.msra.mxu1 %v5289_v44  ;;  %v5370_v44 = vld [vmem:[%s7731_s1 + $0x2e0] ss:$24 sps:$4 sm:$0xff]  }
  0xcc   :  { %4047 = vmatpush1.bf16.msra.mxu0 %v5292_v45  ;;  %3802 = vmatprep.subr.bf16.mxu1 %v5297_v46  ;;  %v5375_v45 = vld [vmem:[%s7731_s1 + $0x30c] ss:$24 sps:$4 sm:$0xff]  }
  0xcd   :  { %4048 = vmatprep.subr.bf16.mxu0 %v5300_v48  ;;  %v5378_v46 = vld [vmem:[%s7731_s1 + $0x314] ss:$24 sps:$4 sm:$0xff]   ;;  %v5373_v48 = vld [vmem:[%s7731_s1 + $0x308] ss:$24 sps:$4 sm:$0xff]  }
  0xcf   :  { %3803 = vmatpush1.bf16.msra.mxu1 %v5295_v47  ;;  %v5376_v47 = vld [vmem:[%s7731_s1 + $0x310] ss:$24 sps:$4 sm:$0xff]  }
  0xd0   :  { %4049 = vmatpush1.bf16.msra.mxu0 %v5298_v49  ;;  %3804 = vmatprep.subr.bf16.mxu1 %v5303_v50  ;;  %v5381_v49 = vld [vmem:[%s7731_s1 + $0x33c] ss:$24 sps:$4 sm:$0xff]  }
  0xd1   :  { %4050 = vmatprep.subr.bf16.mxu0 %v5306_v51  ;;  %v5384_v50 = vld [vmem:[%s7731_s1 + $0x344] ss:$24 sps:$4 sm:$0xff]   ;;  %v5379_v51 = vld [vmem:[%s7731_s1 + $0x338] ss:$24 sps:$4 sm:$0xff]  }
  0xd3   :  { %3805 = vmatpush1.bf16.msra.mxu1 %v5301_v52  ;;  %v5382_v52 = vld [vmem:[%s7731_s1 + $0x340] ss:$24 sps:$4 sm:$0xff]  }
  0xd4   :  { %4051 = vmatpush1.bf16.msra.mxu0 %v5304_v54  ;;  %3806 = vmatprep.subr.bf16.mxu1 %v5309_v55  ;;  %v5387_v54 = vld [vmem:[%s7731_s1 + $0x36c] ss:$24 sps:$4 sm:$0xff]   ;;  %v5385_v55 = vld [vmem:[%s7731_s1 + $0x368] ss:$24 sps:$4 sm:$0xff]  }
  0xd5   :  { %4052 = vmatprep.subr.bf16.mxu0 %v5312_v56  ;;  %v5388_v56 = vld [vmem:[%s7731_s1 + $0x370] ss:$24 sps:$4 sm:$0xff]  }
  0xd7   :  { %3807 = vmatpush1.bf16.msra.mxu1 %v5307_v57  ;;  %v5393_v57 = vld [vmem:[%s7731_s1 + $0x39c] ss:$24 sps:$4 sm:$0xff]  }
  0xd8   :  { %4053 = vmatpush1.bf16.msra.mxu0 %v5310_v58  ;;  %3808 = vmatprep.subr.bf16.mxu1 %v5315_v59  ;;  %v5391_v58 = vld [vmem:[%s7731_s1 + $0x398] ss:$24 sps:$4 sm:$0xff]  }
  0xd9   :  { %4054 = vmatprep.subr.bf16.mxu0 %v5318_v60  ;;  %v5394_v59 = vld [vmem:[%s7731_s1 + $0x3a0] ss:$24 sps:$4 sm:$0xff]   ;;  %v5399_v60 = vld [vmem:[%s7731_s1 + $0x3cc] ss:$24 sps:$4 sm:$0xff]  }
  0xdb   :  { %3809 = vmatpush1.bf16.msra.mxu1 %v5313_v61  ;;  %v5402_v61 = vld [vmem:[%s7731_s1 + $0x3d4] ss:$24 sps:$4 sm:$0xff]  }
  0xdc   :  { %4055 = vmatpush1.bf16.msra.mxu0 %v5316_v62  ;;  %3810 = vmatprep.subr.bf16.mxu1 %v5321_v63  ;;  %v5397_v62 = vld [vmem:[%s7731_s1 + $0x3c8] ss:$24 sps:$4 sm:$0xff]  }
  0xdd   :  { %4056 = vmatprep.subr.bf16.mxu0 %v5324_v0  ;;  %v5400_v63 = vld [vmem:[%s7731_s1 + $0x3d0] ss:$24 sps:$4 sm:$0xff]   ;;  %v5405_v0 = vld [vmem:[%s7731_s1 + $0x3fc] ss:$24 sps:$4 sm:$0xff]  }
  0xdf   :  { %3811 = vmatpush1.bf16.msra.mxu1 %v5319_v1  ;;  %v5408_v1 = vld [vmem:[%s7731_s1 + $0x404] ss:$24 sps:$4 sm:$0xff]  }
  0xe0   :  { %4057 = vmatpush1.bf16.msra.mxu0 %v5322_v2  ;;  %3812 = vmatprep.subr.bf16.mxu1 %v5327_v3  ;;  %v5403_v2 = vld [vmem:[%s7731_s1 + $0x3f8] ss:$24 sps:$4 sm:$0xff]  }
  0xe1   :  { %4058 = vmatprep.subr.bf16.mxu0 %v5330_v4  ;;  %v5406_v3 = vld [vmem:[%s7731_s1 + $0x400] ss:$24 sps:$4 sm:$0xff]   ;;  %v5411_v4 = vld [vmem:[%s7731_s1 + $0x42c] ss:$24 sps:$4 sm:$0xff]  }
  0xe3   :  { %3813 = vmatpush1.bf16.msra.mxu1 %v5325_v5  ;;  %v5414_v5 = vld [vmem:[%s7731_s1 + $0x434] ss:$24 sps:$4 sm:$0xff]  }
  0xe4   :  { %4059 = vmatpush1.bf16.msra.mxu0 %v5328_v8  ;;  %3814 = vmatprep.subr.bf16.mxu1 %v5333_v9  ;;  %v5409_v8 = vld [vmem:[%s7731_s1 + $0x428] ss:$24 sps:$4 sm:$0xff]  }
  0xe5   :  { %4060 = vmatprep.subr.bf16.mxu0 %v5336_v10  ;;  %v5412_v9 = vld [vmem:[%s7731_s1 + $0x430] ss:$24 sps:$4 sm:$0xff]   ;;  %v5417_v10 = vld [vmem:[%s7731_s1 + $0x45c] ss:$24 sps:$4 sm:$0xff]  }
  0xe7   :  { %3815 = vmatpush1.bf16.msra.mxu1 %v5331_v11  ;;  %v5420_v11 = vld [vmem:[%s7731_s1 + $0x464] ss:$24 sps:$4 sm:$0xff]  }
  0xe8   :  { %4061 = vmatpush1.bf16.msra.mxu0 %v5334_v12  ;;  %3816 = vmatprep.subr.bf16.mxu1 %v5339_v13  ;;  %v5415_v12 = vld [vmem:[%s7731_s1 + $0x458] ss:$24 sps:$4 sm:$0xff]  }
  0xe9   :  { %4062 = vmatprep.subr.bf16.mxu0 %v5342_v14  ;;  %v5418_v13 = vld [vmem:[%s7731_s1 + $0x460] ss:$24 sps:$4 sm:$0xff]   ;;  %v5423_v14 = vld [vmem:[%s7731_s1 + $0x48c] ss:$24 sps:$4 sm:$0xff]  }
  0xeb   :  { %3817 = vmatpush1.bf16.msra.mxu1 %v5337_v15  ;;  %v5426_v15 = vld [vmem:[%s7731_s1 + $0x494] ss:$24 sps:$4 sm:$0xff]  }
  0xec   :  { %4063 = vmatpush1.bf16.msra.mxu0 %v5340_v17  ;;  %3818 = vmatprep.subr.bf16.mxu1 %v5345_v19  ;;  %v5421_v17 = vld [vmem:[%s7731_s1 + $0x488] ss:$24 sps:$4 sm:$0xff]  }
  0xed   :  { %4064 = vmatprep.subr.bf16.mxu0 %v5348_v20  ;;  %v5424_v19 = vld [vmem:[%s7731_s1 + $0x490] ss:$24 sps:$4 sm:$0xff]   ;;  %v5429_v20 = vld [vmem:[%s7731_s1 + $0x4bc] ss:$24 sps:$4 sm:$0xff]  }
  0xef   :  { %3819 = vmatpush1.bf16.msra.mxu1 %v5343_v21  ;;  %v5432_v21 = vld [vmem:[%s7731_s1 + $0x4c4] ss:$24 sps:$4 sm:$0xff]  }
  0xf0   :  { %4065 = vmatpush1.bf16.msra.mxu0 %v5346_v26  ;;  %3820 = vmatprep.subr.bf16.mxu1 %v5351_v27  ;;  %v5427_v26 = vld [vmem:[%s7731_s1 + $0x4b8] ss:$24 sps:$4 sm:$0xff]  }
  0xf1   :  { %4066 = vmatprep.subr.bf16.mxu0 %v5354_v28  ;;  %v5430_v27 = vld [vmem:[%s7731_s1 + $0x4c0] ss:$24 sps:$4 sm:$0xff]   ;;  %v5435_v28 = vld [vmem:[%s7731_s1 + $0x4ec] ss:$24 sps:$4 sm:$0xff]  }
  0xf3   :  { %3821 = vmatpush1.bf16.msra.mxu1 %v5349_v29  ;;  %v5438_v29 = vld [vmem:[%s7731_s1 + $0x4f4] ss:$24 sps:$4 sm:$0xff]  }
  0xf4   :  { %4067 = vmatpush1.bf16.msra.mxu0 %v5352_v30  ;;  %3822 = vmatprep.subr.bf16.mxu1 %v5357_v31  ;;  %v5433_v30 = vld [vmem:[%s7731_s1 + $0x4e8] ss:$24 sps:$4 sm:$0xff]  }
  0xf5   :  { %4068 = vmatprep.subr.bf16.mxu0 %v5360_v32  ;;  %v5436_v31 = vld [vmem:[%s7731_s1 + $0x4f0] ss:$24 sps:$4 sm:$0xff]   ;;  %v5441_v32 = vld [vmem:[%s7731_s1 + $0x51c] ss:$24 sps:$4 sm:$0xff]  }
  0xf7   :  { %3823 = vmatpush1.bf16.msra.mxu1 %v5355_v33  ;;  %v5444_v33 = vld [vmem:[%s7731_s1 + $0x524] ss:$24 sps:$4 sm:$0xff]  }
  0xf8   :  { %4069 = vmatpush1.bf16.msra.mxu0 %v5358_v37  ;;  %3824 = vmatprep.subr.bf16.mxu1 %v5363_v39  ;;  %v5439_v37 = vld [vmem:[%s7731_s1 + $0x518] ss:$24 sps:$4 sm:$0xff]  }
  0xf9   :  { %4070 = vmatprep.subr.bf16.mxu0 %v5366_v22  ;;  %v5442_v39 = vld [vmem:[%s7731_s1 + $0x520] ss:$24 sps:$4 sm:$0xff]   ;;  %v5447_v22 = vld [vmem:[%s7731_s1 + $0x54c] ss:$24 sps:$4 sm:$0xff]  }
  0xfb   :  { %3825 = vmatpush1.bf16.msra.mxu1 %v5361_v23  ;;  %v5450_v23 = vld [vmem:[%s7731_s1 + $0x554] ss:$24 sps:$4 sm:$0xff]  }
  0xfc   :  { %4071 = vmatpush1.bf16.msra.mxu0 %v5364_v40  ;;  %3826 = vmatprep.subr.bf16.mxu1 %v5369_v41  ;;  %v5445_v40 = vld [vmem:[%s7731_s1 + $0x548] ss:$24 sps:$4 sm:$0xff]  }
  0xfd   :  { %4072 = vmatprep.subr.bf16.mxu0 %v5372_v42  ;;  %v5448_v41 = vld [vmem:[%s7731_s1 + $0x550] ss:$24 sps:$4 sm:$0xff]   ;;  %v5453_v42 = vld [vmem:[%s7731_s1 + $0x57c] ss:$24 sps:$4 sm:$0xff]  }
  0xff   :  { %3827 = vmatpush1.bf16.msra.mxu1 %v5367_v43  ;;  %v5456_v43 = vld [vmem:[%s7731_s1 + $0x584] ss:$24 sps:$4 sm:$0xff]  }
 0x100   :  { %4073 = vmatpush1.bf16.msra.mxu0 %v5370_v44  ;;  %3837 = vmatprep.subr.bf16.mxu1 %v5375_v45  ;;  %v5451_v44 = vld [vmem:[%s7731_s1 + $0x578] ss:$24 sps:$4 sm:$0xff]  }
 0x101   :  { %4083 = vmatprep.subr.bf16.mxu0 %v5378_v46  ;;  %v5454_v45 = vld [vmem:[%s7731_s1 + $0x580] ss:$24 sps:$4 sm:$0xff]   ;;  %v5459_v46 = vld [vmem:[%s7731_s1 + $0x5ac] ss:$24 sps:$4 sm:$0xff]  }
 0x102   :  { %3829 = vmatmul.mubr.bf16.vlgmr.msra.gmra.mrb[4].mxu1 %v6083_v6 }
 0x103   :  { %4075 = vmatmul.mubr.bf16.vlgmr.msra.gmra.mrb[4].mxu0 %v6083_v6  ;;  %3838 = vmatpush1.bf16.msra.mxu1 %v5373_v48  ;;  %v5390_v6 = vld [vmem:[%s7731_s1 + $0x374] ss:$24 sps:$4 sm:$0xff]  }
 0x104   :  { %4084 = vmatpush1.bf16.msra.mxu0 %v5376_v47  ;;  %3839 = vmatprep.subr.bf16.mxu1 %v5381_v49  ;;  %v5462_v48 = vld [vmem:[%s7731_s1 + $0x5b4] ss:$24 sps:$4 sm:$0xff]   ;;  %v5457_v47 = vld [vmem:[%s7731_s1 + $0x5a8] ss:$24 sps:$4 sm:$0xff]  }
 0x105   :  { %4085 = vmatprep.subr.bf16.mxu0 %v5384_v50  ;;  %3869 = vmatprep.mubr.bf16.mxu1 %v6174_v35  ;;  %v5460_v49 = vld [vmem:[%s7731_s1 + $0x5b0] ss:$24 sps:$4 sm:$0xff]   ;;  %v5465_v50 = vld [vmem:[%s7731_s1 + $0x5dc] ss:$24 sps:$4 sm:$0xff]  }
 0x106   :  { %4115 = vmatprep.mubr.bf16.mxu0 %v6174_v35  ;;  %v5396_v35 = vld [vmem:[%s7731_s1 + $0x3a4] ss:$24 sps:$4 sm:$0xff]  }
 0x107   :  { %3840 = vmatpush1.bf16.msra.mxu1 %v5379_v51  ;;  %v5468_v51 = vld [vmem:[%s7731_s1 + $0x5e4] ss:$24 sps:$4 sm:$0xff]  }
 0x108   :  { %4086 = vmatpush1.bf16.msra.mxu0 %v5382_v52  ;;  %3841 = vmatprep.subr.bf16.mxu1 %v5387_v54  ;;  %v5463_v52 = vld [vmem:[%s7731_s1 + $0x5d8] ss:$24 sps:$4 sm:$0xff]  }
 0x109   :  { %4087 = vmatprep.subr.bf16.mxu0 %v5390_v6  ;;  %v5466_v54 = vld [vmem:[%s7731_s1 + $0x5e0] ss:$24 sps:$4 sm:$0xff]   ;;  %v5471_v6 = vld [vmem:[%s7731_s1 + $0x60c] ss:$24 sps:$4 sm:$0xff]  }
 0x10b   :  { %3842 = vmatpush1.bf16.msra.mxu1 %v5385_v55  ;;  %v5474_v55 = vld [vmem:[%s7731_s1 + $0x614] ss:$24 sps:$4 sm:$0xff]  }
 0x10c   :  { %4088 = vmatpush1.bf16.msra.mxu0 %v5388_v56  ;;  %3843 = vmatprep.subr.bf16.mxu1 %v5393_v57  ;;  %v5469_v56 = vld [vmem:[%s7731_s1 + $0x608] ss:$24 sps:$4 sm:$0xff]  }
 0x10d   :  { %4089 = vmatprep.subr.bf16.mxu0 %v5396_v35  ;;  %v5472_v57 = vld [vmem:[%s7731_s1 + $0x610] ss:$24 sps:$4 sm:$0xff]   ;;  %v5477_v35 = vld [vmem:[%s7731_s1 + $0x63c] ss:$24 sps:$4 sm:$0xff]  }
 0x10f   :  { %3844 = vmatpush1.bf16.msra.mxu1 %v5391_v58  ;;  %v5480_v58 = vld [vmem:[%s7731_s1 + $0x644] ss:$24 sps:$4 sm:$0xff]  }
 0x110   :  { %4090 = vmatpush1.bf16.msra.mxu0 %v5394_v59  ;;  %3845 = vmatprep.subr.bf16.mxu1 %v5399_v60  ;;  %v5475_v59 = vld [vmem:[%s7731_s1 + $0x638] ss:$24 sps:$4 sm:$0xff]  }
 0x111   :  { %4091 = vmatprep.subr.bf16.mxu0 %v5402_v61  ;;  %v5478_v60 = vld [vmem:[%s7731_s1 + $0x640] ss:$24 sps:$4 sm:$0xff]   ;;  %v5483_v61 = vld [vmem:[%s7731_s1 + $0x66c] ss:$24 sps:$4 sm:$0xff]  }
 0x113   :  { %3846 = vmatpush1.bf16.msra.mxu1 %v5397_v62  ;;  %v5481_v62 = vld [vmem:[%s7731_s1 + $0x668] ss:$24 sps:$4 sm:$0xff]  }
 0x114   :  { %4092 = vmatpush1.bf16.msra.mxu0 %v5400_v63  ;;  %3847 = vmatprep.subr.bf16.mxu1 %v5405_v0  ;;  %v5484_v63 = vld [vmem:[%s7731_s1 + $0x670] ss:$24 sps:$4 sm:$0xff]   ;;  %v5489_v0 = vld [vmem:[%s7731_s1 + $0x69c] ss:$24 sps:$4 sm:$0xff]  }
 0x115   :  { %4093 = vmatprep.subr.bf16.mxu0 %v5408_v1  ;;  %v5487_v1 = vld [vmem:[%s7731_s1 + $0x698] ss:$24 sps:$4 sm:$0xff]  }
 0x117   :  { %3848 = vmatpush1.bf16.msra.mxu1 %v5403_v2  ;;  %v5490_v2 = vld [vmem:[%s7731_s1 + $0x6a0] ss:$24 sps:$4 sm:$0xff]  }
 0x118   :  { %4094 = vmatpush1.bf16.msra.mxu0 %v5406_v3  ;;  %3849 = vmatprep.subr.bf16.mxu1 %v5411_v4  ;;  %v5495_v3 = vld [vmem:[%s7731_s1 + $0x6cc] ss:$24 sps:$4 sm:$0xff]  }
 0x119   :  { %4095 = vmatprep.subr.bf16.mxu0 %v5414_v5  ;;  %v5498_v4 = vld [vmem:[%s7731_s1 + $0x6d4] ss:$24 sps:$4 sm:$0xff]   ;;  %v5493_v5 = vld [vmem:[%s7731_s1 + $0x6c8] ss:$24 sps:$4 sm:$0xff]  }
 0x11b   :  { %3850 = vmatpush1.bf16.msra.mxu1 %v5409_v8  ;;  %v5496_v8 = vld [vmem:[%s7731_s1 + $0x6d0] ss:$24 sps:$4 sm:$0xff]  }
 0x11c   :  { %4096 = vmatpush1.bf16.msra.mxu0 %v5412_v9  ;;  %3851 = vmatprep.subr.bf16.mxu1 %v5417_v10  ;;  %v5501_v9 = vld [vmem:[%s7731_s1 + $0x6fc] ss:$24 sps:$4 sm:$0xff]  }
 0x11d   :  { %4097 = vmatprep.subr.bf16.mxu0 %v5420_v11  ;;  %v5504_v10 = vld [vmem:[%s7731_s1 + $0x704] ss:$24 sps:$4 sm:$0xff]   ;;  %v5499_v11 = vld [vmem:[%s7731_s1 + $0x6f8] ss:$24 sps:$4 sm:$0xff]  }
 0x11f   :  { %3852 = vmatpush1.bf16.msra.mxu1 %v5415_v12  ;;  %v5502_v12 = vld [vmem:[%s7731_s1 + $0x700] ss:$24 sps:$4 sm:$0xff]  }
 0x120   :  { %4098 = vmatpush1.bf16.msra.mxu0 %v5418_v13  ;;  %3853 = vmatprep.subr.bf16.mxu1 %v5423_v14  ;;  %v5507_v13 = vld [vmem:[%s7731_s1 + $0x72c] ss:$24 sps:$4 sm:$0xff]  }
 0x121   :  { %4099 = vmatprep.subr.bf16.mxu0 %v5426_v15  ;;  %v5510_v14 = vld [vmem:[%s7731_s1 + $0x734] ss:$24 sps:$4 sm:$0xff]   ;;  %v5505_v15 = vld [vmem:[%s7731_s1 + $0x728] ss:$24 sps:$4 sm:$0xff]  }
 0x123   :  { %3854 = vmatpush1.bf16.msra.mxu1 %v5421_v17  ;;  %v5508_v17 = vld [vmem:[%s7731_s1 + $0x730] ss:$24 sps:$4 sm:$0xff]  }
 0x124   :  { %4100 = vmatpush1.bf16.msra.mxu0 %v5424_v19  ;;  %3855 = vmatprep.subr.bf16.mxu1 %v5429_v20  ;;  %v5513_v19 = vld [vmem:[%s7731_s1 + $0x75c] ss:$24 sps:$4 sm:$0xff]  }
 0x125   :  { %4101 = vmatprep.subr.bf16.mxu0 %v5432_v21  ;;  %v5516_v20 = vld [vmem:[%s7731_s1 + $0x764] ss:$24 sps:$4 sm:$0xff]   ;;  %v5511_v21 = vld [vmem:[%s7731_s1 + $0x758] ss:$24 sps:$4 sm:$0xff]  }
 0x127   :  { %3856 = vmatpush1.bf16.msra.mxu1 %v5427_v26  ;;  %v5514_v26 = vld [vmem:[%s7731_s1 + $0x760] ss:$24 sps:$4 sm:$0xff]  }
 0x128   :  { %4102 = vmatpush1.bf16.msra.mxu0 %v5430_v27  ;;  %3857 = vmatprep.subr.bf16.mxu1 %v5435_v28  ;;  %v5519_v27 = vld [vmem:[%s7731_s1 + $0x78c] ss:$24 sps:$4 sm:$0xff]  }
 0x129   :  { %4103 = vmatprep.subr.bf16.mxu0 %v5438_v29  ;;  %v5522_v28 = vld [vmem:[%s7731_s1 + $0x794] ss:$24 sps:$4 sm:$0xff]   ;;  %v5517_v29 = vld [vmem:[%s7731_s1 + $0x788] ss:$24 sps:$4 sm:$0xff]  }
 0x12b   :  { %3858 = vmatpush1.bf16.msra.mxu1 %v5433_v30  ;;  %v5520_v30 = vld [vmem:[%s7731_s1 + $0x790] ss:$24 sps:$4 sm:$0xff]  }
 0x12c   :  { %4104 = vmatpush1.bf16.msra.mxu0 %v5436_v31  ;;  %3859 = vmatprep.subr.bf16.mxu1 %v5441_v32  ;;  %v5525_v31 = vld [vmem:[%s7731_s1 + $0x7bc] ss:$24 sps:$4 sm:$0xff]  }
 0x12d   :  { %4105 = vmatprep.subr.bf16.mxu0 %v5444_v33  ;;  %v5528_v32 = vld [vmem:[%s7731_s1 + $0x7c4] ss:$24 sps:$4 sm:$0xff]   ;;  %v5523_v33 = vld [vmem:[%s7731_s1 + $0x7b8] ss:$24 sps:$4 sm:$0xff]  }
 0x12f   :  { %3860 = vmatpush1.bf16.msra.mxu1 %v5439_v37  ;;  %v5526_v37 = vld [vmem:[%s7731_s1 + $0x7c0] ss:$24 sps:$4 sm:$0xff]  }
 0x130   :  { %4106 = vmatpush1.bf16.msra.mxu0 %v5442_v39  ;;  %3861 = vmatprep.subr.bf16.mxu1 %v5447_v22  ;;  %v5531_v39 = vld [vmem:[%s7731_s1 + $0x7ec] ss:$24 sps:$4 sm:$0xff]  }
 0x131   :  { %4107 = vmatprep.subr.bf16.mxu0 %v5450_v23  ;;  %v5534_v22 = vld [vmem:[%s7731_s1 + $0x7f4] ss:$24 sps:$4 sm:$0xff]   ;;  %v5529_v23 = vld [vmem:[%s7731_s1 + $0x7e8] ss:$24 sps:$4 sm:$0xff]  }
 0x133   :  { %3862 = vmatpush1.bf16.msra.mxu1 %v5445_v40  ;;  %v5532_v40 = vld [vmem:[%s7731_s1 + $0x7f0] ss:$24 sps:$4 sm:$0xff]  }
 0x134   :  { %4108 = vmatpush1.bf16.msra.mxu0 %v5448_v41  ;;  %3863 = vmatprep.subr.bf16.mxu1 %v5453_v42  ;;  %v5537_v41 = vld [vmem:[%s7731_s1 + $0x81c] ss:$24 sps:$4 sm:$0xff]  }
 0x135   :  { %4109 = vmatprep.subr.bf16.mxu0 %v5456_v43  ;;  %v5540_v42 = vld [vmem:[%s7731_s1 + $0x824] ss:$24 sps:$4 sm:$0xff]   ;;  %v5535_v43 = vld [vmem:[%s7731_s1 + $0x818] ss:$24 sps:$4 sm:$0xff]  }
 0x137   :  { %3864 = vmatpush1.bf16.msra.mxu1 %v5451_v44  ;;  %v5538_v44 = vld [vmem:[%s7731_s1 + $0x820] ss:$24 sps:$4 sm:$0xff]  }
 0x138   :  { %4110 = vmatpush1.bf16.msra.mxu0 %v5454_v45  ;;  %3865 = vmatprep.subr.bf16.mxu1 %v5459_v46  ;;  %v5543_v45 = vld [vmem:[%s7731_s1 + $0x84c] ss:$24 sps:$4 sm:$0xff]  }
 0x139   :  { %4111 = vmatprep.subr.bf16.mxu0 %v5462_v48  ;;  %v5546_v46 = vld [vmem:[%s7731_s1 + $0x854] ss:$24 sps:$4 sm:$0xff]   ;;  %v5541_v48 = vld [vmem:[%s7731_s1 + $0x848] ss:$24 sps:$4 sm:$0xff]  }
 0x13b   :  { %3866 = vmatpush1.bf16.msra.mxu1 %v5457_v47  ;;  %v5544_v47 = vld [vmem:[%s7731_s1 + $0x850] ss:$24 sps:$4 sm:$0xff]  }
 0x13c   :  { %4112 = vmatpush1.bf16.msra.mxu0 %v5460_v49  ;;  %3867 = vmatprep.subr.bf16.mxu1 %v5465_v50  ;;  %v5549_v49 = vld [vmem:[%s7731_s1 + $0x87c] ss:$24 sps:$4 sm:$0xff]  }
 0x13d   :  { %4113 = vmatprep.subr.bf16.mxu0 %v5468_v51  ;;  %v5552_v50 = vld [vmem:[%s7731_s1 + $0x884] ss:$24 sps:$4 sm:$0xff]   ;;  %v5547_v51 = vld [vmem:[%s7731_s1 + $0x878] ss:$24 sps:$4 sm:$0xff]  }
 0x13f   :  { %3868 = vmatpush1.bf16.msra.mxu1 %v5463_v52  ;;  %v5550_v52 = vld [vmem:[%s7731_s1 + $0x880] ss:$24 sps:$4 sm:$0xff]  }
 0x140   :  { %4114 = vmatpush1.bf16.msra.mxu0 %v5466_v54  ;;  %3878 = vmatprep.subr.bf16.mxu1 %v5471_v6  ;;  %v5555_v54 = vld [vmem:[%s7731_s1 + $0x8ac] ss:$24 sps:$4 sm:$0xff]  }
 0x141   :  { %4124 = vmatprep.subr.bf16.mxu0 %v5474_v55  ;;  %v5558_v6 = vld [vmem:[%s7731_s1 + $0x8b4] ss:$24 sps:$4 sm:$0xff]   ;;  %v5553_v55 = vld [vmem:[%s7731_s1 + $0x8a8] ss:$24 sps:$4 sm:$0xff]  }
 0x142   :  { %3870 = vmatmul.mubr.bf16.vlgmr.msra.gmra.mrb[4].mxu1 %v6303_v16 }
 0x143   :  { %4116 = vmatmul.mubr.bf16.vlgmr.msra.gmra.mrb[4].mxu0 %v6303_v16  ;;  %3879 = vmatpush1.bf16.msra.mxu1 %v5469_v56  ;;  %v5486_v16 = vld [vmem:[%s7731_s1 + $0x674] ss:$24 sps:$4 sm:$0xff]   ;;  %v5556_v56 = vld [vmem:[%s7731_s1 + $0x8b0] ss:$24 sps:$4 sm:$0xff]  }
 0x144   :  { %4125 = vmatpush1.bf16.msra.mxu0 %v5472_v57  ;;  %3880 = vmatprep.subr.bf16.mxu1 %v5477_v35  ;;  %v5561_v57 = vld [vmem:[%s7731_s1 + $0x8dc] ss:$24 sps:$4 sm:$0xff]  }
 0x145   :  { %4126 = vmatprep.subr.bf16.mxu0 %v5480_v58  ;;  %3910 = vmatprep.mubr.bf16.mxu1 %v6333_v24  ;;  %v5564_v35 = vld [vmem:[%s7731_s1 + $0x8e4] ss:$24 sps:$4 sm:$0xff]   ;;  %v5559_v58 = vld [vmem:[%s7731_s1 + $0x8d8] ss:$24 sps:$4 sm:$0xff]  }
 0x146   :  { %4156 = vmatprep.mubr.bf16.mxu0 %v6333_v24  ;;  %v5492_v24 = vld [vmem:[%s7731_s1 + $0x6a4] ss:$24 sps:$4 sm:$0xff]  }
 0x147   :  { %3881 = vmatpush1.bf16.msra.mxu1 %v5475_v59  ;;  %v5562_v59 = vld [vmem:[%s7731_s1 + $0x8e0] ss:$24 sps:$4 sm:$0xff]  }
 0x148   :  { %4127 = vmatpush1.bf16.msra.mxu0 %v5478_v60  ;;  %3882 = vmatprep.subr.bf16.mxu1 %v5483_v61  ;;  %v5567_v60 = vld [vmem:[%s7731_s1 + $0x90c] ss:$24 sps:$4 sm:$0xff]  }
 0x149   :  { %4128 = vmatprep.subr.bf16.mxu0 %v5486_v16  ;;  %v5570_v61 = vld [vmem:[%s7731_s1 + $0x914] ss:$24 sps:$4 sm:$0xff]   ;;  %v5565_v16 = vld [vmem:[%s7731_s1 + $0x908] ss:$24 sps:$4 sm:$0xff]  }
 0x14b   :  { %3883 = vmatpush1.bf16.msra.mxu1 %v5481_v62  ;;  %v5568_v62 = vld [vmem:[%s7731_s1 + $0x910] ss:$24 sps:$4 sm:$0xff]  }
 0x14c   :  { %4129 = vmatpush1.bf16.msra.mxu0 %v5484_v63  ;;  %3884 = vmatprep.subr.bf16.mxu1 %v5489_v0  ;;  %v5573_v63 = vld [vmem:[%s7731_s1 + $0x93c] ss:$24 sps:$4 sm:$0xff]  }
 0x14d   :  { %4130 = vmatprep.subr.bf16.mxu0 %v5492_v24  ;;  %v5576_v0 = vld [vmem:[%s7731_s1 + $0x944] ss:$24 sps:$4 sm:$0xff]   ;;  %v5571_v24 = vld [vmem:[%s7731_s1 + $0x938] ss:$24 sps:$4 sm:$0xff]  }
 0x14f   :  { %3885 = vmatpush1.bf16.msra.mxu1 %v5487_v1  ;;  %v5574_v1 = vld [vmem:[%s7731_s1 + $0x940] ss:$24 sps:$4 sm:$0xff]  }
 0x150   :  { %4131 = vmatpush1.bf16.msra.mxu0 %v5490_v2  ;;  %3886 = vmatprep.subr.bf16.mxu1 %v5495_v3  ;;  %v5579_v2 = vld [vmem:[%s7731_s1 + $0x96c] ss:$24 sps:$4 sm:$0xff]   ;;  %v598_v3 = vlaneseq }
 0x151   :  { %4132 = vmatprep.subr.bf16.mxu0 %v5498_v4  ;;  %v5577_v4 = vld [vmem:[%s7731_s1 + $0x968] ss:$24 sps:$4 sm:$0xff]  }
 0x153   :  { %3887 = vmatpush1.bf16.msra.mxu1 %v5493_v5  ;;  %v5580_v5 = vld [vmem:[%s7731_s1 + $0x970] ss:$24 sps:$4 sm:$0xff]  }
 0x154   :  { %4133 = vmatpush1.bf16.msra.mxu0 %v5496_v8  ;;  %3888 = vmatprep.subr.bf16.mxu1 %v5501_v9  ;;  %v5585_v8 = vld [vmem:[%s7731_s1 + $0x99c] ss:$24 sps:$4 sm:$0xff]   ;;  %v7159_v9 = vshrl.u32 %v598_v3, 7 }
 0x155   :  { %4134 = vmatprep.subr.bf16.mxu0 %v5504_v10  ;;  %v5583_v10 = vld [vmem:[%s7731_s1 + $0x998] ss:$24 sps:$4 sm:$0xff]   ;;  %v5642_v3 = vld [vmem:[%s7731_s1 + $0xb54] ss:$24 sps:$4 sm:$0xff]  }
 0x157   :  { %3889 = vmatpush1.bf16.msra.mxu1 %v5499_v11  ;;  %v5586_v11 = vld [vmem:[%s7731_s1 + $0x9a0] ss:$24 sps:$4 sm:$0xff]  }
 0x158   :  { %4135 = vmatpush1.bf16.msra.mxu0 %v5502_v12  ;;  %3890 = vmatprep.subr.bf16.mxu1 %v5507_v13  ;;  %v5591_v12 = vld [vmem:[%s7731_s1 + $0x9cc] ss:$24 sps:$4 sm:$0xff]  }
 0x159   :  { %4136 = vmatprep.subr.bf16.mxu0 %v5510_v14  ;;  %v5594_v13 = vld [vmem:[%s7731_s1 + $0x9d4] ss:$24 sps:$4 sm:$0xff]   ;;  %v5589_v14 = vld [vmem:[%s7731_s1 + $0x9c8] ss:$24 sps:$4 sm:$0xff]  }
 0x15b   :  { %3891 = vmatpush1.bf16.msra.mxu1 %v5505_v15  ;;  %v600_v15 = vsub.s32 0, %v7159_v9 }
 0x15c   :  { %4137 = vmatpush1.bf16.msra.mxu0 %v5508_v17  ;;  %3892 = vmatprep.subr.bf16.mxu1 %v5513_v19  ;;  %v5592_v17 = vld [vmem:[%s7731_s1 + $0x9d0] ss:$24 sps:$4 sm:$0xff]   ;;  %v7183_v19 = vld [vmem:[%s7733_s2] sm:$0x3f] }
 0x15d   :  { %4138 = vmatprep.subr.bf16.mxu0 %v5516_v20  ;;  %v604_v20 = vsub.s32 1, %v7159_v9 }
 0x15f   :  { %3893 = vmatpush1.bf16.msra.mxu1 %v5511_v21  ;;  %v5597_v21 = vld [vmem:[%s7731_s1 + $0x9fc] ss:$24 sps:$4 sm:$0xff]  }
 0x160   :  { %4139 = vmatpush1.bf16.msra.mxu0 %v5514_v26  ;;  %3894 = vmatprep.subr.bf16.mxu1 %v5519_v27  ;;  %v5600_v26 = vld [vmem:[%s7731_s1 + $0xa04] ss:$24 sps:$4 sm:$0xff]   ;;  %v601_v27 = vrot.slane %v7183_v19, %v600_v15  ;;  %v5652_v15 = vld [vmem:[%s7731_s1 + $0xbb0] ss:$24 sps:$4 sm:$0xff]  }
 0x161   :  { %4140 = vmatprep.subr.bf16.mxu0 %v5522_v28  ;;  %v605_v28 = vrot.slane %v7183_v19, %v604_v20  ;;  %v5660_v20 = vld [vmem:[%s7731_s1 + $0xbe4] ss:$24 sps:$4 sm:$0xff]  }
 0x163   :  { %3895 = vmatpush1.bf16.msra.mxu1 %v5517_v29  ;;  %v5595_v29 = vld [vmem:[%s7731_s1 + $0x9f8] ss:$24 sps:$4 sm:$0xff]  }
 0x164   :  { %4141 = vmatpush1.bf16.msra.mxu0 %v5520_v30  ;;  %3896 = vmatprep.subr.bf16.mxu1 %v5525_v31  ;;  %v5598_v30 = vld [vmem:[%s7731_s1 + $0xa00] ss:$24 sps:$4 sm:$0xff]   ;;  %v5603_v31 = vld [vmem:[%s7731_s1 + $0xa2c] ss:$24 sps:$4 sm:$0xff]  }
 0x165   :  { %4142 = vmatprep.subr.bf16.mxu0 %v5528_v32  ;;  %v5606_v32 = vld [vmem:[%s7731_s1 + $0xa34] ss:$24 sps:$4 sm:$0xff]  }
 0x167   :  { %3897 = vmatpush1.bf16.msra.mxu1 %v5523_v33 }
 0x168   :  { %4143 = vmatpush1.bf16.msra.mxu0 %v5526_v37  ;;  %3898 = vmatprep.subr.bf16.mxu1 %v5531_v39 }
 0x169   :  { %4144 = vmatprep.subr.bf16.mxu0 %v5534_v22 }
 0x16b   :  { %3899 = vmatpush1.bf16.msra.mxu1 %v5529_v23 }
 0x16c   :  { %4145 = vmatpush1.bf16.msra.mxu0 %v5532_v40  ;;  %3900 = vmatprep.subr.bf16.mxu1 %v5537_v41 }
 0x16d   :  { %4146 = vmatprep.subr.bf16.mxu0 %v5540_v42 }
 0x16f   :  { %3901 = vmatpush1.bf16.msra.mxu1 %v5535_v43  ;;  %v5601_v43 = vld [vmem:[%s7731_s1 + $0xa28] ss:$24 sps:$4 sm:$0xff]  }
 0x170   :  { %4147 = vmatpush1.bf16.msra.mxu0 %v5538_v44  ;;  %3902 = vmatprep.subr.bf16.mxu1 %v5543_v45  ;;  %v5604_v44 = vld [vmem:[%s7731_s1 + $0xa30] ss:$24 sps:$4 sm:$0xff]  }
 0x171   :  { %4148 = vmatprep.subr.bf16.mxu0 %v5546_v46 }
 0x173   :  { %3903 = vmatpush1.bf16.msra.mxu1 %v5541_v48 }
 0x174   :  { %4149 = vmatpush1.bf16.msra.mxu0 %v5544_v47  ;;  %3904 = vmatprep.subr.bf16.mxu1 %v5549_v49  ;;  %v5609_v47 = vld [vmem:[%s7731_s1 + $0xa5c] ss:$24 sps:$4 sm:$0xff]  }
 0x175   :  { %4150 = vmatprep.subr.bf16.mxu0 %v5552_v50  ;;  %v5612_v49 = vld [vmem:[%s7731_s1 + $0xa64] ss:$24 sps:$4 sm:$0xff]  }
 0x177   :  { %3905 = vmatpush1.bf16.msra.mxu1 %v5547_v51 }
 0x178   :  { %4151 = vmatpush1.bf16.msra.mxu0 %v5550_v52  ;;  %3906 = vmatprep.subr.bf16.mxu1 %v5555_v54  ;;  %v5607_v52 = vld [vmem:[%s7731_s1 + $0xa58] ss:$24 sps:$4 sm:$0xff]  }
 0x179   :  { %4152 = vmatprep.subr.bf16.mxu0 %v5558_v6  ;;  %v5610_v54 = vld [vmem:[%s7731_s1 + $0xa60] ss:$24 sps:$4 sm:$0xff]   ;;  %v5615_v6 = vld [vmem:[%s7731_s1 + $0xa8c] ss:$24 sps:$4 sm:$0xff]  }
 0x17b   :  { %3907 = vmatpush1.bf16.msra.mxu1 %v5553_v55  ;;  %v5618_v55 = vld [vmem:[%s7731_s1 + $0xa94] ss:$24 sps:$4 sm:$0xff]  }
 0x17c   :  { %4153 = vmatpush1.bf16.msra.mxu0 %v5556_v56  ;;  %3908 = vmatprep.subr.bf16.mxu1 %v5561_v57  ;;  %v5613_v56 = vld [vmem:[%s7731_s1 + $0xa88] ss:$24 sps:$4 sm:$0xff]  }
 0x17d   :  { %4154 = vmatprep.subr.bf16.mxu0 %v5564_v35  ;;  %v5616_v57 = vld [vmem:[%s7731_s1 + $0xa90] ss:$24 sps:$4 sm:$0xff]   ;;  %v5621_v35 = vld [vmem:[%s7731_s1 + $0xabc] ss:$24 sps:$4 sm:$0xff]  }
 0x17f   :  { %3909 = vmatpush1.bf16.msra.mxu1 %v5559_v58  ;;  %v5624_v58 = vld [vmem:[%s7731_s1 + $0xac4] ss:$24 sps:$4 sm:$0xff]  }
 0x180   :  { %4155 = vmatpush1.bf16.msra.mxu0 %v5562_v59  ;;  %3919 = vmatprep.subr.bf16.mxu1 %v5567_v60  ;;  %v5619_v59 = vld [vmem:[%s7731_s1 + $0xab8] ss:$24 sps:$4 sm:$0xff]  }
 0x181   :  { %4165 = vmatprep.subr.bf16.mxu0 %v5570_v61  ;;  %v5622_v60 = vld [vmem:[%s7731_s1 + $0xac0] ss:$24 sps:$4 sm:$0xff]   ;;  %v5627_v61 = vld [vmem:[%s7731_s1 + $0xaec] ss:$24 sps:$4 sm:$0xff]  }
 0x182   :  { %3911 = vmatmul.mubr.bf16.vlgmr.msra.gmra.mrb[4].mxu1 %v6525_v34 }
 0x183   :  { %4157 = vmatmul.mubr.bf16.vlgmr.msra.gmra.mrb[4].mxu0 %v6525_v34  ;;  %3920 = vmatpush1.bf16.msra.mxu1 %v5565_v16  ;;  %v5582_v34 = vld [vmem:[%s7731_s1 + $0x974] ss:$24 sps:$4 sm:$0xff]  }
 0x184   :  { %4166 = vmatpush1.bf16.msra.mxu0 %v5568_v62  ;;  %3921 = vmatprep.subr.bf16.mxu1 %v5573_v63  ;;  %v5630_v16 = vld [vmem:[%s7731_s1 + $0xaf4] ss:$24 sps:$4 sm:$0xff]   ;;  %v5625_v62 = vld [vmem:[%s7731_s1 + $0xae8] ss:$24 sps:$4 sm:$0xff]  }
 0x185   :  { %4167 = vmatprep.subr.bf16.mxu0 %v5576_v0  ;;  %3951 = vmatprep.mubr.bf16.mxu1 %v6031_v53  ;;  %v5628_v63 = vld [vmem:[%s7731_s1 + $0xaf0] ss:$24 sps:$4 sm:$0xff]   ;;  %v5633_v0 = vld [vmem:[%s7731_s1 + $0xb1c] ss:$24 sps:$4 sm:$0xff]  }
 0x186   :  { %4197 = vmatprep.mubr.bf16.mxu0 %v6031_v53  ;;  %v5588_v53 = vld [vmem:[%s7731_s1 + $0x9a4] ss:$24 sps:$4 sm:$0xff]  }
 0x187   :  { %3922 = vmatpush1.bf16.msra.mxu1 %v5571_v24  ;;  %v5636_v24 = vld [vmem:[%s7731_s1 + $0xb24] ss:$24 sps:$4 sm:$0xff]  }
 0x188   :  { %4168 = vmatpush1.bf16.msra.mxu0 %v5574_v1  ;;  %3923 = vmatprep.subr.bf16.mxu1 %v5579_v2  ;;  %v5631_v1 = vld [vmem:[%s7731_s1 + $0xb18] ss:$24 sps:$4 sm:$0xff]  }
 0x189   :  { %4169 = vmatprep.subr.bf16.mxu0 %v5582_v34  ;;  %v5634_v2 = vld [vmem:[%s7731_s1 + $0xb20] ss:$24 sps:$4 sm:$0xff]   ;;  %v5639_v34 = vld [vmem:[%s7731_s1 + $0xb4c] ss:$24 sps:$4 sm:$0xff]  }
 0x18b   :  { %3924 = vmatpush1.bf16.msra.mxu1 %v5577_v4  ;;  %v5637_v4 = vld [vmem:[%s7731_s1 + $0xb48] ss:$24 sps:$4 sm:$0xff]  }
 0x18c   :  { %4170 = vmatpush1.bf16.msra.mxu0 %v5580_v5  ;;  %3925 = vmatprep.subr.bf16.mxu1 %v5585_v8  ;;  %v5640_v5 = vld [vmem:[%s7731_s1 + $0xb50] ss:$24 sps:$4 sm:$0xff]   ;;  %v5645_v8 = vld [vmem:[%s7731_s1 + $0xb7c] ss:$24 sps:$4 sm:$0xff]  }
 0x18d   :  { %4171 = vmatprep.subr.bf16.mxu0 %v5588_v53  ;;  %v5648_v53 = vld [vmem:[%s7731_s1 + $0xb84] ss:$24 sps:$4 sm:$0xff]  }
 0x18f   :  { %3926 = vmatpush1.bf16.msra.mxu1 %v5583_v10  ;;  %v5643_v10 = vld [vmem:[%s7731_s1 + $0xb78] ss:$24 sps:$4 sm:$0xff]  }
 0x190   :  { %4172 = vmatpush1.bf16.msra.mxu0 %v5586_v11  ;;  %3927 = vmatprep.subr.bf16.mxu1 %v5591_v12  ;;  %v5646_v11 = vld [vmem:[%s7731_s1 + $0xb80] ss:$24 sps:$4 sm:$0xff]   ;;  %v5651_v12 = vld [vmem:[%s7731_s1 + $0xbac] ss:$24 sps:$4 sm:$0xff]  }
 0x191   :  { %4173 = vmatprep.subr.bf16.mxu0 %v5594_v13  ;;  %v5654_v13 = vld [vmem:[%s7731_s1 + $0xbb4] ss:$24 sps:$4 sm:$0xff]  }
 0x193   :  { %3928 = vmatpush1.bf16.msra.mxu1 %v5589_v14  ;;  %v5649_v14 = vld [vmem:[%s7731_s1 + $0xba8] ss:$24 sps:$4 sm:$0xff]  }
 0x194   :  { %4174 = vmatpush1.bf16.msra.mxu0 %v5592_v17  ;;  %3929 = vmatprep.subr.bf16.mxu1 %v5597_v21  ;;  %v5657_v17 = vld [vmem:[%s7731_s1 + $0xbdc] ss:$24 sps:$4 sm:$0xff]   ;;  %v5655_v21 = vld [vmem:[%s7731_s1 + $0xbd8] ss:$24 sps:$4 sm:$0xff]  }
 0x195   :  { %4175 = vmatprep.subr.bf16.mxu0 %v5600_v26  ;;  %v3666_v33 = vpop.f32.mrb[0].mxu1  ;;  %v5658_v26 = vld [vmem:[%s7731_s1 + $0xbe0] ss:$24 sps:$4 sm:$0xff]  }
 0x196   :  { %v3789_v37 = vpop.f32.mrb[0].mxu0  ;;  %v4913_v39 = vadd.f32 %v3666_v33, %v601_v27  ;;  %v3668_v22 = vpop.f32.mrb[1].mxu1  ;;  %v5663_v27 = vld [vmem:[%s7731_s1 + $0xc0c] ss:$24 sps:$4 sm:$0xff]   ;;  %v5667_v33 = vld [vmem:[%s7731_s1 + $0xc38] ss:$24 sps:$4 sm:$0xff]  }
 0x197   :  { %v3791_v23 = vpop.f32.mrb[1].mxu0  ;;  %v4915_v40 = vadd.f32 %v3668_v22, %v605_v28  ;;  %v3670_v41 = vpop.f32.mrb[2].mxu1  ;;  %3930 = vmatpush1.bf16.msra.mxu1 %v5595_v29  ;;  %v5666_v28 = vld [vmem:[%s7731_s1 + $0xc14] ss:$24 sps:$4 sm:$0xff]   ;;  %v5661_v29 = vld [vmem:[%s7731_s1 + $0xc08] ss:$24 sps:$4 sm:$0xff]  }
 0x198   :  { %v3793_v42 = vpop.f32.mrb[2].mxu0  ;;  %4176 = vmatpush1.bf16.msra.mxu0 %v5598_v30  ;;  %v4914_v45 = vadd.f32 %v4913_v39, %v3789_v37  ;;  %v3671_v46 = vpop.f32.mrb[3].mxu1  ;;  %3931 = vmatprep.subr.bf16.mxu1 %v5603_v31  ;;  %v5664_v30 = vld [vmem:[%s7731_s1 + $0xc10] ss:$24 sps:$4 sm:$0xff]   ;;  %v5669_v31 = vld [vmem:[%s7731_s1 + $0xc3c] ss:$24 sps:$4 sm:$0xff]  }
 0x199   :  { %v3794_v48 = vpop.f32.mrb[3].mxu0  ;;  %4177 = vmatprep.subr.bf16.mxu0 %v5606_v32  ;;  %v4916_v50 = vadd.f32 %v4915_v40, %v3791_v23  ;;  %v5672_v32 = vld [vmem:[%s7731_s1 + $0xc44] ss:$24 sps:$4 sm:$0xff]   ;;  %v5670_v37 = vld [vmem:[%s7731_s1 + $0xc40] ss:$24 sps:$4 sm:$0xff]  }
 0x19a   :  { %v5675_v39 = vld [vmem:[%s7731_s1 + $0xc6c] ss:$24 sps:$4 sm:$0xff]   ;;  %v5673_v22 = vld [vmem:[%s7731_s1 + $0xc68] ss:$24 sps:$4 sm:$0xff]   ;;  %v5681_v40 = vld [vmem:[%s7731_s1 + $0xc9c] ss:$24 sps:$4 sm:$0xff]  }
 0x19b   :  { %v4910_v51 = vpack.c.bf16 %v4916_v50, %v4914_v45  ;;  %3932 = vmatpush1.bf16.msra.mxu1 %v5601_v43  ;;  %v5676_v23 = vld [vmem:[%s7731_s1 + $0xc70] ss:$24 sps:$4 sm:$0xff]   ;;  %v5682_v42 = vld [vmem:[%s7731_s1 + $0xca0] ss:$24 sps:$4 sm:$0xff]   ;;  %v5687_v43 = vld [vmem:[%s7731_s1 + $0xccc] ss:$24 sps:$4 sm:$0xff]  }
 0x19c   :  { %4178 = vmatpush1.bf16.msra.mxu0 %v5604_v44  ;;  %3933 = vmatprep.subr.bf16.mxu1 %v5609_v47  ;;  %v5679_v41 = vld [vmem:[%s7731_s1 + $0xc98] ss:$24 sps:$4 sm:$0xff]   ;;  %v5690_v44 = vld [vmem:[%s7731_s1 + $0xcd4] ss:$24 sps:$4 sm:$0xff]   ;;  %v5685_v45 = vld [vmem:[%s7731_s1 + $0xcc8] ss:$24 sps:$4 sm:$0xff]  }
 0x19d   :  { %4179 = vmatprep.subr.bf16.mxu0 %v5612_v49  ;;  %4312 = vst [vmem:[%s7734_s3] sm:$0xff] %v4910_v51  ;;  %v5688_v46 = vld [vmem:[%s7731_s1 + $0xcd0] ss:$24 sps:$4 sm:$0xff]   ;;  %v5693_v48 = vld [vmem:[%s7731_s1 + $0xcfc] ss:$24 sps:$4 sm:$0xff]   ;;  %v5694_v50 = vld [vmem:[%s7731_s1 + $0xd00] ss:$24 sps:$4 sm:$0xff]  }
 0x19e   :  { %v5696_v47 = vld [vmem:[%s7731_s1 + $0xd04] ss:$24 sps:$4 sm:$0xff]   ;;  %v5691_v49 = vld [vmem:[%s7731_s1 + $0xcf8] ss:$24 sps:$4 sm:$0xff]  }
 0x19f   :  { %3934 = vmatpush1.bf16.msra.mxu1 %v5607_v52  ;;  %v5699_v51 = vld [vmem:[%s7731_s1 + $0xd2c] ss:$24 sps:$4 sm:$0xff]  }
 0x1a0   :  { %4180 = vmatpush1.bf16.msra.mxu0 %v5610_v54  ;;  %3935 = vmatprep.subr.bf16.mxu1 %v5615_v6  ;;  %v5702_v52 = vld [vmem:[%s7731_s1 + $0xd34] ss:$24 sps:$4 sm:$0xff]   ;;  %v5697_v54 = vld [vmem:[%s7731_s1 + $0xd28] ss:$24 sps:$4 sm:$0xff]  }
 0x1a1   :  { %4181 = vmatprep.subr.bf16.mxu0 %v5618_v55  ;;  %v5700_v6 = vld [vmem:[%s7731_s1 + $0xd30] ss:$24 sps:$4 sm:$0xff]   ;;  %v5705_v55 = vld [vmem:[%s7731_s1 + $0xd5c] ss:$24 sps:$4 sm:$0xff]  }
 0x1a3   :  { %3936 = vmatpush1.bf16.msra.mxu1 %v5613_v56  ;;  %v5708_v56 = vld [vmem:[%s7731_s1 + $0xd64] ss:$24 sps:$4 sm:$0xff]  }
 0x1a4   :  { %4182 = vmatpush1.bf16.msra.mxu0 %v5616_v57  ;;  %3937 = vmatprep.subr.bf16.mxu1 %v5621_v35  ;;  %v5703_v57 = vld [vmem:[%s7731_s1 + $0xd58] ss:$24 sps:$4 sm:$0xff]  }
 0x1a5   :  { %4183 = vmatprep.subr.bf16.mxu0 %v5624_v58  ;;  %v5706_v35 = vld [vmem:[%s7731_s1 + $0xd60] ss:$24 sps:$4 sm:$0xff]   ;;  %v5711_v58 = vld [vmem:[%s7731_s1 + $0xd8c] ss:$24 sps:$4 sm:$0xff]  }
 0x1a7   :  { %3938 = vmatpush1.bf16.msra.mxu1 %v5619_v59  ;;  %v5714_v59 = vld [vmem:[%s7731_s1 + $0xd94] ss:$24 sps:$4 sm:$0xff]  }
 0x1a8   :  { %4184 = vmatpush1.bf16.msra.mxu0 %v5622_v60  ;;  %3939 = vmatprep.subr.bf16.mxu1 %v5627_v61  ;;  %v5709_v60 = vld [vmem:[%s7731_s1 + $0xd88] ss:$24 sps:$4 sm:$0xff]  }
 0x1a9   :  { %4185 = vmatprep.subr.bf16.mxu0 %v5630_v16  ;;  %v5712_v61 = vld [vmem:[%s7731_s1 + $0xd90] ss:$24 sps:$4 sm:$0xff]   ;;  %v5717_v16 = vld [vmem:[%s7731_s1 + $0xdbc] ss:$24 sps:$4 sm:$0xff]  }
 0x1ab   :  { %3940 = vmatpush1.bf16.msra.mxu1 %v5625_v62  ;;  %v5720_v62 = vld [vmem:[%s7731_s1 + $0xdc4] ss:$24 sps:$4 sm:$0xff]  }
 0x1ac   :  { %4186 = vmatpush1.bf16.msra.mxu0 %v5628_v63  ;;  %3941 = vmatprep.subr.bf16.mxu1 %v5633_v0  ;;  %v5715_v63 = vld [vmem:[%s7731_s1 + $0xdb8] ss:$24 sps:$4 sm:$0xff]  }
 0x1ad   :  { %4187 = vmatprep.subr.bf16.mxu0 %v5636_v24  ;;  %v5718_v0 = vld [vmem:[%s7731_s1 + $0xdc0] ss:$24 sps:$4 sm:$0xff]   ;;  %v5723_v24 = vld [vmem:[%s7731_s1 + $0xdec] ss:$24 sps:$4 sm:$0xff]  }
 0x1af   :  { %3942 = vmatpush1.bf16.msra.mxu1 %v5631_v1  ;;  %v5726_v1 = vld [vmem:[%s7731_s1 + $0xdf4] ss:$24 sps:$4 sm:$0xff]  }
 0x1b0   :  { %4188 = vmatpush1.bf16.msra.mxu0 %v5634_v2  ;;  %3943 = vmatprep.subr.bf16.mxu1 %v5639_v34  ;;  %v5721_v2 = vld [vmem:[%s7731_s1 + $0xde8] ss:$24 sps:$4 sm:$0xff]  }
 0x1b1   :  { %4189 = vmatprep.subr.bf16.mxu0 %v5642_v3  ;;  %v5724_v34 = vld [vmem:[%s7731_s1 + $0xdf0] ss:$24 sps:$4 sm:$0xff]   ;;  %v5729_v3 = vld [vmem:[%s7731_s1 + $0xe1c] ss:$24 sps:$4 sm:$0xff]  }
 0x1b3   :  { %3944 = vmatpush1.bf16.msra.mxu1 %v5637_v4  ;;  %v5732_v4 = vld [vmem:[%s7731_s1 + $0xe24] ss:$24 sps:$4 sm:$0xff]  }
 0x1b4   :  { %4190 = vmatpush1.bf16.msra.mxu0 %v5640_v5  ;;  %3945 = vmatprep.subr.bf16.mxu1 %v5645_v8  ;;  %v5727_v5 = vld [vmem:[%s7731_s1 + $0xe18] ss:$24 sps:$4 sm:$0xff]  }
 0x1b5   :  { %4191 = vmatprep.subr.bf16.mxu0 %v5648_v53  ;;  %v5730_v8 = vld [vmem:[%s7731_s1 + $0xe20] ss:$24 sps:$4 sm:$0xff]   ;;  %v5735_v53 = vld [vmem:[%s7731_s1 + $0xe4c] ss:$24 sps:$4 sm:$0xff]  }
 0x1b7   :  { %3946 = vmatpush1.bf16.msra.mxu1 %v5643_v10  ;;  %v5738_v10 = vld [vmem:[%s7731_s1 + $0xe54] ss:$24 sps:$4 sm:$0xff]  }
 0x1b8   :  { %4192 = vmatpush1.bf16.msra.mxu0 %v5646_v11  ;;  %3947 = vmatprep.subr.bf16.mxu1 %v5651_v12  ;;  %v5733_v11 = vld [vmem:[%s7731_s1 + $0xe48] ss:$24 sps:$4 sm:$0xff]  }
 0x1b9   :  { %4193 = vmatprep.subr.bf16.mxu0 %v5654_v13  ;;  %v5736_v12 = vld [vmem:[%s7731_s1 + $0xe50] ss:$24 sps:$4 sm:$0xff]   ;;  %v5741_v13 = vld [vmem:[%s7731_s1 + $0xe7c] ss:$24 sps:$4 sm:$0xff]  }
 0x1bb   :  { %3948 = vmatpush1.bf16.msra.mxu1 %v5649_v14  ;;  %v5744_v14 = vld [vmem:[%s7731_s1 + $0xe84] ss:$24 sps:$4 sm:$0xff]  }
 0x1bc   :  { %4194 = vmatpush1.bf16.msra.mxu0 %v5652_v15  ;;  %3949 = vmatprep.subr.bf16.mxu1 %v5657_v17  ;;  %v5739_v15 = vld [vmem:[%s7731_s1 + $0xe78] ss:$24 sps:$4 sm:$0xff]  }
 0x1bd   :  { %4195 = vmatprep.subr.bf16.mxu0 %v5660_v20  ;;  %v5742_v17 = vld [vmem:[%s7731_s1 + $0xe80] ss:$24 sps:$4 sm:$0xff]   ;;  %v5747_v20 = vld [vmem:[%s7731_s1 + $0xeac] ss:$24 sps:$4 sm:$0xff]  }
 0x1bf   :  { %3950 = vmatpush1.bf16.msra.mxu1 %v5655_v21  ;;  %v5750_v21 = vld [vmem:[%s7731_s1 + $0xeb4] ss:$24 sps:$4 sm:$0xff]  }
 0x1c0   :  { %4196 = vmatpush1.bf16.msra.mxu0 %v5658_v26  ;;  %3960 = vmatprep.subr.bf16.mxu1 %v5663_v27  ;;  %v5745_v26 = vld [vmem:[%s7731_s1 + $0xea8] ss:$24 sps:$4 sm:$0xff]  }
 0x1c1   :  { %4206 = vmatprep.subr.bf16.mxu0 %v5666_v28  ;;  %v5748_v27 = vld [vmem:[%s7731_s1 + $0xeb0] ss:$24 sps:$4 sm:$0xff]   ;;  %v5753_v28 = vld [vmem:[%s7731_s1 + $0xedc] ss:$24 sps:$4 sm:$0xff]  }
 0x1c2   :  { %3952 = vmatmul.mubr.bf16.vlgmr.msra.gmra.mrb[4].mxu1 %v6085_v7 }
 0x1c3   :  { %4198 = vmatmul.mubr.bf16.vlgmr.msra.gmra.mrb[4].mxu0 %v6085_v7  ;;  %3961 = vmatpush1.bf16.msra.mxu1 %v5661_v29  ;;  %v5678_v7 = vld [vmem:[%s7731_s1 + $0xc74] ss:$24 sps:$4 sm:$0xff]   ;;  %v5756_v29 = vld [vmem:[%s7731_s1 + $0xee4] ss:$24 sps:$4 sm:$0xff]  }
 0x1c4   :  { %4207 = vmatpush1.bf16.msra.mxu0 %v5664_v30  ;;  %3962 = vmatprep.subr.bf16.mxu1 %v5669_v31  ;;  %v5751_v30 = vld [vmem:[%s7731_s1 + $0xed8] ss:$24 sps:$4 sm:$0xff]  }
 0x1c5   :  { %4208 = vmatprep.subr.bf16.mxu0 %v5672_v32  ;;  %3992 = vmatprep.mubr.bf16.mxu1 %v6186_v38  ;;  %v5754_v31 = vld [vmem:[%s7731_s1 + $0xee0] ss:$24 sps:$4 sm:$0xff]   ;;  %v5759_v32 = vld [vmem:[%s7731_s1 + $0xf0c] ss:$24 sps:$4 sm:$0xff]  }
 0x1c6   :  { %4238 = vmatprep.mubr.bf16.mxu0 %v6186_v38  ;;  %v5684_v38 = vld [vmem:[%s7731_s1 + $0xca4] ss:$24 sps:$4 sm:$0xff]  }
 0x1c7   :  { %3963 = vmatpush1.bf16.msra.mxu1 %v5667_v33  ;;  %v5762_v33 = vld [vmem:[%s7731_s1 + $0xf14] ss:$24 sps:$4 sm:$0xff]  }
 0x1c8   :  { %4209 = vmatpush1.bf16.msra.mxu0 %v5670_v37  ;;  %3964 = vmatprep.subr.bf16.mxu1 %v5675_v39  ;;  %v5757_v37 = vld [vmem:[%s7731_s1 + $0xf08] ss:$24 sps:$4 sm:$0xff]  }
 0x1c9   :  { %4210 = vmatprep.subr.bf16.mxu0 %v5678_v7  ;;  %v5760_v39 = vld [vmem:[%s7731_s1 + $0xf10] ss:$24 sps:$4 sm:$0xff]   ;;  %v5765_v7 = vld [vmem:[%s7731_s1 + $0xf3c] ss:$24 sps:$4 sm:$0xff]  }
 0x1cb   :  { %3965 = vmatpush1.bf16.msra.mxu1 %v5673_v22  ;;  %v5768_v22 = vld [vmem:[%s7731_s1 + $0xf44] ss:$24 sps:$4 sm:$0xff]  }
 0x1cc   :  { %4211 = vmatpush1.bf16.msra.mxu0 %v5676_v23  ;;  %3966 = vmatprep.subr.bf16.mxu1 %v5681_v40  ;;  %v5763_v23 = vld [vmem:[%s7731_s1 + $0xf38] ss:$24 sps:$4 sm:$0xff]  }
 0x1cd   :  { %4212 = vmatprep.subr.bf16.mxu0 %v5684_v38  ;;  %v5766_v40 = vld [vmem:[%s7731_s1 + $0xf40] ss:$24 sps:$4 sm:$0xff]   ;;  %v5771_v38 = vld [vmem:[%s7731_s1 + $0xf6c] ss:$24 sps:$4 sm:$0xff]  }
 0x1cf   :  { %3967 = vmatpush1.bf16.msra.mxu1 %v5679_v41  ;;  %v5769_v41 = vld [vmem:[%s7731_s1 + $0xf68] ss:$24 sps:$4 sm:$0xff]  }
 0x1d0   :  { %4213 = vmatpush1.bf16.msra.mxu0 %v5682_v42  ;;  %3968 = vmatprep.subr.bf16.mxu1 %v5687_v43  ;;  %v5772_v42 = vld [vmem:[%s7731_s1 + $0xf70] ss:$24 sps:$4 sm:$0xff]   ;;  %v5777_v43 = vld [vmem:[%s7731_s1 + $0xf9c] ss:$24 sps:$4 sm:$0xff]  }
 0x1d1   :  { %4214 = vmatprep.subr.bf16.mxu0 %v5690_v44  ;;  %v5775_v44 = vld [vmem:[%s7731_s1 + $0xf98] ss:$24 sps:$4 sm:$0xff]  }
 0x1d3   :  { %3969 = vmatpush1.bf16.msra.mxu1 %v5685_v45  ;;  %v5778_v45 = vld [vmem:[%s7731_s1 + $0xfa0] ss:$24 sps:$4 sm:$0xff]  }
 0x1d4   :  { %4215 = vmatpush1.bf16.msra.mxu0 %v5688_v46  ;;  %3970 = vmatprep.subr.bf16.mxu1 %v5693_v48  ;;  %v5783_v46 = vld [vmem:[%s7731_s1 + $0xfcc] ss:$24 sps:$4 sm:$0xff]  }
 0x1d5   :  { %4216 = vmatprep.subr.bf16.mxu0 %v5696_v47  ;;  %v5786_v48 = vld [vmem:[%s7731_s1 + $0xfd4] ss:$24 sps:$4 sm:$0xff]   ;;  %v5781_v47 = vld [vmem:[%s7731_s1 + $0xfc8] ss:$24 sps:$4 sm:$0xff]  }
 0x1d7   :  { %3971 = vmatpush1.bf16.msra.mxu1 %v5691_v49  ;;  %v5784_v49 = vld [vmem:[%s7731_s1 + $0xfd0] ss:$24 sps:$4 sm:$0xff]  }
 0x1d8   :  { %4217 = vmatpush1.bf16.msra.mxu0 %v5694_v50  ;;  %3972 = vmatprep.subr.bf16.mxu1 %v5699_v51  ;;  %v5789_v50 = vld [vmem:[%s7731_s1 + $0xffc] ss:$24 sps:$4 sm:$0xff]  }
 0x1d9   :  { %4218 = vmatprep.subr.bf16.mxu0 %v5702_v52  ;;  %v5792_v51 = vld [vmem:[%s7731_s1 + $0x1004] ss:$24 sps:$4 sm:$0xff]   ;;  %v5787_v52 = vld [vmem:[%s7731_s1 + $0xff8] ss:$24 sps:$4 sm:$0xff]  }
 0x1db   :  { %3973 = vmatpush1.bf16.msra.mxu1 %v5697_v54  ;;  %v5790_v54 = vld [vmem:[%s7731_s1 + $0x1000] ss:$24 sps:$4 sm:$0xff]  }
 0x1dc   :  { %4219 = vmatpush1.bf16.msra.mxu0 %v5700_v6  ;;  %3974 = vmatprep.subr.bf16.mxu1 %v5705_v55  ;;  %v5795_v6 = vld [vmem:[%s7731_s1 + $0x102c] ss:$24 sps:$4 sm:$0xff]  }
 0x1dd   :  { %4220 = vmatprep.subr.bf16.mxu0 %v5708_v56  ;;  %v5798_v55 = vld [vmem:[%s7731_s1 + $0x1034] ss:$24 sps:$4 sm:$0xff]   ;;  %v5793_v56 = vld [vmem:[%s7731_s1 + $0x1028] ss:$24 sps:$4 sm:$0xff]  }
 0x1df   :  { %3975 = vmatpush1.bf16.msra.mxu1 %v5703_v57  ;;  %v5796_v57 = vld [vmem:[%s7731_s1 + $0x1030] ss:$24 sps:$4 sm:$0xff]  }
 0x1e0   :  { %4221 = vmatpush1.bf16.msra.mxu0 %v5706_v35  ;;  %3976 = vmatprep.subr.bf16.mxu1 %v5711_v58  ;;  %v5801_v35 = vld [vmem:[%s7731_s1 + $0x105c] ss:$24 sps:$4 sm:$0xff]  }
 0x1e1   :  { %4222 = vmatprep.subr.bf16.mxu0 %v5714_v59  ;;  %v5804_v58 = vld [vmem:[%s7731_s1 + $0x1064] ss:$24 sps:$4 sm:$0xff]   ;;  %v5799_v59 = vld [vmem:[%s7731_s1 + $0x1058] ss:$24 sps:$4 sm:$0xff]  }
 0x1e3   :  { %3977 = vmatpush1.bf16.msra.mxu1 %v5709_v60  ;;  %v5802_v60 = vld [vmem:[%s7731_s1 + $0x1060] ss:$24 sps:$4 sm:$0xff]  }
 0x1e4   :  { %4223 = vmatpush1.bf16.msra.mxu0 %v5712_v61  ;;  %3978 = vmatprep.subr.bf16.mxu1 %v5717_v16  ;;  %v5807_v61 = vld [vmem:[%s7731_s1 + $0x108c] ss:$24 sps:$4 sm:$0xff]  }
 0x1e5   :  { %4224 = vmatprep.subr.bf16.mxu0 %v5720_v62  ;;  %v5810_v16 = vld [vmem:[%s7731_s1 + $0x1094] ss:$24 sps:$4 sm:$0xff]   ;;  %v5805_v62 = vld [vmem:[%s7731_s1 + $0x1088] ss:$24 sps:$4 sm:$0xff]  }
 0x1e7   :  { %3979 = vmatpush1.bf16.msra.mxu1 %v5715_v63  ;;  %v5808_v63 = vld [vmem:[%s7731_s1 + $0x1090] ss:$24 sps:$4 sm:$0xff]  }
 0x1e8   :  { %4225 = vmatpush1.bf16.msra.mxu0 %v5718_v0  ;;  %3980 = vmatprep.subr.bf16.mxu1 %v5723_v24  ;;  %v5813_v0 = vld [vmem:[%s7731_s1 + $0x10bc] ss:$24 sps:$4 sm:$0xff]  }
 0x1e9   :  { %4226 = vmatprep.subr.bf16.mxu0 %v5726_v1  ;;  %v5816_v24 = vld [vmem:[%s7731_s1 + $0x10c4] ss:$24 sps:$4 sm:$0xff]   ;;  %v5811_v1 = vld [vmem:[%s7731_s1 + $0x10b8] ss:$24 sps:$4 sm:$0xff]  }
 0x1eb   :  { %3981 = vmatpush1.bf16.msra.mxu1 %v5721_v2  ;;  %v5814_v2 = vld [vmem:[%s7731_s1 + $0x10c0] ss:$24 sps:$4 sm:$0xff]  }
 0x1ec   :  { %4227 = vmatpush1.bf16.msra.mxu0 %v5724_v34  ;;  %3982 = vmatprep.subr.bf16.mxu1 %v5729_v3  ;;  %v5819_v34 = vld [vmem:[%s7731_s1 + $0x10ec] ss:$24 sps:$4 sm:$0xff]  }
 0x1ed   :  { %4228 = vmatprep.subr.bf16.mxu0 %v5732_v4  ;;  %v5822_v3 = vld [vmem:[%s7731_s1 + $0x10f4] ss:$24 sps:$4 sm:$0xff]   ;;  %v5817_v4 = vld [vmem:[%s7731_s1 + $0x10e8] ss:$24 sps:$4 sm:$0xff]  }
 0x1ef   :  { %3983 = vmatpush1.bf16.msra.mxu1 %v5727_v5  ;;  %v5820_v5 = vld [vmem:[%s7731_s1 + $0x10f0] ss:$24 sps:$4 sm:$0xff]  }
 0x1f0   :  { %4229 = vmatpush1.bf16.msra.mxu0 %v5730_v8  ;;  %3984 = vmatprep.subr.bf16.mxu1 %v5735_v53  ;;  %v5825_v8 = vld [vmem:[%s7731_s1 + $0x111c] ss:$24 sps:$4 sm:$0xff]  }
 0x1f1   :  { %4230 = vmatprep.subr.bf16.mxu0 %v5738_v10  ;;  %v5828_v53 = vld [vmem:[%s7731_s1 + $0x1124] ss:$24 sps:$4 sm:$0xff]   ;;  %v5823_v10 = vld [vmem:[%s7731_s1 + $0x1118] ss:$24 sps:$4 sm:$0xff]  }
 0x1f3   :  { %3985 = vmatpush1.bf16.msra.mxu1 %v5733_v11  ;;  %v5826_v11 = vld [vmem:[%s7731_s1 + $0x1120] ss:$24 sps:$4 sm:$0xff]  }
 0x1f4   :  { %4231 = vmatpush1.bf16.msra.mxu0 %v5736_v12  ;;  %3986 = vmatprep.subr.bf16.mxu1 %v5741_v13  ;;  %v5831_v12 = vld [vmem:[%s7731_s1 + $0x114c] ss:$24 sps:$4 sm:$0xff]  }
 0x1f5   :  { %4232 = vmatprep.subr.bf16.mxu0 %v5744_v14  ;;  %v5834_v13 = vld [vmem:[%s7731_s1 + $0x1154] ss:$24 sps:$4 sm:$0xff]   ;;  %v5829_v14 = vld [vmem:[%s7731_s1 + $0x1148] ss:$24 sps:$4 sm:$0xff]  }
 0x1f7   :  { %3987 = vmatpush1.bf16.msra.mxu1 %v5739_v15  ;;  %v5832_v15 = vld [vmem:[%s7731_s1 + $0x1150] ss:$24 sps:$4 sm:$0xff]  }
 0x1f8   :  { %4233 = vmatpush1.bf16.msra.mxu0 %v5742_v17  ;;  %3988 = vmatprep.subr.bf16.mxu1 %v5747_v20  ;;  %v5837_v17 = vld [vmem:[%s7731_s1 + $0x117c] ss:$24 sps:$4 sm:$0xff]  }
 0x1f9   :  { %4234 = vmatprep.subr.bf16.mxu0 %v5750_v21  ;;  %v5840_v20 = vld [vmem:[%s7731_s1 + $0x1184] ss:$24 sps:$4 sm:$0xff]   ;;  %v5835_v21 = vld [vmem:[%s7731_s1 + $0x1178] ss:$24 sps:$4 sm:$0xff]  }
 0x1fb   :  { %3989 = vmatpush1.bf16.msra.mxu1 %v5745_v26  ;;  %v5838_v26 = vld [vmem:[%s7731_s1 + $0x1180] ss:$24 sps:$4 sm:$0xff]  }
 0x1fc   :  { %4235 = vmatpush1.bf16.msra.mxu0 %v5748_v27  ;;  %3990 = vmatprep.subr.bf16.mxu1 %v5753_v28  ;;  %v5843_v27 = vld [vmem:[%s7731_s1 + $0x11ac] ss:$24 sps:$4 sm:$0xff]  }
 0x1fd   :  { %4236 = vmatprep.subr.bf16.mxu0 %v5756_v29  ;;  %v5846_v28 = vld [vmem:[%s7731_s1 + $0x11b4] ss:$24 sps:$4 sm:$0xff]   ;;  %v5841_v29 = vld [vmem:[%s7731_s1 + $0x11a8] ss:$24 sps:$4 sm:$0xff]  }
 0x1ff   :  { %3991 = vmatpush1.bf16.msra.mxu1 %v5751_v30  ;;  %v5844_v30 = vld [vmem:[%s7731_s1 + $0x11b0] ss:$24 sps:$4 sm:$0xff]  }
 0x200   :  { %4237 = vmatpush1.bf16.msra.mxu0 %v5754_v31  ;;  %4001 = vmatprep.subr.bf16.mxu1 %v5759_v32  ;;  %v5849_v31 = vld [vmem:[%s7731_s1 + $0x11dc] ss:$24 sps:$4 sm:$0xff]  }
 0x201   :  { %4247 = vmatprep.subr.bf16.mxu0 %v5762_v33  ;;  %v5852_v32 = vld [vmem:[%s7731_s1 + $0x11e4] ss:$24 sps:$4 sm:$0xff]   ;;  %v5847_v33 = vld [vmem:[%s7731_s1 + $0x11d8] ss:$24 sps:$4 sm:$0xff]  }
 0x202   :  { %3993 = vmatmul.mubr.bf16.vlgmr.msra.gmra.mrb[4].mxu1 %v6310_v18 }
 0x203   :  { %4239 = vmatmul.mubr.bf16.vlgmr.msra.gmra.mrb[4].mxu0 %v6310_v18  ;;  %4002 = vmatpush1.bf16.msra.mxu1 %v5757_v37  ;;  %v5774_v18 = vld [vmem:[%s7731_s1 + $0xf74] ss:$24 sps:$4 sm:$0xff]   ;;  %v5850_v37 = vld [vmem:[%s7731_s1 + $0x11e0] ss:$24 sps:$4 sm:$0xff]  }
 0x204   :  { %4248 = vmatpush1.bf16.msra.mxu0 %v5760_v39  ;;  %4003 = vmatprep.subr.bf16.mxu1 %v5765_v7  ;;  %v608_v39 = vsub.s32 2, %v7159_v9  ;;  %v616_v7 = vsub.s32 4, %v7159_v9 }
 0x205   :  { %4249 = vmatprep.subr.bf16.mxu0 %v5768_v22  ;;  %4033 = vmatprep.mubr.bf16.mxu1 %v6337_v25  ;;  %v612_v22 = vsub.s32 3, %v7159_v9 }
 0x206   :  { %4279 = vmatprep.mubr.bf16.mxu0 %v6337_v25  ;;  %v5780_v25 = vld [vmem:[%s7731_s1 + $0xfa4] ss:$24 sps:$4 sm:$0xff]  }
 0x207   :  { %4004 = vmatpush1.bf16.msra.mxu1 %v5763_v23  ;;  %v620_v23 = vsub.s32 5, %v7159_v9 }
 0x208   :  { %4250 = vmatpush1.bf16.msra.mxu0 %v5766_v40  ;;  %4005 = vmatprep.subr.bf16.mxu1 %v5771_v38  ;;  %v609_v40 = vrot.slane %v7183_v19, %v608_v39  ;;  %v617_v38 = vrot.slane %v7183_v19, %v616_v7 }
 0x209   :  { %4251 = vmatprep.subr.bf16.mxu0 %v5774_v18  ;;  %v613_v18 = vrot.slane %v7183_v19, %v612_v22 }
 0x20b   :  { %4006 = vmatpush1.bf16.msra.mxu1 %v5769_v41  ;;  %v621_v41 = vrot.slane %v7183_v19, %v620_v23 }
 0x20c   :  { %4252 = vmatpush1.bf16.msra.mxu0 %v5772_v42  ;;  %4007 = vmatprep.subr.bf16.mxu1 %v5777_v43 }
 0x20d   :  { %4253 = vmatprep.subr.bf16.mxu0 %v5780_v25 }
 0x20f   :  { %4008 = vmatpush1.bf16.msra.mxu1 %v5775_v44 }
 0x210   :  { %4254 = vmatpush1.bf16.msra.mxu0 %v5778_v45  ;;  %4009 = vmatprep.subr.bf16.mxu1 %v5783_v46 }
 0x211   :  { %4255 = vmatprep.subr.bf16.mxu0 %v5786_v48 }
 0x213   :  { %4010 = vmatpush1.bf16.msra.mxu1 %v5781_v47 }
 0x214   :  { %4256 = vmatpush1.bf16.msra.mxu0 %v5784_v49  ;;  %4011 = vmatprep.subr.bf16.mxu1 %v5789_v50 }
 0x215   :  { %4257 = vmatprep.subr.bf16.mxu0 %v5792_v51 }
 0x217   :  { %4012 = vmatpush1.bf16.msra.mxu1 %v5787_v52 }
 0x218   :  { %4258 = vmatpush1.bf16.msra.mxu0 %v5790_v54  ;;  %4013 = vmatprep.subr.bf16.mxu1 %v5795_v6 }
 0x219   :  { %4259 = vmatprep.subr.bf16.mxu0 %v5798_v55 }
 0x21b   :  { %4014 = vmatpush1.bf16.msra.mxu1 %v5793_v56 }
 0x21c   :  { %4260 = vmatpush1.bf16.msra.mxu0 %v5796_v57  ;;  %4015 = vmatprep.subr.bf16.mxu1 %v5801_v35 }
 0x21d   :  { %4261 = vmatprep.subr.bf16.mxu0 %v5804_v58 }
 0x21f   :  { %4016 = vmatpush1.bf16.msra.mxu1 %v5799_v59 }
 0x220   :  { %4262 = vmatpush1.bf16.msra.mxu0 %v5802_v60  ;;  %4017 = vmatprep.subr.bf16.mxu1 %v5807_v61 }
 0x221   :  { %4263 = vmatprep.subr.bf16.mxu0 %v5810_v16 }
 0x223   :  { %4018 = vmatpush1.bf16.msra.mxu1 %v5805_v62 }
 0x224   :  { %4264 = vmatpush1.bf16.msra.mxu0 %v5808_v63  ;;  %4019 = vmatprep.subr.bf16.mxu1 %v5813_v0 }
 0x225   :  { %4265 = vmatprep.subr.bf16.mxu0 %v5816_v24 }
 0x227   :  { %4020 = vmatpush1.bf16.msra.mxu1 %v5811_v1 }
 0x228   :  { %4266 = vmatpush1.bf16.msra.mxu0 %v5814_v2  ;;  %4021 = vmatprep.subr.bf16.mxu1 %v5819_v34 }
 0x229   :  { %4267 = vmatprep.subr.bf16.mxu0 %v5822_v3 }
 0x22b   :  { %4022 = vmatpush1.bf16.msra.mxu1 %v5817_v4 }
 0x22c   :  { %4268 = vmatpush1.bf16.msra.mxu0 %v5820_v5  ;;  %4023 = vmatprep.subr.bf16.mxu1 %v5825_v8 }
 0x22d   :  { %4269 = vmatprep.subr.bf16.mxu0 %v5828_v53 }
 0x22f   :  { %4024 = vmatpush1.bf16.msra.mxu1 %v5823_v10 }
 0x230   :  { %4270 = vmatpush1.bf16.msra.mxu0 %v5826_v11  ;;  %4025 = vmatprep.subr.bf16.mxu1 %v5831_v12 }
 0x231   :  { %4271 = vmatprep.subr.bf16.mxu0 %v5834_v13 }
 0x233   :  { %4026 = vmatpush1.bf16.msra.mxu1 %v5829_v14 }
 0x234   :  { %4272 = vmatpush1.bf16.msra.mxu0 %v5832_v15  ;;  %4027 = vmatprep.subr.bf16.mxu1 %v5837_v17 }
 0x235   :  { %4273 = vmatprep.subr.bf16.mxu0 %v5840_v20 }
 0x237   :  { %4028 = vmatpush1.bf16.msra.mxu1 %v5835_v21 }
 0x238   :  { %4274 = vmatpush1.bf16.msra.mxu0 %v5838_v26  ;;  %4029 = vmatprep.subr.bf16.mxu1 %v5843_v27 }
 0x239   :  { %4275 = vmatprep.subr.bf16.mxu0 %v5846_v28 }
 0x23b   :  { %4030 = vmatpush1.bf16.msra.mxu1 %v5841_v29 }
 0x23c   :  { %4276 = vmatpush1.bf16.msra.mxu0 %v5844_v30  ;;  %4031 = vmatprep.subr.bf16.mxu1 %v5849_v31 }
 0x23d   :  { %4277 = vmatprep.subr.bf16.mxu0 %v5852_v32 }
 0x23f   :  { %4032 = vmatpush1.bf16.msra.mxu1 %v5847_v33 }
 0x240   :  { %4278 = vmatpush1.bf16.msra.mxu0 %v5850_v37 }
 0x242   :  { %4034 = vmatmul.mubr.bf16.vlgmr.msra.gmra.mrb[4].mxu1 %v6529_v36 }
 0x243   :  { %4280 = vmatmul.mubr.bf16.vlgmr.msra.gmra.mrb[4].mxu0 %v6529_v36 }
 0x315   :  { %v4035_v42 = vpop.f32.mrb[4].mxu1 }
 0x316   :  { %v4281_v43 = vpop.f32.mrb[4].mxu0  ;;  %v4917_v25 = vadd.f32 %v4035_v42, %v609_v40  ;;  %v4037_v44 = vpop.f32.mrb[5].mxu1 }
 0x317   :  { %v4919_v36 = vadd.f32 %v4281_v43, %v617_v38  ;;  %v4283_v45 = vpop.f32.mrb[5].mxu0  ;;  %v4918_v46 = vadd.f32 %v4037_v44, %v613_v18  ;;  %v4039_v47 = vpop.f32.mrb[6].mxu1 }
 0x318   :  { %v4920_v48 = vadd.f32 %v4283_v45, %v621_v41  ;;  %v4285_v49 = vpop.f32.mrb[6].mxu0  ;;  %v4040_v50 = vpop.f32.mrb[7].mxu1 }
 0x319   :  { %v4286_v9 = vpop.f32.mrb[7].mxu0  ;;  %v4911_v51 = vpack.c.bf16 %v4918_v46, %v4917_v25 }
 0x31a   :  { %v4912_v52 = vpack.c.bf16 %v4920_v48, %v4919_v36 }
 0x31b   :  { %4313 = vst [vmem:[%s7734_s3 + $0x8] sm:$0xff] %v4911_v51 }
 0x31c   :  { %4314 = vst [vmem:[%s7734_s3 + $0x10] sm:$0xff] %v4912_v52 }

// kernel: backbone_base_agent_swin_forward.16
= control target key start
LH: loop header
LB: loop body
LE: loop exit
PB: predicated region body
PF: predicated region fallthrough
CT: control target
= control target key end

     0   :  { %v679_v0 = vmov 0   ;;  %vm209_vm0 = vcmask 523264   ;;  %s890_s1 = inlined_call_operand.vmem [shape: bf16[192,128], index: 1, kind: input, shape index: {}]   ;;  %s891_s0 = inlined_call_operand.vmem [shape: bf16[128,192], index: 0, kind: input, shape index: {}]   ;;  %s892_s3 = inlined_call_operand.vmem [shape: bf16[128,128], index: 3, kind: input, shape index: {}]   ;;  %s893_s2 = inlined_call_operand.vmem [shape: f32[1,128], index: 2, kind: input, shape index: {}]   ;;  %s894_s4 = inlined_call_operand.vmem [shape: bf16[128,128], index: 4, kind: output, shape index: {}]  }
   0x1   :  { %234 = vmatprep.subr.bf16.mxu0 %v679_v0  ;;  %618 = vmatprep.subr.bf16.mxu1 %v679_v0  ;;  %v643_v1 = vld [vmem:[%s890_s1] sm:$0xff]   ;;  %v644_v2 = vld [vmem:[%s890_s1 + $0x8] sm:$0xff]   ;;  %v645_v3 = vld [vmem:[%s890_s1 + $0x10] sm:$0xff]  }
   0x2   :  { %235 = vmatpush1.bf16.msra.mxu0 %v643_v1  ;;  %630 = vmatpush1.bf16.msra.mxu1 %v643_v1  ;;  %v646_v4 = vld [vmem:[%s890_s1 + $0x18] sm:$0xff]   ;;  %v657_v5 = vld [vmem:[%s891_s0 + $0x4] ss:$8 sps:$4 sm:$0xff]   ;;  %v649_v9 = vld [vmem:[%s890_s1 + $0x30] sm:$0xff]  }
   0x3   :  { %236 = vmatprep.subr.bf16.mxu0 %v679_v0  ;;  %619 = vmatprep.subr.bf16.mxu1 %v679_v0  ;;  %v647_v6 = vld [vmem:[%s890_s1 + $0x20] sm:$0xff]   ;;  %v648_v8 = vld [vmem:[%s890_s1 + $0x28] sm:$0xff]   ;;  %v650_v10 = vld [vmem:[%s890_s1 + $0x38] sm:$0xff]  }
   0x4   :  { %v660_v7 = vld [vmem:[%s891_s0 + $0x44] ss:$8 sps:$4 sm:$0xff]   ;;  %492 = vmatprep.mubr.msk.bf16.mxu0 %vm209_vm0, %v657_v5  ;;  %v653_v13 = vld [vmem:[%s890_s1 + $0x50] sm:$0xff]   ;;  %v654_v14 = vld [vmem:[%s890_s1 + $0x58] sm:$0xff]  }
   0x5   :  { %496 = vmatprep.mubr.msk.bf16.mxu1 %vm209_vm0, %v660_v7  ;;  %v651_v11 = vld [vmem:[%s890_s1 + $0x40] sm:$0xff]   ;;  %v652_v12 = vld [vmem:[%s890_s1 + $0x48] sm:$0xff]   ;;  %v661_v17 = vld [vmem:[%s891_s0 + $0x14] ss:$8 sps:$4 sm:$0xff]  }
   0x6   :  { %237 = vmatpush1.bf16.msra.mxu0 %v644_v2  ;;  %631 = vmatpush1.bf16.msra.mxu1 %v644_v2  ;;  %v655_v15 = vld [vmem:[%s891_s0] ss:$8 sps:$4 sm:$0xff]   ;;  %v663_v18 = vld [vmem:[%s891_s0 + $0x54] ss:$8 sps:$4 sm:$0xff]   ;;  %v665_v19 = vld [vmem:[%s891_s0 + $0x10] ss:$8 sps:$4 sm:$0xff]  }
   0x7   :  { %238 = vmatprep.subr.bf16.mxu0 %v679_v0  ;;  %620 = vmatprep.subr.bf16.mxu1 %v679_v0  ;;  %v658_v16 = vld [vmem:[%s891_s0 + $0x40] ss:$8 sps:$4 sm:$0xff]   ;;  %v666_v20 = vld [vmem:[%s891_s0 + $0x50] ss:$8 sps:$4 sm:$0xff]   ;;  %v667_v21 = vld [vmem:[%s891_s0 + $0x24] ss:$8 sps:$4 sm:$0xff]  }
   0x8   :  { %v669_v22 = vld [vmem:[%s891_s0 + $0x64] ss:$8 sps:$4 sm:$0xff]   ;;  %v671_v23 = vld [vmem:[%s891_s0 + $0x20] ss:$8 sps:$4 sm:$0xff]   ;;  %v673_v25 = vld [vmem:[%s891_s0 + $0x34] ss:$8 sps:$4 sm:$0xff]  }
   0x9   :  { %v672_v24 = vld [vmem:[%s891_s0 + $0x60] ss:$8 sps:$4 sm:$0xff]   ;;  %v675_v26 = vld [vmem:[%s891_s0 + $0x74] ss:$8 sps:$4 sm:$0xff]   ;;  %v677_v27 = vld [vmem:[%s891_s0 + $0x30] ss:$8 sps:$4 sm:$0xff]  }
   0xa   :  { %239 = vmatpush1.bf16.msra.mxu0 %v645_v3  ;;  %632 = vmatpush1.bf16.msra.mxu1 %v645_v3  ;;  %v678_v28 = vld [vmem:[%s891_s0 + $0x70] ss:$8 sps:$4 sm:$0xff]   ;;  %v533_v29 = vld [vmem:[%s892_s3] sm:$0xff]   ;;  %v604_v52 = vld [vmem:[%s892_s3 + $0x8] sm:$0xff]  }
   0xb   :  { %240 = vmatprep.subr.bf16.mxu0 %v679_v0  ;;  %621 = vmatprep.subr.bf16.mxu1 %v679_v0  ;;  %v607_v30 = vld [vmem:[%s892_s3 + $0x20] sm:$0xff]   ;;  %v534_v33 = vunpack.c.l.bf16 %v533_v29  ;;  %v535_v40 = vunpack.c.h.bf16 %v533_v29  ;;  %v608_v53 = vld [vmem:[%s892_s3 + $0x28] sm:$0xff]   ;;  %v538_v57 = vunpack.c.l.bf16 %v604_v52 }
   0xc   :  { %v830_v31 = vld [vmem:[%s893_s2] ss:$0 sm:$0xff]  ;;  %v550_v35 = vunpack.c.l.bf16 %v607_v30  ;;  %v551_v41 = vunpack.c.h.bf16 %v607_v30  ;;  %v554_v59 = vunpack.c.l.bf16 %v608_v53  ;;  %v555_v1 = vunpack.c.h.bf16 %v608_v53 }
   0xe   :  { %241 = vmatpush1.bf16.msra.mxu0 %v646_v4  ;;  %633 = vmatpush1.bf16.msra.mxu1 %v646_v4 }
   0xf   :  { %242 = vmatprep.subr.bf16.mxu0 %v679_v0  ;;  %622 = vmatprep.subr.bf16.mxu1 %v679_v0 }
  0x12   :  { %243 = vmatpush1.bf16.msra.mxu0 %v647_v6  ;;  %634 = vmatpush1.bf16.msra.mxu1 %v647_v6 }
  0x13   :  { %244 = vmatprep.subr.bf16.mxu0 %v679_v0  ;;  %623 = vmatprep.subr.bf16.mxu1 %v679_v0 }
  0x16   :  { %245 = vmatpush1.bf16.msra.mxu0 %v648_v8  ;;  %635 = vmatpush1.bf16.msra.mxu1 %v648_v8 }
  0x17   :  { %246 = vmatprep.subr.bf16.mxu0 %v679_v0  ;;  %624 = vmatprep.subr.bf16.mxu1 %v679_v0 }
  0x1a   :  { %247 = vmatpush1.bf16.msra.mxu0 %v649_v9  ;;  %636 = vmatpush1.bf16.msra.mxu1 %v649_v9 }
  0x1b   :  { %248 = vmatprep.subr.bf16.mxu0 %v679_v0  ;;  %625 = vmatprep.subr.bf16.mxu1 %v679_v0 }
  0x1e   :  { %249 = vmatpush1.bf16.msra.mxu0 %v650_v10  ;;  %637 = vmatpush1.bf16.msra.mxu1 %v650_v10 }
  0x1f   :  { %250 = vmatprep.subr.bf16.mxu0 %v679_v0  ;;  %626 = vmatprep.subr.bf16.mxu1 %v679_v0 }
  0x22   :  { %251 = vmatpush1.bf16.msra.mxu0 %v651_v11  ;;  %638 = vmatpush1.bf16.msra.mxu1 %v651_v11 }
  0x23   :  { %252 = vmatprep.subr.bf16.mxu0 %v679_v0  ;;  %627 = vmatprep.subr.bf16.mxu1 %v679_v0 }
  0x26   :  { %253 = vmatpush1.bf16.msra.mxu0 %v652_v12  ;;  %639 = vmatpush1.bf16.msra.mxu1 %v652_v12  ;;  %v605_v12 = vld [vmem:[%s892_s3 + $0x10] sm:$0xff]  }
  0x27   :  { %254 = vmatprep.subr.bf16.mxu0 %v679_v0  ;;  %628 = vmatprep.subr.bf16.mxu1 %v679_v0 }
  0x2a   :  { %255 = vmatpush1.bf16.msra.mxu0 %v653_v13  ;;  %640 = vmatpush1.bf16.msra.mxu1 %v653_v13  ;;  %v609_v13 = vld [vmem:[%s892_s3 + $0x30] sm:$0xff]  }
  0x2b   :  { %256 = vmatprep.subr.bf16.mxu0 %v679_v0  ;;  %629 = vmatprep.subr.bf16.mxu1 %v679_v0  ;;  %v539_v0 = vunpack.c.h.bf16 %v604_v52 }
  0x2e   :  { %257 = vmatpush1.bf16.msra.mxu0 %v654_v14  ;;  %641 = vmatpush1.bf16.msra.mxu1 %v654_v14 }
  0x31   :  { %267 = vmatmul.mubr.bf16.vlgmr.msra.gmra.mrb[0].mxu0 %v655_v15  ;;  %299 = vmatmul.mubr.bf16.vlgmr.msra.gmra.mrb[0].mxu1 %v658_v16 }
  0x32   :  { %493 = vmatprep.mubr.msk.bf16.mxu0 %vm209_vm0, %v661_v17  ;;  %497 = vmatprep.mubr.msk.bf16.mxu1 %vm209_vm0, %v663_v18  ;;  %v542_v17 = vunpack.c.l.bf16 %v605_v12 }
  0x39   :  { %275 = vmatmul.mubr.bf16.gmra.mrb[4].mxu0 %v665_v19  ;;  %307 = vmatmul.mubr.bf16.gmra.mrb[4].mxu1 %v666_v20  ;;  %v558_v19 = vunpack.c.l.bf16 %v609_v13 }
  0x3a   :  { %494 = vmatprep.mubr.msk.bf16.mxu0 %vm209_vm0, %v667_v21  ;;  %498 = vmatprep.mubr.msk.bf16.mxu1 %vm209_vm0, %v669_v22 }
  0x41   :  { %283 = vmatmul.mubr.bf16.gmra.mrb[8].mxu0 %v671_v23  ;;  %315 = vmatmul.mubr.bf16.gmra.mrb[8].mxu1 %v672_v24  ;;  %v543_v24 = vunpack.c.h.bf16 %v605_v12 }
  0x42   :  { %495 = vmatprep.mubr.msk.bf16.mxu0 %vm209_vm0, %v673_v25  ;;  %499 = vmatprep.mubr.msk.bf16.mxu1 %vm209_vm0, %v675_v26  ;;  %v559_v25 = vunpack.c.h.bf16 %v609_v13 }
  0x49   :  { %291 = vmatmul.mubr.bf16.gmra.mrb[12].mxu0 %v677_v27  ;;  %323 = vmatmul.mubr.bf16.gmra.mrb[12].mxu1 %v678_v28 }
 0x104   :  { %v268_v32 = vpop.f32.mrb[0].mxu0  ;;  %v300_v34 = vpop.f32.mrb[0].mxu1 }
 0x105   :  { %v269_v36 = vadd.f32 %v830_v31, %v268_v32  ;;  %v301_v37 = vadd.f32 %v830_v31, %v300_v34  ;;  %v270_v38 = vpop.f32.mrb[1].mxu0  ;;  %v302_v39 = vpop.f32.mrb[1].mxu1 }
 0x106   :  { %v271_v42 = vpop.f32.mrb[2].mxu0  ;;  %v303_v43 = vpop.f32.mrb[2].mxu1  ;;  %v610_v38 = vld [vmem:[%s892_s3 + $0x38] sm:$0xff]  }
 0x107   :  { %v272_v44 = vadd.f32 %v830_v31, %v271_v42  ;;  %v304_v45 = vadd.f32 %v830_v31, %v303_v43  ;;  %v273_v46 = vpop.f32.mrb[3].mxu0  ;;  %v305_v47 = vpop.f32.mrb[3].mxu1  ;;  %v363_v48 = vadd.f32 %v534_v33, %v269_v36  ;;  %v371_v49 = vadd.f32 %v550_v35, %v301_v37  ;;  %v606_v37 = vld [vmem:[%s892_s3 + $0x18] sm:$0xff]  }
 0x108   :  { %v546_v42 = vunpack.c.l.bf16 %v606_v37 }
 0x109   :  { %v364_v50 = vadd.f32 %v535_v40, %v272_v44  ;;  %v372_v51 = vadd.f32 %v551_v41, %v304_v45  ;;  %v562_v44 = vunpack.c.l.bf16 %v610_v38 }
 0x10b   :  { %v567_v54 = vpack.c.bf16 %v364_v50, %v363_v48  ;;  %v587_v55 = vpack.c.bf16 %v372_v51, %v371_v49  ;;  %v547_v49 = vunpack.c.h.bf16 %v606_v37  ;;  %v563_v50 = vunpack.c.h.bf16 %v610_v38 }
 0x10c   :  { %v276_v56 = vpop.f32.mrb[4].mxu0  ;;  %v308_v58 = vpop.f32.mrb[4].mxu1 }
 0x10d   :  { %568 = vst [vmem:[%s894_s4] sm:$0xff] %v567_v54   ;;  %614 = vst [vmem:[%s894_s4 + $0x20] sm:$0xff] %v587_v55   ;;  %v277_v60 = vadd.f32 %v830_v31, %v276_v56  ;;  %v309_v61 = vadd.f32 %v830_v31, %v308_v58  ;;  %v278_v62 = vpop.f32.mrb[5].mxu0  ;;  %v310_v63 = vpop.f32.mrb[5].mxu1 }
 0x10e   :  { %v279_v2 = vpop.f32.mrb[6].mxu0  ;;  %v311_v3 = vpop.f32.mrb[6].mxu1 }
 0x10f   :  { %v280_v4 = vadd.f32 %v830_v31, %v279_v2  ;;  %v312_v5 = vadd.f32 %v830_v31, %v311_v3  ;;  %v281_v6 = vpop.f32.mrb[7].mxu0  ;;  %v313_v7 = vpop.f32.mrb[7].mxu1  ;;  %v365_v8 = vadd.f32 %v538_v57, %v277_v60  ;;  %v373_v9 = vadd.f32 %v554_v59, %v309_v61 }
 0x111   :  { %v366_v10 = vadd.f32 %v539_v0, %v280_v4  ;;  %v374_v11 = vadd.f32 %v555_v1, %v312_v5 }
 0x113   :  { %v572_v14 = vpack.c.bf16 %v366_v10, %v365_v8  ;;  %v592_v15 = vpack.c.bf16 %v374_v11, %v373_v9 }
 0x114   :  { %v284_v16 = vpop.f32.mrb[8].mxu0  ;;  %v316_v18 = vpop.f32.mrb[8].mxu1 }
 0x115   :  { %611 = vst [vmem:[%s894_s4 + $0x8] sm:$0xff] %v572_v14   ;;  %615 = vst [vmem:[%s894_s4 + $0x28] sm:$0xff] %v592_v15   ;;  %v285_v20 = vadd.f32 %v830_v31, %v284_v16  ;;  %v317_v21 = vadd.f32 %v830_v31, %v316_v18  ;;  %v286_v22 = vpop.f32.mrb[9].mxu0  ;;  %v318_v23 = vpop.f32.mrb[9].mxu1 }
 0x116   :  { %v287_v26 = vpop.f32.mrb[10].mxu0  ;;  %v319_v27 = vpop.f32.mrb[10].mxu1 }
 0x117   :  { %v288_v28 = vadd.f32 %v830_v31, %v287_v26  ;;  %v320_v29 = vadd.f32 %v830_v31, %v319_v27  ;;  %v289_v30 = vpop.f32.mrb[11].mxu0  ;;  %v321_v32 = vpop.f32.mrb[11].mxu1  ;;  %v367_v33 = vadd.f32 %v542_v17, %v285_v20  ;;  %v375_v34 = vadd.f32 %v558_v19, %v317_v21 }
 0x119   :  { %v368_v35 = vadd.f32 %v543_v24, %v288_v28  ;;  %v376_v36 = vadd.f32 %v559_v25, %v320_v29 }
 0x11b   :  { %v577_v39 = vpack.c.bf16 %v368_v35, %v367_v33  ;;  %v597_v40 = vpack.c.bf16 %v376_v36, %v375_v34 }
 0x11c   :  { %v292_v41 = vpop.f32.mrb[12].mxu0  ;;  %v324_v43 = vpop.f32.mrb[12].mxu1 }
 0x11d   :  { %612 = vst [vmem:[%s894_s4 + $0x10] sm:$0xff] %v577_v39   ;;  %616 = vst [vmem:[%s894_s4 + $0x30] sm:$0xff] %v597_v40   ;;  %v293_v45 = vadd.f32 %v830_v31, %v292_v41  ;;  %v325_v46 = vadd.f32 %v830_v31, %v324_v43  ;;  %v294_v47 = vpop.f32.mrb[13].mxu0  ;;  %v326_v48 = vpop.f32.mrb[13].mxu1 }
 0x11e   :  { %v295_v51 = vpop.f32.mrb[14].mxu0  ;;  %v327_v52 = vpop.f32.mrb[14].mxu1 }
 0x11f   :  { %v296_v53 = vadd.f32 %v830_v31, %v295_v51  ;;  %v328_v54 = vadd.f32 %v830_v31, %v327_v52  ;;  %v297_v55 = vpop.f32.mrb[15].mxu0  ;;  %v329_v56 = vpop.f32.mrb[15].mxu1  ;;  %v369_v57 = vadd.f32 %v546_v42, %v293_v45  ;;  %v377_v58 = vadd.f32 %v562_v44, %v325_v46 }
 0x121   :  { %v370_v59 = vadd.f32 %v547_v49, %v296_v53  ;;  %v378_v60 = vadd.f32 %v563_v50, %v328_v54 }
 0x123   :  { %v582_v61 = vpack.c.bf16 %v370_v59, %v369_v57  ;;  %v602_v62 = vpack.c.bf16 %v378_v60, %v377_v58 }
 0x125   :  { %613 = vst [vmem:[%s894_s4 + $0x18] sm:$0xff] %v582_v61   ;;  %617 = vst [vmem:[%s894_s4 + $0x38] sm:$0xff] %v602_v62  }

// kernel: backbone_base_agent_swin_forward.15
= control target key start
LH: loop header
LB: loop body
LE: loop exit
PB: predicated region body
PF: predicated region fallthrough
CT: control target
= control target key end

     0   :  { %s1709_s12 = smov 0   ;;  %s1711_s13 = smov 0   ;;  %s2008_s0 = inlined_call_operand.vmem [shape: bf16[2,56,128], index: 0, kind: input, shape index: {}]   ;;  %s2009_s1 = inlined_call_operand.vmem [shape: bf16[1152,128], index: 1, kind: input, shape index: {}]   ;;  %s2010_s2 = inlined_call_operand.vmem [shape: f32[1,128], index: 2, kind: input, shape index: {}]   ;;  %s2011_s3 = inlined_call_operand.vmem [shape: f32[2,32,128], index: 3, kind: output, shape index: {}]  }
   0x1   :  { %s1713_s14 = smov 0  }
   0x2 LB: > { %s25_s15 = sadd.s32 1, %s1683_s13  ;;  %p1318_p0 = scmp.ge.s32.totalorder %s1687_s14, 1  ;;  %s1687_s14 = sphi %s1713_s14, %s13_s14   ;;  %s1683_s13 = sphi %s1711_s13, %s2013_s13   ;;  %s1679_s12 = sphi %s1709_s12, %s2012_s12  }
   0x3   : > { %p27_p1 = scmp.ge.s32.totalorder %s25_s15, 2  ;;  %p151_p2 = scmp.lt.s32.totalorder %s1687_s14, 3 }
   0x5   : > { %s2015_s15 = smov (%p27_p1, %s25_s15), 0  ;;  %p152_p3 = pnand %p1318_p0, %p151_p2 }
   0x6   : > { %v1584_v0 = vld [vmem:[%s2009_s1 + $0x40] sm:$0xff] (!%p152_p3)   ;;  %v1588_v4 = vld [vmem:[%s2009_s1 + $0x48] sm:$0xff] (!%p152_p3)   ;;  %v1592_v8 = vld [vmem:[%s2009_s1 + $0x50] sm:$0xff] (!%p152_p3)   ;;  %p179_p4 = scmp.lt.s32.totalorder (!%p152_p3), %s1679_s12, 1  ;;  %vm222_vm0 = vsmask.f32 (!%p152_p3), 7424 }
   0x7   : > { %155 = sbr.rel (%p152_p3) target bundleno = 321 (0x141), region = 32  ;;  %v1585_v1 = vld [vmem:[%s2009_s1] sm:$0xff] (!%p152_p3)   ;;  %1417 = vmatprep.subr.bf16.mxu0 (!%p152_p3), %v1584_v0  ;;  %v1589_v5 = vld [vmem:[%s2009_s1 + $0x8] sm:$0xff] (!%p152_p3)   ;;  %v1593_v9 = vld [vmem:[%s2009_s1 + $0x10] sm:$0xff] (!%p152_p3)   ;;  %vm247_vm1 = vcmask (!%p152_p3), 1046528  }
   0x8   : > { %v1586_v2 = vld [vmem:[%s2009_s1 + $0xc0] sm:$0xff] (!%p152_p3)   ;;  %1418 = vmatpush3.bf16.msra.mxu0 (!%p152_p3), %v1585_v1  ;;  %v1590_v6 = vld [vmem:[%s2009_s1 + $0xc8] sm:$0xff] (!%p152_p3)   ;;  %v1594_v10 = vld [vmem:[%s2009_s1 + $0xd0] sm:$0xff] (!%p152_p3)  }
   0x9   : > { %v1587_v3 = vld [vmem:[%s2009_s1 + $0x80] sm:$0xff] (!%p152_p3)   ;;  %1445 = vmatprep.subr.bf16.mxu1 (!%p152_p3), %v1586_v2  ;;  %1419 = vmatprep.subr.bf16.mxu0 (!%p152_p3), %v1588_v4  ;;  %v1591_v7 = vld [vmem:[%s2009_s1 + $0x88] sm:$0xff] (!%p152_p3)   ;;  %v1595_v11 = vld [vmem:[%s2009_s1 + $0x90] sm:$0xff] (!%p152_p3)  }
   0xa   : > { %1446 = vmatpush3.bf16.msra.mxu1 (!%p152_p3), %v1587_v3  ;;  %v1596_v12 = vld [vmem:[%s2009_s1 + $0x58] sm:$0xff] (!%p152_p3)   ;;  %v1600_v16 = vld [vmem:[%s2009_s1 + $0x60] sm:$0xff] (!%p152_p3)   ;;  %v1604_v20 = vld [vmem:[%s2009_s1 + $0x68] sm:$0xff] (!%p152_p3)  }
   0xb   : > { %1447 = vmatprep.subr.bf16.mxu1 (!%p152_p3), %v1590_v6  ;;  %v1597_v13 = vld [vmem:[%s2009_s1 + $0x18] sm:$0xff] (!%p152_p3)   ;;  %v1601_v17 = vld [vmem:[%s2009_s1 + $0x20] sm:$0xff] (!%p152_p3)   ;;  %v1605_v21 = vld [vmem:[%s2009_s1 + $0x28] sm:$0xff] (!%p152_p3)  }
   0xc   : > { %1420 = vmatpush3.bf16.msra.mxu0 (!%p152_p3), %v1589_v5  ;;  %v1598_v14 = vld [vmem:[%s2009_s1 + $0xd8] sm:$0xff] (!%p152_p3)   ;;  %v1602_v18 = vld [vmem:[%s2009_s1 + $0xe0] sm:$0xff] (!%p152_p3)   ;;  %v1606_v22 = vld [vmem:[%s2009_s1 + $0xe8] sm:$0xff] (!%p152_p3)  }
   0xd   : > { %1421 = vmatprep.subr.bf16.mxu0 (!%p152_p3), %v1592_v8  ;;  %v1599_v15 = vld [vmem:[%s2009_s1 + $0x98] sm:$0xff] (!%p152_p3)   ;;  %v1603_v19 = vld [vmem:[%s2009_s1 + $0xa0] sm:$0xff] (!%p152_p3)   ;;  %v1607_v23 = vld [vmem:[%s2009_s1 + $0xa8] sm:$0xff] (!%p152_p3)  }
   0xe   : > { %1448 = vmatpush3.bf16.msra.mxu1 %v1591_v7  ;;  %s2017_s12 = smov (!%p179_p4, %s1679_s12), 1  ;;  %v1608_v24 = vld [vmem:[%s2009_s1 + $0x70] sm:$0xff]   ;;  %v1612_v28 = vld [vmem:[%s2009_s1 + $0x78] sm:$0xff]   ;;  %v1618_v37 = vld [vmem:[%s2009_s1 + $0x140] sm:$0xff]  }
   0xf   : > { %1449 = vmatprep.subr.bf16.mxu1 %v1594_v10  ;;  %v1609_v25 = vld [vmem:[%s2009_s1 + $0x30] sm:$0xff]   ;;  %s1559_s22 = smul.u32 28, %s2017_s12  ;;  %v1613_v29 = vld [vmem:[%s2009_s1 + $0x38] sm:$0xff]   ;;  %v1620_v41 = vld [vmem:[%s2009_s1 + $0x100] sm:$0xff]   ;;  %s1416_s30 = sshll.u32 %s2017_s12, 5 }
  0x10   : > { %1422 = vmatpush3.bf16.msra.mxu0 %v1593_v9  ;;  %v1610_v26 = vld [vmem:[%s2009_s1 + $0xf0] sm:$0xff]   ;;  %v1614_v30 = vld [vmem:[%s2009_s1 + $0xf8] sm:$0xff]   ;;  %v1621_v45 = vld [vmem:[%s2009_s1 + $0x1c0] sm:$0xff]   ;;  %s192_s7 = scalar_lea.vmem %s2011_s3, %s1416_s30 }
  0x11   : > { %1423 = vmatprep.subr.bf16.mxu0 %v1596_v12  ;;  %v1611_v27 = vld [vmem:[%s2009_s1 + $0xb0] sm:$0xff]   ;;  %s1827_s6 = scalar_lea.vmem %s2008_s0, %s1559_s22  ;;  %v1617_v33 = vld [vmem:[%s2009_s1 + $0xb8] sm:$0xff]   ;;  %v1622_v47 = vld [vmem:[%s2009_s1 + $0x180] sm:$0xff]  }
  0x12   : > { %1450 = vmatpush3.bf16.msra.mxu1 %v1595_v11  ;;  %v1615_v31 = vld [vmem:[%s1827_s6] sm:$0xff]   ;;  %v1834_v32 = vld [vmem:[%s1827_s6 + $0x8] sm:$0xff]   ;;  %v1627_v53 = vld [vmem:[%s2009_s1 + $0x150] sm:$0xff]  }
  0x13   : > { %1451 = vmatprep.subr.bf16.mxu1 %v1598_v14  ;;  %v224_v34 = vshrl.u32 %v1615_v31, 16  ;;  %v226_v35 = vshll.u32 %v1615_v31, 16  ;;  %v231_v36 = vshll.u32 %v1834_v32, 16  ;;  %v1844_v40 = vld [vmem:[%s1827_s6 + $0x4] sm:$0xff]   ;;  %v248_v42 = vrot.slane %v1615_v31, 1  ;;  %v1628_v54 = vld [vmem:[%s2009_s1 + $0x110] sm:$0xff]  }
  0x14   : > { %1424 = vmatpush3.bf16.msra.mxu0 %v1597_v13  ;;  %v249_v43 = vrot.slane %v1834_v32, 1  ;;  %1059 = vmatprep.mubr.bf16.mxu1 %v1844_v40  ;;  %v1623_v49 = vld [vmem:[%s2009_s1 + $0x148] sm:$0xff]   ;;  %v1629_v55 = vld [vmem:[%s2009_s1 + $0x1d0] sm:$0xff]   ;;  %v1631_v57 = vld [vmem:[%s2009_s1 + $0x158] sm:$0xff]   ;;  %v235_v63 = vshrl.u32 %v1834_v32, 16  ;;  %v287_v1 = vshll.u32 %v1844_v40, 16 }
  0x15   : > { %1425 = vmatprep.subr.bf16.mxu0 %v1600_v16  ;;  %v228_v38 = vrot.slane %v226_v35, 1  ;;  %v233_v39 = vrot.slane %v231_v36, 1  ;;  %v1624_v50 = vld [vmem:[%s2009_s1 + $0x108] sm:$0xff]   ;;  %v1630_v56 = vld [vmem:[%s2009_s1 + $0x190] sm:$0xff]   ;;  %v1632_v58 = vld [vmem:[%s2009_s1 + $0x118] sm:$0xff]   ;;  %v308_v3 = vrot.slane %v1844_v40, 1 }
  0x16   : > { %1452 = vmatpush3.bf16.msra.mxu1 %v1599_v15  ;;  %v250_v46 = vsel %vm247_vm1, %v248_v42, %v249_v43  ;;  %v1625_v51 = vld [vmem:[%s2009_s1 + $0x1c8] sm:$0xff]   ;;  %v1633_v59 = vld [vmem:[%s2009_s1 + $0x1d8] sm:$0xff]   ;;  %v1635_v61 = vld [vmem:[%s2009_s1 + $0x160] sm:$0xff]   ;;  %v285_v5 = vshrl.u32 %v1844_v40, 16  ;;  %v289_v8 = vrot.slane %v287_v1, 1 }
  0x17   : > { %1453 = vmatprep.subr.bf16.mxu1 %v1602_v18  ;;  %v229_v44 = vor.u32 %v228_v38, %v224_v34  ;;  %v1626_v52 = vld [vmem:[%s2009_s1 + $0x188] sm:$0xff]   ;;  %v1634_v60 = vld [vmem:[%s2009_s1 + $0x198] sm:$0xff]   ;;  %v1636_v62 = vld [vmem:[%s2009_s1 + $0x120] sm:$0xff]   ;;  %v237_v9 = vor.u32 %v235_v63, %v233_v39 }
  0x18   : > { %1426 = vmatpush3.bf16.msra.mxu0 %v1601_v17  ;;  %v1637_v0 = vld [vmem:[%s2009_s1 + $0x1e0] sm:$0xff]   ;;  %v1639_v4 = vld [vmem:[%s2009_s1 + $0x168] sm:$0xff]   ;;  %v1640_v6 = vld [vmem:[%s1827_s6 + $0x10] ss:$0 sps:$4 sm:$0xff]  }
  0x19   : > { %1427 = vmatprep.subr.bf16.mxu0 %v1604_v20  ;;  %v234_v48 = vsel %vm222_vm0, %v229_v44, %v233_v39  ;;  %v1638_v2 = vld [vmem:[%s2009_s1 + $0x1a0] sm:$0xff]   ;;  %v1641_v7 = vld [vmem:[%s2009_s1 + $0x128] sm:$0xff]   ;;  %v239_v10 = vshll.u32 %v1640_v6, 16  ;;  %v251_v13 = vrot.slane %v1640_v6, 1  ;;  %v1645_v17 = vld [vmem:[%s2009_s1 + $0x170] sm:$0xff]  }
  0x1a   : > { %1454 = vmatpush3.bf16.msra.mxu1 %v1603_v19  ;;  %1010 = vmatprep.mubr.bf16.mxu0 %v234_v48  ;;  %v1642_v11 = vld [vmem:[%s2009_s1 + $0x1e8] sm:$0xff]   ;;  %v1646_v20 = vld [vmem:[%s2009_s1 + $0x130] sm:$0xff]   ;;  %v1659_v48 = vld [vmem:[%s1827_s6 + $0x18] ss:$0 sps:$4 sm:$0xff]  }
  0x1b   : > { %1455 = vmatprep.subr.bf16.mxu1 %v1606_v22  ;;  %v1643_v12 = vld [vmem:[%s1827_s6 + $0xc] sm:$0xff]   ;;  %v241_v14 = vrot.slane %v239_v10, 1  ;;  %v252_v16 = vsel %vm247_vm1, %v249_v43, %v251_v13  ;;  %v1657_v40 = vld [vmem:[%s1827_s6 + $0x14] ss:$0 sps:$4 sm:$0xff]   ;;  %v1664_v1 = vld [vmem:[%s2009_s1 + $0x238] sm:$0xff]  }
  0x1c   : > { %1428 = vmatpush3.bf16.msra.mxu0 %v1605_v21  ;;  %v1644_v15 = vld [vmem:[%s2009_s1 + $0x1a8] sm:$0xff]   ;;  %v309_v18 = vrot.slane %v1643_v12, 1  ;;  %v292_v21 = vshll.u32 %v1643_v12, 16  ;;  %v1647_v22 = vld [vmem:[%s2009_s1 + $0x1f0] sm:$0xff]   ;;  %v296_v35 = vshrl.u32 %v1643_v12, 16  ;;  %v311_v44 = vrot.slane %v1657_v40, 1 }
  0x1d   : > { %1429 = vmatprep.subr.bf16.mxu0 %v1608_v24  ;;  %v242_v19 = vsel %vm222_vm0, %v237_v9, %v241_v14  ;;  %v1648_v24 = vld [vmem:[%s2009_s1 + $0x1b0] sm:$0xff]   ;;  %v1656_v38 = vld [vmem:[%s2009_s1 + $0x208] sm:$0xff]   ;;  %v1341_v9 = vld [vmem:[%s2010_s2] ss:$0 sm:$0xff] }
  0x1e   : > { %1456 = vmatpush3.bf16.msra.mxu1 %v1607_v23  ;;  %v310_v23 = vsel %vm247_vm1, %v308_v3, %v309_v18  ;;  %v1655_v34 = vld [vmem:[%s1827_s6 + $0x10] sm:$0xff]   ;;  %v1662_v63 = vld [vmem:[%s2009_s1 + $0x228] sm:$0xff]  }
  0x1f   : > { %1457 = vmatprep.subr.bf16.mxu1 %v1610_v26  ;;  %v1650_v26 = vld [vmem:[%s2009_s1 + $0x138] sm:$0xff]   ;;  %v352_v39 = vshll.u32 %v1655_v34, 16 }
  0x20   : > { %1430 = vmatpush3.bf16.msra.mxu0 %v1609_v25  ;;  %v1649_v25 = vld [vmem:[%s2009_s1 + $0x178] sm:$0xff]  }
  0x21   : > { %1431 = vmatprep.subr.bf16.mxu0 %v1612_v28  ;;  %v294_v28 = vrot.slane %v292_v21, 1  ;;  %v354_v43 = vrot.slane %v352_v39, 1 }
  0x22   : > { %1458 = vmatpush3.bf16.msra.mxu1 %v1611_v27  ;;  %v290_v27 = vor.u32 %v289_v8, %v285_v5 }
  0x23   : > { %1459 = vmatprep.subr.bf16.mxu1 %v1614_v30  ;;  %v1652_v30 = vld [vmem:[%s2009_s1 + $0x1b8] sm:$0xff]  }
  0x24   : > { %1432 = vmatpush3.bf16.msra.mxu0 %v1613_v29  ;;  %v1651_v29 = vld [vmem:[%s2009_s1 + $0x1f8] sm:$0xff]  }
  0x25   : > { %1473 = vmatprep.subr.bf16.mxu0 %v1618_v37 }
  0x26   : > { %1460 = vmatpush3.bf16.msra.mxu1 %v1617_v33  ;;  %v1654_v33 = vld [vmem:[%s1827_s6 + $0x8] sm:$0xff]  }
  0x27   : > { %1501 = vmatprep.subr.bf16.mxu1 %v1621_v45  ;;  %1011 = vmatmul.mubr.bf16.vlgmr.msra.gmra.mrb[0].mxu0 %v1615_v31  ;;  %v1653_v31 = vld [vmem:[%s2009_s1 + $0x200] sm:$0xff]   ;;  %v345_v36 = vshrl.u32 %v1654_v33, 16  ;;  %v347_v37 = vshll.u32 %v1654_v33, 16  ;;  %v298_v45 = vor.u32 %v296_v35, %v294_v28 }
  0x28   : > { %1474 = vmatpush3.bf16.msra.mxu0 %v1620_v41  ;;  %1018 = vmatprep.mubr.bf16.mxu0 %v242_v19  ;;  %v356_v41 = vshrl.u32 %v1655_v34, 16 }
  0x29   : > { %1060 = vmatmul.mubr.bf16.vlgmr.msra.gmra.mrb[0].mxu1 %v250_v46  ;;  %1475 = vmatprep.subr.bf16.mxu0 %v1623_v49  ;;  %v349_v42 = vrot.slane %v347_v37, 1  ;;  %v300_v46 = vshll.u32 %v1657_v40, 16 }
  0x2a   : > { %1502 = vmatpush3.bf16.msra.mxu1 %v1622_v47  ;;  %1067 = vmatprep.mubr.bf16.mxu1 %v1643_v12  ;;  %v1658_v47 = vld [vmem:[%s2009_s1 + $0x210] sm:$0xff]  }
  0x2b   : > { %1503 = vmatprep.subr.bf16.mxu1 %v1625_v51  ;;  %v350_v49 = vor.u32 %v349_v42, %v345_v36  ;;  %v302_v51 = vrot.slane %v300_v46, 1 }
  0x2c   : > { %1476 = vmatpush3.bf16.msra.mxu0 %v1624_v50  ;;  %v312_v50 = vsel %vm247_vm1, %v309_v18, %v311_v44 }
  0x2d   : > { %1477 = vmatprep.subr.bf16.mxu0 %v1627_v53  ;;  %v360_v53 = vshll.u32 %v1659_v48, 16 }
  0x2e   : > { %1504 = vmatpush3.bf16.msra.mxu1 %v1626_v52  ;;  %v358_v52 = vor.u32 %v356_v41, %v354_v43 }
  0x2f   : > { %1505 = vmatprep.subr.bf16.mxu1 %v1629_v55  ;;  %1019 = vmatmul.mubr.bf16.gmra.mrb[4].mxu0 %v1834_v32  ;;  %v295_v32 = vsel %vm222_vm0, %v290_v27, %v294_v28  ;;  %v368_v55 = vrot.slane %v1654_v33, 1 }
  0x30   : > { %1478 = vmatpush3.bf16.msra.mxu0 %v1628_v54  ;;  %1108 = vmatprep.mubr.bf16.mxu0 %v310_v23  ;;  %v355_v54 = vsel %vm222_vm0, %v350_v49, %v354_v43 }
  0x31   : > { %1479 = vmatprep.subr.bf16.mxu0 %v1631_v57  ;;  %1068 = vmatmul.mubr.bf16.gmra.mrb[4].mxu1 %v252_v16  ;;  %v362_v57 = vrot.slane %v360_v53, 1 }
  0x32   : > { %1506 = vmatpush3.bf16.msra.mxu1 %v1630_v56  ;;  %1157 = vmatprep.mubr.bf16.mxu1 %v355_v54  ;;  %v303_v56 = vsel %vm222_vm0, %v298_v45, %v302_v51 }
  0x33   : > { %1507 = vmatprep.subr.bf16.mxu1 %v1633_v59  ;;  %v369_v59 = vrot.slane %v1655_v34, 1 }
  0x34   : > { %1480 = vmatpush3.bf16.msra.mxu0 %v1632_v58  ;;  %v1660_v58 = vld [vmem:[%s2009_s1 + $0x218] sm:$0xff]  }
  0x35   : > { %1481 = vmatprep.subr.bf16.mxu0 %v1635_v61  ;;  %v370_v61 = vsel %vm247_vm1, %v368_v55, %v369_v59 }
  0x36   : > { %1508 = vmatpush3.bf16.msra.mxu1 %v1634_v60  ;;  %v363_v60 = vsel %vm222_vm0, %v358_v52, %v362_v57 }
  0x37   : > { %1509 = vmatprep.subr.bf16.mxu1 %v1637_v0  ;;  %v1663_v0 = vld [vmem:[%s2009_s1 + $0x230] sm:$0xff]  }
  0x38   : > { %1482 = vmatpush3.bf16.msra.mxu0 %v1636_v62  ;;  %v1661_v62 = vld [vmem:[%s2009_s1 + $0x220] sm:$0xff]  }
  0x39   : > { %1483 = vmatprep.subr.bf16.mxu0 %v1639_v4 }
  0x3a   : > { %1510 = vmatpush3.bf16.msra.mxu1 %v1638_v2  ;;  %v371_v2 = vrot.slane %v1659_v48, 1 }
  0x3b   : > { %1511 = vmatprep.subr.bf16.mxu1 %v1642_v11 }
  0x3c   : > { %1484 = vmatpush3.bf16.msra.mxu0 %v1641_v7  ;;  %v372_v3 = vsel %vm247_vm1, %v369_v59, %v371_v2 }
  0x3d   : > { %1485 = vmatprep.subr.bf16.mxu0 %v1645_v17 }
  0x3e   : > { %1512 = vmatpush3.bf16.msra.mxu1 %v1644_v15 }
  0x3f   : > { %1513 = vmatprep.subr.bf16.mxu1 %v1647_v22 }
  0x40   : > { %1486 = vmatpush3.bf16.msra.mxu0 %v1646_v20 }
  0x41   : > { %1487 = vmatprep.subr.bf16.mxu0 %v1649_v25 }
  0x42   : > { %1514 = vmatpush3.bf16.msra.mxu1 %v1648_v24 }
  0x43   : > { %1515 = vmatprep.subr.bf16.mxu1 %v1651_v29 }
  0x44   : > { %1488 = vmatpush3.bf16.msra.mxu0 %v1650_v26 }
  0x45   : > { %1539 = vmatprep.subr.bf16.mxu0 %v1653_v31 }
  0x46   : > { %1516 = vmatpush3.bf16.msra.mxu1 %v1652_v30 }
  0x47   : > { %1109 = vmatmul.mubr.bf16.vlgmr.msra.gmra.mrb[8].mxu0 %v295_v32 }
  0x48   : > { %1540 = vmatpush3.bf16.msra.mxu0 %v1653_v31  ;;  %1116 = vmatprep.mubr.bf16.mxu0 %v312_v50 }
  0x49   : > { %1541 = vmatprep.subr.bf16.mxu0 %v1656_v38  ;;  %1158 = vmatmul.mubr.bf16.vlgmr.msra.gmra.mrb[8].mxu1 %v1654_v33 }
  0x4a   : > { %1165 = vmatprep.mubr.bf16.mxu1 %v363_v60 }
  0x4c   : > { %1542 = vmatpush3.bf16.msra.mxu0 %v1656_v38 }
  0x4d   : > { %1543 = vmatprep.subr.bf16.mxu0 %v1658_v47 }
  0x4f   : > { %1117 = vmatmul.mubr.bf16.gmra.mrb[12].mxu0 %v303_v56 }
  0x50   : > { %1544 = vmatpush3.bf16.msra.mxu0 %v1658_v47  ;;  %1555 = vmatprep.mubr.bf16.mxu0 %v370_v61 }
  0x51   : > { %1545 = vmatprep.subr.bf16.mxu0 %v1660_v58  ;;  %1166 = vmatmul.mubr.bf16.gmra.mrb[12].mxu1 %v1655_v34 }
  0x54   : > { %1546 = vmatpush3.bf16.msra.mxu0 %v1660_v58 }
  0x55   : > { %1547 = vmatprep.subr.bf16.mxu0 %v1661_v62 }
  0x58   : > { %1548 = vmatpush3.bf16.msra.mxu0 %v1661_v62 }
  0x59   : > { %1549 = vmatprep.subr.bf16.mxu0 %v1662_v63 }
  0x5c   : > { %1550 = vmatpush3.bf16.msra.mxu0 %v1662_v63 }
  0x5d   : > { %1551 = vmatprep.subr.bf16.mxu0 %v1663_v0 }
  0x60   : > { %1552 = vmatpush3.bf16.msra.mxu0 %v1663_v0 }
  0x61   : > { %1553 = vmatprep.subr.bf16.mxu0 %v1664_v1 }
  0x64   : > { %1554 = vmatpush3.bf16.msra.mxu0 %v1664_v1 }
  0x67   : > { %1556 = vmatmul.mubr.bf16.vlgmr.msra.gmra.mrb[16].mxu0 %v372_v3 }
  0xfa   : > { %v1433_v6 = vpop.f32.mrb[0].mxu0 }
  0xfb   : > { %v1434_v10 = vpop.f32.mrb[1].mxu0 }
  0xfc   : > { %v1461_v4 = vpop.f32.mrb[0].mxu1  ;;  %v1435_v12 = vadd.f32 %v1434_v10, %v1433_v6  ;;  %v1436_v13 = vpop.f32.mrb[2].mxu0 }
  0xfd   : > { %v1462_v5 = vpop.f32.mrb[1].mxu1  ;;  %v1437_v15 = vpop.f32.mrb[3].mxu0 }
  0xfe   : > { %v1463_v7 = vadd.f32 %v1462_v5, %v1461_v4  ;;  %v1464_v8 = vpop.f32.mrb[2].mxu1  ;;  %v1013_v16 = vadd.f32 %v1435_v12, %v1341_v9  ;;  %v1438_v17 = vadd.f32 %v1437_v15, %v1436_v13 }
  0xff   : > { %v1465_v11 = vpop.f32.mrb[3].mxu1 }
 0x100   : > { %v1466_v14 = vadd.f32 %v1465_v11, %v1464_v8  ;;  %v1016_v18 = vadd.f32 %v1438_v17, %v1341_v9  ;;  %v1062_v19 = vadd.f32 %v1463_v7, %v1013_v16 }
 0x102   : > { %v1065_v20 = vadd.f32 %v1466_v14, %v1016_v18  ;;  %v1439_v22 = vpop.f32.mrb[4].mxu0 }
 0x103   : > { %v1440_v24 = vpop.f32.mrb[5].mxu0 }
 0x104   : > { %v1467_v21 = vpop.f32.mrb[4].mxu1  ;;  %v1441_v27 = vadd.f32 %v1440_v24, %v1439_v22  ;;  %v1442_v28 = vpop.f32.mrb[6].mxu0 }
 0x105   : > { %v1468_v23 = vpop.f32.mrb[5].mxu1  ;;  %v1443_v30 = vpop.f32.mrb[7].mxu0 }
 0x106   : > { %v1469_v25 = vadd.f32 %v1468_v23, %v1467_v21  ;;  %v1470_v26 = vpop.f32.mrb[6].mxu1  ;;  %v1021_v32 = vadd.f32 %v1441_v27, %v1341_v9  ;;  %v1444_v33 = vadd.f32 %v1443_v30, %v1442_v28 }
 0x107   : > { %v1471_v29 = vpop.f32.mrb[7].mxu1 }
 0x108   : > { %v1472_v31 = vadd.f32 %v1471_v29, %v1470_v26  ;;  %v1024_v34 = vadd.f32 %v1444_v33, %v1341_v9  ;;  %v1070_v35 = vadd.f32 %v1469_v25, %v1021_v32 }
 0x10a   : > { %v1073_v36 = vadd.f32 %v1472_v31, %v1024_v34 }
 0x11a   : > { %v1489_v37 = vpop.f32.mrb[8].mxu0 }
 0x11b   : > { %v1490_v38 = vpop.f32.mrb[9].mxu0 }
 0x11c   : > { %v1491_v39 = vadd.f32 %v1490_v38, %v1489_v37  ;;  %v1492_v40 = vpop.f32.mrb[10].mxu0  ;;  %v1517_v45 = vpop.f32.mrb[8].mxu1 }
 0x11d   : > { %v1493_v41 = vpop.f32.mrb[11].mxu0  ;;  %v1518_v46 = vpop.f32.mrb[9].mxu1 }
 0x11e   : > { %v1111_v42 = vadd.f32 %v1491_v39, %v1062_v19  ;;  %v1494_v43 = vadd.f32 %v1493_v41, %v1492_v40  ;;  %v1519_v48 = vadd.f32 %v1518_v46, %v1517_v45  ;;  %v1520_v49 = vpop.f32.mrb[10].mxu1 }
 0x11f   : > { %v1521_v51 = vpop.f32.mrb[11].mxu1 }
 0x120   : > { %v1114_v44 = vadd.f32 %v1494_v43, %v1065_v20  ;;  %v1522_v54 = vadd.f32 %v1521_v51, %v1520_v49  ;;  %v1160_v56 = vadd.f32 %v1519_v48, %v1111_v42 }
 0x122   : > { %v1495_v47 = vpop.f32.mrb[12].mxu0  ;;  %v1163_v59 = vadd.f32 %v1522_v54, %v1114_v44 }
 0x123   : > { %v1496_v50 = vpop.f32.mrb[13].mxu0 }
 0x124   : > { %v1497_v52 = vadd.f32 %v1496_v50, %v1495_v47  ;;  %v1498_v53 = vpop.f32.mrb[14].mxu0  ;;  %v1523_v61 = vpop.f32.mrb[12].mxu1 }
 0x125   : > { %v1499_v55 = vpop.f32.mrb[15].mxu0  ;;  %v1524_v62 = vpop.f32.mrb[13].mxu1 }
 0x126   : > { %v1119_v57 = vadd.f32 %v1497_v52, %v1070_v35  ;;  %v1500_v58 = vadd.f32 %v1499_v55, %v1498_v53  ;;  %v1525_v63 = vadd.f32 %v1524_v62, %v1523_v61  ;;  %v1526_v0 = vpop.f32.mrb[14].mxu1 }
 0x127   : > { %v1527_v1 = vpop.f32.mrb[15].mxu1 }
 0x128   : > { %v1122_v60 = vadd.f32 %v1500_v58, %v1073_v36  ;;  %v1528_v2 = vadd.f32 %v1527_v1, %v1526_v0  ;;  %v1168_v3 = vadd.f32 %v1525_v63, %v1119_v57 }
 0x12a   : > { %v1171_v4 = vadd.f32 %v1528_v2, %v1122_v60 }
 0x13a   : > { %v1557_v5 = vpop.f32.mrb[16].mxu0 }
 0x13b   : > { %v1217_v6 = vadd.f32 %v1557_v5, %v1168_v3  ;;  %v1208_v7 = vpop.f32.mrb[17].mxu0 }
 0x13c   : > { %v1209_v8 = vadd.f32 %v1208_v7, %v1160_v56  ;;  %v1558_v9 = vpop.f32.mrb[18].mxu0 }
 0x13d   : > { %1225 = vst [vmem:[%s192_s7 + $0x10] sm:$0xff] %v1217_v6  ;;  %v1220_v10 = vadd.f32 %v1558_v9, %v1171_v4  ;;  %v1211_v11 = vpop.f32.mrb[19].mxu0 }
 0x13e   : > { %1223 = vst [vmem:[%s192_s7] sm:$0xff] %v1209_v8  ;;  %v1212_v12 = vadd.f32 %v1211_v11, %v1163_v59 }
 0x13f   : > { %1226 = vst [vmem:[%s192_s7 + $0x18] sm:$0xff] %v1220_v10 }
 0x140   : > { %1224 = vst [vmem:[%s192_s7 + $0x8] sm:$0xff] %v1212_v12 }
 0x141 PF: > { %s13_s14 = sadd.s32 1, %s1687_s14   ;;  %s2012_s12 = smov %s1683_s13 }
 0x142   : > { %p10_p5 = scmp.ge.s32.totalorder %s13_s14, 4   ;;  %s2013_s13 = smov %s2015_s15 }
 0x144   :  { %12 = sbr.rel (!%p10_p5) target bundleno = 2 (0x2), region = 65 }

// kernel: backbone_base_agent_swin_forward.17
= control target key start
LH: loop header
LB: loop body
LE: loop exit
PB: predicated region body
PF: predicated region fallthrough
CT: control target
= control target key end

     0   :  { %s2667_s12 = smov 0   ;;  %s2669_s13 = smov 0   ;;  %s3248_s0 = inlined_call_operand.vmem [shape: bf16[2,176,128], index: 0, kind: input, shape index: {}]   ;;  %s3249_s1 = inlined_call_operand.vmem [shape: bf16[1152,128], index: 1, kind: input, shape index: {}]   ;;  %s3250_s2 = inlined_call_operand.vmem [shape: f32[1,128], index: 2, kind: input, shape index: {}]   ;;  %s3251_s3 = inlined_call_operand.vmem [shape: f32[2,128,128], index: 3, kind: output, shape index: {}]  }
   0x1   :  { %s2671_s14 = smov 0  }
   0x2 LB: > { %s25_s15 = sadd.s32 1, %s2641_s13  ;;  %p2038_p0 = scmp.ge.s32.totalorder %s2645_s14, 1  ;;  %s2645_s14 = sphi %s2671_s14, %s13_s14   ;;  %s2641_s13 = sphi %s2669_s13, %s3253_s13   ;;  %s2637_s12 = sphi %s2667_s12, %s3252_s12  }
   0x3   : > { %p27_p1 = scmp.ge.s32.totalorder %s25_s15, 2  ;;  %p151_p2 = scmp.lt.s32.totalorder %s2645_s14, 3 }
   0x5   : > { %s3255_s15 = smov (%p27_p1, %s25_s15), 0  ;;  %p152_p3 = pnand %p2038_p0, %p151_p2 }
   0x6   : > { %v2524_v0 = vld [vmem:[%s3249_s1 + $0x40] sm:$0xff] (!%p152_p3)   ;;  %v2528_v4 = vld [vmem:[%s3249_s1 + $0x48] sm:$0xff] (!%p152_p3)   ;;  %v2532_v8 = vld [vmem:[%s3249_s1 + $0x50] sm:$0xff] (!%p152_p3)   ;;  %p179_p4 = scmp.lt.s32.totalorder (!%p152_p3), %s2637_s12, 1  ;;  %vm276_vm0 = vsmask.f32 (!%p152_p3), 7424 }
   0x7   : > { %155 = sbr.rel (%p152_p3) target bundleno = 395 (0x18b), region = 32  ;;  %v2525_v1 = vld [vmem:[%s3249_s1 + $0xc0] sm:$0xff] (!%p152_p3)   ;;  %2179 = vmatprep.subr.bf16.mxu0 (!%p152_p3), %v2524_v0  ;;  %v2529_v5 = vld [vmem:[%s3249_s1 + $0xc8] sm:$0xff] (!%p152_p3)   ;;  %v2533_v9 = vld [vmem:[%s3249_s1 + $0xd0] sm:$0xff] (!%p152_p3)   ;;  %vm361_vm1 = vcmask (!%p152_p3), 1046528  }
   0x8   : > { %v2526_v2 = vld [vmem:[%s3249_s1] sm:$0xff] (!%p152_p3)   ;;  %2243 = vmatprep.subr.bf16.mxu1 (!%p152_p3), %v2525_v1  ;;  %v2530_v6 = vld [vmem:[%s3249_s1 + $0x8] sm:$0xff] (!%p152_p3)   ;;  %v2534_v10 = vld [vmem:[%s3249_s1 + $0x10] sm:$0xff] (!%p152_p3)  }
   0x9   : > { %v2527_v3 = vld [vmem:[%s3249_s1 + $0x80] sm:$0xff] (!%p152_p3)   ;;  %2180 = vmatpush3.bf16.msra.mxu0 (!%p152_p3), %v2526_v2  ;;  %v2531_v7 = vld [vmem:[%s3249_s1 + $0x88] sm:$0xff] (!%p152_p3)   ;;  %v2535_v11 = vld [vmem:[%s3249_s1 + $0x90] sm:$0xff] (!%p152_p3)  }
   0xa   : > { %2244 = vmatpush3.bf16.msra.mxu1 (!%p152_p3), %v2527_v3  ;;  %2181 = vmatprep.subr.bf16.mxu0 (!%p152_p3), %v2528_v4  ;;  %v2536_v12 = vld [vmem:[%s3249_s1 + $0x58] sm:$0xff] (!%p152_p3)   ;;  %v2540_v16 = vld [vmem:[%s3249_s1 + $0x60] sm:$0xff] (!%p152_p3)   ;;  %v2544_v20 = vld [vmem:[%s3249_s1 + $0x68] sm:$0xff] (!%p152_p3)  }
   0xb   : > { %2245 = vmatprep.subr.bf16.mxu1 (!%p152_p3), %v2529_v5  ;;  %v2537_v13 = vld [vmem:[%s3249_s1 + $0xd8] sm:$0xff] (!%p152_p3)   ;;  %v2541_v17 = vld [vmem:[%s3249_s1 + $0xe0] sm:$0xff] (!%p152_p3)   ;;  %v2545_v21 = vld [vmem:[%s3249_s1 + $0xe8] sm:$0xff] (!%p152_p3)  }
   0xc   : > { %v2538_v14 = vld [vmem:[%s3249_s1 + $0x18] sm:$0xff] (!%p152_p3)   ;;  %v2542_v18 = vld [vmem:[%s3249_s1 + $0x20] sm:$0xff] (!%p152_p3)   ;;  %v2546_v22 = vld [vmem:[%s3249_s1 + $0x28] sm:$0xff] (!%p152_p3)  }
   0xd   : > { %2182 = vmatpush3.bf16.msra.mxu0 (!%p152_p3), %v2530_v6  ;;  %v2539_v15 = vld [vmem:[%s3249_s1 + $0x98] sm:$0xff] (!%p152_p3)   ;;  %v2543_v19 = vld [vmem:[%s3249_s1 + $0xa0] sm:$0xff] (!%p152_p3)   ;;  %v2547_v23 = vld [vmem:[%s3249_s1 + $0xa8] sm:$0xff] (!%p152_p3)  }
   0xe   : > { %2246 = vmatpush3.bf16.msra.mxu1 %v2531_v7  ;;  %2183 = vmatprep.subr.bf16.mxu0 %v2532_v8  ;;  %s3257_s12 = smov (!%p179_p4, %s2637_s12), 1  ;;  %v2548_v24 = vld [vmem:[%s3249_s1 + $0x70] sm:$0xff]   ;;  %v2552_v28 = vld [vmem:[%s3249_s1 + $0x78] sm:$0xff]   ;;  %v2559_v40 = vld [vmem:[%s3249_s1 + $0x140] sm:$0xff]  }
   0xf   : > { %2247 = vmatprep.subr.bf16.mxu1 %v2533_v9  ;;  %v2549_v25 = vld [vmem:[%s3249_s1 + $0xf0] sm:$0xff]   ;;  %s2499_s24 = smul.u32 88, %s3257_s12  ;;  %v2553_v29 = vld [vmem:[%s3249_s1 + $0xf8] sm:$0xff]   ;;  %v2560_v43 = vld [vmem:[%s3249_s1 + $0x1c0] sm:$0xff]   ;;  %s2178_s30 = sshll.u32 %s3257_s12, 7 }
  0x10   : > { %v2550_v26 = vld [vmem:[%s3249_s1 + $0x30] sm:$0xff]   ;;  %v2554_v30 = vld [vmem:[%s3249_s1 + $0x38] sm:$0xff]   ;;  %v2561_v45 = vld [vmem:[%s3249_s1 + $0x100] sm:$0xff]   ;;  %s3212_s6 = scalar_lea.vmem %s3251_s3, %s2178_s30 }
  0x11   : > { %2184 = vmatpush3.bf16.msra.mxu0 %v2534_v10  ;;  %v2551_v27 = vld [vmem:[%s3249_s1 + $0xb0] sm:$0xff]   ;;  %s2788_s8 = scalar_lea.vmem %s3248_s0, %s2499_s24  ;;  %v2555_v31 = vld [vmem:[%s3249_s1 + $0xb8] sm:$0xff]   ;;  %v2562_v47 = vld [vmem:[%s3249_s1 + $0x180] sm:$0xff]  }
  0x12   : > { %2248 = vmatpush3.bf16.msra.mxu1 %v2535_v11  ;;  %2185 = vmatprep.subr.bf16.mxu0 %v2536_v12  ;;  %v2556_v32 = vld [vmem:[%s2788_s8] sm:$0xff]   ;;  %v2557_v33 = vld [vmem:[%s2788_s8 + $0x8] sm:$0xff]   ;;  %v2563_v49 = vld [vmem:[%s2788_s8 + $0x10] sm:$0xff]  }
  0x13   : > { %2249 = vmatprep.subr.bf16.mxu1 %v2537_v13  ;;  %v2796_v34 = vld [vmem:[%s2788_s8 + $0x8] sm:$0xff]   ;;  %v278_v35 = vshrl.u32 %v2556_v32, 16  ;;  %v280_v36 = vshll.u32 %v2556_v32, 16  ;;  %v285_v37 = vshll.u32 %v2557_v33, 16  ;;  %v362_v38 = vrot.slane %v2556_v32, 1  ;;  %v2815_v51 = vld [vmem:[%s2788_s8 + $0x10] sm:$0xff]  }
  0x14   : > { %1575 = vmatprep.mubr.bf16.mxu1 %v2796_v34  ;;  %v363_v39 = vrot.slane %v2557_v33, 1  ;;  %v289_v48 = vshrl.u32 %v2557_v33, 16  ;;  %v293_v53 = vshll.u32 %v2563_v49, 16  ;;  %v365_v54 = vrot.slane %v2563_v49, 1  ;;  %v2565_v55 = vld [vmem:[%s3249_s1 + $0x148] sm:$0xff]   ;;  %v2833_v63 = vld [vmem:[%s2788_s8 + $0x18] sm:$0xff]  }
  0x15   : > { %2186 = vmatpush3.bf16.msra.mxu0 %v2538_v14  ;;  %v282_v41 = vrot.slane %v280_v36, 1  ;;  %v287_v42 = vrot.slane %v285_v37, 1  ;;  %v2566_v56 = vld [vmem:[%s3249_s1 + $0x1c8] sm:$0xff]   ;;  %v297_v61 = vshrl.u32 %v2563_v49, 16  ;;  %v2836_v0 = vld [vmem:[%s2788_s8 + $0x18] sm:$0xff]   ;;  %v301_v2 = vshll.u32 %v2833_v63, 16 }
  0x16   : > { %2250 = vmatpush3.bf16.msra.mxu1 %v2539_v15  ;;  %2187 = vmatprep.subr.bf16.mxu0 %v2540_v16  ;;  %v364_v44 = vsel %vm361_vm1, %v362_v38, %v363_v39  ;;  %v295_v57 = vrot.slane %v293_v53, 1  ;;  %v366_v58 = vsel %vm361_vm1, %v363_v39, %v365_v54  ;;  %v2567_v59 = vld [vmem:[%s3249_s1 + $0x108] sm:$0xff]   ;;  %v367_v3 = vrot.slane %v2833_v63, 1  ;;  %v2571_v4 = vld [vmem:[%s3249_s1 + $0x150] sm:$0xff]   ;;  %v2857_v12 = vld [vmem:[%s2788_s8 + $0x20] sm:$0xff]  }
  0x17   : > { %2251 = vmatprep.subr.bf16.mxu1 %v2541_v17  ;;  %v283_v46 = vor.u32 %v282_v41, %v278_v35  ;;  %v291_v52 = vor.u32 %v289_v48, %v287_v42  ;;  %v2568_v60 = vld [vmem:[%s3249_s1 + $0x188] sm:$0xff]   ;;  %v2572_v5 = vld [vmem:[%s3249_s1 + $0x1d0] sm:$0xff]   ;;  %v303_v6 = vrot.slane %v301_v2, 1  ;;  %v305_v9 = vshrl.u32 %v2833_v63, 16  ;;  %v2860_v13 = vld [vmem:[%s2788_s8 + $0x20] sm:$0xff]  }
  0x18   : > { %v299_v1 = vor.u32 %v297_v61, %v295_v57  ;;  %v2573_v7 = vld [vmem:[%s3249_s1 + $0x110] sm:$0xff]   ;;  %v368_v11 = vsel %vm361_vm1, %v365_v54, %v367_v3  ;;  %v309_v15 = vshll.u32 %v2857_v12, 16  ;;  %v369_v16 = vrot.slane %v2857_v12, 1  ;;  %v2577_v17 = vld [vmem:[%s3249_s1 + $0x158] sm:$0xff]   ;;  %v2589_v41 = vld [vmem:[%s3249_s1 + $0x168] sm:$0xff]  }
  0x19   : > { %2188 = vmatpush3.bf16.msra.mxu0 %v2542_v18  ;;  %v288_v50 = vsel %vm276_vm0, %v283_v46, %v287_v42  ;;  %v296_v62 = vsel %vm276_vm0, %v291_v52, %v295_v57  ;;  %v2574_v8 = vld [vmem:[%s3249_s1 + $0x190] sm:$0xff]   ;;  %v307_v14 = vor.u32 %v305_v9, %v303_v6  ;;  %v2578_v18 = vld [vmem:[%s3249_s1 + $0x1d8] sm:$0xff]   ;;  %v2590_v42 = vld [vmem:[%s3249_s1 + $0x1e8] sm:$0xff]  }
  0x1a   : > { %2252 = vmatpush3.bf16.msra.mxu1 %v2543_v19  ;;  %2189 = vmatprep.subr.bf16.mxu0 %v2544_v20  ;;  %v304_v10 = vsel %vm276_vm0, %v299_v1, %v303_v6  ;;  %v311_v19 = vrot.slane %v309_v15, 1  ;;  %v2579_v20 = vld [vmem:[%s3249_s1 + $0x118] sm:$0xff]   ;;  %v2902_v36 = vld [vmem:[%s2788_s8 + $0x30] sm:$0xff]   ;;  %v2607_v15 = vld [vmem:[%s3249_s1 + $0x200] sm:$0xff]  }
  0x1b   : > { %2253 = vmatprep.subr.bf16.mxu1 %v2545_v21  ;;  %1478 = vmatprep.mubr.bf16.mxu0 %v288_v50  ;;  %v2580_v21 = vld [vmem:[%s3249_s1 + $0x198] sm:$0xff]   ;;  %v325_v39 = vshll.u32 %v2902_v36, 16  ;;  %v329_v50 = vshrl.u32 %v2902_v36, 16  ;;  %v2595_v53 = vld [vmem:[%s3249_s1 + $0x170] sm:$0xff]  }
  0x1c   : > { %v2925_v48 = vld [vmem:[%s2788_s8 + $0x38] sm:$0xff]   ;;  %v2596_v54 = vld [vmem:[%s3249_s1 + $0x1f0] sm:$0xff]  }
  0x1d   : > { %2190 = vmatpush3.bf16.msra.mxu0 %v2546_v22  ;;  %v313_v22 = vshrl.u32 %v2857_v12, 16  ;;  %v327_v46 = vrot.slane %v325_v39, 1  ;;  %v333_v52 = vshll.u32 %v2925_v48, 16  ;;  %v2597_v57 = vld [vmem:[%s3249_s1 + $0x130] sm:$0xff]   ;;  %v2601_v1 = vld [vmem:[%s3249_s1 + $0x178] sm:$0xff]   ;;  %v337_v6 = vshrl.u32 %v2925_v48, 16 }
  0x1e   : > { %2254 = vmatpush3.bf16.msra.mxu1 %v2547_v23  ;;  %2191 = vmatprep.subr.bf16.mxu0 %v2548_v24  ;;  %v312_v23 = vsel %vm276_vm0, %v307_v14, %v311_v19  ;;  %v2880_v24 = vld [vmem:[%s2788_s8 + $0x28] sm:$0xff]   ;;  %v2602_v2 = vld [vmem:[%s3249_s1 + $0x1f8] sm:$0xff]  }
  0x1f   : > { %2255 = vmatprep.subr.bf16.mxu1 %v2549_v25  ;;  %v2883_v25 = vld [vmem:[%s2788_s8 + $0x28] sm:$0xff]   ;;  %v371_v35 = vrot.slane %v2880_v24, 1  ;;  %v321_v38 = vshrl.u32 %v2880_v24, 16  ;;  %v331_v61 = vor.u32 %v329_v50, %v327_v46  ;;  %v2971_v9 = vld [vmem:[%s2788_s8 + $0x18] sm:$0xff]  }
  0x21   : > { %2192 = vmatpush3.bf16.msra.mxu0 %v2550_v26  ;;  %v370_v26 = vsel %vm361_vm1, %v367_v3, %v369_v16 }
  0x22   : > { %2256 = vmatpush3.bf16.msra.mxu1 %v2551_v27  ;;  %2193 = vmatprep.subr.bf16.mxu0 %v2552_v28  ;;  %v317_v27 = vshll.u32 %v2880_v24, 16  ;;  %v2583_v28 = vld [vmem:[%s3249_s1 + $0x160] sm:$0xff]  }
  0x23   : > { %2257 = vmatprep.subr.bf16.mxu1 %v2553_v29  ;;  %v2584_v29 = vld [vmem:[%s3249_s1 + $0x1e0] sm:$0xff]  }
  0x25   : > { %2194 = vmatpush3.bf16.msra.mxu0 %v2554_v30  ;;  %v315_v30 = vor.u32 %v313_v22, %v311_v19 }
  0x26   : > { %2258 = vmatpush3.bf16.msra.mxu1 %v2555_v31  ;;  %2307 = vmatprep.subr.bf16.mxu0 %v2559_v40  ;;  %v319_v31 = vrot.slane %v317_v27, 1  ;;  %v2908_v40 = vld [vmem:[%s2788_s8 + $0x30] sm:$0xff]   ;;  %v560_v27 = vrot.slane %v2796_v34, 1 }
  0x27   : > { %2371 = vmatprep.subr.bf16.mxu1 %v2560_v43  ;;  %v372_v43 = vsel %vm361_vm1, %v369_v16, %v371_v35 }
  0x28   : > { %1479 = vmatmul.mubr.bf16.vlgmr.msra.gmra.mrb[0].mxu0 %v2556_v32  ;;  %v2585_v32 = vld [vmem:[%s3249_s1 + $0x120] sm:$0xff]   ;;  %v320_v37 = vsel %vm276_vm0, %v315_v30, %v319_v31 }
  0x29   : > { %1576 = vmatmul.mubr.bf16.vlgmr.msra.gmra.mrb[0].mxu1 %v364_v44  ;;  %2308 = vmatpush3.bf16.msra.mxu0 %v2561_v45  ;;  %v2591_v44 = vld [vmem:[%s3249_s1 + $0x128] sm:$0xff]   ;;  %v323_v45 = vor.u32 %v321_v38, %v319_v31  ;;  %v686_v31 = vshrl.u32 %v2971_v9, 16 }
  0x2a   : > { %2372 = vmatpush3.bf16.msra.mxu1 %v2562_v47  ;;  %1583 = vmatprep.mubr.bf16.mxu1 %v2815_v51  ;;  %v2592_v47 = vld [vmem:[%s3249_s1 + $0x1a8] sm:$0xff]  }
  0x2b   : > { %2373 = vmatprep.subr.bf16.mxu1 %v2566_v56  ;;  %2309 = vmatprep.subr.bf16.mxu0 %v2565_v55  ;;  %v328_v55 = vsel %vm276_vm0, %v323_v45, %v327_v46  ;;  %v2939_v56 = vld [vmem:[%s2788_s8 + $0x38] sm:$0xff]  }
  0x2c   : > { %1486 = vmatprep.mubr.bf16.mxu0 %v296_v62  ;;  %v335_v62 = vrot.slane %v333_v52, 1  ;;  %v488_v52 = vshrl.u32 %v2815_v51, 16 }
  0x2d   : > { %2310 = vmatpush3.bf16.msra.mxu0 %v2567_v59 }
  0x2e   : > { %2374 = vmatpush3.bf16.msra.mxu1 %v2568_v60  ;;  %2311 = vmatprep.subr.bf16.mxu0 %v2571_v4  ;;  %v2599_v60 = vld [vmem:[%s2788_s8 + $0x40] ss:$0 sps:$4 sm:$0xff]   ;;  %v2603_v4 = vld [vmem:[%s3249_s1 + $0x138] sm:$0xff]   ;;  %v339_v16 = vor.u32 %v337_v6, %v335_v62 }
  0x2f   : > { %2375 = vmatprep.subr.bf16.mxu1 %v2572_v5  ;;  %v341_v3 = vshll.u32 %v2599_v60, 16  ;;  %v336_v5 = vsel %vm276_vm0, %v331_v61, %v335_v62 }
  0x30   : > { %1487 = vmatmul.mubr.bf16.gmra.mrb[4].mxu0 %v2557_v33  ;;  %v2586_v33 = vld [vmem:[%s3249_s1 + $0x1a0] sm:$0xff]  }
  0x31   : > { %1584 = vmatmul.mubr.bf16.gmra.mrb[4].mxu1 %v366_v58  ;;  %2312 = vmatpush3.bf16.msra.mxu0 %v2573_v7  ;;  %v2598_v58 = vld [vmem:[%s3249_s1 + $0x1b0] sm:$0xff]   ;;  %v2604_v7 = vld [vmem:[%s3249_s1 + $0x1b8] sm:$0xff]  }
  0x32   : > { %1591 = vmatprep.mubr.bf16.mxu1 %v2836_v0  ;;  %1494 = vmatprep.mubr.bf16.mxu0 %v304_v10 }
  0x33   : > { %2376 = vmatpush3.bf16.msra.mxu1 %v2574_v8  ;;  %2313 = vmatprep.subr.bf16.mxu0 %v2577_v17  ;;  %v2967_v8 = vld [vmem:[%s2788_s8 + $0x10] sm:$0xff]  }
  0x34   : > { %2377 = vmatprep.subr.bf16.mxu1 %v2578_v18  ;;  %v677_v14 = vshll.u32 %v2967_v8, 16  ;;  %v675_v17 = vshrl.u32 %v2967_v8, 16  ;;  %v682_v18 = vshll.u32 %v2971_v9, 16 }
  0x35   : > { %2314 = vmatpush3.bf16.msra.mxu0 %v2579_v20  ;;  %v377_v20 = vrot.slane %v2599_v60, 1 }
  0x36   : > { %2315 = vmatprep.subr.bf16.mxu0 %v2583_v28  ;;  %v679_v19 = vrot.slane %v677_v14, 1  ;;  %v479_v28 = vshll.u32 %v2796_v34, 16 }
  0x37   : > { %2378 = vmatpush3.bf16.msra.mxu1 %v2580_v21 }
  0x38   : > { %1495 = vmatmul.mubr.bf16.gmra.mrb[8].mxu0 %v2563_v49  ;;  %2379 = vmatprep.subr.bf16.mxu1 %v2584_v29  ;;  %v373_v49 = vrot.slane %v2902_v36, 1  ;;  %v680_v22 = vor.u32 %v679_v19, %v675_v17  ;;  %v561_v29 = vrot.slane %v2815_v51, 1 }
  0x39   : > { %1592 = vmatmul.mubr.bf16.gmra.mrb[8].mxu1 %v368_v11  ;;  %1502 = vmatprep.mubr.bf16.mxu0 %v312_v23  ;;  %v343_v11 = vrot.slane %v341_v3, 1  ;;  %v684_v23 = vrot.slane %v682_v18, 1 }
  0x3a   : > { %1599 = vmatprep.mubr.bf16.mxu1 %v2860_v13  ;;  %2316 = vmatpush3.bf16.msra.mxu0 %v2585_v32  ;;  %v374_v59 = vsel %vm361_vm1, %v371_v35, %v373_v49  ;;  %v481_v35 = vrot.slane %v479_v28, 1 }
  0x3b   : > { %2380 = vmatpush3.bf16.msra.mxu1 %v2586_v33  ;;  %2317 = vmatprep.subr.bf16.mxu0 %v2589_v41  ;;  %v344_v21 = vsel %vm276_vm0, %v339_v16, %v343_v11  ;;  %v685_v30 = vsel %vm276_vm0, %v680_v22, %v684_v23  ;;  %v477_v33 = vshrl.u32 %v2796_v34, 16  ;;  %v688_v38 = vor.u32 %v686_v31, %v684_v23  ;;  %v3000_v41 = vld [vmem:[%s2788_s8 + $0x28] sm:$0xff]   ;;  %v2619_v31 = vld [vmem:[%s3249_s1 + $0x230] sm:$0xff]  }
  0x3c   : > { %2381 = vmatprep.subr.bf16.mxu1 %v2590_v42  ;;  %v2609_v34 = vld [vmem:[%s3249_s1 + $0x208] sm:$0xff]   ;;  %v702_v3 = vshrl.u32 %v3000_v41, 16  ;;  %v504_v23 = vshrl.u32 %v2860_v13, 16 }
  0x3d   : > { %v482_v42 = vor.u32 %v481_v35, %v477_v33  ;;  %v569_v33 = vrot.slane %v2908_v40, 1 }
  0x3e   : > { %2318 = vmatpush3.bf16.msra.mxu0 %v2591_v44  ;;  %v563_v44 = vrot.slane %v2836_v0, 1 }
  0x3f   : > { %2382 = vmatpush3.bf16.msra.mxu1 %v2592_v47  ;;  %2319 = vmatprep.subr.bf16.mxu0 %v2595_v53  ;;  %v698_v47 = vshll.u32 %v3000_v41, 16  ;;  %v492_v53 = vshll.u32 %v2836_v0, 16 }
  0x40   : > { %1503 = vmatmul.mubr.bf16.gmra.mrb[12].mxu0 %v2833_v63  ;;  %2383 = vmatprep.subr.bf16.mxu1 %v2596_v54  ;;  %v375_v63 = vrot.slane %v2925_v48, 1  ;;  %v564_v54 = vsel %vm361_vm1, %v561_v29, %v563_v44 }
  0x41   : > { %1600 = vmatmul.mubr.bf16.gmra.mrb[12].mxu1 %v370_v26  ;;  %1510 = vmatprep.mubr.bf16.mxu0 %v320_v37  ;;  %v562_v37 = vsel %vm361_vm1, %v560_v27, %v561_v29  ;;  %v494_v62 = vrot.slane %v492_v53, 1 }
  0x42   : > { %1607 = vmatprep.mubr.bf16.mxu1 %v2883_v25  ;;  %2320 = vmatpush3.bf16.msra.mxu0 %v2597_v57  ;;  %v376_v10 = vsel %vm361_vm1, %v373_v49, %v375_v63  ;;  %v378_v26 = vsel %vm361_vm1, %v375_v63, %v377_v20  ;;  %v759_v49 = vrot.slane %v2971_v9, 1  ;;  %v700_v57 = vrot.slane %v698_v47, 1 }
  0x43   : > { %2384 = vmatpush3.bf16.msra.mxu1 %v2598_v58  ;;  %2321 = vmatprep.subr.bf16.mxu0 %v2601_v1  ;;  %v3018_v58 = vld [vmem:[%s2788_s8 + $0x30] sm:$0xff]   ;;  %v565_v1 = vrot.slane %v2860_v13, 1 }
  0x44   : > { %2385 = vmatprep.subr.bf16.mxu1 %v2602_v2  ;;  %v704_v11 = vor.u32 %v702_v3, %v700_v57  ;;  %v710_v19 = vshrl.u32 %v3018_v58, 16 }
  0x46   : > { %2322 = vmatpush3.bf16.msra.mxu0 %v2603_v4  ;;  %v706_v4 = vshll.u32 %v3018_v58, 16 }
  0x47   : > { %2386 = vmatpush3.bf16.msra.mxu1 %v2604_v7  ;;  %2451 = vmatprep.subr.bf16.mxu0 %v2607_v15  ;;  %v496_v7 = vshrl.u32 %v2836_v0, 16  ;;  %v567_v0 = vrot.slane %v2883_v25, 1 }
  0x48   : > { %1511 = vmatmul.mubr.bf16.gmra.mrb[16].mxu0 %v2857_v12  ;;  %v2975_v12 = vld [vmem:[%s2788_s8 + $0x40] sm:$0xff]   ;;  %2483 = vmatprep.subr.bf16.mxu1 %v2607_v15  ;;  %v708_v14 = vrot.slane %v706_v4, 1 }
  0x49   : > { %1608 = vmatmul.mubr.bf16.gmra.mrb[16].mxu1 %v372_v43  ;;  %1518 = vmatprep.mubr.bf16.mxu0 %v328_v55  ;;  %v498_v16 = vor.u32 %v496_v7, %v494_v62  ;;  %v568_v27 = vsel %vm361_vm1, %v565_v1, %v567_v0  ;;  %v573_v3 = vrot.slane %v2975_v12, 1  ;;  %v528_v7 = vshrl.u32 %v2939_v56, 16 }
  0x4a   : > { %1615 = vmatprep.mubr.bf16.mxu1 %v2908_v40  ;;  %v709_v18 = vsel %vm276_vm0, %v704_v11, %v708_v14  ;;  %v712_v28 = vor.u32 %v710_v19, %v708_v14  ;;  %v2620_v11 = vld [vmem:[%s2788_s8 + $0x48] ss:$0 sps:$4 sm:$0xff]  }
  0x50   : > { %1519 = vmatmul.mubr.bf16.gmra.mrb[20].mxu0 %v2880_v24  ;;  %v2986_v24 = vld [vmem:[%s2788_s8 + $0x20] sm:$0xff]  }
  0x51   : > { %1616 = vmatmul.mubr.bf16.gmra.mrb[20].mxu1 %v374_v59  ;;  %1526 = vmatprep.mubr.bf16.mxu0 %v336_v5  ;;  %v690_v32 = vshll.u32 %v2986_v24, 16  ;;  %v694_v46 = vshrl.u32 %v2986_v24, 16  ;;  %v2611_v59 = vld [vmem:[%s3249_s1 + $0x210] sm:$0xff]   ;;  %v761_v61 = vrot.slane %v2986_v24, 1  ;;  %v2613_v5 = vld [vmem:[%s3249_s1 + $0x218] sm:$0xff]  }
  0x52   : > { %1623 = vmatprep.mubr.bf16.mxu1 %v2939_v56 }
  0x53   : > { %v692_v39 = vrot.slane %v690_v32, 1  ;;  %v3030_v63 = vsel %vm361_vm1, %v759_v49, %v761_v61 }
  0x55   : > { %v693_v45 = vsel %vm276_vm0, %v688_v38, %v692_v39  ;;  %v696_v55 = vor.u32 %v694_v46, %v692_v39  ;;  %v2622_v38 = vld [vmem:[%s3249_s1 + $0x238] sm:$0xff]   ;;  %v3081_v46 = vld [vmem:[%s2788_s8 + $0x48] sm:$0xff]  }
  0x57   : > { %v701_v2 = vsel %vm276_vm0, %v696_v55, %v700_v57  ;;  %v524_v55 = vshll.u32 %v2939_v56, 16 }
  0x58   : > { %1527 = vmatmul.mubr.bf16.gmra.mrb[24].mxu0 %v2902_v36  ;;  %v484_v36 = vshll.u32 %v2815_v51, 16 }
  0x59   : > { %1624 = vmatmul.mubr.bf16.gmra.mrb[24].mxu1 %v376_v10  ;;  %1534 = vmatprep.mubr.bf16.mxu0 %v344_v21  ;;  %v566_v10 = vsel %vm361_vm1, %v563_v44, %v565_v1  ;;  %v2617_v21 = vld [vmem:[%s3249_s1 + $0x228] sm:$0xff]   ;;  %v570_v44 = vsel %vm361_vm1, %v567_v0, %v569_v33  ;;  %v575_v0 = vrot.slane %v2620_v11, 1 }
  0x5a   : > { %1631 = vmatprep.mubr.bf16.mxu1 %v2975_v12  ;;  %v486_v43 = vrot.slane %v484_v36, 1 }
  0x5c   : > { %v487_v50 = vsel %vm276_vm0, %v482_v42, %v486_v43  ;;  %v490_v51 = vor.u32 %v488_v52, %v486_v43  ;;  %v512_v42 = vshrl.u32 %v2883_v25, 16  ;;  %v516_v43 = vshll.u32 %v2908_v40, 16 }
  0x5d   : > { %v730_v52 = vshll.u32 %v3081_v46, 16 }
  0x5e   : > { %v495_v6 = vsel %vm276_vm0, %v490_v51, %v494_v62  ;;  %v2621_v62 = vld [vmem:[%s2788_s8 + $0x50] ss:$0 sps:$4 sm:$0xff]  }
  0x5f   : > { %v732_v51 = vrot.slane %v730_v52, 1 }
  0x60   : > { %1535 = vmatmul.mubr.bf16.gmra.mrb[28].mxu0 %v2925_v48  ;;  %v758_v48 = vrot.slane %v2967_v8, 1 }
  0x61   : > { %1632 = vmatmul.mubr.bf16.gmra.mrb[28].mxu1 %v378_v26  ;;  %1672 = vmatprep.mubr.bf16.mxu0 %v562_v37  ;;  %v508_v26 = vshll.u32 %v2883_v25, 16  ;;  %v571_v25 = vrot.slane %v2939_v56, 1  ;;  %v536_v56 = vshrl.u32 %v2975_v12, 16 }
  0x62   : > { %1769 = vmatprep.mubr.bf16.mxu1 %v685_v30  ;;  %v3024_v60 = vsel %vm361_vm1, %v758_v48, %v759_v49  ;;  %v3063_v30 = vld [vmem:[%s2788_s8 + $0x40] sm:$0xff]   ;;  %v518_v48 = vrot.slane %v516_v43, 1 }
  0x63   : > { %v722_v37 = vshll.u32 %v3063_v30, 16  ;;  %v572_v57 = vsel %vm361_vm1, %v569_v33, %v571_v25 }
  0x68   : > { %1673 = vmatmul.mubr.bf16.vlgmr.msra.gmra.mrb[32].mxu0 %v487_v50  ;;  %v726_v50 = vshrl.u32 %v3063_v30, 16 }
  0x69   : > { %1770 = vmatmul.mubr.bf16.vlgmr.msra.gmra.mrb[32].mxu1 %v2967_v8  ;;  %2452 = vmatpush3.bf16.msra.mxu0 %v2607_v15  ;;  %v500_v8 = vshll.u32 %v2860_v13, 16  ;;  %v510_v13 = vrot.slane %v508_v26, 1 }
  0x6a   : > { %2491 = vmatpush3.bf16.msra.mxu1 %v2607_v15  ;;  %1777 = vmatprep.mubr.bf16.mxu1 %v693_v45  ;;  %v3045_v15 = vld [vmem:[%s2788_s8 + $0x38] sm:$0xff]  }
  0x6b   : > { %2484 = vmatprep.subr.bf16.mxu1 %v2609_v34  ;;  %1680 = vmatprep.mubr.bf16.mxu0 %v564_v54  ;;  %v502_v17 = vrot.slane %v500_v8, 1  ;;  %v714_v20 = vshll.u32 %v3045_v15, 16  ;;  %v718_v36 = vshrl.u32 %v3045_v15, 16  ;;  %v514_v47 = vor.u32 %v512_v42, %v510_v13 }
  0x6c   : > { %2453 = vmatprep.subr.bf16.mxu0 %v2609_v34  ;;  %v520_v54 = vshrl.u32 %v2908_v40, 16  ;;  %v738_v40 = vshll.u32 %v2621_v62, 16  ;;  %v532_v8 = vshll.u32 %v2975_v12, 16  ;;  %v769_v12 = vrot.slane %v3063_v30, 1 }
  0x6d   : > { %2454 = vmatpush3.bf16.msra.mxu0 %v2609_v34  ;;  %v503_v22 = vsel %vm276_vm0, %v498_v16, %v502_v17  ;;  %v716_v29 = vrot.slane %v714_v20, 1  ;;  %v506_v32 = vor.u32 %v504_v23, %v502_v17  ;;  %v519_v53 = vsel %vm276_vm0, %v514_v47, %v518_v48 }
  0x6e   : > { %2492 = vmatpush3.bf16.msra.mxu1 %v2609_v34  ;;  %2455 = vmatprep.subr.bf16.mxu0 %v2611_v59  ;;  %v724_v34 = vrot.slane %v722_v37, 1  ;;  %v522_v1 = vor.u32 %v520_v54, %v518_v48  ;;  %v534_v17 = vrot.slane %v532_v8, 1  ;;  %v540_v20 = vshll.u32 %v2620_v11, 16 }
  0x6f   : > { %2485 = vmatprep.subr.bf16.mxu1 %v2611_v59  ;;  %v717_v35 = vsel %vm276_vm0, %v712_v28, %v716_v29  ;;  %v511_v39 = vsel %vm276_vm0, %v506_v32, %v510_v13  ;;  %v720_v45 = vor.u32 %v718_v36, %v716_v29  ;;  %v767_v23 = vrot.slane %v3045_v15, 1 }
  0x70   : > { %1681 = vmatmul.mubr.bf16.gmra.mrb[36].mxu0 %v495_v6  ;;  %v538_v26 = vor.u32 %v536_v56, %v534_v17  ;;  %v773_v13 = vrot.slane %v2621_v62, 1 }
  0x71   : > { %1778 = vmatmul.mubr.bf16.gmra.mrb[36].mxu1 %v2971_v9  ;;  %v2615_v9 = vld [vmem:[%s3249_s1 + $0x220] sm:$0xff]   ;;  %1688 = vmatprep.mubr.bf16.mxu0 %v566_v10  ;;  %v725_v49 = vsel %vm276_vm0, %v720_v45, %v724_v34  ;;  %v574_v10 = vsel %vm361_vm1, %v571_v25, %v573_v3 }
  0x72   : > { %1785 = vmatprep.mubr.bf16.mxu1 %v701_v2  ;;  %2493 = vmatpush3.bf16.msra.mxu1 %v2611_v59  ;;  %v526_v2 = vrot.slane %v524_v55, 1 }
  0x73   : > { %2486 = vmatprep.subr.bf16.mxu1 %v2613_v5  ;;  %2456 = vmatpush3.bf16.msra.mxu0 %v2611_v59  ;;  %v728_v59 = vor.u32 %v726_v50, %v724_v34 }
  0x74   : > { %2457 = vmatprep.subr.bf16.mxu0 %v2613_v5  ;;  %v527_v6 = vsel %vm276_vm0, %v522_v1, %v526_v2  ;;  %v530_v16 = vor.u32 %v528_v7, %v526_v2 }
  0x75   : > { %v733_v4 = vsel %vm276_vm0, %v728_v59, %v732_v51 }
  0x76   : > { %2494 = vmatpush3.bf16.msra.mxu1 %v2613_v5  ;;  %v535_v19 = vsel %vm276_vm0, %v530_v16, %v534_v17 }
  0x77   : > { %2487 = vmatprep.subr.bf16.mxu1 %v2615_v9  ;;  %2458 = vmatpush3.bf16.msra.mxu0 %v2613_v5  ;;  %v734_v5 = vshrl.u32 %v3081_v46, 16 }
  0x78   : > { %2459 = vmatprep.subr.bf16.mxu0 %v2615_v9  ;;  %1689 = vmatmul.mubr.bf16.gmra.mrb[40].mxu0 %v503_v22  ;;  %v765_v22 = vrot.slane %v3018_v58, 1 }
  0x79   : > { %1786 = vmatmul.mubr.bf16.gmra.mrb[40].mxu1 %v2986_v24  ;;  %1696 = vmatprep.mubr.bf16.mxu0 %v568_v27  ;;  %v736_v14 = vor.u32 %v734_v5, %v732_v51  ;;  %v542_v27 = vrot.slane %v540_v20, 1  ;;  %v3127_v24 = vld [vmem:[%s3250_s2] ss:$0 sm:$0xff] }
  0x7a   : > { %1793 = vmatprep.mubr.bf16.mxu1 %v709_v18  ;;  %2495 = vmatpush3.bf16.msra.mxu1 %v2615_v9  ;;  %v768_v28 = vsel %vm361_vm1, %v765_v22, %v767_v23 }
  0x7b   : > { %2488 = vmatprep.subr.bf16.mxu1 %v2617_v21  ;;  %2460 = vmatpush3.bf16.msra.mxu0 %v2615_v9  ;;  %v740_v9 = vrot.slane %v738_v40, 1  ;;  %v543_v29 = vsel %vm276_vm0, %v538_v26, %v542_v27 }
  0x7c   : > { %2461 = vmatprep.subr.bf16.mxu0 %v2617_v21 }
  0x7d   : > { %v741_v18 = vsel %vm276_vm0, %v736_v14, %v740_v9 }
  0x7e   : > { %2496 = vmatpush3.bf16.msra.mxu1 %v2617_v21 }
  0x7f   : > { %2489 = vmatprep.subr.bf16.mxu1 %v2619_v31  ;;  %2462 = vmatpush3.bf16.msra.mxu0 %v2617_v21  ;;  %v576_v21 = vsel %vm361_vm1, %v573_v3, %v575_v0 }
  0x80   : > { %2463 = vmatprep.subr.bf16.mxu0 %v2619_v31  ;;  %1697 = vmatmul.mubr.bf16.gmra.mrb[44].mxu0 %v511_v39 }
  0x81   : > { %1794 = vmatmul.mubr.bf16.gmra.mrb[44].mxu1 %v3000_v41  ;;  %1704 = vmatprep.mubr.bf16.mxu0 %v570_v44 }
  0x82   : > { %1801 = vmatprep.mubr.bf16.mxu1 %v717_v35  ;;  %2497 = vmatpush3.bf16.msra.mxu1 %v2619_v31 }
  0x83   : > { %2490 = vmatprep.subr.bf16.mxu1 %v2622_v38  ;;  %2464 = vmatpush3.bf16.msra.mxu0 %v2619_v31  ;;  %v771_v31 = vrot.slane %v3081_v46, 1 }
  0x84   : > { %2465 = vmatprep.subr.bf16.mxu0 %v2622_v38 }
  0x85   : > { %v772_v32 = vsel %vm361_vm1, %v769_v12, %v771_v31 }
  0x86   : > { %2498 = vmatpush3.bf16.msra.mxu1 %v2622_v38 }
  0x87   : > { %2466 = vmatpush3.bf16.msra.mxu0 %v2622_v38 }
  0x88   : > { %1705 = vmatmul.mubr.bf16.gmra.mrb[48].mxu0 %v519_v53 }
  0x89   : > { %1802 = vmatmul.mubr.bf16.gmra.mrb[48].mxu1 %v3018_v58  ;;  %1712 = vmatprep.mubr.bf16.mxu0 %v572_v57  ;;  %v770_v58 = vsel %vm361_vm1, %v767_v23, %v769_v12 }
  0x8a   : > { %1809 = vmatprep.mubr.bf16.mxu1 %v725_v49 }
  0x90   : > { %1713 = vmatmul.mubr.bf16.gmra.mrb[52].mxu0 %v527_v6 }
  0x91   : > { %1810 = vmatmul.mubr.bf16.gmra.mrb[52].mxu1 %v3045_v15  ;;  %1720 = vmatprep.mubr.bf16.mxu0 %v574_v10  ;;  %v763_v15 = vrot.slane %v3000_v41, 1 }
  0x92   : > { %1817 = vmatprep.mubr.bf16.mxu1 %v733_v4 }
  0x93   : > { %v764_v33 = vsel %vm361_vm1, %v761_v61, %v763_v15 }
  0x98   : > { %1721 = vmatmul.mubr.bf16.gmra.mrb[56].mxu0 %v535_v19 }
  0x99   : > { %1818 = vmatmul.mubr.bf16.gmra.mrb[56].mxu1 %v3063_v30  ;;  %1728 = vmatprep.mubr.bf16.mxu0 %v576_v21  ;;  %v774_v30 = vsel %vm361_vm1, %v771_v31, %v773_v13 }
  0x9a   : > { %1825 = vmatprep.mubr.bf16.mxu1 %v741_v18 }
  0xa0   : > { %1729 = vmatmul.mubr.bf16.gmra.mrb[60].mxu0 %v543_v29 }
  0xa1   : > { %1826 = vmatmul.mubr.bf16.gmra.mrb[60].mxu1 %v3081_v46  ;;  %2467 = vmatprep.mubr.bf16.mxu0 %v3024_v60  ;;  %v766_v60 = vsel %vm361_vm1, %v763_v15, %v765_v22 }
  0xa2   : > { %2475 = vmatprep.mubr.bf16.mxu1 %v768_v28 }
  0xa8   : > { %2468 = vmatmul.mubr.bf16.vlgmr.msra.gmra.mrb[64].mxu0 %v3030_v63 }
  0xa9   : > { %2476 = vmatmul.mubr.bf16.vlgmr.msra.gmra.mrb[64].mxu1 %v770_v58  ;;  %2471 = vmatprep.mubr.bf16.mxu0 %v764_v33 }
  0xaa   : > { %2479 = vmatprep.mubr.bf16.mxu1 %v772_v32 }
  0xb0   : > { %2472 = vmatmul.mubr.bf16.gmra.mrb[68].mxu0 %v766_v60 }
  0xb1   : > { %2480 = vmatmul.mubr.bf16.gmra.mrb[68].mxu1 %v774_v30 }
  0xfb   : > { %v2195_v39 = vpop.f32.mrb[0].mxu0 }
  0xfc   : > { %v2259_v35 = vpop.f32.mrb[0].mxu1  ;;  %v2196_v61 = vpop.f32.mrb[1].mxu0 }
  0xfd   : > { %v2260_v41 = vpop.f32.mrb[1].mxu1  ;;  %v2197_v63 = vadd.f32 %v2196_v61, %v2195_v39  ;;  %v2198_v43 = vpop.f32.mrb[2].mxu0 }
  0xfe   : > { %v2261_v36 = vadd.f32 %v2260_v41, %v2259_v35  ;;  %v2262_v37 = vpop.f32.mrb[2].mxu1  ;;  %v2199_v44 = vpop.f32.mrb[3].mxu0 }
  0xff   : > { %v2263_v38 = vpop.f32.mrb[3].mxu1  ;;  %v1481_v45 = vadd.f32 %v2197_v63, %v3127_v24  ;;  %v2200_v34 = vadd.f32 %v2199_v44, %v2198_v43 }
 0x100   : > { %v2264_v42 = vadd.f32 %v2263_v38, %v2262_v37 }
 0x101   : > { %v3130_v48 = vadd.f32 %v2261_v36, %v1481_v45  ;;  %v1484_v25 = vadd.f32 %v2200_v34, %v3127_v24 }
 0x103   : > { %v3133_v53 = vadd.f32 %v2264_v42, %v1484_v25  ;;  %v2201_v54 = vpop.f32.mrb[4].mxu0 }
 0x104   : > { %v2265_v46 = vpop.f32.mrb[4].mxu1  ;;  %v2202_v57 = vpop.f32.mrb[5].mxu0 }
 0x105   : > { %v2266_v47 = vpop.f32.mrb[5].mxu1  ;;  %v2203_v59 = vadd.f32 %v2202_v57, %v2201_v54  ;;  %v2204_v51 = vpop.f32.mrb[6].mxu0 }
 0x106   : > { %v2267_v49 = vadd.f32 %v2266_v47, %v2265_v46  ;;  %v2268_v50 = vpop.f32.mrb[6].mxu1  ;;  %v2205_v62 = vpop.f32.mrb[7].mxu0 }
 0x107   : > { %v2269_v52 = vpop.f32.mrb[7].mxu1  ;;  %v1489_v1 = vadd.f32 %v2203_v59, %v3127_v24  ;;  %v2206_v2 = vadd.f32 %v2205_v62, %v2204_v51 }
 0x108   : > { %v2270_v55 = vadd.f32 %v2269_v52, %v2268_v50 }
 0x109   : > { %v3136_v5 = vadd.f32 %v2267_v49, %v1489_v1  ;;  %v1492_v40 = vadd.f32 %v2206_v2, %v3127_v24 }
 0x10b   : > { %v3139_v10 = vadd.f32 %v2270_v55, %v1492_v40  ;;  %v2207_v11 = vpop.f32.mrb[8].mxu0 }
 0x10c   : > { %v2271_v3 = vpop.f32.mrb[8].mxu1  ;;  %v2208_v9 = vpop.f32.mrb[9].mxu0 }
 0x10d   : > { %v2272_v4 = vpop.f32.mrb[9].mxu1  ;;  %v2209_v16 = vadd.f32 %v2208_v9, %v2207_v11  ;;  %v2210_v17 = vpop.f32.mrb[10].mxu0 }
 0x10e   : > { %v2273_v6 = vadd.f32 %v2272_v4, %v2271_v3  ;;  %v2274_v7 = vpop.f32.mrb[10].mxu1  ;;  %v2211_v0 = vpop.f32.mrb[11].mxu0 }
 0x10f   : > { %v2275_v8 = vpop.f32.mrb[11].mxu1  ;;  %v1497_v18 = vadd.f32 %v2209_v16, %v3127_v24  ;;  %v2212_v19 = vadd.f32 %v2211_v0, %v2210_v17 }
 0x110   : > { %v2276_v14 = vadd.f32 %v2275_v8, %v2274_v7 }
 0x111   : > { %v3142_v21 = vadd.f32 %v2273_v6, %v1497_v18  ;;  %v1500_v22 = vadd.f32 %v2212_v19, %v3127_v24 }
 0x113   : > { %v3145_v28 = vadd.f32 %v2276_v14, %v1500_v22  ;;  %v2213_v29 = vpop.f32.mrb[12].mxu0 }
 0x114   : > { %v2277_v56 = vpop.f32.mrb[12].mxu1  ;;  %v2214_v31 = vpop.f32.mrb[13].mxu0 }
 0x115   : > { %v2278_v20 = vpop.f32.mrb[13].mxu1  ;;  %v2215_v58 = vadd.f32 %v2214_v31, %v2213_v29  ;;  %v2216_v15 = vpop.f32.mrb[14].mxu0 }
 0x116   : > { %v2279_v23 = vadd.f32 %v2278_v20, %v2277_v56  ;;  %v2280_v26 = vpop.f32.mrb[14].mxu1  ;;  %v2217_v32 = vpop.f32.mrb[15].mxu0 }
 0x117   : > { %v2281_v27 = vpop.f32.mrb[15].mxu1  ;;  %v1505_v13 = vadd.f32 %v2215_v58, %v3127_v24  ;;  %v2218_v33 = vadd.f32 %v2217_v32, %v2216_v15 }
 0x118   : > { %v2282_v12 = vadd.f32 %v2281_v27, %v2280_v26 }
 0x119   : > { %v3148_v35 = vadd.f32 %v2279_v23, %v1505_v13  ;;  %v1508_v41 = vadd.f32 %v2218_v33, %v3127_v24 }
 0x11b   : > { %v3151_v39 = vadd.f32 %v2282_v12, %v1508_v41  ;;  %v2219_v42 = vpop.f32.mrb[16].mxu0 }
 0x11c   : > { %v2283_v30 = vpop.f32.mrb[16].mxu1  ;;  %v2220_v63 = vpop.f32.mrb[17].mxu0 }
 0x11d   : > { %v2284_v60 = vpop.f32.mrb[17].mxu1  ;;  %v2221_v43 = vadd.f32 %v2220_v63, %v2219_v42  ;;  %v2222_v44 = vpop.f32.mrb[18].mxu0 }
 0x11e   : > { %v2285_v36 = vadd.f32 %v2284_v60, %v2283_v30  ;;  %v2286_v37 = vpop.f32.mrb[18].mxu1  ;;  %v2223_v45 = vpop.f32.mrb[19].mxu0 }
 0x11f   : > { %v2287_v38 = vpop.f32.mrb[19].mxu1  ;;  %v1513_v34 = vadd.f32 %v2221_v43, %v3127_v24  ;;  %v2224_v46 = vadd.f32 %v2223_v45, %v2222_v44 }
 0x120   : > { %v2288_v61 = vadd.f32 %v2287_v38, %v2286_v37 }
 0x121   : > { %v3154_v49 = vadd.f32 %v2285_v36, %v1513_v34  ;;  %v1516_v50 = vadd.f32 %v2224_v46, %v3127_v24 }
 0x123   : > { %v3157_v57 = vadd.f32 %v2288_v61, %v1516_v50  ;;  %v2225_v59 = vpop.f32.mrb[20].mxu0 }
 0x124   : > { %v2289_v47 = vpop.f32.mrb[20].mxu1  ;;  %v2226_v62 = vpop.f32.mrb[21].mxu0 }
 0x125   : > { %v2290_v25 = vpop.f32.mrb[21].mxu1  ;;  %v2227_v1 = vadd.f32 %v2226_v62, %v2225_v59  ;;  %v2228_v2 = vpop.f32.mrb[22].mxu0 }
 0x126   : > { %v2291_v52 = vadd.f32 %v2290_v25, %v2289_v47  ;;  %v2292_v54 = vpop.f32.mrb[22].mxu1  ;;  %v2229_v3 = vpop.f32.mrb[23].mxu0 }
 0x127   : > { %v2293_v55 = vpop.f32.mrb[23].mxu1  ;;  %v1521_v4 = vadd.f32 %v2227_v1, %v3127_v24  ;;  %v2230_v40 = vadd.f32 %v2229_v3, %v2228_v2 }
 0x128   : > { %v2294_v51 = vadd.f32 %v2293_v55, %v2292_v54 }
 0x129   : > { %v3160_v8 = vadd.f32 %v2291_v52, %v1521_v4  ;;  %v1524_v11 = vadd.f32 %v2230_v40, %v3127_v24 }
 0x12b   : > { %v3163_v17 = vadd.f32 %v2294_v51, %v1524_v11  ;;  %v2231_v0 = vpop.f32.mrb[24].mxu0 }
 0x12c   : > { %v2295_v6 = vpop.f32.mrb[24].mxu1  ;;  %v2232_v19 = vpop.f32.mrb[25].mxu0 }
 0x12d   : > { %v2296_v7 = vpop.f32.mrb[25].mxu1  ;;  %v2233_v56 = vadd.f32 %v2232_v19, %v2231_v0  ;;  %v2234_v20 = vpop.f32.mrb[26].mxu0 }
 0x12e   : > { %v2297_v14 = vadd.f32 %v2296_v7, %v2295_v6  ;;  %v2298_v9 = vpop.f32.mrb[26].mxu1  ;;  %v2235_v22 = vpop.f32.mrb[27].mxu0 }
 0x12f   : > { %v2299_v16 = vpop.f32.mrb[27].mxu1  ;;  %v1529_v23 = vadd.f32 %v2233_v56, %v3127_v24  ;;  %v2236_v26 = vadd.f32 %v2235_v22, %v2234_v20 }
 0x130   : > { %v2300_v18 = vadd.f32 %v2299_v16, %v2298_v9 }
 0x131   : > { %v3166_v12 = vadd.f32 %v2297_v14, %v1529_v23  ;;  %v1532_v31 = vadd.f32 %v2236_v26, %v3127_v24 }
 0x133   : > { %v3169_v13 = vadd.f32 %v2300_v18, %v1532_v31  ;;  %v2237_v33 = vpop.f32.mrb[28].mxu0 }
 0x134   : > { %v2301_v27 = vpop.f32.mrb[28].mxu1  ;;  %v2238_v60 = vpop.f32.mrb[29].mxu0 }
 0x135   : > { %v2302_v29 = vpop.f32.mrb[29].mxu1  ;;  %v2239_v41 = vadd.f32 %v2238_v60, %v2237_v33  ;;  %v2240_v36 = vpop.f32.mrb[30].mxu0 }
 0x136   : > { %v2303_v58 = vadd.f32 %v2302_v29, %v2301_v27  ;;  %v2304_v15 = vpop.f32.mrb[30].mxu1  ;;  %v2241_v37 = vpop.f32.mrb[31].mxu0 }
 0x137   : > { %v2305_v32 = vpop.f32.mrb[31].mxu1  ;;  %v1537_v38 = vadd.f32 %v2239_v41, %v3127_v24  ;;  %v2242_v42 = vadd.f32 %v2241_v37, %v2240_v36 }
 0x138   : > { %v2306_v30 = vadd.f32 %v2305_v32, %v2304_v15 }
 0x139   : > { %v3172_v43 = vadd.f32 %v2303_v58, %v1537_v38  ;;  %v1540_v44 = vadd.f32 %v2242_v42, %v3127_v24 }
 0x13b   : > { %v3175_v47 = vadd.f32 %v2306_v30, %v1540_v44  ;;  %v2323_v25 = vpop.f32.mrb[32].mxu0 }
 0x13c   : > { %v2387_v61 = vpop.f32.mrb[32].mxu1  ;;  %v2324_v52 = vpop.f32.mrb[33].mxu0 }
 0x13d   : > { %v2388_v63 = vpop.f32.mrb[33].mxu1  ;;  %v2325_v54 = vadd.f32 %v2324_v52, %v2323_v25  ;;  %v2326_v55 = vpop.f32.mrb[34].mxu0 }
 0x13e   : > { %v2389_v45 = vadd.f32 %v2388_v63, %v2387_v61  ;;  %v2390_v34 = vpop.f32.mrb[34].mxu1  ;;  %v2327_v59 = vpop.f32.mrb[35].mxu0 }
 0x13f   : > { %v2391_v46 = vpop.f32.mrb[35].mxu1  ;;  %v1675_v51 = vadd.f32 %v2325_v54, %v3130_v48  ;;  %v2328_v62 = vadd.f32 %v2327_v59, %v2326_v55 }
 0x140   : > { %v2392_v50 = vadd.f32 %v2391_v46, %v2390_v34 }
 0x141   : > { %v1678_v3 = vadd.f32 %v2328_v62, %v3133_v53  ;;  %v3179_v40 = vadd.f32 %v2389_v45, %v1675_v51 }
 0x143   : > { %v2329_v7 = vpop.f32.mrb[36].mxu0  ;;  %v3181_v14 = vadd.f32 %v2392_v50, %v1678_v3 }
 0x144   : > { %v2393_v1 = vpop.f32.mrb[36].mxu1  ;;  %v2330_v9 = vpop.f32.mrb[37].mxu0 }
 0x145   : > { %v2394_v2 = vpop.f32.mrb[37].mxu1  ;;  %v2331_v16 = vadd.f32 %v2330_v9, %v2329_v7  ;;  %v2332_v0 = vpop.f32.mrb[38].mxu0 }
 0x146   : > { %v2395_v4 = vadd.f32 %v2394_v2, %v2393_v1  ;;  %v2396_v24 = vpop.f32.mrb[38].mxu1  ;;  %v2333_v18 = vpop.f32.mrb[39].mxu0 }
 0x147   : > { %v2397_v6 = vpop.f32.mrb[39].mxu1  ;;  %v1683_v48 = vadd.f32 %v2331_v16, %v3136_v5  ;;  %v2334_v19 = vadd.f32 %v2333_v18, %v2332_v0 }
 0x148   : > { %v2398_v11 = vadd.f32 %v2397_v6, %v2396_v24 }
 0x149   : > { %v1686_v53 = vadd.f32 %v2334_v19, %v3139_v10  ;;  %v3185_v26 = vadd.f32 %v2395_v4, %v1683_v48 }
 0x14b   : > { %v2335_v29 = vpop.f32.mrb[40].mxu0  ;;  %v3187_v58 = vadd.f32 %v2398_v11, %v1686_v53 }
 0x14c   : > { %v2399_v56 = vpop.f32.mrb[40].mxu1  ;;  %v2336_v15 = vpop.f32.mrb[41].mxu0 }
 0x14d   : > { %v2400_v20 = vpop.f32.mrb[41].mxu1  ;;  %v2337_v32 = vadd.f32 %v2336_v15, %v2335_v29  ;;  %v2338_v33 = vpop.f32.mrb[42].mxu0 }
 0x14e   : > { %v2401_v22 = vadd.f32 %v2400_v20, %v2399_v56  ;;  %v2402_v23 = vpop.f32.mrb[42].mxu1  ;;  %v2339_v30 = vpop.f32.mrb[43].mxu0 }
 0x14f   : > { %v2403_v27 = vpop.f32.mrb[43].mxu1  ;;  %v1691_v5 = vadd.f32 %v2337_v32, %v3142_v21  ;;  %v2340_v60 = vadd.f32 %v2339_v30, %v2338_v33 }
 0x150   : > { %v2404_v31 = vadd.f32 %v2403_v27, %v2402_v23 }
 0x151   : > { %v1694_v10 = vadd.f32 %v2340_v60, %v3145_v28  ;;  %v3191_v42 = vadd.f32 %v2401_v22, %v1691_v5 }
 0x153   : > { %v2341_v63 = vpop.f32.mrb[44].mxu0  ;;  %v3193_v45 = vadd.f32 %v2404_v31, %v1694_v10 }
 0x154   : > { %v2405_v41 = vpop.f32.mrb[44].mxu1  ;;  %v2342_v34 = vpop.f32.mrb[45].mxu0 }
 0x155   : > { %v2406_v36 = vpop.f32.mrb[45].mxu1  ;;  %v2343_v46 = vadd.f32 %v2342_v34, %v2341_v63  ;;  %v2344_v25 = vpop.f32.mrb[46].mxu0 }
 0x156   : > { %v2407_v37 = vadd.f32 %v2406_v36, %v2405_v41  ;;  %v2408_v38 = vpop.f32.mrb[46].mxu1  ;;  %v2345_v50 = vpop.f32.mrb[47].mxu0 }
 0x157   : > { %v2409_v61 = vpop.f32.mrb[47].mxu1  ;;  %v1699_v21 = vadd.f32 %v2343_v46, %v3148_v35  ;;  %v2346_v52 = vadd.f32 %v2345_v50, %v2344_v25 }
 0x158   : > { %v2410_v44 = vadd.f32 %v2409_v61, %v2408_v38 }
 0x159   : > { %v1702_v28 = vadd.f32 %v2346_v52, %v3151_v39  ;;  %v3197_v62 = vadd.f32 %v2407_v37, %v1699_v21 }
 0x15b   : > { %v2347_v2 = vpop.f32.mrb[48].mxu0  ;;  %v3199_v4 = vadd.f32 %v2410_v44, %v1702_v28 }
 0x15c   : > { %v2411_v54 = vpop.f32.mrb[48].mxu1  ;;  %v2348_v24 = vpop.f32.mrb[49].mxu0 }
 0x15d   : > { %v2412_v55 = vpop.f32.mrb[49].mxu1  ;;  %v2349_v6 = vadd.f32 %v2348_v24, %v2347_v2  ;;  %v2350_v7 = vpop.f32.mrb[50].mxu0 }
 0x15e   : > { %v2413_v59 = vadd.f32 %v2412_v55, %v2411_v54  ;;  %v2414_v51 = vpop.f32.mrb[50].mxu1  ;;  %v2351_v11 = vpop.f32.mrb[51].mxu0 }
 0x15f   : > { %v2415_v1 = vpop.f32.mrb[51].mxu1  ;;  %v1707_v35 = vadd.f32 %v2349_v6, %v3154_v49  ;;  %v2352_v9 = vadd.f32 %v2351_v11, %v2350_v7 }
 0x160   : > { %v2416_v3 = vadd.f32 %v2415_v1, %v2414_v51 }
 0x161   : > { %v1710_v39 = vadd.f32 %v2352_v9, %v3157_v57  ;;  %v1804_v19 = vadd.f32 %v2413_v59, %v1707_v35 }
 0x163   : > { %v2353_v20 = vpop.f32.mrb[52].mxu0  ;;  %v1807_v22 = vadd.f32 %v2416_v3, %v1710_v39 }
 0x164   : > { %v2417_v16 = vpop.f32.mrb[52].mxu1  ;;  %v2354_v23 = vpop.f32.mrb[53].mxu0 }
 0x165   : > { %v2418_v0 = vpop.f32.mrb[53].mxu1  ;;  %v2355_v27 = vadd.f32 %v2354_v23, %v2353_v20  ;;  %v2356_v29 = vpop.f32.mrb[54].mxu0 }
 0x166   : > { %v2419_v18 = vadd.f32 %v2418_v0, %v2417_v16  ;;  %v2420_v48 = vpop.f32.mrb[54].mxu1  ;;  %v2357_v31 = vpop.f32.mrb[55].mxu0 }
 0x167   : > { %v2421_v56 = vpop.f32.mrb[55].mxu1  ;;  %v1715_v15 = vadd.f32 %v2355_v27, %v3160_v8  ;;  %v2358_v32 = vadd.f32 %v2357_v31, %v2356_v29 }
 0x168   : > { %v2422_v53 = vadd.f32 %v2421_v56, %v2420_v48 }
 0x169   : > { %v1718_v30 = vadd.f32 %v2358_v32, %v3163_v17  ;;  %v1812_v60 = vadd.f32 %v2419_v18, %v1715_v15 }
 0x16b   : > { %v2359_v36 = vpop.f32.mrb[56].mxu0  ;;  %v1815_v37 = vadd.f32 %v2422_v53, %v1718_v30 }
 0x16c   : > { %v2423_v49 = vpop.f32.mrb[56].mxu1  ;;  %v2360_v38 = vpop.f32.mrb[57].mxu0 }
 0x16d   : > { %v2424_v33 = vpop.f32.mrb[57].mxu1  ;;  %v2361_v61 = vadd.f32 %v2360_v38, %v2359_v36  ;;  %v2362_v63 = vpop.f32.mrb[58].mxu0 }
 0x16e   : > { %v2425_v5 = vadd.f32 %v2424_v33, %v2423_v49  ;;  %v2426_v57 = vpop.f32.mrb[58].mxu1  ;;  %v2363_v44 = vpop.f32.mrb[59].mxu0 }
 0x16f   : > { %v2427_v41 = vpop.f32.mrb[59].mxu1  ;;  %v1723_v34 = vadd.f32 %v2361_v61, %v3166_v12  ;;  %v2364_v8 = vadd.f32 %v2363_v44, %v2362_v63 }
 0x170   : > { %v2428_v10 = vadd.f32 %v2427_v41, %v2426_v57 }
 0x171   : > { %v1726_v50 = vadd.f32 %v2364_v8, %v3169_v13  ;;  %v1820_v52 = vadd.f32 %v2425_v5, %v1723_v34 }
 0x173   : > { %v2365_v55 = vpop.f32.mrb[60].mxu0  ;;  %v1823_v59 = vadd.f32 %v2428_v10, %v1726_v50 }
 0x174   : > { %v2429_v46 = vpop.f32.mrb[60].mxu1  ;;  %v2366_v51 = vpop.f32.mrb[61].mxu0 }
 0x175   : > { %v2430_v25 = vpop.f32.mrb[61].mxu1  ;;  %v2367_v1 = vadd.f32 %v2366_v51, %v2365_v55  ;;  %v2368_v2 = vpop.f32.mrb[62].mxu0 }
 0x176   : > { %v2431_v17 = vadd.f32 %v2430_v25, %v2429_v46  ;;  %v2432_v21 = vpop.f32.mrb[62].mxu1  ;;  %v2369_v3 = vpop.f32.mrb[63].mxu0 }
 0x177   : > { %v2433_v54 = vpop.f32.mrb[63].mxu1  ;;  %v1731_v24 = vadd.f32 %v2367_v1, %v3172_v43  ;;  %v2370_v12 = vadd.f32 %v2369_v3, %v2368_v2 }
 0x178   : > { %v2434_v28 = vadd.f32 %v2433_v54, %v2432_v21 }
 0x179   : > { %v1734_v11 = vadd.f32 %v2370_v12, %v3175_v47  ;;  %v1828_v16 = vadd.f32 %v2431_v17, %v1731_v24 }
 0x17b   : > { %v2469_v39 = vpop.f32.mrb[64].mxu0  ;;  %v1831_v48 = vadd.f32 %v2434_v28, %v1734_v11 }
 0x17c   : > { %v2477_v13 = vpop.f32.mrb[64].mxu1  ;;  %v1877_v56 = vadd.f32 %v2469_v39, %v3185_v26  ;;  %v1868_v20 = vpop.f32.mrb[65].mxu0 }
 0x17d   : > { %v1909_v6 = vadd.f32 %v2477_v13, %v1812_v60  ;;  %v1900_v7 = vpop.f32.mrb[65].mxu1  ;;  %v1869_v47 = vadd.f32 %v1868_v20, %v3179_v40 }
 0x17e   : > { %v1901_v35 = vadd.f32 %v1900_v7, %v1804_v19  ;;  %v2478_v9 = vpop.f32.mrb[66].mxu1  ;;  %v2470_v19 = vpop.f32.mrb[66].mxu0  ;;  %1933 = vst [vmem:[%s3212_s6 + $0x10] sm:$0xff] %v1877_v56 }
 0x17f   : > { %1941 = vst [vmem:[%s3212_s6 + $0x50] sm:$0xff] %v1909_v6  ;;  %v1912_v43 = vadd.f32 %v2478_v9, %v1815_v37  ;;  %v1903_v0 = vpop.f32.mrb[67].mxu1  ;;  %v1880_v53 = vadd.f32 %v2470_v19, %v3187_v58  ;;  %v1871_v23 = vpop.f32.mrb[67].mxu0  ;;  %1931 = vst [vmem:[%s3212_s6] sm:$0xff] %v1869_v47 }
 0x180   : > { %1939 = vst [vmem:[%s3212_s6 + $0x40] sm:$0xff] %v1901_v35  ;;  %v1904_v18 = vadd.f32 %v1903_v0, %v1807_v22  ;;  %v1872_v27 = vadd.f32 %v1871_v23, %v3181_v14 }
 0x181   : > { %1942 = vst [vmem:[%s3212_s6 + $0x58] sm:$0xff] %v1912_v43  ;;  %1934 = vst [vmem:[%s3212_s6 + $0x18] sm:$0xff] %v1880_v53 }
 0x182   : > { %1940 = vst [vmem:[%s3212_s6 + $0x48] sm:$0xff] %v1904_v18  ;;  %1932 = vst [vmem:[%s3212_s6 + $0x8] sm:$0xff] %v1872_v27 }
 0x183   : > { %v2473_v58 = vpop.f32.mrb[68].mxu0 }
 0x184   : > { %v2481_v22 = vpop.f32.mrb[68].mxu1  ;;  %v1893_v14 = vadd.f32 %v2473_v58, %v3197_v62  ;;  %v1884_v33 = vpop.f32.mrb[69].mxu0 }
 0x185   : > { %v1925_v29 = vadd.f32 %v2481_v22, %v1828_v16  ;;  %v1916_v26 = vpop.f32.mrb[69].mxu1  ;;  %v1885_v30 = vadd.f32 %v1884_v33, %v3191_v42  ;;  %v2474_v5 = vpop.f32.mrb[70].mxu0 }
 0x186   : > { %v1917_v31 = vadd.f32 %v1916_v26, %v1820_v52  ;;  %v2482_v40 = vpop.f32.mrb[70].mxu1  ;;  %1937 = vst [vmem:[%s3212_s6 + $0x30] sm:$0xff] %v1893_v14  ;;  %v1896_v57 = vadd.f32 %v2474_v5, %v3199_v4  ;;  %v1887_v60 = vpop.f32.mrb[71].mxu0 }
 0x187   : > { %1945 = vst [vmem:[%s3212_s6 + $0x70] sm:$0xff] %v1925_v29  ;;  %v1928_v15 = vadd.f32 %v2482_v40, %v1831_v48  ;;  %v1919_v32 = vpop.f32.mrb[71].mxu1  ;;  %1935 = vst [vmem:[%s3212_s6 + $0x20] sm:$0xff] %v1885_v30  ;;  %v1888_v41 = vadd.f32 %v1887_v60, %v3193_v45 }
 0x188   : > { %1943 = vst [vmem:[%s3212_s6 + $0x60] sm:$0xff] %v1917_v31  ;;  %v1920_v49 = vadd.f32 %v1919_v32, %v1823_v59  ;;  %1938 = vst [vmem:[%s3212_s6 + $0x38] sm:$0xff] %v1896_v57 }
 0x189   : > { %1946 = vst [vmem:[%s3212_s6 + $0x78] sm:$0xff] %v1928_v15  ;;  %1936 = vst [vmem:[%s3212_s6 + $0x28] sm:$0xff] %v1888_v41 }
 0x18a   : > { %1944 = vst [vmem:[%s3212_s6 + $0x68] sm:$0xff] %v1920_v49 }
 0x18b PF: > { %s13_s14 = sadd.s32 1, %s2645_s14   ;;  %s3252_s12 = smov %s2641_s13 }
 0x18c   : > { %p10_p5 = scmp.ge.s32.totalorder %s13_s14, 4   ;;  %s3253_s13 = smov %s3255_s15 }
 0x18e   :  { %12 = sbr.rel (!%p10_p5) target bundleno = 2 (0x2), region = 65 }

</bundles_post_ra>
